<compile_context>
chip_gen: v6e
topology: v6e:2x2x1
jax: 0.10.0
libtpu: 0.0.40
codegen_flags: <defaults>
</compile_context>

<pallas_src>
import functools
import math

import jax
import jax.numpy as jnp
from jax.experimental import pallas as pl
from jax.experimental.pallas import tpu as pltpu

D_MODEL = 32          # d_model (constructor arg, kept small)
NHEAD = 8             # nn.Transformer default
DFF = 2048            # nn.Transformer default dim_feedforward
NLAYERS = 6           # nn.Transformer default encoder/decoder layers
MAX_LEN = 72          # max_length in the reference script
PAD_ID = 2
LN_EPS = 1e-5
NEG_MASK = -1e9       # finite "-inf" for additive masks (NaN-safe softmax)


# ------------------------- in-kernel helpers (values, not refs) ---------------

def _layernorm(x, ln):
    """LayerNorm over last axis. ln: (2, D) with row0=gamma, row1=beta."""
    gamma = ln[0:1, :]
    beta = ln[1:2, :]
    mean = jnp.mean(x, axis=-1, keepdims=True)
    var = jnp.mean(jnp.square(x - mean), axis=-1, keepdims=True)
    return (x - mean) * jax.lax.rsqrt(var + LN_EPS) * gamma + beta


def _attention_heads(q, k, v, mask, batch):
    """q: (B*Lq, D), k/v: (B*Lk, D), mask: (B, Lq, Lk) additive or None."""
    m, d = q.shape
    lq = m // batch
    lk = k.shape[0] // batch
    dh = d // NHEAD
    scale = 1.0 / math.sqrt(dh)
    q3 = q.reshape(batch, lq, d)
    k3 = k.reshape(batch, lk, d)
    v3 = v.reshape(batch, lk, d)
    outs = []
    for h in range(NHEAD):                      # unrolled; all inside one kernel
        sl = slice(h * dh, (h + 1) * dh)
        s = jnp.einsum("bqd,bkd->bqk", q3[:, :, sl], k3[:, :, sl],
                       preferred_element_type=jnp.float32) * scale
        if mask is not None:
            s = s + mask
        s = s - jnp.max(s, axis=-1, keepdims=True)
        p = jnp.exp(s)
        p = p / jnp.sum(p, axis=-1, keepdims=True)
        outs.append(jnp.einsum("bqk,bkd->bqd", p, v3[:, :, sl],
                               preferred_element_type=jnp.float32))
    return jnp.concatenate(outs, axis=-1).reshape(m, d)


def _self_mha(x, mask, wqkv, bqkv, wo, bo, batch):
    """Fused in-proj: one (M,D)@(D,3D) matmul, split q/k/v inside the kernel."""
    d = x.shape[-1]
    qkv = jnp.dot(x, wqkv, preferred_element_type=jnp.float32) + bqkv
    ctx = _attention_heads(qkv[:, :d], qkv[:, d:2 * d], qkv[:, 2 * d:], mask, batch)
    return jnp.dot(ctx, wo, preferred_element_type=jnp.float32) + bo


def _cross_mha(xq, xkv, mask, wqkv, bqkv, wo, bo, batch):
    d = xq.shape[-1]
    q = jnp.dot(xq, wqkv[:, :d], preferred_element_type=jnp.float32) + bqkv[:, :d]
    kv = jnp.dot(xkv, wqkv[:, d:], preferred_element_type=jnp.float32) + bqkv[:, d:]
    ctx = _attention_heads(q, kv[:, :d], kv[:, d:], mask, batch)
    return jnp.dot(ctx, wo, preferred_element_type=jnp.float32) + bo


def _ffn(x, w1, b1, w2, b2):
    """w1 + ReLU + w2 fused; (M, 2048) intermediate never leaves VMEM."""
    h = jnp.maximum(jnp.dot(x, w1, preferred_element_type=jnp.float32) + b1, 0.0)
    return jnp.dot(h, w2, preferred_element_type=jnp.float32) + b2


# ------------------------- fused stack kernels --------------------------------

def _encoder_stack_kernel(x_ref, mask_ref,
                          wqkv_ref, bqkv_ref, wo_ref, bo_ref, ln1_ref,
                          w1_ref, b1_ref, w2_ref, b2_ref, ln2_ref,
                          fln_ref, o_ref, *, batch):
    l = pl.program_id(0)

    @pl.when(l == 0)
    def _():
        o_ref[...] = x_ref[...]          # seed the VMEM-resident activation

    x = o_ref[...]
    attn = _self_mha(x, mask_ref[...], wqkv_ref[0], bqkv_ref[0],
                     wo_ref[0], bo_ref[0], batch)
    x1 = _layernorm(x + attn, ln1_ref[0])
    y = _layernorm(x1 + _ffn(x1, w1_ref[0], b1_ref[0], w2_ref[0], b2_ref[0]),
                   ln2_ref[0])
    o_ref[...] = y

    @pl.when(l == pl.num_programs(0) - 1)
    def _():
        o_ref[...] = _layernorm(y, fln_ref[...])   # nn.Transformer encoder.norm


def _decoder_stack_kernel(y_ref, mem_ref, mask_ref,
                          sa_wqkv_ref, sa_bqkv_ref, sa_wo_ref, sa_bo_ref, ln1_ref,
                          ca_wqkv_ref, ca_bqkv_ref, ca_wo_ref, ca_bo_ref, ln2_ref,
                          w1_ref, b1_ref, w2_ref, b2_ref, ln3_ref,
                          fln_ref, o_ref, *, batch):
    l = pl.program_id(0)

    @pl.when(l == 0)
    def _():
        o_ref[...] = y_ref[...]

    y = o_ref[...]
    mem = mem_ref[...]
    sa = _self_mha(y, mask_ref[...], sa_wqkv_ref[0], sa_bqkv_ref[0],
                   sa_wo_ref[0], sa_bo_ref[0], batch)
    y1 = _layernorm(y + sa, ln1_ref[0])
    # cross-attention: memory_key_padding_mask=None in the reference -> no mask
    ca = _cross_mha(y1, mem, None, ca_wqkv_ref[0], ca_bqkv_ref[0],
                    ca_wo_ref[0], ca_bo_ref[0], batch)
    y2 = _layernorm(y1 + ca, ln2_ref[0])
    y3 = _layernorm(y2 + _ffn(y2, w1_ref[0], b1_ref[0], w2_ref[0], b2_ref[0]),
                    ln3_ref[0])
    o_ref[...] = y3

    @pl.when(l == pl.num_programs(0) - 1)
    def _():
        o_ref[...] = _layernorm(y3, fln_ref[...])  # nn.Transformer decoder.norm


# ------------------------- pallas_call wrappers --------------------------------

def _per_layer_spec(a):
    """Block = one layer's slice; streamed (double-buffered) over the layer grid."""
    return pl.BlockSpec((1,) + a.shape[1:], lambda l: (l,) + (0,) * (a.ndim - 1))


def _shared_spec(a):
    """Full array, same block every layer step (stays resident in VMEM)."""
    return pl.BlockSpec(a.shape, lambda l: (0,) * a.ndim)


def encoder_stack(x, mask, p, batch):
    M, D = x.shape
    per_layer = (p["enc_wqkv_t"], p["enc_bqkv"], p["enc_wo_t"], p["enc_bo"],
                 p["enc_ln1"], p["enc_w1_t"], p["enc_b1"], p["enc_w2_t"],
                 p["enc_b2"], p["enc_ln2"])
    args = (x, mask) + per_layer + (p["enc_norm"],)
    in_specs = ([_shared_spec(x), _shared_spec(mask)]
                + [_per_layer_spec(a) for a in per_layer]
                + [_shared_spec(p["enc_norm"])])
    return pl.pallas_call(
        functools.partial(_encoder_stack_kernel, batch=batch),
        out_shape=jax.ShapeDtypeStruct((M, D), jnp.float32),
        grid=(NLAYERS,),
        in_specs=in_specs,
        out_specs=pl.BlockSpec((M, D), lambda l: (0, 0)),
        compiler_params=pltpu.CompilerParams(dimension_semantics=("arbitrary",)),
    )(*args)


def decoder_stack(y, memory, mask, p, batch):
    M, D = y.shape
    per_layer = (p["dec_sa_wqkv_t"], p["dec_sa_bqkv"], p["dec_sa_wo_t"],
                 p["dec_sa_bo"], p["dec_ln1"],
                 p["dec_ca_wqkv_t"], p["dec_ca_bqkv"], p["dec_ca_wo_t"],
                 p["dec_ca_bo"], p["dec_ln2"],
                 p["dec_w1_t"], p["dec_b1"], p["dec_w2_t"], p["dec_b2"],
                 p["dec_ln3"])
    args = (y, memory, mask) + per_layer + (p["dec_norm"],)
    in_specs = ([_shared_spec(y), _shared_spec(memory), _shared_spec(mask)]
                + [_per_layer_spec(a) for a in per_layer]
                + [_shared_spec(p["dec_norm"])])
    return pl.pallas_call(
        functools.partial(_decoder_stack_kernel, batch=batch),
        out_shape=jax.ShapeDtypeStruct((M, D), jnp.float32),
        grid=(NLAYERS,),
        in_specs=in_specs,
        out_specs=pl.BlockSpec((M, D), lambda l: (0, 0)),
        compiler_params=pltpu.CompilerParams(dimension_semantics=("arbitrary",)),
    )(*args)


# ------------------------- model glue (plain JAX) ------------------------------

def positional_encoding_table(d_model, max_len=MAX_LEN):
    position = jnp.arange(max_len, dtype=jnp.float32)[:, None]
    div_term = jnp.exp(jnp.arange(0, d_model, 2, dtype=jnp.float32)
                       * (-math.log(10000.0) / d_model))
    pe = jnp.zeros((max_len, d_model), jnp.float32)
    pe = pe.at[:, 0::2].set(jnp.sin(position * div_term))
    pe = pe.at[:, 1::2].set(jnp.cos(position * div_term))
    return pe[None]                                            # (1, max_len, d)


def init_params(key, src_vocab, tgt_vocab):
    keys = iter(jax.random.split(key, 64))

    def nrm(shape):
        return 0.02 * jax.random.normal(next(keys), shape, jnp.float32)

    def ln_stack():
        return jnp.concatenate([jnp.ones((NLAYERS, 1, D_MODEL), jnp.float32),
                                jnp.zeros((NLAYERS, 1, D_MODEL), jnp.float32)],
                               axis=1)                         # (L, 2, D)

    final_ln = jnp.concatenate([jnp.ones((1, D_MODEL), jnp.float32),
                                jnp.zeros((1, D_MODEL), jnp.float32)], axis=0)

    return {
        "src_emb": nrm((src_vocab, D_MODEL)).at[PAD_ID].set(0.0),  # padding_idx=2
        "tgt_emb": nrm((tgt_vocab, D_MODEL)).at[PAD_ID].set(0.0),
        # encoder layer weights (stacked over layers, pre-transposed for x @ w)
        "enc_wqkv_t": nrm((NLAYERS, D_MODEL, 3 * D_MODEL)),
        "enc_bqkv":   nrm((NLAYERS, 1, 3 * D_MODEL)),
        "enc_wo_t":   nrm((NLAYERS, D_MODEL, D_MODEL)),
        "enc_bo":     nrm((NLAYERS, 1, D_MODEL)),
        "enc_ln1":    ln_stack(),
        "enc_w1_t":   nrm((NLAYERS, D_MODEL, DFF)),
        "enc_b1":     nrm((NLAYERS, 1, DFF)),
        "enc_w2_t":   nrm((NLAYERS, DFF, D_MODEL)),
        "enc_b2":     nrm((NLAYERS, 1, D_MODEL)),
        "enc_ln2":    ln_stack(),
        "enc_norm":   final_ln,
        # decoder layer weights
        "dec_sa_wqkv_t": nrm((NLAYERS, D_MODEL, 3 * D_MODEL)),
        "dec_sa_bqkv":   nrm((NLAYERS, 1, 3 * D_MODEL)),
        "dec_sa_wo_t":   nrm((NLAYERS, D_MODEL, D_MODEL)),
        "dec_sa_bo":     nrm((NLAYERS, 1, D_MODEL)),
        "dec_ln1":       ln_stack(),
        "dec_ca_wqkv_t": nrm((NLAYERS, D_MODEL, 3 * D_MODEL)),
        "dec_ca_bqkv":   nrm((NLAYERS, 1, 3 * D_MODEL)),
        "dec_ca_wo_t":   nrm((NLAYERS, D_MODEL, D_MODEL)),
        "dec_ca_bo":     nrm((NLAYERS, 1, D_MODEL)),
        "dec_ln2":       ln_stack(),
        "dec_w1_t":      nrm((NLAYERS, D_MODEL, DFF)),
        "dec_b1":        nrm((NLAYERS, 1, DFF)),
        "dec_w2_t":      nrm((NLAYERS, DFF, D_MODEL)),
        "dec_b2":        nrm((NLAYERS, 1, D_MODEL)),
        "dec_ln3":       ln_stack(),
        "dec_norm":      final_ln,
        # predictor exists in __init__ but the reference forward never applies it
        "pred_w": nrm((tgt_vocab, D_MODEL)),
        "pred_b": nrm((tgt_vocab,)),
    }


def translation_model_forward(params, src_tokens, tgt_tokens):
    B, S = src_tokens.shape
    T = tgt_tokens.shape[1]
    neg = jnp.float32(NEG_MASK)

    # additive masks (0 / NEG), matching PyTorch key-padding + causal semantics
    src_mask = jnp.broadcast_to(
        jnp.where(src_tokens[:, None, :] == PAD_ID, neg, 0.0),
        (B, S, S)).astype(jnp.float32)
    causal = jnp.where(jnp.arange(T)[:, None] < jnp.arange(T)[None, :], neg, 0.0)
    tgt_mask = (causal[None, :, :]
                + jnp.where(tgt_tokens[:, None, :] == PAD_ID, neg, 0.0))
    tgt_mask = jnp.broadcast_to(tgt_mask, (B, T, T)).astype(jnp.float32)
    # cross-attention mask omitted: reference passes memory_key_padding_mask=None

    # embeddings + positional encoding (dropout = identity in eval)
    pe = positional_encoding_table(D_MODEL)
    src = jnp.take(params["src_emb"], src_tokens, axis=0) + pe[:, :S]
    tgt = jnp.take(params["tgt_emb"], tgt_tokens, axis=0) + pe[:, :T]

    memory = encoder_stack(src.reshape(B * S, D_MODEL), src_mask, params, B)
    out = decoder_stack(tgt.reshape(B * T, D_MODEL), memory, tgt_mask, params, B)
    return out.reshape(B, T, D_MODEL)   # same as the reference forward output


if __name__ == "__main__":
    SRC_VOCAB, TGT_VOCAB = 50, 60
    B, S, T = 2, 8, 8

    key = jax.random.PRNGKey(0)
    k_params, k_src, k_tgt = jax.random.split(key, 3)
    params = init_params(k_params, SRC_VOCAB, TGT_VOCAB)

    src = jax.random.randint(k_src, (B, S), 3, SRC_VOCAB, dtype=jnp.int32)
    tgt = jax.random.randint(k_tgt, (B, T), 3, TGT_VOCAB, dtype=jnp.int32)
    # exercise the key-padding masks (token id 2 == pad)
    src = src.at[:, -1].set(PAD_ID)
    tgt = tgt.at[:, -1].set(PAD_ID)

    out = jax.jit(translation_model_forward)(params, src, tgt)
    out = jax.block_until_ready(out)
    assert out.shape == (B, T, D_MODEL)
    assert bool(jnp.all(jnp.isfinite(out)))
    print("KERNEL_OK")
</pallas_src>

<mosaic_0001>
module attributes {stable_mosaic.version = 11 : i64} {
  func.func @_encoder_stack_kernel(%arg0: i32, %arg1: memref<16x32xf32, #tpu.memory_space<vmem>>, %arg2: memref<2x8x8xf32, #tpu.memory_space<vmem>>, %arg3: memref<1x32x96xf32, #tpu.memory_space<vmem>>, %arg4: memref<1x1x96xf32, #tpu.memory_space<vmem>>, %arg5: memref<1x32x32xf32, #tpu.memory_space<vmem>>, %arg6: memref<1x1x32xf32, #tpu.memory_space<vmem>>, %arg7: memref<1x2x32xf32, #tpu.memory_space<vmem>>, %arg8: memref<1x32x2048xf32, #tpu.memory_space<vmem>>, %arg9: memref<1x1x2048xf32, #tpu.memory_space<vmem>>, %arg10: memref<1x2048x32xf32, #tpu.memory_space<vmem>>, %arg11: memref<1x1x32xf32, #tpu.memory_space<vmem>>, %arg12: memref<1x2x32xf32, #tpu.memory_space<vmem>>, %arg13: memref<2x32xf32, #tpu.memory_space<vmem>>, %arg14: memref<16x32xf32, #tpu.memory_space<vmem>>) attributes {dimension_semantics = [#tpu.dimension_semantics<arbitrary>], iteration_bounds = array<i64: 6>, scalar_prefetch = 0 : i64, scratch_operands = 0 : i64, tpu.core_type = #tpu.core_type<tc>, window_params = [{pipeline_mode = #tpu.pipeline_mode<synchronous>, transform_indices = @transform_0, window_bounds = array<i64: 16, 32>}, {pipeline_mode = #tpu.pipeline_mode<synchronous>, transform_indices = @transform_1, window_bounds = array<i64: 2, 8, 8>}, {transform_indices = @transform_2, window_bounds = array<i64: 1, 32, 96>}, {transform_indices = @transform_3, window_bounds = array<i64: 1, 1, 96>}, {transform_indices = @transform_4, window_bounds = array<i64: 1, 32, 32>}, {transform_indices = @transform_5, window_bounds = array<i64: 1, 1, 32>}, {transform_indices = @transform_6, window_bounds = array<i64: 1, 2, 32>}, {transform_indices = @transform_7, window_bounds = array<i64: 1, 32, 2048>}, {transform_indices = @transform_8, window_bounds = array<i64: 1, 1, 2048>}, {transform_indices = @transform_9, window_bounds = array<i64: 1, 2048, 32>}, {transform_indices = @transform_10, window_bounds = array<i64: 1, 1, 32>}, {transform_indices = @transform_11, window_bounds = array<i64: 1, 2, 32>}, {pipeline_mode = #tpu.pipeline_mode<synchronous>, transform_indices = @transform_12, window_bounds = array<i64: 2, 32>}, {pipeline_mode = #tpu.pipeline_mode<synchronous>, transform_indices = @transform_13, window_bounds = array<i64: 16, 32>}]} {
    %c0_i32 = arith.constant 0 : i32
    %0 = arith.cmpi eq, %arg0, %c0_i32 : i32
    %1 = arith.extui %0 : i1 to i32
    %c0_i32_0 = arith.constant 0 : i32
    %2 = arith.cmpi ne, %1, %c0_i32_0 : i32
    scf.if %2 {
      %c0_92 = arith.constant 0 : index
      %c0_93 = arith.constant 0 : index
      %237 = vector.load %arg1[%c0_92, %c0_93] : memref<16x32xf32, #tpu.memory_space<vmem>>, vector<16x32xf32>
      %c0_94 = arith.constant 0 : index
      %c0_95 = arith.constant 0 : index
      %238 = vector.load %arg14[%c0_94, %c0_95] : memref<16x32xf32, #tpu.memory_space<vmem>>, vector<16x32xf32>
      tpu.vector_store %arg14[%c0_94, %c0_95], %237 {strides = array<i32>} : memref<16x32xf32, #tpu.memory_space<vmem>>, vector<16x32xf32>,
    } else {
    }
    %c0 = arith.constant 0 : index
    %c0_1 = arith.constant 0 : index
    %3 = vector.load %arg14[%c0, %c0_1] : memref<16x32xf32, #tpu.memory_space<vmem>>, vector<16x32xf32>
    %c0_2 = arith.constant 0 : index
    %c0_3 = arith.constant 0 : index
    %c0_4 = arith.constant 0 : index
    %4 = vector.load %arg2[%c0_2, %c0_3, %c0_4] : memref<2x8x8xf32, #tpu.memory_space<vmem>>, vector<2x8x8xf32>
    %c0_5 = arith.constant 0 : index
    %c0_6 = arith.constant 0 : index
    %c0_7 = arith.constant 0 : index
    %5 = vector.load %arg3[%c0_5, %c0_6, %c0_7] : memref<1x32x96xf32, #tpu.memory_space<vmem>>, vector<1x32x96xf32>
    %6 = vector.shape_cast %5 : vector<1x32x96xf32> to vector<32x96xf32>
    %c0_8 = arith.constant 0 : index
    %c0_9 = arith.constant 0 : index
    %c0_10 = arith.constant 0 : index
    %7 = vector.load %arg4[%c0_8, %c0_9, %c0_10] : memref<1x1x96xf32, #tpu.memory_space<vmem>>, vector<1x1x96xf32>
    %8 = vector.shape_cast %7 : vector<1x1x96xf32> to vector<1x96xf32>
    %c0_11 = arith.constant 0 : index
    %c0_12 = arith.constant 0 : index
    %c0_13 = arith.constant 0 : index
    %9 = vector.load %arg5[%c0_11, %c0_12, %c0_13] : memref<1x32x32xf32, #tpu.memory_space<vmem>>, vector<1x32x32xf32>
    %10 = vector.shape_cast %9 : vector<1x32x32xf32> to vector<32x32xf32>
    %c0_14 = arith.constant 0 : index
    %c0_15 = arith.constant 0 : index
    %c0_16 = arith.constant 0 : index
    %11 = vector.load %arg6[%c0_14, %c0_15, %c0_16] : memref<1x1x32xf32, #tpu.memory_space<vmem>>, vector<1x1x32xf32>
    %12 = vector.shape_cast %11 : vector<1x1x32xf32> to vector<1x32xf32>
    %cst = arith.constant dense<0.000000e+00> : vector<16x96xf32>
    %13 = tpu.matmul %3, %6, %cst {dimension_numbers = #tpu.dot_dimension_numbers<[1], [0], [0], [1], [0, 0, 1, 1], [], []>} : vector<16x32xf32>, vector<32x96xf32>, vector<16x96xf32> -> vector<16x96xf32>
    %14 = vector.broadcast %8 : vector<1x96xf32> to vector<16x96xf32>
    %15 = arith.addf %13, %14 : vector<16x96xf32>
    %16 = vector.extract_strided_slice %15 {offsets = [0, 0], sizes = [16, 32], strides = [1, 1]} : vector<16x96xf32> to vector<16x32xf32>
    %17 = vector.extract_strided_slice %15 {offsets = [0, 32], sizes = [16, 32], strides = [1, 1]} : vector<16x96xf32> to vector<16x32xf32>
    %18 = vector.extract_strided_slice %15 {offsets = [0, 64], sizes = [16, 32], strides = [1, 1]} : vector<16x96xf32> to vector<16x32xf32>
    %19 = vector.shape_cast %16 : vector<16x32xf32> to vector<2x8x32xf32>
    %20 = vector.shape_cast %17 : vector<16x32xf32> to vector<2x8x32xf32>
    %21 = vector.shape_cast %18 : vector<16x32xf32> to vector<2x8x32xf32>
    %22 = vector.extract_strided_slice %19 {offsets = [0, 0, 0], sizes = [2, 8, 4], strides = [1, 1, 1]} : vector<2x8x32xf32> to vector<2x8x4xf32>
    %23 = vector.extract_strided_slice %20 {offsets = [0, 0, 0], sizes = [2, 8, 4], strides = [1, 1, 1]} : vector<2x8x32xf32> to vector<2x8x4xf32>
    "tpu.trace_start"() <{level = 10 : i32, message = "bqd,bkd->bqk"}> : () -> ()
    %cst_17 = arith.constant dense<0.000000e+00> : vector<2x8x8xf32>
    %24 = tpu.matmul %22, %23, %cst_17 {dimension_numbers = #tpu.dot_dimension_numbers<[2], [2], [1], [1], [0, 0, 0, 1, 1, 1], [0], [0]>} : vector<2x8x4xf32>, vector<2x8x4xf32>, vector<2x8x8xf32> -> vector<2x8x8xf32>
    "tpu.trace_stop"() : () -> ()
    %cst_18 = arith.constant 5.000000e-01 : f32
    %25 = vector.broadcast %cst_18 : f32 to vector<2x8x8xf32>
    %26 = arith.mulf %24, %25 : vector<2x8x8xf32>
    %27 = arith.addf %26, %4 : vector<2x8x8xf32>
    %cst_19 = arith.constant dense<0xFF800000> : vector<2x8xf32>
    %28 = vector.multi_reduction <maximumf>, %27, %cst_19 [2] : vector<2x8x8xf32> to vector<2x8xf32>
    %29 = vector.shape_cast %28 : vector<2x8xf32> to vector<2x8x1xf32>
    %30 = vector.broadcast %29 : vector<2x8x1xf32> to vector<2x8x8xf32>
    %31 = arith.subf %27, %30 : vector<2x8x8xf32>
    %32 = math.exp %31 : vector<2x8x8xf32>
    %cst_20 = arith.constant dense<0.000000e+00> : vector<2x8xf32>
    %33 = vector.multi_reduction <add>, %32, %cst_20 [2] : vector<2x8x8xf32> to vector<2x8xf32>
    %34 = vector.shape_cast %33 : vector<2x8xf32> to vector<2x8x1xf32>
    %35 = vector.broadcast %34 : vector<2x8x1xf32> to vector<2x8x8xf32>
    %36 = arith.divf %32, %35 : vector<2x8x8xf32>
    %37 = vector.extract_strided_slice %21 {offsets = [0, 0, 0], sizes = [2, 8, 4], strides = [1, 1, 1]} : vector<2x8x32xf32> to vector<2x8x4xf32>
    "tpu.trace_start"() <{level = 10 : i32, message = "bqk,bkd->bqd"}> : () -> ()
    %cst_21 = arith.constant dense<0.000000e+00> : vector<2x8x4xf32>
    %38 = tpu.matmul %36, %37, %cst_21 {dimension_numbers = #tpu.dot_dimension_numbers<[2], [1], [1], [2], [0, 0, 0, 1, 1, 2], [0], [0]>} : vector<2x8x8xf32>, vector<2x8x4xf32>, vector<2x8x4xf32> -> vector<2x8x4xf32>
    "tpu.trace_stop"() : () -> ()
    %39 = vector.extract_strided_slice %19 {offsets = [0, 0, 4], sizes = [2, 8, 4], strides = [1, 1, 1]} : vector<2x8x32xf32> to vector<2x8x4xf32>
    %40 = vector.extract_strided_slice %20 {offsets = [0, 0, 4], sizes = [2, 8, 4], strides = [1, 1, 1]} : vector<2x8x32xf32> to vector<2x8x4xf32>
    "tpu.trace_start"() <{level = 10 : i32, message = "bqd,bkd->bqk"}> : () -> ()
    %cst_22 = arith.constant dense<0.000000e+00> : vector<2x8x8xf32>
    %41 = tpu.matmul %39, %40, %cst_22 {dimension_numbers = #tpu.dot_dimension_numbers<[2], [2], [1], [1], [0, 0, 0, 1, 1, 1], [0], [0]>} : vector<2x8x4xf32>, vector<2x8x4xf32>, vector<2x8x8xf32> -> vector<2x8x8xf32>
    "tpu.trace_stop"() : () -> ()
    %cst_23 = arith.constant 5.000000e-01 : f32
    %42 = vector.broadcast %cst_23 : f32 to vector<2x8x8xf32>
    %43 = arith.mulf %41, %42 : vector<2x8x8xf32>
    %44 = arith.addf %43, %4 : vector<2x8x8xf32>
    %cst_24 = arith.constant dense<0xFF800000> : vector<2x8xf32>
    %45 = vector.multi_reduction <maximumf>, %44, %cst_24 [2] : vector<2x8x8xf32> to vector<2x8xf32>
    %46 = vector.shape_cast %45 : vector<2x8xf32> to vector<2x8x1xf32>
    %47 = vector.broadcast %46 : vector<2x8x1xf32> to vector<2x8x8xf32>
    %48 = arith.subf %44, %47 : vector<2x8x8xf32>
    %49 = math.exp %48 : vector<2x8x8xf32>
    %cst_25 = arith.constant dense<0.000000e+00> : vector<2x8xf32>
    %50 = vector.multi_reduction <add>, %49, %cst_25 [2] : vector<2x8x8xf32> to vector<2x8xf32>
    %51 = vector.shape_cast %50 : vector<2x8xf32> to vector<2x8x1xf32>
    %52 = vector.broadcast %51 : vector<2x8x1xf32> to vector<2x8x8xf32>
    %53 = arith.divf %49, %52 : vector<2x8x8xf32>
    %54 = vector.extract_strided_slice %21 {offsets = [0, 0, 4], sizes = [2, 8, 4], strides = [1, 1, 1]} : vector<2x8x32xf32> to vector<2x8x4xf32>
    "tpu.trace_start"() <{level = 10 : i32, message = "bqk,bkd->bqd"}> : () -> ()
    %cst_26 = arith.constant dense<0.000000e+00> : vector<2x8x4xf32>
    %55 = tpu.matmul %53, %54, %cst_26 {dimension_numbers = #tpu.dot_dimension_numbers<[2], [1], [1], [2], [0, 0, 0, 1, 1, 2], [0], [0]>} : vector<2x8x8xf32>, vector<2x8x4xf32>, vector<2x8x4xf32> -> vector<2x8x4xf32>
    "tpu.trace_stop"() : () -> ()
    %56 = vector.extract_strided_slice %19 {offsets = [0, 0, 8], sizes = [2, 8, 4], strides = [1, 1, 1]} : vector<2x8x32xf32> to vector<2x8x4xf32>
    %57 = vector.extract_strided_slice %20 {offsets = [0, 0, 8], sizes = [2, 8, 4], strides = [1, 1, 1]} : vector<2x8x32xf32> to vector<2x8x4xf32>
    "tpu.trace_start"() <{level = 10 : i32, message = "bqd,bkd->bqk"}> : () -> ()
    %cst_27 = arith.constant dense<0.000000e+00> : vector<2x8x8xf32>
    %58 = tpu.matmul %56, %57, %cst_27 {dimension_numbers = #tpu.dot_dimension_numbers<[2], [2], [1], [1], [0, 0, 0, 1, 1, 1], [0], [0]>} : vector<2x8x4xf32>, vector<2x8x4xf32>, vector<2x8x8xf32> -> vector<2x8x8xf32>
    "tpu.trace_stop"() : () -> ()
    %cst_28 = arith.constant 5.000000e-01 : f32
    %59 = vector.broadcast %cst_28 : f32 to vector<2x8x8xf32>
    %60 = arith.mulf %58, %59 : vector<2x8x8xf32>
    %61 = arith.addf %60, %4 : vector<2x8x8xf32>
    %cst_29 = arith.constant dense<0xFF800000> : vector<2x8xf32>
    %62 = vector.multi_reduction <maximumf>, %61, %cst_29 [2] : vector<2x8x8xf32> to vector<2x8xf32>
    %63 = vector.shape_cast %62 : vector<2x8xf32> to vector<2x8x1xf32>
    %64 = vector.broadcast %63 : vector<2x8x1xf32> to vector<2x8x8xf32>
    %65 = arith.subf %61, %64 : vector<2x8x8xf32>
    %66 = math.exp %65 : vector<2x8x8xf32>
    %cst_30 = arith.constant dense<0.000000e+00> : vector<2x8xf32>
    %67 = vector.multi_reduction <add>, %66, %cst_30 [2] : vector<2x8x8xf32> to vector<2x8xf32>
    %68 = vector.shape_cast %67 : vector<2x8xf32> to vector<2x8x1xf32>
    %69 = vector.broadcast %68 : vector<2x8x1xf32> to vector<2x8x8xf32>
    %70 = arith.divf %66, %69 : vector<2x8x8xf32>
    %71 = vector.extract_strided_slice %21 {offsets = [0, 0, 8], sizes = [2, 8, 4], strides = [1, 1, 1]} : vector<2x8x32xf32> to vector<2x8x4xf32>
    "tpu.trace_start"() <{level = 10 : i32, message = "bqk,bkd->bqd"}> : () -> ()
    %cst_31 = arith.constant dense<0.000000e+00> : vector<2x8x4xf32>
    %72 = tpu.matmul %70, %71, %cst_31 {dimension_numbers = #tpu.dot_dimension_numbers<[2], [1], [1], [2], [0, 0, 0, 1, 1, 2], [0], [0]>} : vector<2x8x8xf32>, vector<2x8x4xf32>, vector<2x8x4xf32> -> vector<2x8x4xf32>
    "tpu.trace_stop"() : () -> ()
    %73 = vector.extract_strided_slice %19 {offsets = [0, 0, 12], sizes = [2, 8, 4], strides = [1, 1, 1]} : vector<2x8x32xf32> to vector<2x8x4xf32>
    %74 = vector.extract_strided_slice %20 {offsets = [0, 0, 12], sizes = [2, 8, 4], strides = [1, 1, 1]} : vector<2x8x32xf32> to vector<2x8x4xf32>
    "tpu.trace_start"() <{level = 10 : i32, message = "bqd,bkd->bqk"}> : () -> ()
    %cst_32 = arith.constant dense<0.000000e+00> : vector<2x8x8xf32>
    %75 = tpu.matmul %73, %74, %cst_32 {dimension_numbers = #tpu.dot_dimension_numbers<[2], [2], [1], [1], [0, 0, 0, 1, 1, 1], [0], [0]>} : vector<2x8x4xf32>, vector<2x8x4xf32>, vector<2x8x8xf32> -> vector<2x8x8xf32>
    "tpu.trace_stop"() : () -> ()
    %cst_33 = arith.constant 5.000000e-01 : f32
    %76 = vector.broadcast %cst_33 : f32 to vector<2x8x8xf32>
    %77 = arith.mulf %75, %76 : vector<2x8x8xf32>
    %78 = arith.addf %77, %4 : vector<2x8x8xf32>
    %cst_34 = arith.constant dense<0xFF800000> : vector<2x8xf32>
    %79 = vector.multi_reduction <maximumf>, %78, %cst_34 [2] : vector<2x8x8xf32> to vector<2x8xf32>
    %80 = vector.shape_cast %79 : vector<2x8xf32> to vector<2x8x1xf32>
    %81 = vector.broadcast %80 : vector<2x8x1xf32> to vector<2x8x8xf32>
    %82 = arith.subf %78, %81 : vector<2x8x8xf32>
    %83 = math.exp %82 : vector<2x8x8xf32>
    %cst_35 = arith.constant dense<0.000000e+00> : vector<2x8xf32>
    %84 = vector.multi_reduction <add>, %83, %cst_35 [2] : vector<2x8x8xf32> to vector<2x8xf32>
    %85 = vector.shape_cast %84 : vector<2x8xf32> to vector<2x8x1xf32>
    %86 = vector.broadcast %85 : vector<2x8x1xf32> to vector<2x8x8xf32>
    %87 = arith.divf %83, %86 : vector<2x8x8xf32>
    %88 = vector.extract_strided_slice %21 {offsets = [0, 0, 12], sizes = [2, 8, 4], strides = [1, 1, 1]} : vector<2x8x32xf32> to vector<2x8x4xf32>
    "tpu.trace_start"() <{level = 10 : i32, message = "bqk,bkd->bqd"}> : () -> ()
    %cst_36 = arith.constant dense<0.000000e+00> : vector<2x8x4xf32>
    %89 = tpu.matmul %87, %88, %cst_36 {dimension_numbers = #tpu.dot_dimension_numbers<[2], [1], [1], [2], [0, 0, 0, 1, 1, 2], [0], [0]>} : vector<2x8x8xf32>, vector<2x8x4xf32>, vector<2x8x4xf32> -> vector<2x8x4xf32>
    "tpu.trace_stop"() : () -> ()
    %90 = vector.extract_strided_slice %19 {offsets = [0, 0, 16], sizes = [2, 8, 4], strides = [1, 1, 1]} : vector<2x8x32xf32> to vector<2x8x4xf32>
    %91 = vector.extract_strided_slice %20 {offsets = [0, 0, 16], sizes = [2, 8, 4], strides = [1, 1, 1]} : vector<2x8x32xf32> to vector<2x8x4xf32>
    "tpu.trace_start"() <{level = 10 : i32, message = "bqd,bkd->bqk"}> : () -> ()
    %cst_37 = arith.constant dense<0.000000e+00> : vector<2x8x8xf32>
    %92 = tpu.matmul %90, %91, %cst_37 {dimension_numbers = #tpu.dot_dimension_numbers<[2], [2], [1], [1], [0, 0, 0, 1, 1, 1], [0], [0]>} : vector<2x8x4xf32>, vector<2x8x4xf32>, vector<2x8x8xf32> -> vector<2x8x8xf32>
    "tpu.trace_stop"() : () -> ()
    %cst_38 = arith.constant 5.000000e-01 : f32
    %93 = vector.broadcast %cst_38 : f32 to vector<2x8x8xf32>
    %94 = arith.mulf %92, %93 : vector<2x8x8xf32>
    %95 = arith.addf %94, %4 : vector<2x8x8xf32>
    %cst_39 = arith.constant dense<0xFF800000> : vector<2x8xf32>
    %96 = vector.multi_reduction <maximumf>, %95, %cst_39 [2] : vector<2x8x8xf32> to vector<2x8xf32>
    %97 = vector.shape_cast %96 : vector<2x8xf32> to vector<2x8x1xf32>
    %98 = vector.broadcast %97 : vector<2x8x1xf32> to vector<2x8x8xf32>
    %99 = arith.subf %95, %98 : vector<2x8x8xf32>
    %100 = math.exp %99 : vector<2x8x8xf32>
    %cst_40 = arith.constant dense<0.000000e+00> : vector<2x8xf32>
    %101 = vector.multi_reduction <add>, %100, %cst_40 [2] : vector<2x8x8xf32> to vector<2x8xf32>
    %102 = vector.shape_cast %101 : vector<2x8xf32> to vector<2x8x1xf32>
    %103 = vector.broadcast %102 : vector<2x8x1xf32> to vector<2x8x8xf32>
    %104 = arith.divf %100, %103 : vector<2x8x8xf32>
    %105 = vector.extract_strided_slice %21 {offsets = [0, 0, 16], sizes = [2, 8, 4], strides = [1, 1, 1]} : vector<2x8x32xf32> to vector<2x8x4xf32>
    "tpu.trace_start"() <{level = 10 : i32, message = "bqk,bkd->bqd"}> : () -> ()
    %cst_41 = arith.constant dense<0.000000e+00> : vector<2x8x4xf32>
    %106 = tpu.matmul %104, %105, %cst_41 {dimension_numbers = #tpu.dot_dimension_numbers<[2], [1], [1], [2], [0, 0, 0, 1, 1, 2], [0], [0]>} : vector<2x8x8xf32>, vector<2x8x4xf32>, vector<2x8x4xf32> -> vector<2x8x4xf32>
    "tpu.trace_stop"() : () -> ()
    %107 = vector.extract_strided_slice %19 {offsets = [0, 0, 20], sizes = [2, 8, 4], strides = [1, 1, 1]} : vector<2x8x32xf32> to vector<2x8x4xf32>
    %108 = vector.extract_strided_slice %20 {offsets = [0, 0, 20], sizes = [2, 8, 4], strides = [1, 1, 1]} : vector<2x8x32xf32> to vector<2x8x4xf32>
    "tpu.trace_start"() <{level = 10 : i32, message = "bqd,bkd->bqk"}> : () -> ()
    %cst_42 = arith.constant dense<0.000000e+00> : vector<2x8x8xf32>
    %109 = tpu.matmul %107, %108, %cst_42 {dimension_numbers = #tpu.dot_dimension_numbers<[2], [2], [1], [1], [0, 0, 0, 1, 1, 1], [0], [0]>} : vector<2x8x4xf32>, vector<2x8x4xf32>, vector<2x8x8xf32> -> vector<2x8x8xf32>
    "tpu.trace_stop"() : () -> ()
    %cst_43 = arith.constant 5.000000e-01 : f32
    %110 = vector.broadcast %cst_43 : f32 to vector<2x8x8xf32>
    %111 = arith.mulf %109, %110 : vector<2x8x8xf32>
    %112 = arith.addf %111, %4 : vector<2x8x8xf32>
    %cst_44 = arith.constant dense<0xFF800000> : vector<2x8xf32>
    %113 = vector.multi_reduction <maximumf>, %112, %cst_44 [2] : vector<2x8x8xf32> to vector<2x8xf32>
    %114 = vector.shape_cast %113 : vector<2x8xf32> to vector<2x8x1xf32>
    %115 = vector.broadcast %114 : vector<2x8x1xf32> to vector<2x8x8xf32>
    %116 = arith.subf %112, %115 : vector<2x8x8xf32>
    %117 = math.exp %116 : vector<2x8x8xf32>
    %cst_45 = arith.constant dense<0.000000e+00> : vector<2x8xf32>
    %118 = vector.multi_reduction <add>, %117, %cst_45 [2] : vector<2x8x8xf32> to vector<2x8xf32>
    %119 = vector.shape_cast %118 : vector<2x8xf32> to vector<2x8x1xf32>
    %120 = vector.broadcast %119 : vector<2x8x1xf32> to vector<2x8x8xf32>
    %121 = arith.divf %117, %120 : vector<2x8x8xf32>
    %122 = vector.extract_strided_slice %21 {offsets = [0, 0, 20], sizes = [2, 8, 4], strides = [1, 1, 1]} : vector<2x8x32xf32> to vector<2x8x4xf32>
    "tpu.trace_start"() <{level = 10 : i32, message = "bqk,bkd->bqd"}> : () -> ()
    %cst_46 = arith.constant dense<0.000000e+00> : vector<2x8x4xf32>
    %123 = tpu.matmul %121, %122, %cst_46 {dimension_numbers = #tpu.dot_dimension_numbers<[2], [1], [1], [2], [0, 0, 0, 1, 1, 2], [0], [0]>} : vector<2x8x8xf32>, vector<2x8x4xf32>, vector<2x8x4xf32> -> vector<2x8x4xf32>
    "tpu.trace_stop"() : () -> ()
    %124 = vector.extract_strided_slice %19 {offsets = [0, 0, 24], sizes = [2, 8, 4], strides = [1, 1, 1]} : vector<2x8x32xf32> to vector<2x8x4xf32>
    %125 = vector.extract_strided_slice %20 {offsets = [0, 0, 24], sizes = [2, 8, 4], strides = [1, 1, 1]} : vector<2x8x32xf32> to vector<2x8x4xf32>
    "tpu.trace_start"() <{level = 10 : i32, message = "bqd,bkd->bqk"}> : () -> ()
    %cst_47 = arith.constant dense<0.000000e+00> : vector<2x8x8xf32>
    %126 = tpu.matmul %124, %125, %cst_47 {dimension_numbers = #tpu.dot_dimension_numbers<[2], [2], [1], [1], [0, 0, 0, 1, 1, 1], [0], [0]>} : vector<2x8x4xf32>, vector<2x8x4xf32>, vector<2x8x8xf32> -> vector<2x8x8xf32>
    "tpu.trace_stop"() : () -> ()
    %cst_48 = arith.constant 5.000000e-01 : f32
    %127 = vector.broadcast %cst_48 : f32 to vector<2x8x8xf32>
    %128 = arith.mulf %126, %127 : vector<2x8x8xf32>
    %129 = arith.addf %128, %4 : vector<2x8x8xf32>
    %cst_49 = arith.constant dense<0xFF800000> : vector<2x8xf32>
    %130 = vector.multi_reduction <maximumf>, %129, %cst_49 [2] : vector<2x8x8xf32> to vector<2x8xf32>
    %131 = vector.shape_cast %130 : vector<2x8xf32> to vector<2x8x1xf32>
    %132 = vector.broadcast %131 : vector<2x8x1xf32> to vector<2x8x8xf32>
    %133 = arith.subf %129, %132 : vector<2x8x8xf32>
    %134 = math.exp %133 : vector<2x8x8xf32>
    %cst_50 = arith.constant dense<0.000000e+00> : vector<2x8xf32>
    %135 = vector.multi_reduction <add>, %134, %cst_50 [2] : vector<2x8x8xf32> to vector<2x8xf32>
    %136 = vector.shape_cast %135 : vector<2x8xf32> to vector<2x8x1xf32>
    %137 = vector.broadcast %136 : vector<2x8x1xf32> to vector<2x8x8xf32>
    %138 = arith.divf %134, %137 : vector<2x8x8xf32>
    %139 = vector.extract_strided_slice %21 {offsets = [0, 0, 24], sizes = [2, 8, 4], strides = [1, 1, 1]} : vector<2x8x32xf32> to vector<2x8x4xf32>
    "tpu.trace_start"() <{level = 10 : i32, message = "bqk,bkd->bqd"}> : () -> ()
    %cst_51 = arith.constant dense<0.000000e+00> : vector<2x8x4xf32>
    %140 = tpu.matmul %138, %139, %cst_51 {dimension_numbers = #tpu.dot_dimension_numbers<[2], [1], [1], [2], [0, 0, 0, 1, 1, 2], [0], [0]>} : vector<2x8x8xf32>, vector<2x8x4xf32>, vector<2x8x4xf32> -> vector<2x8x4xf32>
    "tpu.trace_stop"() : () -> ()
    %141 = vector.extract_strided_slice %19 {offsets = [0, 0, 28], sizes = [2, 8, 4], strides = [1, 1, 1]} : vector<2x8x32xf32> to vector<2x8x4xf32>
    %142 = vector.extract_strided_slice %20 {offsets = [0, 0, 28], sizes = [2, 8, 4], strides = [1, 1, 1]} : vector<2x8x32xf32> to vector<2x8x4xf32>
    "tpu.trace_start"() <{level = 10 : i32, message = "bqd,bkd->bqk"}> : () -> ()
    %cst_52 = arith.constant dense<0.000000e+00> : vector<2x8x8xf32>
    %143 = tpu.matmul %141, %142, %cst_52 {dimension_numbers = #tpu.dot_dimension_numbers<[2], [2], [1], [1], [0, 0, 0, 1, 1, 1], [0], [0]>} : vector<2x8x4xf32>, vector<2x8x4xf32>, vector<2x8x8xf32> -> vector<2x8x8xf32>
    "tpu.trace_stop"() : () -> ()
    %cst_53 = arith.constant 5.000000e-01 : f32
    %144 = vector.broadcast %cst_53 : f32 to vector<2x8x8xf32>
    %145 = arith.mulf %143, %144 : vector<2x8x8xf32>
    %146 = arith.addf %145, %4 : vector<2x8x8xf32>
    %cst_54 = arith.constant dense<0xFF800000> : vector<2x8xf32>
    %147 = vector.multi_reduction <maximumf>, %146, %cst_54 [2] : vector<2x8x8xf32> to vector<2x8xf32>
    %148 = vector.shape_cast %147 : vector<2x8xf32> to vector<2x8x1xf32>
    %149 = vector.broadcast %148 : vector<2x8x1xf32> to vector<2x8x8xf32>
    %150 = arith.subf %146, %149 : vector<2x8x8xf32>
    %151 = math.exp %150 : vector<2x8x8xf32>
    %cst_55 = arith.constant dense<0.000000e+00> : vector<2x8xf32>
    %152 = vector.multi_reduction <add>, %151, %cst_55 [2] : vector<2x8x8xf32> to vector<2x8xf32>
    %153 = vector.shape_cast %152 : vector<2x8xf32> to vector<2x8x1xf32>
    %154 = vector.broadcast %153 : vector<2x8x1xf32> to vector<2x8x8xf32>
    %155 = arith.divf %151, %154 : vector<2x8x8xf32>
    %156 = vector.extract_strided_slice %21 {offsets = [0, 0, 28], sizes = [2, 8, 4], strides = [1, 1, 1]} : vector<2x8x32xf32> to vector<2x8x4xf32>
    "tpu.trace_start"() <{level = 10 : i32, message = "bqk,bkd->bqd"}> : () -> ()
    %cst_56 = arith.constant dense<0.000000e+00> : vector<2x8x4xf32>
    %157 = tpu.matmul %155, %156, %cst_56 {dimension_numbers = #tpu.dot_dimension_numbers<[2], [1], [1], [2], [0, 0, 0, 1, 1, 2], [0], [0]>} : vector<2x8x8xf32>, vector<2x8x4xf32>, vector<2x8x4xf32> -> vector<2x8x4xf32>
    "tpu.trace_stop"() : () -> ()
    %158 = tpu.concatenate %38, %55, %72, %89, %106, %123, %140, %157 in 2 : vector<2x8x4xf32>, vector<2x8x4xf32>, vector<2x8x4xf32>, vector<2x8x4xf32>, vector<2x8x4xf32>, vector<2x8x4xf32>, vector<2x8x4xf32>, vector<2x8x4xf32> -> vector<2x8x32xf32>
    %159 = vector.shape_cast %158 : vector<2x8x32xf32> to vector<16x32xf32>
    %cst_57 = arith.constant dense<0.000000e+00> : vector<16x32xf32>
    %160 = tpu.matmul %159, %10, %cst_57 {dimension_numbers = #tpu.dot_dimension_numbers<[1], [0], [0], [1], [0, 0, 1, 1], [], []>} : vector<16x32xf32>, vector<32x32xf32>, vector<16x32xf32> -> vector<16x32xf32>
    %161 = vector.broadcast %12 : vector<1x32xf32> to vector<16x32xf32>
    %162 = arith.addf %160, %161 : vector<16x32xf32>
    %163 = arith.addf %3, %162 : vector<16x32xf32>
    %c0_58 = arith.constant 0 : index
    %c0_59 = arith.constant 0 : index
    %c0_60 = arith.constant 0 : index
    %164 = vector.load %arg7[%c0_58, %c0_59, %c0_60] : memref<1x2x32xf32, #tpu.memory_space<vmem>>, vector<1x2x32xf32>
    %165 = vector.shape_cast %164 : vector<1x2x32xf32> to vector<2x32xf32>
    %166 = vector.extract_strided_slice %165 {offsets = [0, 0], sizes = [1, 32], strides = [1, 1]} : vector<2x32xf32> to vector<1x32xf32>
    %167 = vector.extract_strided_slice %165 {offsets = [1, 0], sizes = [1, 32], strides = [1, 1]} : vector<2x32xf32> to vector<1x32xf32>
    %cst_61 = arith.constant dense<0.000000e+00> : vector<16xf32>
    %168 = vector.multi_reduction <add>, %163, %cst_61 [1] : vector<16x32xf32> to vector<16xf32>
    %169 = vector.shape_cast %168 : vector<16xf32> to vector<16x1xf32>
    %cst_62 = arith.constant 3.200000e+01 : f32
    %170 = vector.broadcast %cst_62 : f32 to vector<16x1xf32>
    %171 = arith.divf %169, %170 : vector<16x1xf32>
    %172 = vector.broadcast %171 : vector<16x1xf32> to vector<16x32xf32>
    %173 = arith.subf %163, %172 : vector<16x32xf32>
    %174 = arith.mulf %173, %173 : vector<16x32xf32>
    %cst_63 = arith.constant dense<0.000000e+00> : vector<16xf32>
    %175 = vector.multi_reduction <add>, %174, %cst_63 [1] : vector<16x32xf32> to vector<16xf32>
    %176 = vector.shape_cast %175 : vector<16xf32> to vector<16x1xf32>
    %cst_64 = arith.constant 3.200000e+01 : f32
    %177 = vector.broadcast %cst_64 : f32 to vector<16x1xf32>
    %178 = arith.divf %176, %177 : vector<16x1xf32>
    %179 = vector.broadcast %171 : vector<16x1xf32> to vector<16x32xf32>
    %180 = arith.subf %163, %179 : vector<16x32xf32>
    %cst_65 = arith.constant 9.99999974E-6 : f32
    %181 = vector.broadcast %cst_65 : f32 to vector<16x1xf32>
    %182 = arith.addf %178, %181 : vector<16x1xf32>
    %183 = math.rsqrt %182 : vector<16x1xf32>
    %184 = vector.broadcast %183 : vector<16x1xf32> to vector<16x32xf32>
    %185 = arith.mulf %180, %184 : vector<16x32xf32>
    %186 = vector.broadcast %166 : vector<1x32xf32> to vector<16x32xf32>
    %187 = arith.mulf %185, %186 : vector<16x32xf32>
    %188 = vector.broadcast %167 : vector<1x32xf32> to vector<16x32xf32>
    %189 = arith.addf %187, %188 : vector<16x32xf32>
    %c0_66 = arith.constant 0 : index
    %c0_67 = arith.constant 0 : index
    %c0_68 = arith.constant 0 : index
    %190 = vector.load %arg8[%c0_66, %c0_67, %c0_68] : memref<1x32x2048xf32, #tpu.memory_space<vmem>>, vector<1x32x2048xf32>
    %191 = vector.shape_cast %190 : vector<1x32x2048xf32> to vector<32x2048xf32>
    %c0_69 = arith.constant 0 : index
    %c0_70 = arith.constant 0 : index
    %c0_71 = arith.constant 0 : index
    %192 = vector.load %arg9[%c0_69, %c0_70, %c0_71] : memref<1x1x2048xf32, #tpu.memory_space<vmem>>, vector<1x1x2048xf32>
    %193 = vector.shape_cast %192 : vector<1x1x2048xf32> to vector<1x2048xf32>
    %c0_72 = arith.constant 0 : index
    %c0_73 = arith.constant 0 : index
    %c0_74 = arith.constant 0 : index
    %194 = vector.load %arg10[%c0_72, %c0_73, %c0_74] : memref<1x2048x32xf32, #tpu.memory_space<vmem>>, vector<1x2048x32xf32>
    %195 = vector.shape_cast %194 : vector<1x2048x32xf32> to vector<2048x32xf32>
    %c0_75 = arith.constant 0 : index
    %c0_76 = arith.constant 0 : index
    %c0_77 = arith.constant 0 : index
    %196 = vector.load %arg11[%c0_75, %c0_76, %c0_77] : memref<1x1x32xf32, #tpu.memory_space<vmem>>, vector<1x1x32xf32>
    %197 = vector.shape_cast %196 : vector<1x1x32xf32> to vector<1x32xf32>
    %cst_78 = arith.constant dense<0.000000e+00> : vector<16x2048xf32>
    %198 = tpu.matmul %189, %191, %cst_78 {dimension_numbers = #tpu.dot_dimension_numbers<[1], [0], [0], [1], [0, 0, 1, 1], [], []>} : vector<16x32xf32>, vector<32x2048xf32>, vector<16x2048xf32> -> vector<16x2048xf32>
    %199 = vector.broadcast %193 : vector<1x2048xf32> to vector<16x2048xf32>
    %200 = arith.addf %198, %199 : vector<16x2048xf32>
    %cst_79 = arith.constant 0.000000e+00 : f32
    %201 = vector.broadcast %cst_79 : f32 to vector<16x2048xf32>
    %202 = arith.maximumf %200, %201 : vector<16x2048xf32>
    %cst_80 = arith.constant dense<0.000000e+00> : vector<16x32xf32>
    %203 = tpu.matmul %202, %195, %cst_80 {dimension_numbers = #tpu.dot_dimension_numbers<[1], [0], [0], [1], [0, 0, 1, 1], [], []>} : vector<16x2048xf32>, vector<2048x32xf32>, vector<16x32xf32> -> vector<16x32xf32>
    %204 = vector.broadcast %197 : vector<1x32xf32> to vector<16x32xf32>
    %205 = arith.addf %203, %204 : vector<16x32xf32>
    %206 = arith.addf %189, %205 : vector<16x32xf32>
    %c0_81 = arith.constant 0 : index
    %c0_82 = arith.constant 0 : index
    %c0_83 = arith.constant 0 : index
    %207 = vector.load %arg12[%c0_81, %c0_82, %c0_83] : memref<1x2x32xf32, #tpu.memory_space<vmem>>, vector<1x2x32xf32>
    %208 = vector.shape_cast %207 : vector<1x2x32xf32> to vector<2x32xf32>
    %209 = vector.extract_strided_slice %208 {offsets = [0, 0], sizes = [1, 32], strides = [1, 1]} : vector<2x32xf32> to vector<1x32xf32>
    %210 = vector.extract_strided_slice %208 {offsets = [1, 0], sizes = [1, 32], strides = [1, 1]} : vector<2x32xf32> to vector<1x32xf32>
    %cst_84 = arith.constant dense<0.000000e+00> : vector<16xf32>
    %211 = vector.multi_reduction <add>, %206, %cst_84 [1] : vector<16x32xf32> to vector<16xf32>
    %212 = vector.shape_cast %211 : vector<16xf32> to vector<16x1xf32>
    %cst_85 = arith.constant 3.200000e+01 : f32
    %213 = vector.broadcast %cst_85 : f32 to vector<16x1xf32>
    %214 = arith.divf %212, %213 : vector<16x1xf32>
    %215 = vector.broadcast %214 : vector<16x1xf32> to vector<16x32xf32>
    %216 = arith.subf %206, %215 : vector<16x32xf32>
    %217 = arith.mulf %216, %216 : vector<16x32xf32>
    %cst_86 = arith.constant dense<0.000000e+00> : vector<16xf32>
    %218 = vector.multi_reduction <add>, %217, %cst_86 [1] : vector<16x32xf32> to vector<16xf32>
    %219 = vector.shape_cast %218 : vector<16xf32> to vector<16x1xf32>
    %cst_87 = arith.constant 3.200000e+01 : f32
    %220 = vector.broadcast %cst_87 : f32 to vector<16x1xf32>
    %221 = arith.divf %219, %220 : vector<16x1xf32>
    %222 = vector.broadcast %214 : vector<16x1xf32> to vector<16x32xf32>
    %223 = arith.subf %206, %222 : vector<16x32xf32>
    %cst_88 = arith.constant 9.99999974E-6 : f32
    %224 = vector.broadcast %cst_88 : f32 to vector<16x1xf32>
    %225 = arith.addf %221, %224 : vector<16x1xf32>
    %226 = math.rsqrt %225 : vector<16x1xf32>
    %227 = vector.broadcast %226 : vector<16x1xf32> to vector<16x32xf32>
    %228 = arith.mulf %223, %227 : vector<16x32xf32>
    %229 = vector.broadcast %209 : vector<1x32xf32> to vector<16x32xf32>
    %230 = arith.mulf %228, %229 : vector<16x32xf32>
    %231 = vector.broadcast %210 : vector<1x32xf32> to vector<16x32xf32>
    %232 = arith.addf %230, %231 : vector<16x32xf32>
    %c0_89 = arith.constant 0 : index
    %c0_90 = arith.constant 0 : index
    %233 = vector.load %arg14[%c0_89, %c0_90] : memref<16x32xf32, #tpu.memory_space<vmem>>, vector<16x32xf32>
    tpu.vector_store %arg14[%c0_89, %c0_90], %232 {strides = array<i32>} : memref<16x32xf32, #tpu.memory_space<vmem>>, vector<16x32xf32>,
    %c5_i32 = arith.constant 5 : i32
    %234 = arith.cmpi eq, %arg0, %c5_i32 : i32
    %235 = arith.extui %234 : i1 to i32
    %c0_i32_91 = arith.constant 0 : i32
    %236 = arith.cmpi ne, %235, %c0_i32_91 : i32
    scf.if %236 {
      %c0_92 = arith.constant 0 : index
      %c0_93 = arith.constant 0 : index
      %237 = vector.load %arg13[%c0_92, %c0_93] : memref<2x32xf32, #tpu.memory_space<vmem>>, vector<2x32xf32>
      %238 = vector.extract_strided_slice %237 {offsets = [0, 0], sizes = [1, 32], strides = [1, 1]} : vector<2x32xf32> to vector<1x32xf32>
      %239 = vector.extract_strided_slice %237 {offsets = [1, 0], sizes = [1, 32], strides = [1, 1]} : vector<2x32xf32> to vector<1x32xf32>
      %cst_94 = arith.constant dense<0.000000e+00> : vector<16xf32>
      %240 = vector.multi_reduction <add>, %232, %cst_94 [1] : vector<16x32xf32> to vector<16xf32>
      %241 = vector.shape_cast %240 : vector<16xf32> to vector<16x1xf32>
      %cst_95 = arith.constant 3.200000e+01 : f32
      %242 = vector.broadcast %cst_95 : f32 to vector<16x1xf32>
      %243 = arith.divf %241, %242 : vector<16x1xf32>
      %244 = vector.broadcast %243 : vector<16x1xf32> to vector<16x32xf32>
      %245 = arith.subf %232, %244 : vector<16x32xf32>
      %246 = arith.mulf %245, %245 : vector<16x32xf32>
      %cst_96 = arith.constant dense<0.000000e+00> : vector<16xf32>
      %247 = vector.multi_reduction <add>, %246, %cst_96 [1] : vector<16x32xf32> to vector<16xf32>
      %248 = vector.shape_cast %247 : vector<16xf32> to vector<16x1xf32>
      %cst_97 = arith.constant 3.200000e+01 : f32
      %249 = vector.broadcast %cst_97 : f32 to vector<16x1xf32>
      %250 = arith.divf %248, %249 : vector<16x1xf32>
      %251 = vector.broadcast %243 : vector<16x1xf32> to vector<16x32xf32>
      %252 = arith.subf %232, %251 : vector<16x32xf32>
      %cst_98 = arith.constant 9.99999974E-6 : f32
      %253 = vector.broadcast %cst_98 : f32 to vector<16x1xf32>
      %254 = arith.addf %250, %253 : vector<16x1xf32>
      %255 = math.rsqrt %254 : vector<16x1xf32>
      %256 = vector.broadcast %255 : vector<16x1xf32> to vector<16x32xf32>
      %257 = arith.mulf %252, %256 : vector<16x32xf32>
      %258 = vector.broadcast %238 : vector<1x32xf32> to vector<16x32xf32>
      %259 = arith.mulf %257, %258 : vector<16x32xf32>
      %260 = vector.broadcast %239 : vector<1x32xf32> to vector<16x32xf32>
      %261 = arith.addf %259, %260 : vector<16x32xf32>
      %c0_99 = arith.constant 0 : index
      %c0_100 = arith.constant 0 : index
      %262 = vector.load %arg14[%c0_99, %c0_100] : memref<16x32xf32, #tpu.memory_space<vmem>>, vector<16x32xf32>
      tpu.vector_store %arg14[%c0_99, %c0_100], %261 {strides = array<i32>} : memref<16x32xf32, #tpu.memory_space<vmem>>, vector<16x32xf32>,
    } else {
    }
    return
  }
  func.func @transform_0(%arg0: i32) -> (i32, i32) {
    %c0_i32 = arith.constant 0 : i32
    %c0_i32_0 = arith.constant 0 : i32
    %c0_i32_1 = arith.constant 0 : i32
    return %c0_i32, %c0_i32_0 : i32, i32
  }
  func.func @transform_1(%arg0: i32) -> (i32, i32, i32) {
    %c0_i32 = arith.constant 0 : i32
    %c0_i32_0 = arith.constant 0 : i32
    %c0_i32_1 = arith.constant 0 : i32
    %c0_i32_2 = arith.constant 0 : i32
    return %c0_i32, %c0_i32_0, %c0_i32_1 : i32, i32, i32
  }
  func.func @transform_2(%arg0: i32) -> (i32, i32, i32) {
    %c0_i32 = arith.constant 0 : i32
    %c0_i32_0 = arith.constant 0 : i32
    %c0_i32_1 = arith.constant 0 : i32
    return %arg0, %c0_i32, %c0_i32_0 : i32, i32, i32
  }
  func.func @transform_3(%arg0: i32) -> (i32, i32, i32) {
    %c0_i32 = arith.constant 0 : i32
    %c0_i32_0 = arith.constant 0 : i32
    %c0_i32_1 = arith.constant 0 : i32
    return %arg0, %c0_i32, %c0_i32_0 : i32, i32, i32
  }
  func.func @transform_4(%arg0: i32) -> (i32, i32, i32) {
    %c0_i32 = arith.constant 0 : i32
    %c0_i32_0 = arith.constant 0 : i32
    %c0_i32_1 = arith.constant 0 : i32
    return %arg0, %c0_i32, %c0_i32_0 : i32, i32, i32
  }
  func.func @transform_5(%arg0: i32) -> (i32, i32, i32) {
    %c0_i32 = arith.constant 0 : i32
    %c0_i32_0 = arith.constant 0 : i32
    %c0_i32_1 = arith.constant 0 : i32
    return %arg0, %c0_i32, %c0_i32_0 : i32, i32, i32
  }
  func.func @transform_6(%arg0: i32) -> (i32, i32, i32) {
    %c0_i32 = arith.constant 0 : i32
    %c0_i32_0 = arith.constant 0 : i32
    %c0_i32_1 = arith.constant 0 : i32
    return %arg0, %c0_i32, %c0_i32_0 : i32, i32, i32
  }
  func.func @transform_7(%arg0: i32) -> (i32, i32, i32) {
    %c0_i32 = arith.constant 0 : i32
    %c0_i32_0 = arith.constant 0 : i32
    %c0_i32_1 = arith.constant 0 : i32
    return %arg0, %c0_i32, %c0_i32_0 : i32, i32, i32
  }
  func.func @transform_8(%arg0: i32) -> (i32, i32, i32) {
    %c0_i32 = arith.constant 0 : i32
    %c0_i32_0 = arith.constant 0 : i32
    %c0_i32_1 = arith.constant 0 : i32
    return %arg0, %c0_i32, %c0_i32_0 : i32, i32, i32
  }
  func.func @transform_9(%arg0: i32) -> (i32, i32, i32) {
    %c0_i32 = arith.constant 0 : i32
    %c0_i32_0 = arith.constant 0 : i32
    %c0_i32_1 = arith.constant 0 : i32
    return %arg0, %c0_i32, %c0_i32_0 : i32, i32, i32
  }
  func.func @transform_10(%arg0: i32) -> (i32, i32, i32) {
    %c0_i32 = arith.constant 0 : i32
    %c0_i32_0 = arith.constant 0 : i32
    %c0_i32_1 = arith.constant 0 : i32
    return %arg0, %c0_i32, %c0_i32_0 : i32, i32, i32
  }
  func.func @transform_11(%arg0: i32) -> (i32, i32, i32) {
    %c0_i32 = arith.constant 0 : i32
    %c0_i32_0 = arith.constant 0 : i32
    %c0_i32_1 = arith.constant 0 : i32
    return %arg0, %c0_i32, %c0_i32_0 : i32, i32, i32
  }
  func.func @transform_12(%arg0: i32) -> (i32, i32) {
    %c0_i32 = arith.constant 0 : i32
    %c0_i32_0 = arith.constant 0 : i32
    %c0_i32_1 = arith.constant 0 : i32
    return %c0_i32, %c0_i32_0 : i32, i32
  }
  func.func @transform_13(%arg0: i32) -> (i32, i32) {
    %c0_i32 = arith.constant 0 : i32
    %c0_i32_0 = arith.constant 0 : i32
    %c0_i32_1 = arith.constant 0 : i32
    return %c0_i32, %c0_i32_0 : i32, i32
  }
}

module attributes {stable_mosaic.version = 11 : i64} {
  func.func @_decoder_stack_kernel(%arg0: i32, %arg1: memref<16x32xf32, #tpu.memory_space<vmem>>, %arg2: memref<16x32xf32, #tpu.memory_space<vmem>>, %arg3: memref<2x8x8xf32, #tpu.memory_space<vmem>>, %arg4: memref<1x32x96xf32, #tpu.memory_space<vmem>>, %arg5: memref<1x1x96xf32, #tpu.memory_space<vmem>>, %arg6: memref<1x32x32xf32, #tpu.memory_space<vmem>>, %arg7: memref<1x1x32xf32, #tpu.memory_space<vmem>>, %arg8: memref<1x2x32xf32, #tpu.memory_space<vmem>>, %arg9: memref<1x32x96xf32, #tpu.memory_space<vmem>>, %arg10: memref<1x1x96xf32, #tpu.memory_space<vmem>>, %arg11: memref<1x32x32xf32, #tpu.memory_space<vmem>>, %arg12: memref<1x1x32xf32, #tpu.memory_space<vmem>>, %arg13: memref<1x2x32xf32, #tpu.memory_space<vmem>>, %arg14: memref<1x32x2048xf32, #tpu.memory_space<vmem>>, %arg15: memref<1x1x2048xf32, #tpu.memory_space<vmem>>, %arg16: memref<1x2048x32xf32, #tpu.memory_space<vmem>>, %arg17: memref<1x1x32xf32, #tpu.memory_space<vmem>>, %arg18: memref<1x2x32xf32, #tpu.memory_space<vmem>>, %arg19: memref<2x32xf32, #tpu.memory_space<vmem>>, %arg20: memref<16x32xf32, #tpu.memory_space<vmem>>) attributes {dimension_semantics = [#tpu.dimension_semantics<arbitrary>], iteration_bounds = array<i64: 6>, scalar_prefetch = 0 : i64, scratch_operands = 0 : i64, tpu.core_type = #tpu.core_type<tc>, window_params = [{pipeline_mode = #tpu.pipeline_mode<synchronous>, transform_indices = @transform_0, window_bounds = array<i64: 16, 32>}, {pipeline_mode = #tpu.pipeline_mode<synchronous>, transform_indices = @transform_1, window_bounds = array<i64: 16, 32>}, {pipeline_mode = #tpu.pipeline_mode<synchronous>, transform_indices = @transform_2, window_bounds = array<i64: 2, 8, 8>}, {transform_indices = @transform_3, window_bounds = array<i64: 1, 32, 96>}, {transform_indices = @transform_4, window_bounds = array<i64: 1, 1, 96>}, {transform_indices = @transform_5, window_bounds = array<i64: 1, 32, 32>}, {transform_indices = @transform_6, window_bounds = array<i64: 1, 1, 32>}, {transform_indices = @transform_7, window_bounds = array<i64: 1, 2, 32>}, {transform_indices = @transform_8, window_bounds = array<i64: 1, 32, 96>}, {transform_indices = @transform_9, window_bounds = array<i64: 1, 1, 96>}, {transform_indices = @transform_10, window_bounds = array<i64: 1, 32, 32>}, {transform_indices = @transform_11, window_bounds = array<i64: 1, 1, 32>}, {transform_indices = @transform_12, window_bounds = array<i64: 1, 2, 32>}, {transform_indices = @transform_13, window_bounds = array<i64: 1, 32, 2048>}, {transform_indices = @transform_14, window_bounds = array<i64: 1, 1, 2048>}, {transform_indices = @transform_15, window_bounds = array<i64: 1, 2048, 32>}, {transform_indices = @transform_16, window_bounds = array<i64: 1, 1, 32>}, {transform_indices = @transform_17, window_bounds = array<i64: 1, 2, 32>}, {pipeline_mode = #tpu.pipeline_mode<synchronous>, transform_indices = @transform_18, window_bounds = array<i64: 2, 32>}, {pipeline_mode = #tpu.pipeline_mode<synchronous>, transform_indices = @transform_19, window_bounds = array<i64: 16, 32>}]} {
    %c0_i32 = arith.constant 0 : i32
    %0 = arith.cmpi eq, %arg0, %c0_i32 : i32
    %1 = arith.extui %0 : i1 to i32
    %c0_i32_0 = arith.constant 0 : i32
    %2 = arith.cmpi ne, %1, %c0_i32_0 : i32
    scf.if %2 {
      %c0_157 = arith.constant 0 : index
      %c0_158 = arith.constant 0 : index
      %421 = vector.load %arg1[%c0_157, %c0_158] : memref<16x32xf32, #tpu.memory_space<vmem>>, vector<16x32xf32>
      %c0_159 = arith.constant 0 : index
      %c0_160 = arith.constant 0 : index
      %422 = vector.load %arg20[%c0_159, %c0_160] : memref<16x32xf32, #tpu.memory_space<vmem>>, vector<16x32xf32>
      tpu.vector_store %arg20[%c0_159, %c0_160], %421 {strides = array<i32>} : memref<16x32xf32, #tpu.memory_space<vmem>>, vector<16x32xf32>,
    } else {
    }
    %c0 = arith.constant 0 : index
    %c0_1 = arith.constant 0 : index
    %3 = vector.load %arg20[%c0, %c0_1] : memref<16x32xf32, #tpu.memory_space<vmem>>, vector<16x32xf32>
    %c0_2 = arith.constant 0 : index
    %c0_3 = arith.constant 0 : index
    %4 = vector.load %arg2[%c0_2, %c0_3] : memref<16x32xf32, #tpu.memory_space<vmem>>, vector<16x32xf32>
    %c0_4 = arith.constant 0 : index
    %c0_5 = arith.constant 0 : index
    %c0_6 = arith.constant 0 : index
    %5 = vector.load %arg3[%c0_4, %c0_5, %c0_6] : memref<2x8x8xf32, #tpu.memory_space<vmem>>, vector<2x8x8xf32>
    %c0_7 = arith.constant 0 : index
    %c0_8 = arith.constant 0 : index
    %c0_9 = arith.constant 0 : index
    %6 = vector.load %arg4[%c0_7, %c0_8, %c0_9] : memref<1x32x96xf32, #tpu.memory_space<vmem>>, vector<1x32x96xf32>
    %7 = vector.shape_cast %6 : vector<1x32x96xf32> to vector<32x96xf32>
    %c0_10 = arith.constant 0 : index
    %c0_11 = arith.constant 0 : index
    %c0_12 = arith.constant 0 : index
    %8 = vector.load %arg5[%c0_10, %c0_11, %c0_12] : memref<1x1x96xf32, #tpu.memory_space<vmem>>, vector<1x1x96xf32>
    %9 = vector.shape_cast %8 : vector<1x1x96xf32> to vector<1x96xf32>
    %c0_13 = arith.constant 0 : index
    %c0_14 = arith.constant 0 : index
    %c0_15 = arith.constant 0 : index
    %10 = vector.load %arg6[%c0_13, %c0_14, %c0_15] : memref<1x32x32xf32, #tpu.memory_space<vmem>>, vector<1x32x32xf32>
    %11 = vector.shape_cast %10 : vector<1x32x32xf32> to vector<32x32xf32>
    %c0_16 = arith.constant 0 : index
    %c0_17 = arith.constant 0 : index
    %c0_18 = arith.constant 0 : index
    %12 = vector.load %arg7[%c0_16, %c0_17, %c0_18] : memref<1x1x32xf32, #tpu.memory_space<vmem>>, vector<1x1x32xf32>
    %13 = vector.shape_cast %12 : vector<1x1x32xf32> to vector<1x32xf32>
    %cst = arith.constant dense<0.000000e+00> : vector<16x96xf32>
    %14 = tpu.matmul %3, %7, %cst {dimension_numbers = #tpu.dot_dimension_numbers<[1], [0], [0], [1], [0, 0, 1, 1], [], []>} : vector<16x32xf32>, vector<32x96xf32>, vector<16x96xf32> -> vector<16x96xf32>
    %15 = vector.broadcast %9 : vector<1x96xf32> to vector<16x96xf32>
    %16 = arith.addf %14, %15 : vector<16x96xf32>
    %17 = vector.extract_strided_slice %16 {offsets = [0, 0], sizes = [16, 32], strides = [1, 1]} : vector<16x96xf32> to vector<16x32xf32>
    %18 = vector.extract_strided_slice %16 {offsets = [0, 32], sizes = [16, 32], strides = [1, 1]} : vector<16x96xf32> to vector<16x32xf32>
    %19 = vector.extract_strided_slice %16 {offsets = [0, 64], sizes = [16, 32], strides = [1, 1]} : vector<16x96xf32> to vector<16x32xf32>
    %20 = vector.shape_cast %17 : vector<16x32xf32> to vector<2x8x32xf32>
    %21 = vector.shape_cast %18 : vector<16x32xf32> to vector<2x8x32xf32>
    %22 = vector.shape_cast %19 : vector<16x32xf32> to vector<2x8x32xf32>
    %23 = vector.extract_strided_slice %20 {offsets = [0, 0, 0], sizes = [2, 8, 4], strides = [1, 1, 1]} : vector<2x8x32xf32> to vector<2x8x4xf32>
    %24 = vector.extract_strided_slice %21 {offsets = [0, 0, 0], sizes = [2, 8, 4], strides = [1, 1, 1]} : vector<2x8x32xf32> to vector<2x8x4xf32>
    "tpu.trace_start"() <{level = 10 : i32, message = "bqd,bkd->bqk"}> : () -> ()
    %cst_19 = arith.constant dense<0.000000e+00> : vector<2x8x8xf32>
    %25 = tpu.matmul %23, %24, %cst_19 {dimension_numbers = #tpu.dot_dimension_numbers<[2], [2], [1], [1], [0, 0, 0, 1, 1, 1], [0], [0]>} : vector<2x8x4xf32>, vector<2x8x4xf32>, vector<2x8x8xf32> -> vector<2x8x8xf32>
    "tpu.trace_stop"() : () -> ()
    %cst_20 = arith.constant 5.000000e-01 : f32
    %26 = vector.broadcast %cst_20 : f32 to vector<2x8x8xf32>
    %27 = arith.mulf %25, %26 : vector<2x8x8xf32>
    %28 = arith.addf %27, %5 : vector<2x8x8xf32>
    %cst_21 = arith.constant dense<0xFF800000> : vector<2x8xf32>
    %29 = vector.multi_reduction <maximumf>, %28, %cst_21 [2] : vector<2x8x8xf32> to vector<2x8xf32>
    %30 = vector.shape_cast %29 : vector<2x8xf32> to vector<2x8x1xf32>
    %31 = vector.broadcast %30 : vector<2x8x1xf32> to vector<2x8x8xf32>
    %32 = arith.subf %28, %31 : vector<2x8x8xf32>
    %33 = math.exp %32 : vector<2x8x8xf32>
    %cst_22 = arith.constant dense<0.000000e+00> : vector<2x8xf32>
    %34 = vector.multi_reduction <add>, %33, %cst_22 [2] : vector<2x8x8xf32> to vector<2x8xf32>
    %35 = vector.shape_cast %34 : vector<2x8xf32> to vector<2x8x1xf32>
    %36 = vector.broadcast %35 : vector<2x8x1xf32> to vector<2x8x8xf32>
    %37 = arith.divf %33, %36 : vector<2x8x8xf32>
    %38 = vector.extract_strided_slice %22 {offsets = [0, 0, 0], sizes = [2, 8, 4], strides = [1, 1, 1]} : vector<2x8x32xf32> to vector<2x8x4xf32>
    "tpu.trace_start"() <{level = 10 : i32, message = "bqk,bkd->bqd"}> : () -> ()
    %cst_23 = arith.constant dense<0.000000e+00> : vector<2x8x4xf32>
    %39 = tpu.matmul %37, %38, %cst_23 {dimension_numbers = #tpu.dot_dimension_numbers<[2], [1], [1], [2], [0, 0, 0, 1, 1, 2], [0], [0]>} : vector<2x8x8xf32>, vector<2x8x4xf32>, vector<2x8x4xf32> -> vector<2x8x4xf32>
    "tpu.trace_stop"() : () -> ()
    %40 = vector.extract_strided_slice %20 {offsets = [0, 0, 4], sizes = [2, 8, 4], strides = [1, 1, 1]} : vector<2x8x32xf32> to vector<2x8x4xf32>
    %41 = vector.extract_strided_slice %21 {offsets = [0, 0, 4], sizes = [2, 8, 4], strides = [1, 1, 1]} : vector<2x8x32xf32> to vector<2x8x4xf32>
    "tpu.trace_start"() <{level = 10 : i32, message = "bqd,bkd->bqk"}> : () -> ()
    %cst_24 = arith.constant dense<0.000000e+00> : vector<2x8x8xf32>
    %42 = tpu.matmul %40, %41, %cst_24 {dimension_numbers = #tpu.dot_dimension_numbers<[2], [2], [1], [1], [0, 0, 0, 1, 1, 1], [0], [0]>} : vector<2x8x4xf32>, vector<2x8x4xf32>, vector<2x8x8xf32> -> vector<2x8x8xf32>
    "tpu.trace_stop"() : () -> ()
    %cst_25 = arith.constant 5.000000e-01 : f32
    %43 = vector.broadcast %cst_25 : f32 to vector<2x8x8xf32>
    %44 = arith.mulf %42, %43 : vector<2x8x8xf32>
    %45 = arith.addf %44, %5 : vector<2x8x8xf32>
    %cst_26 = arith.constant dense<0xFF800000> : vector<2x8xf32>
    %46 = vector.multi_reduction <maximumf>, %45, %cst_26 [2] : vector<2x8x8xf32> to vector<2x8xf32>
    %47 = vector.shape_cast %46 : vector<2x8xf32> to vector<2x8x1xf32>
    %48 = vector.broadcast %47 : vector<2x8x1xf32> to vector<2x8x8xf32>
    %49 = arith.subf %45, %48 : vector<2x8x8xf32>
    %50 = math.exp %49 : vector<2x8x8xf32>
    %cst_27 = arith.constant dense<0.000000e+00> : vector<2x8xf32>
    %51 = vector.multi_reduction <add>, %50, %cst_27 [2] : vector<2x8x8xf32> to vector<2x8xf32>
    %52 = vector.shape_cast %51 : vector<2x8xf32> to vector<2x8x1xf32>
    %53 = vector.broadcast %52 : vector<2x8x1xf32> to vector<2x8x8xf32>
    %54 = arith.divf %50, %53 : vector<2x8x8xf32>
    %55 = vector.extract_strided_slice %22 {offsets = [0, 0, 4], sizes = [2, 8, 4], strides = [1, 1, 1]} : vector<2x8x32xf32> to vector<2x8x4xf32>
    "tpu.trace_start"() <{level = 10 : i32, message = "bqk,bkd->bqd"}> : () -> ()
    %cst_28 = arith.constant dense<0.000000e+00> : vector<2x8x4xf32>
    %56 = tpu.matmul %54, %55, %cst_28 {dimension_numbers = #tpu.dot_dimension_numbers<[2], [1], [1], [2], [0, 0, 0, 1, 1, 2], [0], [0]>} : vector<2x8x8xf32>, vector<2x8x4xf32>, vector<2x8x4xf32> -> vector<2x8x4xf32>
    "tpu.trace_stop"() : () -> ()
    %57 = vector.extract_strided_slice %20 {offsets = [0, 0, 8], sizes = [2, 8, 4], strides = [1, 1, 1]} : vector<2x8x32xf32> to vector<2x8x4xf32>
    %58 = vector.extract_strided_slice %21 {offsets = [0, 0, 8], sizes = [2, 8, 4], strides = [1, 1, 1]} : vector<2x8x32xf32> to vector<2x8x4xf32>
    "tpu.trace_start"() <{level = 10 : i32, message = "bqd,bkd->bqk"}> : () -> ()
    %cst_29 = arith.constant dense<0.000000e+00> : vector<2x8x8xf32>
    %59 = tpu.matmul %57, %58, %cst_29 {dimension_numbers = #tpu.dot_dimension_numbers<[2], [2], [1], [1], [0, 0, 0, 1, 1, 1], [0], [0]>} : vector<2x8x4xf32>, vector<2x8x4xf32>, vector<2x8x8xf32> -> vector<2x8x8xf32>
    "tpu.trace_stop"() : () -> ()
    %cst_30 = arith.constant 5.000000e-01 : f32
    %60 = vector.broadcast %cst_30 : f32 to vector<2x8x8xf32>
    %61 = arith.mulf %59, %60 : vector<2x8x8xf32>
    %62 = arith.addf %61, %5 : vector<2x8x8xf32>
    %cst_31 = arith.constant dense<0xFF800000> : vector<2x8xf32>
    %63 = vector.multi_reduction <maximumf>, %62, %cst_31 [2] : vector<2x8x8xf32> to vector<2x8xf32>
    %64 = vector.shape_cast %63 : vector<2x8xf32> to vector<2x8x1xf32>
    %65 = vector.broadcast %64 : vector<2x8x1xf32> to vector<2x8x8xf32>
    %66 = arith.subf %62, %65 : vector<2x8x8xf32>
    %67 = math.exp %66 : vector<2x8x8xf32>
    %cst_32 = arith.constant dense<0.000000e+00> : vector<2x8xf32>
    %68 = vector.multi_reduction <add>, %67, %cst_32 [2] : vector<2x8x8xf32> to vector<2x8xf32>
    %69 = vector.shape_cast %68 : vector<2x8xf32> to vector<2x8x1xf32>
    %70 = vector.broadcast %69 : vector<2x8x1xf32> to vector<2x8x8xf32>
    %71 = arith.divf %67, %70 : vector<2x8x8xf32>
    %72 = vector.extract_strided_slice %22 {offsets = [0, 0, 8], sizes = [2, 8, 4], strides = [1, 1, 1]} : vector<2x8x32xf32> to vector<2x8x4xf32>
    "tpu.trace_start"() <{level = 10 : i32, message = "bqk,bkd->bqd"}> : () -> ()
    %cst_33 = arith.constant dense<0.000000e+00> : vector<2x8x4xf32>
    %73 = tpu.matmul %71, %72, %cst_33 {dimension_numbers = #tpu.dot_dimension_numbers<[2], [1], [1], [2], [0, 0, 0, 1, 1, 2], [0], [0]>} : vector<2x8x8xf32>, vector<2x8x4xf32>, vector<2x8x4xf32> -> vector<2x8x4xf32>
    "tpu.trace_stop"() : () -> ()
    %74 = vector.extract_strided_slice %20 {offsets = [0, 0, 12], sizes = [2, 8, 4], strides = [1, 1, 1]} : vector<2x8x32xf32> to vector<2x8x4xf32>
    %75 = vector.extract_strided_slice %21 {offsets = [0, 0, 12], sizes = [2, 8, 4], strides = [1, 1, 1]} : vector<2x8x32xf32> to vector<2x8x4xf32>
    "tpu.trace_start"() <{level = 10 : i32, message = "bqd,bkd->bqk"}> : () -> ()
    %cst_34 = arith.constant dense<0.000000e+00> : vector<2x8x8xf32>
    %76 = tpu.matmul %74, %75, %cst_34 {dimension_numbers = #tpu.dot_dimension_numbers<[2], [2], [1], [1], [0, 0, 0, 1, 1, 1], [0], [0]>} : vector<2x8x4xf32>, vector<2x8x4xf32>, vector<2x8x8xf32> -> vector<2x8x8xf32>
    "tpu.trace_stop"() : () -> ()
    %cst_35 = arith.constant 5.000000e-01 : f32
    %77 = vector.broadcast %cst_35 : f32 to vector<2x8x8xf32>
    %78 = arith.mulf %76, %77 : vector<2x8x8xf32>
    %79 = arith.addf %78, %5 : vector<2x8x8xf32>
    %cst_36 = arith.constant dense<0xFF800000> : vector<2x8xf32>
    %80 = vector.multi_reduction <maximumf>, %79, %cst_36 [2] : vector<2x8x8xf32> to vector<2x8xf32>
    %81 = vector.shape_cast %80 : vector<2x8xf32> to vector<2x8x1xf32>
    %82 = vector.broadcast %81 : vector<2x8x1xf32> to vector<2x8x8xf32>
    %83 = arith.subf %79, %82 : vector<2x8x8xf32>
    %84 = math.exp %83 : vector<2x8x8xf32>
    %cst_37 = arith.constant dense<0.000000e+00> : vector<2x8xf32>
    %85 = vector.multi_reduction <add>, %84, %cst_37 [2] : vector<2x8x8xf32> to vector<2x8xf32>
    %86 = vector.shape_cast %85 : vector<2x8xf32> to vector<2x8x1xf32>
    %87 = vector.broadcast %86 : vector<2x8x1xf32> to vector<2x8x8xf32>
    %88 = arith.divf %84, %87 : vector<2x8x8xf32>
    %89 = vector.extract_strided_slice %22 {offsets = [0, 0, 12], sizes = [2, 8, 4], strides = [1, 1, 1]} : vector<2x8x32xf32> to vector<2x8x4xf32>
    "tpu.trace_start"() <{level = 10 : i32, message = "bqk,bkd->bqd"}> : () -> ()
    %cst_38 = arith.constant dense<0.000000e+00> : vector<2x8x4xf32>
    %90 = tpu.matmul %88, %89, %cst_38 {dimension_numbers = #tpu.dot_dimension_numbers<[2], [1], [1], [2], [0, 0, 0, 1, 1, 2], [0], [0]>} : vector<2x8x8xf32>, vector<2x8x4xf32>, vector<2x8x4xf32> -> vector<2x8x4xf32>
    "tpu.trace_stop"() : () -> ()
    %91 = vector.extract_strided_slice %20 {offsets = [0, 0, 16], sizes = [2, 8, 4], strides = [1, 1, 1]} : vector<2x8x32xf32> to vector<2x8x4xf32>
    %92 = vector.extract_strided_slice %21 {offsets = [0, 0, 16], sizes = [2, 8, 4], strides = [1, 1, 1]} : vector<2x8x32xf32> to vector<2x8x4xf32>
    "tpu.trace_start"() <{level = 10 : i32, message = "bqd,bkd->bqk"}> : () -> ()
    %cst_39 = arith.constant dense<0.000000e+00> : vector<2x8x8xf32>
    %93 = tpu.matmul %91, %92, %cst_39 {dimension_numbers = #tpu.dot_dimension_numbers<[2], [2], [1], [1], [0, 0, 0, 1, 1, 1], [0], [0]>} : vector<2x8x4xf32>, vector<2x8x4xf32>, vector<2x8x8xf32> -> vector<2x8x8xf32>
    "tpu.trace_stop"() : () -> ()
    %cst_40 = arith.constant 5.000000e-01 : f32
    %94 = vector.broadcast %cst_40 : f32 to vector<2x8x8xf32>
    %95 = arith.mulf %93, %94 : vector<2x8x8xf32>
    %96 = arith.addf %95, %5 : vector<2x8x8xf32>
    %cst_41 = arith.constant dense<0xFF800000> : vector<2x8xf32>
    %97 = vector.multi_reduction <maximumf>, %96, %cst_41 [2] : vector<2x8x8xf32> to vector<2x8xf32>
    %98 = vector.shape_cast %97 : vector<2x8xf32> to vector<2x8x1xf32>
    %99 = vector.broadcast %98 : vector<2x8x1xf32> to vector<2x8x8xf32>
    %100 = arith.subf %96, %99 : vector<2x8x8xf32>
    %101 = math.exp %100 : vector<2x8x8xf32>
    %cst_42 = arith.constant dense<0.000000e+00> : vector<2x8xf32>
    %102 = vector.multi_reduction <add>, %101, %cst_42 [2] : vector<2x8x8xf32> to vector<2x8xf32>
    %103 = vector.shape_cast %102 : vector<2x8xf32> to vector<2x8x1xf32>
    %104 = vector.broadcast %103 : vector<2x8x1xf32> to vector<2x8x8xf32>
    %105 = arith.divf %101, %104 : vector<2x8x8xf32>
    %106 = vector.extract_strided_slice %22 {offsets = [0, 0, 16], sizes = [2, 8, 4], strides = [1, 1, 1]} : vector<2x8x32xf32> to vector<2x8x4xf32>
    "tpu.trace_start"() <{level = 10 : i32, message = "bqk,bkd->bqd"}> : () -> ()
    %cst_43 = arith.constant dense<0.000000e+00> : vector<2x8x4xf32>
    %107 = tpu.matmul %105, %106, %cst_43 {dimension_numbers = #tpu.dot_dimension_numbers<[2], [1], [1], [2], [0, 0, 0, 1, 1, 2], [0], [0]>} : vector<2x8x8xf32>, vector<2x8x4xf32>, vector<2x8x4xf32> -> vector<2x8x4xf32>
    "tpu.trace_stop"() : () -> ()
    %108 = vector.extract_strided_slice %20 {offsets = [0, 0, 20], sizes = [2, 8, 4], strides = [1, 1, 1]} : vector<2x8x32xf32> to vector<2x8x4xf32>
    %109 = vector.extract_strided_slice %21 {offsets = [0, 0, 20], sizes = [2, 8, 4], strides = [1, 1, 1]} : vector<2x8x32xf32> to vector<2x8x4xf32>
    "tpu.trace_start"() <{level = 10 : i32, message = "bqd,bkd->bqk"}> : () -> ()
    %cst_44 = arith.constant dense<0.000000e+00> : vector<2x8x8xf32>
    %110 = tpu.matmul %108, %109, %cst_44 {dimension_numbers = #tpu.dot_dimension_numbers<[2], [2], [1], [1], [0, 0, 0, 1, 1, 1], [0], [0]>} : vector<2x8x4xf32>, vector<2x8x4xf32>, vector<2x8x8xf32> -> vector<2x8x8xf32>
    "tpu.trace_stop"() : () -> ()
    %cst_45 = arith.constant 5.000000e-01 : f32
    %111 = vector.broadcast %cst_45 : f32 to vector<2x8x8xf32>
    %112 = arith.mulf %110, %111 : vector<2x8x8xf32>
    %113 = arith.addf %112, %5 : vector<2x8x8xf32>
    %cst_46 = arith.constant dense<0xFF800000> : vector<2x8xf32>
    %114 = vector.multi_reduction <maximumf>, %113, %cst_46 [2] : vector<2x8x8xf32> to vector<2x8xf32>
    %115 = vector.shape_cast %114 : vector<2x8xf32> to vector<2x8x1xf32>
    %116 = vector.broadcast %115 : vector<2x8x1xf32> to vector<2x8x8xf32>
    %117 = arith.subf %113, %116 : vector<2x8x8xf32>
    %118 = math.exp %117 : vector<2x8x8xf32>
    %cst_47 = arith.constant dense<0.000000e+00> : vector<2x8xf32>
    %119 = vector.multi_reduction <add>, %118, %cst_47 [2] : vector<2x8x8xf32> to vector<2x8xf32>
    %120 = vector.shape_cast %119 : vector<2x8xf32> to vector<2x8x1xf32>
    %121 = vector.broadcast %120 : vector<2x8x1xf32> to vector<2x8x8xf32>
    %122 = arith.divf %118, %121 : vector<2x8x8xf32>
    %123 = vector.extract_strided_slice %22 {offsets = [0, 0, 20], sizes = [2, 8, 4], strides = [1, 1, 1]} : vector<2x8x32xf32> to vector<2x8x4xf32>
    "tpu.trace_start"() <{level = 10 : i32, message = "bqk,bkd->bqd"}> : () -> ()
    %cst_48 = arith.constant dense<0.000000e+00> : vector<2x8x4xf32>
    %124 = tpu.matmul %122, %123, %cst_48 {dimension_numbers = #tpu.dot_dimension_numbers<[2], [1], [1], [2], [0, 0, 0, 1, 1, 2], [0], [0]>} : vector<2x8x8xf32>, vector<2x8x4xf32>, vector<2x8x4xf32> -> vector<2x8x4xf32>
    "tpu.trace_stop"() : () -> ()
    %125 = vector.extract_strided_slice %20 {offsets = [0, 0, 24], sizes = [2, 8, 4], strides = [1, 1, 1]} : vector<2x8x32xf32> to vector<2x8x4xf32>
    %126 = vector.extract_strided_slice %21 {offsets = [0, 0, 24], sizes = [2, 8, 4], strides = [1, 1, 1]} : vector<2x8x32xf32> to vector<2x8x4xf32>
    "tpu.trace_start"() <{level = 10 : i32, message = "bqd,bkd->bqk"}> : () -> ()
    %cst_49 = arith.constant dense<0.000000e+00> : vector<2x8x8xf32>
    %127 = tpu.matmul %125, %126, %cst_49 {dimension_numbers = #tpu.dot_dimension_numbers<[2], [2], [1], [1], [0, 0, 0, 1, 1, 1], [0], [0]>} : vector<2x8x4xf32>, vector<2x8x4xf32>, vector<2x8x8xf32> -> vector<2x8x8xf32>
    "tpu.trace_stop"() : () -> ()
    %cst_50 = arith.constant 5.000000e-01 : f32
    %128 = vector.broadcast %cst_50 : f32 to vector<2x8x8xf32>
    %129 = arith.mulf %127, %128 : vector<2x8x8xf32>
    %130 = arith.addf %129, %5 : vector<2x8x8xf32>
    %cst_51 = arith.constant dense<0xFF800000> : vector<2x8xf32>
    %131 = vector.multi_reduction <maximumf>, %130, %cst_51 [2] : vector<2x8x8xf32> to vector<2x8xf32>
    %132 = vector.shape_cast %131 : vector<2x8xf32> to vector<2x8x1xf32>
    %133 = vector.broadcast %132 : vector<2x8x1xf32> to vector<2x8x8xf32>
    %134 = arith.subf %130, %133 : vector<2x8x8xf32>
    %135 = math.exp %134 : vector<2x8x8xf32>
    %cst_52 = arith.constant dense<0.000000e+00> : vector<2x8xf32>
    %136 = vector.multi_reduction <add>, %135, %cst_52 [2] : vector<2x8x8xf32> to vector<2x8xf32>
    %137 = vector.shape_cast %136 : vector<2x8xf32> to vector<2x8x1xf32>
    %138 = vector.broadcast %137 : vector<2x8x1xf32> to vector<2x8x8xf32>
    %139 = arith.divf %135, %138 : vector<2x8x8xf32>
    %140 = vector.extract_strided_slice %22 {offsets = [0, 0, 24], sizes = [2, 8, 4], strides = [1, 1, 1]} : vector<2x8x32xf32> to vector<2x8x4xf32>
    "tpu.trace_start"() <{level = 10 : i32, message = "bqk,bkd->bqd"}> : () -> ()
    %cst_53 = arith.constant dense<0.000000e+00> : vector<2x8x4xf32>
    %141 = tpu.matmul %139, %140, %cst_53 {dimension_numbers = #tpu.dot_dimension_numbers<[2], [1], [1], [2], [0, 0, 0, 1, 1, 2], [0], [0]>} : vector<2x8x8xf32>, vector<2x8x4xf32>, vector<2x8x4xf32> -> vector<2x8x4xf32>
    "tpu.trace_stop"() : () -> ()
    %142 = vector.extract_strided_slice %20 {offsets = [0, 0, 28], sizes = [2, 8, 4], strides = [1, 1, 1]} : vector<2x8x32xf32> to vector<2x8x4xf32>
    %143 = vector.extract_strided_slice %21 {offsets = [0, 0, 28], sizes = [2, 8, 4], strides = [1, 1, 1]} : vector<2x8x32xf32> to vector<2x8x4xf32>
    "tpu.trace_start"() <{level = 10 : i32, message = "bqd,bkd->bqk"}> : () -> ()
    %cst_54 = arith.constant dense<0.000000e+00> : vector<2x8x8xf32>
    %144 = tpu.matmul %142, %143, %cst_54 {dimension_numbers = #tpu.dot_dimension_numbers<[2], [2], [1], [1], [0, 0, 0, 1, 1, 1], [0], [0]>} : vector<2x8x4xf32>, vector<2x8x4xf32>, vector<2x8x8xf32> -> vector<2x8x8xf32>
    "tpu.trace_stop"() : () -> ()
    %cst_55 = arith.constant 5.000000e-01 : f32
    %145 = vector.broadcast %cst_55 : f32 to vector<2x8x8xf32>
    %146 = arith.mulf %144, %145 : vector<2x8x8xf32>
    %147 = arith.addf %146, %5 : vector<2x8x8xf32>
    %cst_56 = arith.constant dense<0xFF800000> : vector<2x8xf32>
    %148 = vector.multi_reduction <maximumf>, %147, %cst_56 [2] : vector<2x8x8xf32> to vector<2x8xf32>
    %149 = vector.shape_cast %148 : vector<2x8xf32> to vector<2x8x1xf32>
    %150 = vector.broadcast %149 : vector<2x8x1xf32> to vector<2x8x8xf32>
    %151 = arith.subf %147, %150 : vector<2x8x8xf32>
    %152 = math.exp %151 : vector<2x8x8xf32>
    %cst_57 = arith.constant dense<0.000000e+00> : vector<2x8xf32>
    %153 = vector.multi_reduction <add>, %152, %cst_57 [2] : vector<2x8x8xf32> to vector<2x8xf32>
    %154 = vector.shape_cast %153 : vector<2x8xf32> to vector<2x8x1xf32>
    %155 = vector.broadcast %154 : vector<2x8x1xf32> to vector<2x8x8xf32>
    %156 = arith.divf %152, %155 : vector<2x8x8xf32>
    %157 = vector.extract_strided_slice %22 {offsets = [0, 0, 28], sizes = [2, 8, 4], strides = [1, 1, 1]} : vector<2x8x32xf32> to vector<2x8x4xf32>
    "tpu.trace_start"() <{level = 10 : i32, message = "bqk,bkd->bqd"}> : () -> ()
    %cst_58 = arith.constant dense<0.000000e+00> : vector<2x8x4xf32>
    %158 = tpu.matmul %156, %157, %cst_58 {dimension_numbers = #tpu.dot_dimension_numbers<[2], [1], [1], [2], [0, 0, 0, 1, 1, 2], [0], [0]>} : vector<2x8x8xf32>, vector<2x8x4xf32>, vector<2x8x4xf32> -> vector<2x8x4xf32>
    "tpu.trace_stop"() : () -> ()
    %159 = tpu.concatenate %39, %56, %73, %90, %107, %124, %141, %158 in 2 : vector<2x8x4xf32>, vector<2x8x4xf32>, vector<2x8x4xf32>, vector<2x8x4xf32>, vector<2x8x4xf32>, vector<2x8x4xf32>, vector<2x8x4xf32>, vector<2x8x4xf32> -> vector<2x8x32xf32>
    %160 = vector.shape_cast %159 : vector<2x8x32xf32> to vector<16x32xf32>
    %cst_59 = arith.constant dense<0.000000e+00> : vector<16x32xf32>
    %161 = tpu.matmul %160, %11, %cst_59 {dimension_numbers = #tpu.dot_dimension_numbers<[1], [0], [0], [1], [0, 0, 1, 1], [], []>} : vector<16x32xf32>, vector<32x32xf32>, vector<16x32xf32> -> vector<16x32xf32>
    %162 = vector.broadcast %13 : vector<1x32xf32> to vector<16x32xf32>
    %163 = arith.addf %161, %162 : vector<16x32xf32>
    %164 = arith.addf %3, %163 : vector<16x32xf32>
    %c0_60 = arith.constant 0 : index
    %c0_61 = arith.constant 0 : index
    %c0_62 = arith.constant 0 : index
    %165 = vector.load %arg8[%c0_60, %c0_61, %c0_62] : memref<1x2x32xf32, #tpu.memory_space<vmem>>, vector<1x2x32xf32>
    %166 = vector.shape_cast %165 : vector<1x2x32xf32> to vector<2x32xf32>
    %167 = vector.extract_strided_slice %166 {offsets = [0, 0], sizes = [1, 32], strides = [1, 1]} : vector<2x32xf32> to vector<1x32xf32>
    %168 = vector.extract_strided_slice %166 {offsets = [1, 0], sizes = [1, 32], strides = [1, 1]} : vector<2x32xf32> to vector<1x32xf32>
    %cst_63 = arith.constant dense<0.000000e+00> : vector<16xf32>
    %169 = vector.multi_reduction <add>, %164, %cst_63 [1] : vector<16x32xf32> to vector<16xf32>
    %170 = vector.shape_cast %169 : vector<16xf32> to vector<16x1xf32>
    %cst_64 = arith.constant 3.200000e+01 : f32
    %171 = vector.broadcast %cst_64 : f32 to vector<16x1xf32>
    %172 = arith.divf %170, %171 : vector<16x1xf32>
    %173 = vector.broadcast %172 : vector<16x1xf32> to vector<16x32xf32>
    %174 = arith.subf %164, %173 : vector<16x32xf32>
    %175 = arith.mulf %174, %174 : vector<16x32xf32>
    %cst_65 = arith.constant dense<0.000000e+00> : vector<16xf32>
    %176 = vector.multi_reduction <add>, %175, %cst_65 [1] : vector<16x32xf32> to vector<16xf32>
    %177 = vector.shape_cast %176 : vector<16xf32> to vector<16x1xf32>
    %cst_66 = arith.constant 3.200000e+01 : f32
    %178 = vector.broadcast %cst_66 : f32 to vector<16x1xf32>
    %179 = arith.divf %177, %178 : vector<16x1xf32>
    %180 = vector.broadcast %172 : vector<16x1xf32> to vector<16x32xf32>
    %181 = arith.subf %164, %180 : vector<16x32xf32>
    %cst_67 = arith.constant 9.99999974E-6 : f32
    %182 = vector.broadcast %cst_67 : f32 to vector<16x1xf32>
    %183 = arith.addf %179, %182 : vector<16x1xf32>
    %184 = math.rsqrt %183 : vector<16x1xf32>
    %185 = vector.broadcast %184 : vector<16x1xf32> to vector<16x32xf32>
    %186 = arith.mulf %181, %185 : vector<16x32xf32>
    %187 = vector.broadcast %167 : vector<1x32xf32> to vector<16x32xf32>
    %188 = arith.mulf %186, %187 : vector<16x32xf32>
    %189 = vector.broadcast %168 : vector<1x32xf32> to vector<16x32xf32>
    %190 = arith.addf %188, %189 : vector<16x32xf32>
    %c0_68 = arith.constant 0 : index
    %c0_69 = arith.constant 0 : index
    %c0_70 = arith.constant 0 : index
    %191 = vector.load %arg9[%c0_68, %c0_69, %c0_70] : memref<1x32x96xf32, #tpu.memory_space<vmem>>, vector<1x32x96xf32>
    %192 = vector.shape_cast %191 : vector<1x32x96xf32> to vector<32x96xf32>
    %c0_71 = arith.constant 0 : index
    %c0_72 = arith.constant 0 : index
    %c0_73 = arith.constant 0 : index
    %193 = vector.load %arg10[%c0_71, %c0_72, %c0_73] : memref<1x1x96xf32, #tpu.memory_space<vmem>>, vector<1x1x96xf32>
    %194 = vector.shape_cast %193 : vector<1x1x96xf32> to vector<1x96xf32>
    %c0_74 = arith.constant 0 : index
    %c0_75 = arith.constant 0 : index
    %c0_76 = arith.constant 0 : index
    %195 = vector.load %arg11[%c0_74, %c0_75, %c0_76] : memref<1x32x32xf32, #tpu.memory_space<vmem>>, vector<1x32x32xf32>
    %196 = vector.shape_cast %195 : vector<1x32x32xf32> to vector<32x32xf32>
    %c0_77 = arith.constant 0 : index
    %c0_78 = arith.constant 0 : index
    %c0_79 = arith.constant 0 : index
    %197 = vector.load %arg12[%c0_77, %c0_78, %c0_79] : memref<1x1x32xf32, #tpu.memory_space<vmem>>, vector<1x1x32xf32>
    %198 = vector.shape_cast %197 : vector<1x1x32xf32> to vector<1x32xf32>
    %199 = vector.extract_strided_slice %192 {offsets = [0, 0], sizes = [32, 32], strides = [1, 1]} : vector<32x96xf32> to vector<32x32xf32>
    %cst_80 = arith.constant dense<0.000000e+00> : vector<16x32xf32>
    %200 = tpu.matmul %190, %199, %cst_80 {dimension_numbers = #tpu.dot_dimension_numbers<[1], [0], [0], [1], [0, 0, 1, 1], [], []>} : vector<16x32xf32>, vector<32x32xf32>, vector<16x32xf32> -> vector<16x32xf32>
    %201 = vector.extract_strided_slice %194 {offsets = [0, 0], sizes = [1, 32], strides = [1, 1]} : vector<1x96xf32> to vector<1x32xf32>
    %202 = vector.broadcast %201 : vector<1x32xf32> to vector<16x32xf32>
    %203 = arith.addf %200, %202 : vector<16x32xf32>
    %204 = vector.extract_strided_slice %192 {offsets = [0, 32], sizes = [32, 64], strides = [1, 1]} : vector<32x96xf32> to vector<32x64xf32>
    %cst_81 = arith.constant dense<0.000000e+00> : vector<16x64xf32>
    %205 = tpu.matmul %4, %204, %cst_81 {dimension_numbers = #tpu.dot_dimension_numbers<[1], [0], [0], [1], [0, 0, 1, 1], [], []>} : vector<16x32xf32>, vector<32x64xf32>, vector<16x64xf32> -> vector<16x64xf32>
    %206 = vector.extract_strided_slice %194 {offsets = [0, 32], sizes = [1, 64], strides = [1, 1]} : vector<1x96xf32> to vector<1x64xf32>
    %207 = vector.broadcast %206 : vector<1x64xf32> to vector<16x64xf32>
    %208 = arith.addf %205, %207 : vector<16x64xf32>
    %209 = vector.extract_strided_slice %208 {offsets = [0, 0], sizes = [16, 32], strides = [1, 1]} : vector<16x64xf32> to vector<16x32xf32>
    %210 = vector.extract_strided_slice %208 {offsets = [0, 32], sizes = [16, 32], strides = [1, 1]} : vector<16x64xf32> to vector<16x32xf32>
    %211 = vector.shape_cast %203 : vector<16x32xf32> to vector<2x8x32xf32>
    %212 = vector.shape_cast %209 : vector<16x32xf32> to vector<2x8x32xf32>
    %213 = vector.shape_cast %210 : vector<16x32xf32> to vector<2x8x32xf32>
    %214 = vector.extract_strided_slice %211 {offsets = [0, 0, 0], sizes = [2, 8, 4], strides = [1, 1, 1]} : vector<2x8x32xf32> to vector<2x8x4xf32>
    %215 = vector.extract_strided_slice %212 {offsets = [0, 0, 0], sizes = [2, 8, 4], strides = [1, 1, 1]} : vector<2x8x32xf32> to vector<2x8x4xf32>
    "tpu.trace_start"() <{level = 10 : i32, message = "bqd,bkd->bqk"}> : () -> ()
    %cst_82 = arith.constant dense<0.000000e+00> : vector<2x8x8xf32>
    %216 = tpu.matmul %214, %215, %cst_82 {dimension_numbers = #tpu.dot_dimension_numbers<[2], [2], [1], [1], [0, 0, 0, 1, 1, 1], [0], [0]>} : vector<2x8x4xf32>, vector<2x8x4xf32>, vector<2x8x8xf32> -> vector<2x8x8xf32>
    "tpu.trace_stop"() : () -> ()
    %cst_83 = arith.constant 5.000000e-01 : f32
    %217 = vector.broadcast %cst_83 : f32 to vector<2x8x8xf32>
    %218 = arith.mulf %216, %217 : vector<2x8x8xf32>
    %cst_84 = arith.constant dense<0xFF800000> : vector<2x8xf32>
    %219 = vector.multi_reduction <maximumf>, %218, %cst_84 [2] : vector<2x8x8xf32> to vector<2x8xf32>
    %220 = vector.shape_cast %219 : vector<2x8xf32> to vector<2x8x1xf32>
    %221 = vector.broadcast %220 : vector<2x8x1xf32> to vector<2x8x8xf32>
    %222 = arith.subf %218, %221 : vector<2x8x8xf32>
    %223 = math.exp %222 : vector<2x8x8xf32>
    %cst_85 = arith.constant dense<0.000000e+00> : vector<2x8xf32>
    %224 = vector.multi_reduction <add>, %223, %cst_85 [2] : vector<2x8x8xf32> to vector<2x8xf32>
    %225 = vector.shape_cast %224 : vector<2x8xf32> to vector<2x8x1xf32>
    %226 = vector.broadcast %225 : vector<2x8x1xf32> to vector<2x8x8xf32>
    %227 = arith.divf %223, %226 : vector<2x8x8xf32>
    %228 = vector.extract_strided_slice %213 {offsets = [0, 0, 0], sizes = [2, 8, 4], strides = [1, 1, 1]} : vector<2x8x32xf32> to vector<2x8x4xf32>
    "tpu.trace_start"() <{level = 10 : i32, message = "bqk,bkd->bqd"}> : () -> ()
    %cst_86 = arith.constant dense<0.000000e+00> : vector<2x8x4xf32>
    %229 = tpu.matmul %227, %228, %cst_86 {dimension_numbers = #tpu.dot_dimension_numbers<[2], [1], [1], [2], [0, 0, 0, 1, 1, 2], [0], [0]>} : vector<2x8x8xf32>, vector<2x8x4xf32>, vector<2x8x4xf32> -> vector<2x8x4xf32>
    "tpu.trace_stop"() : () -> ()
    %230 = vector.extract_strided_slice %211 {offsets = [0, 0, 4], sizes = [2, 8, 4], strides = [1, 1, 1]} : vector<2x8x32xf32> to vector<2x8x4xf32>
    %231 = vector.extract_strided_slice %212 {offsets = [0, 0, 4], sizes = [2, 8, 4], strides = [1, 1, 1]} : vector<2x8x32xf32> to vector<2x8x4xf32>
    "tpu.trace_start"() <{level = 10 : i32, message = "bqd,bkd->bqk"}> : () -> ()
    %cst_87 = arith.constant dense<0.000000e+00> : vector<2x8x8xf32>
    %232 = tpu.matmul %230, %231, %cst_87 {dimension_numbers = #tpu.dot_dimension_numbers<[2], [2], [1], [1], [0, 0, 0, 1, 1, 1], [0], [0]>} : vector<2x8x4xf32>, vector<2x8x4xf32>, vector<2x8x8xf32> -> vector<2x8x8xf32>
    "tpu.trace_stop"() : () -> ()
    %cst_88 = arith.constant 5.000000e-01 : f32
    %233 = vector.broadcast %cst_88 : f32 to vector<2x8x8xf32>
    %234 = arith.mulf %232, %233 : vector<2x8x8xf32>
    %cst_89 = arith.constant dense<0xFF800000> : vector<2x8xf32>
    %235 = vector.multi_reduction <maximumf>, %234, %cst_89 [2] : vector<2x8x8xf32> to vector<2x8xf32>
    %236 = vector.shape_cast %235 : vector<2x8xf32> to vector<2x8x1xf32>
    %237 = vector.broadcast %236 : vector<2x8x1xf32> to vector<2x8x8xf32>
    %238 = arith.subf %234, %237 : vector<2x8x8xf32>
    %239 = math.exp %238 : vector<2x8x8xf32>
    %cst_90 = arith.constant dense<0.000000e+00> : vector<2x8xf32>
    %240 = vector.multi_reduction <add>, %239, %cst_90 [2] : vector<2x8x8xf32> to vector<2x8xf32>
    %241 = vector.shape_cast %240 : vector<2x8xf32> to vector<2x8x1xf32>
    %242 = vector.broadcast %241 : vector<2x8x1xf32> to vector<2x8x8xf32>
    %243 = arith.divf %239, %242 : vector<2x8x8xf32>
    %244 = vector.extract_strided_slice %213 {offsets = [0, 0, 4], sizes = [2, 8, 4], strides = [1, 1, 1]} : vector<2x8x32xf32> to vector<2x8x4xf32>
    "tpu.trace_start"() <{level = 10 : i32, message = "bqk,bkd->bqd"}> : () -> ()
    %cst_91 = arith.constant dense<0.000000e+00> : vector<2x8x4xf32>
    %245 = tpu.matmul %243, %244, %cst_91 {dimension_numbers = #tpu.dot_dimension_numbers<[2], [1], [1], [2], [0, 0, 0, 1, 1, 2], [0], [0]>} : vector<2x8x8xf32>, vector<2x8x4xf32>, vector<2x8x4xf32> -> vector<2x8x4xf32>
    "tpu.trace_stop"() : () -> ()
    %246 = vector.extract_strided_slice %211 {offsets = [0, 0, 8], sizes = [2, 8, 4], strides = [1, 1, 1]} : vector<2x8x32xf32> to vector<2x8x4xf32>
    %247 = vector.extract_strided_slice %212 {offsets = [0, 0, 8], sizes = [2, 8, 4], strides = [1, 1, 1]} : vector<2x8x32xf32> to vector<2x8x4xf32>
    "tpu.trace_start"() <{level = 10 : i32, message = "bqd,bkd->bqk"}> : () -> ()
    %cst_92 = arith.constant dense<0.000000e+00> : vector<2x8x8xf32>
    %248 = tpu.matmul %246, %247, %cst_92 {dimension_numbers = #tpu.dot_dimension_numbers<[2], [2], [1], [1], [0, 0, 0, 1, 1, 1], [0], [0]>} : vector<2x8x4xf32>, vector<2x8x4xf32>, vector<2x8x8xf32> -> vector<2x8x8xf32>
    "tpu.trace_stop"() : () -> ()
    %cst_93 = arith.constant 5.000000e-01 : f32
    %249 = vector.broadcast %cst_93 : f32 to vector<2x8x8xf32>
    %250 = arith.mulf %248, %249 : vector<2x8x8xf32>
    %cst_94 = arith.constant dense<0xFF800000> : vector<2x8xf32>
    %251 = vector.multi_reduction <maximumf>, %250, %cst_94 [2] : vector<2x8x8xf32> to vector<2x8xf32>
    %252 = vector.shape_cast %251 : vector<2x8xf32> to vector<2x8x1xf32>
    %253 = vector.broadcast %252 : vector<2x8x1xf32> to vector<2x8x8xf32>
    %254 = arith.subf %250, %253 : vector<2x8x8xf32>
    %255 = math.exp %254 : vector<2x8x8xf32>
    %cst_95 = arith.constant dense<0.000000e+00> : vector<2x8xf32>
    %256 = vector.multi_reduction <add>, %255, %cst_95 [2] : vector<2x8x8xf32> to vector<2x8xf32>
    %257 = vector.shape_cast %256 : vector<2x8xf32> to vector<2x8x1xf32>
    %258 = vector.broadcast %257 : vector<2x8x1xf32> to vector<2x8x8xf32>
    %259 = arith.divf %255, %258 : vector<2x8x8xf32>
    %260 = vector.extract_strided_slice %213 {offsets = [0, 0, 8], sizes = [2, 8, 4], strides = [1, 1, 1]} : vector<2x8x32xf32> to vector<2x8x4xf32>
    "tpu.trace_start"() <{level = 10 : i32, message = "bqk,bkd->bqd"}> : () -> ()
    %cst_96 = arith.constant dense<0.000000e+00> : vector<2x8x4xf32>
    %261 = tpu.matmul %259, %260, %cst_96 {dimension_numbers = #tpu.dot_dimension_numbers<[2], [1], [1], [2], [0, 0, 0, 1, 1, 2], [0], [0]>} : vector<2x8x8xf32>, vector<2x8x4xf32>, vector<2x8x4xf32> -> vector<2x8x4xf32>
    "tpu.trace_stop"() : () -> ()
    %262 = vector.extract_strided_slice %211 {offsets = [0, 0, 12], sizes = [2, 8, 4], strides = [1, 1, 1]} : vector<2x8x32xf32> to vector<2x8x4xf32>
    %263 = vector.extract_strided_slice %212 {offsets = [0, 0, 12], sizes = [2, 8, 4], strides = [1, 1, 1]} : vector<2x8x32xf32> to vector<2x8x4xf32>
    "tpu.trace_start"() <{level = 10 : i32, message = "bqd,bkd->bqk"}> : () -> ()
    %cst_97 = arith.constant dense<0.000000e+00> : vector<2x8x8xf32>
    %264 = tpu.matmul %262, %263, %cst_97 {dimension_numbers = #tpu.dot_dimension_numbers<[2], [2], [1], [1], [0, 0, 0, 1, 1, 1], [0], [0]>} : vector<2x8x4xf32>, vector<2x8x4xf32>, vector<2x8x8xf32> -> vector<2x8x8xf32>
    "tpu.trace_stop"() : () -> ()
    %cst_98 = arith.constant 5.000000e-01 : f32
    %265 = vector.broadcast %cst_98 : f32 to vector<2x8x8xf32>
    %266 = arith.mulf %264, %265 : vector<2x8x8xf32>
    %cst_99 = arith.constant dense<0xFF800000> : vector<2x8xf32>
    %267 = vector.multi_reduction <maximumf>, %266, %cst_99 [2] : vector<2x8x8xf32> to vector<2x8xf32>
    %268 = vector.shape_cast %267 : vector<2x8xf32> to vector<2x8x1xf32>
    %269 = vector.broadcast %268 : vector<2x8x1xf32> to vector<2x8x8xf32>
    %270 = arith.subf %266, %269 : vector<2x8x8xf32>
    %271 = math.exp %270 : vector<2x8x8xf32>
    %cst_100 = arith.constant dense<0.000000e+00> : vector<2x8xf32>
    %272 = vector.multi_reduction <add>, %271, %cst_100 [2] : vector<2x8x8xf32> to vector<2x8xf32>
    %273 = vector.shape_cast %272 : vector<2x8xf32> to vector<2x8x1xf32>
    %274 = vector.broadcast %273 : vector<2x8x1xf32> to vector<2x8x8xf32>
    %275 = arith.divf %271, %274 : vector<2x8x8xf32>
    %276 = vector.extract_strided_slice %213 {offsets = [0, 0, 12], sizes = [2, 8, 4], strides = [1, 1, 1]} : vector<2x8x32xf32> to vector<2x8x4xf32>
    "tpu.trace_start"() <{level = 10 : i32, message = "bqk,bkd->bqd"}> : () -> ()
    %cst_101 = arith.constant dense<0.000000e+00> : vector<2x8x4xf32>
    %277 = tpu.matmul %275, %276, %cst_101 {dimension_numbers = #tpu.dot_dimension_numbers<[2], [1], [1], [2], [0, 0, 0, 1, 1, 2], [0], [0]>} : vector<2x8x8xf32>, vector<2x8x4xf32>, vector<2x8x4xf32> -> vector<2x8x4xf32>
    "tpu.trace_stop"() : () -> ()
    %278 = vector.extract_strided_slice %211 {offsets = [0, 0, 16], sizes = [2, 8, 4], strides = [1, 1, 1]} : vector<2x8x32xf32> to vector<2x8x4xf32>
    %279 = vector.extract_strided_slice %212 {offsets = [0, 0, 16], sizes = [2, 8, 4], strides = [1, 1, 1]} : vector<2x8x32xf32> to vector<2x8x4xf32>
    "tpu.trace_start"() <{level = 10 : i32, message = "bqd,bkd->bqk"}> : () -> ()
    %cst_102 = arith.constant dense<0.000000e+00> : vector<2x8x8xf32>
    %280 = tpu.matmul %278, %279, %cst_102 {dimension_numbers = #tpu.dot_dimension_numbers<[2], [2], [1], [1], [0, 0, 0, 1, 1, 1], [0], [0]>} : vector<2x8x4xf32>, vector<2x8x4xf32>, vector<2x8x8xf32> -> vector<2x8x8xf32>
    "tpu.trace_stop"() : () -> ()
    %cst_103 = arith.constant 5.000000e-01 : f32
    %281 = vector.broadcast %cst_103 : f32 to vector<2x8x8xf32>
    %282 = arith.mulf %280, %281 : vector<2x8x8xf32>
    %cst_104 = arith.constant dense<0xFF800000> : vector<2x8xf32>
    %283 = vector.multi_reduction <maximumf>, %282, %cst_104 [2] : vector<2x8x8xf32> to vector<2x8xf32>
    %284 = vector.shape_cast %283 : vector<2x8xf32> to vector<2x8x1xf32>
    %285 = vector.broadcast %284 : vector<2x8x1xf32> to vector<2x8x8xf32>
    %286 = arith.subf %282, %285 : vector<2x8x8xf32>
    %287 = math.exp %286 : vector<2x8x8xf32>
    %cst_105 = arith.constant dense<0.000000e+00> : vector<2x8xf32>
    %288 = vector.multi_reduction <add>, %287, %cst_105 [2] : vector<2x8x8xf32> to vector<2x8xf32>
    %289 = vector.shape_cast %288 : vector<2x8xf32> to vector<2x8x1xf32>
    %290 = vector.broadcast %289 : vector<2x8x1xf32> to vector<2x8x8xf32>
    %291 = arith.divf %287, %290 : vector<2x8x8xf32>
    %292 = vector.extract_strided_slice %213 {offsets = [0, 0, 16], sizes = [2, 8, 4], strides = [1, 1, 1]} : vector<2x8x32xf32> to vector<2x8x4xf32>
    "tpu.trace_start"() <{level = 10 : i32, message = "bqk,bkd->bqd"}> : () -> ()
    %cst_106 = arith.constant dense<0.000000e+00> : vector<2x8x4xf32>
    %293 = tpu.matmul %291, %292, %cst_106 {dimension_numbers = #tpu.dot_dimension_numbers<[2], [1], [1], [2], [0, 0, 0, 1, 1, 2], [0], [0]>} : vector<2x8x8xf32>, vector<2x8x4xf32>, vector<2x8x4xf32> -> vector<2x8x4xf32>
    "tpu.trace_stop"() : () -> ()
    %294 = vector.extract_strided_slice %211 {offsets = [0, 0, 20], sizes = [2, 8, 4], strides = [1, 1, 1]} : vector<2x8x32xf32> to vector<2x8x4xf32>
    %295 = vector.extract_strided_slice %212 {offsets = [0, 0, 20], sizes = [2, 8, 4], strides = [1, 1, 1]} : vector<2x8x32xf32> to vector<2x8x4xf32>
    "tpu.trace_start"() <{level = 10 : i32, message = "bqd,bkd->bqk"}> : () -> ()
    %cst_107 = arith.constant dense<0.000000e+00> : vector<2x8x8xf32>
    %296 = tpu.matmul %294, %295, %cst_107 {dimension_numbers = #tpu.dot_dimension_numbers<[2], [2], [1], [1], [0, 0, 0, 1, 1, 1], [0], [0]>} : vector<2x8x4xf32>, vector<2x8x4xf32>, vector<2x8x8xf32> -> vector<2x8x8xf32>
    "tpu.trace_stop"() : () -> ()
    %cst_108 = arith.constant 5.000000e-01 : f32
    %297 = vector.broadcast %cst_108 : f32 to vector<2x8x8xf32>
    %298 = arith.mulf %296, %297 : vector<2x8x8xf32>
    %cst_109 = arith.constant dense<0xFF800000> : vector<2x8xf32>
    %299 = vector.multi_reduction <maximumf>, %298, %cst_109 [2] : vector<2x8x8xf32> to vector<2x8xf32>
    %300 = vector.shape_cast %299 : vector<2x8xf32> to vector<2x8x1xf32>
    %301 = vector.broadcast %300 : vector<2x8x1xf32> to vector<2x8x8xf32>
    %302 = arith.subf %298, %301 : vector<2x8x8xf32>
    %303 = math.exp %302 : vector<2x8x8xf32>
    %cst_110 = arith.constant dense<0.000000e+00> : vector<2x8xf32>
    %304 = vector.multi_reduction <add>, %303, %cst_110 [2] : vector<2x8x8xf32> to vector<2x8xf32>
    %305 = vector.shape_cast %304 : vector<2x8xf32> to vector<2x8x1xf32>
    %306 = vector.broadcast %305 : vector<2x8x1xf32> to vector<2x8x8xf32>
    %307 = arith.divf %303, %306 : vector<2x8x8xf32>
    %308 = vector.extract_strided_slice %213 {offsets = [0, 0, 20], sizes = [2, 8, 4], strides = [1, 1, 1]} : vector<2x8x32xf32> to vector<2x8x4xf32>
    "tpu.trace_start"() <{level = 10 : i32, message = "bqk,bkd->bqd"}> : () -> ()
    %cst_111 = arith.constant dense<0.000000e+00> : vector<2x8x4xf32>
    %309 = tpu.matmul %307, %308, %cst_111 {dimension_numbers = #tpu.dot_dimension_numbers<[2], [1], [1], [2], [0, 0, 0, 1, 1, 2], [0], [0]>} : vector<2x8x8xf32>, vector<2x8x4xf32>, vector<2x8x4xf32> -> vector<2x8x4xf32>
    "tpu.trace_stop"() : () -> ()
    %310 = vector.extract_strided_slice %211 {offsets = [0, 0, 24], sizes = [2, 8, 4], strides = [1, 1, 1]} : vector<2x8x32xf32> to vector<2x8x4xf32>
    %311 = vector.extract_strided_slice %212 {offsets = [0, 0, 24], sizes = [2, 8, 4], strides = [1, 1, 1]} : vector<2x8x32xf32> to vector<2x8x4xf32>
    "tpu.trace_start"() <{level = 10 : i32, message = "bqd,bkd->bqk"}> : () -> ()
    %cst_112 = arith.constant dense<0.000000e+00> : vector<2x8x8xf32>
    %312 = tpu.matmul %310, %311, %cst_112 {dimension_numbers = #tpu.dot_dimension_numbers<[2], [2], [1], [1], [0, 0, 0, 1, 1, 1], [0], [0]>} : vector<2x8x4xf32>, vector<2x8x4xf32>, vector<2x8x8xf32> -> vector<2x8x8xf32>
    "tpu.trace_stop"() : () -> ()
    %cst_113 = arith.constant 5.000000e-01 : f32
    %313 = vector.broadcast %cst_113 : f32 to vector<2x8x8xf32>
    %314 = arith.mulf %312, %313 : vector<2x8x8xf32>
    %cst_114 = arith.constant dense<0xFF800000> : vector<2x8xf32>
    %315 = vector.multi_reduction <maximumf>, %314, %cst_114 [2] : vector<2x8x8xf32> to vector<2x8xf32>
    %316 = vector.shape_cast %315 : vector<2x8xf32> to vector<2x8x1xf32>
    %317 = vector.broadcast %316 : vector<2x8x1xf32> to vector<2x8x8xf32>
    %318 = arith.subf %314, %317 : vector<2x8x8xf32>
    %319 = math.exp %318 : vector<2x8x8xf32>
    %cst_115 = arith.constant dense<0.000000e+00> : vector<2x8xf32>
    %320 = vector.multi_reduction <add>, %319, %cst_115 [2] : vector<2x8x8xf32> to vector<2x8xf32>
    %321 = vector.shape_cast %320 : vector<2x8xf32> to vector<2x8x1xf32>
    %322 = vector.broadcast %321 : vector<2x8x1xf32> to vector<2x8x8xf32>
    %323 = arith.divf %319, %322 : vector<2x8x8xf32>
    %324 = vector.extract_strided_slice %213 {offsets = [0, 0, 24], sizes = [2, 8, 4], strides = [1, 1, 1]} : vector<2x8x32xf32> to vector<2x8x4xf32>
    "tpu.trace_start"() <{level = 10 : i32, message = "bqk,bkd->bqd"}> : () -> ()
    %cst_116 = arith.constant dense<0.000000e+00> : vector<2x8x4xf32>
    %325 = tpu.matmul %323, %324, %cst_116 {dimension_numbers = #tpu.dot_dimension_numbers<[2], [1], [1], [2], [0, 0, 0, 1, 1, 2], [0], [0]>} : vector<2x8x8xf32>, vector<2x8x4xf32>, vector<2x8x4xf32> -> vector<2x8x4xf32>
    "tpu.trace_stop"() : () -> ()
    %326 = vector.extract_strided_slice %211 {offsets = [0, 0, 28], sizes = [2, 8, 4], strides = [1, 1, 1]} : vector<2x8x32xf32> to vector<2x8x4xf32>
    %327 = vector.extract_strided_slice %212 {offsets = [0, 0, 28], sizes = [2, 8, 4], strides = [1, 1, 1]} : vector<2x8x32xf32> to vector<2x8x4xf32>
    "tpu.trace_start"() <{level = 10 : i32, message = "bqd,bkd->bqk"}> : () -> ()
    %cst_117 = arith.constant dense<0.000000e+00> : vector<2x8x8xf32>
    %328 = tpu.matmul %326, %327, %cst_117 {dimension_numbers = #tpu.dot_dimension_numbers<[2], [2], [1], [1], [0, 0, 0, 1, 1, 1], [0], [0]>} : vector<2x8x4xf32>, vector<2x8x4xf32>, vector<2x8x8xf32> -> vector<2x8x8xf32>
    "tpu.trace_stop"() : () -> ()
    %cst_118 = arith.constant 5.000000e-01 : f32
    %329 = vector.broadcast %cst_118 : f32 to vector<2x8x8xf32>
    %330 = arith.mulf %328, %329 : vector<2x8x8xf32>
    %cst_119 = arith.constant dense<0xFF800000> : vector<2x8xf32>
    %331 = vector.multi_reduction <maximumf>, %330, %cst_119 [2] : vector<2x8x8xf32> to vector<2x8xf32>
    %332 = vector.shape_cast %331 : vector<2x8xf32> to vector<2x8x1xf32>
    %333 = vector.broadcast %332 : vector<2x8x1xf32> to vector<2x8x8xf32>
    %334 = arith.subf %330, %333 : vector<2x8x8xf32>
    %335 = math.exp %334 : vector<2x8x8xf32>
    %cst_120 = arith.constant dense<0.000000e+00> : vector<2x8xf32>
    %336 = vector.multi_reduction <add>, %335, %cst_120 [2] : vector<2x8x8xf32> to vector<2x8xf32>
    %337 = vector.shape_cast %336 : vector<2x8xf32> to vector<2x8x1xf32>
    %338 = vector.broadcast %337 : vector<2x8x1xf32> to vector<2x8x8xf32>
    %339 = arith.divf %335, %338 : vector<2x8x8xf32>
    %340 = vector.extract_strided_slice %213 {offsets = [0, 0, 28], sizes = [2, 8, 4], strides = [1, 1, 1]} : vector<2x8x32xf32> to vector<2x8x4xf32>
    "tpu.trace_start"() <{level = 10 : i32, message = "bqk,bkd->bqd"}> : () -> ()
    %cst_121 = arith.constant dense<0.000000e+00> : vector<2x8x4xf32>
    %341 = tpu.matmul %339, %340, %cst_121 {dimension_numbers = #tpu.dot_dimension_numbers<[2], [1], [1], [2], [0, 0, 0, 1, 1, 2], [0], [0]>} : vector<2x8x8xf32>, vector<2x8x4xf32>, vector<2x8x4xf32> -> vector<2x8x4xf32>
    "tpu.trace_stop"() : () -> ()
    %342 = tpu.concatenate %229, %245, %261, %277, %293, %309, %325, %341 in 2 : vector<2x8x4xf32>, vector<2x8x4xf32>, vector<2x8x4xf32>, vector<2x8x4xf32>, vector<2x8x4xf32>, vector<2x8x4xf32>, vector<2x8x4xf32>, vector<2x8x4xf32> -> vector<2x8x32xf32>
    %343 = vector.shape_cast %342 : vector<2x8x32xf32> to vector<16x32xf32>
    %cst_122 = arith.constant dense<0.000000e+00> : vector<16x32xf32>
    %344 = tpu.matmul %343, %196, %cst_122 {dimension_numbers = #tpu.dot_dimension_numbers<[1], [0], [0], [1], [0, 0, 1, 1], [], []>} : vector<16x32xf32>, vector<32x32xf32>, vector<16x32xf32> -> vector<16x32xf32>
    %345 = vector.broadcast %198 : vector<1x32xf32> to vector<16x32xf32>
    %346 = arith.addf %344, %345 : vector<16x32xf32>
    %347 = arith.addf %190, %346 : vector<16x32xf32>
    %c0_123 = arith.constant 0 : index
    %c0_124 = arith.constant 0 : index
    %c0_125 = arith.constant 0 : index
    %348 = vector.load %arg13[%c0_123, %c0_124, %c0_125] : memref<1x2x32xf32, #tpu.memory_space<vmem>>, vector<1x2x32xf32>
    %349 = vector.shape_cast %348 : vector<1x2x32xf32> to vector<2x32xf32>
    %350 = vector.extract_strided_slice %349 {offsets = [0, 0], sizes = [1, 32], strides = [1, 1]} : vector<2x32xf32> to vector<1x32xf32>
    %351 = vector.extract_strided_slice %349 {offsets = [1, 0], sizes = [1, 32], strides = [1, 1]} : vector<2x32xf32> to vector<1x32xf32>
    %cst_126 = arith.constant dense<0.000000e+00> : vector<16xf32>
    %352 = vector.multi_reduction <add>, %347, %cst_126 [1] : vector<16x32xf32> to vector<16xf32>
    %353 = vector.shape_cast %352 : vector<16xf32> to vector<16x1xf32>
    %cst_127 = arith.constant 3.200000e+01 : f32
    %354 = vector.broadcast %cst_127 : f32 to vector<16x1xf32>
    %355 = arith.divf %353, %354 : vector<16x1xf32>
    %356 = vector.broadcast %355 : vector<16x1xf32> to vector<16x32xf32>
    %357 = arith.subf %347, %356 : vector<16x32xf32>
    %358 = arith.mulf %357, %357 : vector<16x32xf32>
    %cst_128 = arith.constant dense<0.000000e+00> : vector<16xf32>
    %359 = vector.multi_reduction <add>, %358, %cst_128 [1] : vector<16x32xf32> to vector<16xf32>
    %360 = vector.shape_cast %359 : vector<16xf32> to vector<16x1xf32>
    %cst_129 = arith.constant 3.200000e+01 : f32
    %361 = vector.broadcast %cst_129 : f32 to vector<16x1xf32>
    %362 = arith.divf %360, %361 : vector<16x1xf32>
    %363 = vector.broadcast %355 : vector<16x1xf32> to vector<16x32xf32>
    %364 = arith.subf %347, %363 : vector<16x32xf32>
    %cst_130 = arith.constant 9.99999974E-6 : f32
    %365 = vector.broadcast %cst_130 : f32 to vector<16x1xf32>
    %366 = arith.addf %362, %365 : vector<16x1xf32>
    %367 = math.rsqrt %366 : vector<16x1xf32>
    %368 = vector.broadcast %367 : vector<16x1xf32> to vector<16x32xf32>
    %369 = arith.mulf %364, %368 : vector<16x32xf32>
    %370 = vector.broadcast %350 : vector<1x32xf32> to vector<16x32xf32>
    %371 = arith.mulf %369, %370 : vector<16x32xf32>
    %372 = vector.broadcast %351 : vector<1x32xf32> to vector<16x32xf32>
    %373 = arith.addf %371, %372 : vector<16x32xf32>
    %c0_131 = arith.constant 0 : index
    %c0_132 = arith.constant 0 : index
    %c0_133 = arith.constant 0 : index
    %374 = vector.load %arg14[%c0_131, %c0_132, %c0_133] : memref<1x32x2048xf32, #tpu.memory_space<vmem>>, vector<1x32x2048xf32>
    %375 = vector.shape_cast %374 : vector<1x32x2048xf32> to vector<32x2048xf32>
    %c0_134 = arith.constant 0 : index
    %c0_135 = arith.constant 0 : index
    %c0_136 = arith.constant 0 : index
    %376 = vector.load %arg15[%c0_134, %c0_135, %c0_136] : memref<1x1x2048xf32, #tpu.memory_space<vmem>>, vector<1x1x2048xf32>
    %377 = vector.shape_cast %376 : vector<1x1x2048xf32> to vector<1x2048xf32>
    %c0_137 = arith.constant 0 : index
    %c0_138 = arith.constant 0 : index
    %c0_139 = arith.constant 0 : index
    %378 = vector.load %arg16[%c0_137, %c0_138, %c0_139] : memref<1x2048x32xf32, #tpu.memory_space<vmem>>, vector<1x2048x32xf32>
    %379 = vector.shape_cast %378 : vector<1x2048x32xf32> to vector<2048x32xf32>
    %c0_140 = arith.constant 0 : index
    %c0_141 = arith.constant 0 : index
    %c0_142 = arith.constant 0 : index
    %380 = vector.load %arg17[%c0_140, %c0_141, %c0_142] : memref<1x1x32xf32, #tpu.memory_space<vmem>>, vector<1x1x32xf32>
    %381 = vector.shape_cast %380 : vector<1x1x32xf32> to vector<1x32xf32>
    %cst_143 = arith.constant dense<0.000000e+00> : vector<16x2048xf32>
    %382 = tpu.matmul %373, %375, %cst_143 {dimension_numbers = #tpu.dot_dimension_numbers<[1], [0], [0], [1], [0, 0, 1, 1], [], []>} : vector<16x32xf32>, vector<32x2048xf32>, vector<16x2048xf32> -> vector<16x2048xf32>
    %383 = vector.broadcast %377 : vector<1x2048xf32> to vector<16x2048xf32>
    %384 = arith.addf %382, %383 : vector<16x2048xf32>
    %cst_144 = arith.constant 0.000000e+00 : f32
    %385 = vector.broadcast %cst_144 : f32 to vector<16x2048xf32>
    %386 = arith.maximumf %384, %385 : vector<16x2048xf32>
    %cst_145 = arith.constant dense<0.000000e+00> : vector<16x32xf32>
    %387 = tpu.matmul %386, %379, %cst_145 {dimension_numbers = #tpu.dot_dimension_numbers<[1], [0], [0], [1], [0, 0, 1, 1], [], []>} : vector<16x2048xf32>, vector<2048x32xf32>, vector<16x32xf32> -> vector<16x32xf32>
    %388 = vector.broadcast %381 : vector<1x32xf32> to vector<16x32xf32>
    %389 = arith.addf %387, %388 : vector<16x32xf32>
    %390 = arith.addf %373, %389 : vector<16x32xf32>
    %c0_146 = arith.constant 0 : index
    %c0_147 = arith.constant 0 : index
    %c0_148 = arith.constant 0 : index
    %391 = vector.load %arg18[%c0_146, %c0_147, %c0_148] : memref<1x2x32xf32, #tpu.memory_space<vmem>>, vector<1x2x32xf32>
    %392 = vector.shape_cast %391 : vector<1x2x32xf32> to vector<2x32xf32>
    %393 = vector.extract_strided_slice %392 {offsets = [0, 0], sizes = [1, 32], strides = [1, 1]} : vector<2x32xf32> to vector<1x32xf32>
    %394 = vector.extract_strided_slice %392 {offsets = [1, 0], sizes = [1, 32], strides = [1, 1]} : vector<2x32xf32> to vector<1x32xf32>
    %cst_149 = arith.constant dense<0.000000e+00> : vector<16xf32>
    %395 = vector.multi_reduction <add>, %390, %cst_149 [1] : vector<16x32xf32> to vector<16xf32>
    %396 = vector.shape_cast %395 : vector<16xf32> to vector<16x1xf32>
    %cst_150 = arith.constant 3.200000e+01 : f32
    %397 = vector.broadcast %cst_150 : f32 to vector<16x1xf32>
    %398 = arith.divf %396, %397 : vector<16x1xf32>
    %399 = vector.broadcast %398 : vector<16x1xf32> to vector<16x32xf32>
    %400 = arith.subf %390, %399 : vector<16x32xf32>
    %401 = arith.mulf %400, %400 : vector<16x32xf32>
    %cst_151 = arith.constant dense<0.000000e+00> : vector<16xf32>
    %402 = vector.multi_reduction <add>, %401, %cst_151 [1] : vector<16x32xf32> to vector<16xf32>
    %403 = vector.shape_cast %402 : vector<16xf32> to vector<16x1xf32>
    %cst_152 = arith.constant 3.200000e+01 : f32
    %404 = vector.broadcast %cst_152 : f32 to vector<16x1xf32>
    %405 = arith.divf %403, %404 : vector<16x1xf32>
    %406 = vector.broadcast %398 : vector<16x1xf32> to vector<16x32xf32>
    %407 = arith.subf %390, %406 : vector<16x32xf32>
    %cst_153 = arith.constant 9.99999974E-6 : f32
    %408 = vector.broadcast %cst_153 : f32 to vector<16x1xf32>
    %409 = arith.addf %405, %408 : vector<16x1xf32>
    %410 = math.rsqrt %409 : vector<16x1xf32>
    %411 = vector.broadcast %410 : vector<16x1xf32> to vector<16x32xf32>
    %412 = arith.mulf %407, %411 : vector<16x32xf32>
    %413 = vector.broadcast %393 : vector<1x32xf32> to vector<16x32xf32>
    %414 = arith.mulf %412, %413 : vector<16x32xf32>
    %415 = vector.broadcast %394 : vector<1x32xf32> to vector<16x32xf32>
    %416 = arith.addf %414, %415 : vector<16x32xf32>
    %c0_154 = arith.constant 0 : index
    %c0_155 = arith.constant 0 : index
    %417 = vector.load %arg20[%c0_154, %c0_155] : memref<16x32xf32, #tpu.memory_space<vmem>>, vector<16x32xf32>
    tpu.vector_store %arg20[%c0_154, %c0_155], %416 {strides = array<i32>} : memref<16x32xf32, #tpu.memory_space<vmem>>, vector<16x32xf32>,
    %c5_i32 = arith.constant 5 : i32
    %418 = arith.cmpi eq, %arg0, %c5_i32 : i32
    %419 = arith.extui %418 : i1 to i32
    %c0_i32_156 = arith.constant 0 : i32
    %420 = arith.cmpi ne, %419, %c0_i32_156 : i32
    scf.if %420 {
      %c0_157 = arith.constant 0 : index
      %c0_158 = arith.constant 0 : index
      %421 = vector.load %arg19[%c0_157, %c0_158] : memref<2x32xf32, #tpu.memory_space<vmem>>, vector<2x32xf32>
      %422 = vector.extract_strided_slice %421 {offsets = [0, 0], sizes = [1, 32], strides = [1, 1]} : vector<2x32xf32> to vector<1x32xf32>
      %423 = vector.extract_strided_slice %421 {offsets = [1, 0], sizes = [1, 32], strides = [1, 1]} : vector<2x32xf32> to vector<1x32xf32>
      %cst_159 = arith.constant dense<0.000000e+00> : vector<16xf32>
      %424 = vector.multi_reduction <add>, %416, %cst_159 [1] : vector<16x32xf32> to vector<16xf32>
      %425 = vector.shape_cast %424 : vector<16xf32> to vector<16x1xf32>
      %cst_160 = arith.constant 3.200000e+01 : f32
      %426 = vector.broadcast %cst_160 : f32 to vector<16x1xf32>
      %427 = arith.divf %425, %426 : vector<16x1xf32>
      %428 = vector.broadcast %427 : vector<16x1xf32> to vector<16x32xf32>
      %429 = arith.subf %416, %428 : vector<16x32xf32>
      %430 = arith.mulf %429, %429 : vector<16x32xf32>
      %cst_161 = arith.constant dense<0.000000e+00> : vector<16xf32>
      %431 = vector.multi_reduction <add>, %430, %cst_161 [1] : vector<16x32xf32> to vector<16xf32>
      %432 = vector.shape_cast %431 : vector<16xf32> to vector<16x1xf32>
      %cst_162 = arith.constant 3.200000e+01 : f32
      %433 = vector.broadcast %cst_162 : f32 to vector<16x1xf32>
      %434 = arith.divf %432, %433 : vector<16x1xf32>
      %435 = vector.broadcast %427 : vector<16x1xf32> to vector<16x32xf32>
      %436 = arith.subf %416, %435 : vector<16x32xf32>
      %cst_163 = arith.constant 9.99999974E-6 : f32
      %437 = vector.broadcast %cst_163 : f32 to vector<16x1xf32>
      %438 = arith.addf %434, %437 : vector<16x1xf32>
      %439 = math.rsqrt %438 : vector<16x1xf32>
      %440 = vector.broadcast %439 : vector<16x1xf32> to vector<16x32xf32>
      %441 = arith.mulf %436, %440 : vector<16x32xf32>
      %442 = vector.broadcast %422 : vector<1x32xf32> to vector<16x32xf32>
      %443 = arith.mulf %441, %442 : vector<16x32xf32>
      %444 = vector.broadcast %423 : vector<1x32xf32> to vector<16x32xf32>
      %445 = arith.addf %443, %444 : vector<16x32xf32>
      %c0_164 = arith.constant 0 : index
      %c0_165 = arith.constant 0 : index
      %446 = vector.load %arg20[%c0_164, %c0_165] : memref<16x32xf32, #tpu.memory_space<vmem>>, vector<16x32xf32>
      tpu.vector_store %arg20[%c0_164, %c0_165], %445 {strides = array<i32>} : memref<16x32xf32, #tpu.memory_space<vmem>>, vector<16x32xf32>,
    } else {
    }
    return
  }
  func.func @transform_0(%arg0: i32) -> (i32, i32) {
    %c0_i32 = arith.constant 0 : i32
    %c0_i32_0 = arith.constant 0 : i32
    %c0_i32_1 = arith.constant 0 : i32
    return %c0_i32, %c0_i32_0 : i32, i32
  }
  func.func @transform_1(%arg0: i32) -> (i32, i32) {
    %c0_i32 = arith.constant 0 : i32
    %c0_i32_0 = arith.constant 0 : i32
    %c0_i32_1 = arith.constant 0 : i32
    return %c0_i32, %c0_i32_0 : i32, i32
  }
  func.func @transform_2(%arg0: i32) -> (i32, i32, i32) {
    %c0_i32 = arith.constant 0 : i32
    %c0_i32_0 = arith.constant 0 : i32
    %c0_i32_1 = arith.constant 0 : i32
    %c0_i32_2 = arith.constant 0 : i32
    return %c0_i32, %c0_i32_0, %c0_i32_1 : i32, i32, i32
  }
  func.func @transform_3(%arg0: i32) -> (i32, i32, i32) {
    %c0_i32 = arith.constant 0 : i32
    %c0_i32_0 = arith.constant 0 : i32
    %c0_i32_1 = arith.constant 0 : i32
    return %arg0, %c0_i32, %c0_i32_0 : i32, i32, i32
  }
  func.func @transform_4(%arg0: i32) -> (i32, i32, i32) {
    %c0_i32 = arith.constant 0 : i32
    %c0_i32_0 = arith.constant 0 : i32
    %c0_i32_1 = arith.constant 0 : i32
    return %arg0, %c0_i32, %c0_i32_0 : i32, i32, i32
  }
  func.func @transform_5(%arg0: i32) -> (i32, i32, i32) {
    %c0_i32 = arith.constant 0 : i32
    %c0_i32_0 = arith.constant 0 : i32
    %c0_i32_1 = arith.constant 0 : i32
    return %arg0, %c0_i32, %c0_i32_0 : i32, i32, i32
  }
  func.func @transform_6(%arg0: i32) -> (i32, i32, i32) {
    %c0_i32 = arith.constant 0 : i32
    %c0_i32_0 = arith.constant 0 : i32
    %c0_i32_1 = arith.constant 0 : i32
    return %arg0, %c0_i32, %c0_i32_0 : i32, i32, i32
  }
  func.func @transform_7(%arg0: i32) -> (i32, i32, i32) {
    %c0_i32 = arith.constant 0 : i32
    %c0_i32_0 = arith.constant 0 : i32
    %c0_i32_1 = arith.constant 0 : i32
    return %arg0, %c0_i32, %c0_i32_0 : i32, i32, i32
  }
  func.func @transform_8(%arg0: i32) -> (i32, i32, i32) {
    %c0_i32 = arith.constant 0 : i32
    %c0_i32_0 = arith.constant 0 : i32
    %c0_i32_1 = arith.constant 0 : i32
    return %arg0, %c0_i32, %c0_i32_0 : i32, i32, i32
  }
  func.func @transform_9(%arg0: i32) -> (i32, i32, i32) {
    %c0_i32 = arith.constant 0 : i32
    %c0_i32_0 = arith.constant 0 : i32
    %c0_i32_1 = arith.constant 0 : i32
    return %arg0, %c0_i32, %c0_i32_0 : i32, i32, i32
  }
  func.func @transform_10(%arg0: i32) -> (i32, i32, i32) {
    %c0_i32 = arith.constant 0 : i32
    %c0_i32_0 = arith.constant 0 : i32
    %c0_i32_1 = arith.constant 0 : i32
    return %arg0, %c0_i32, %c0_i32_0 : i32, i32, i32
  }
  func.func @transform_11(%arg0: i32) -> (i32, i32, i32) {
    %c0_i32 = arith.constant 0 : i32
    %c0_i32_0 = arith.constant 0 : i32
    %c0_i32_1 = arith.constant 0 : i32
    return %arg0, %c0_i32, %c0_i32_0 : i32, i32, i32
  }
  func.func @transform_12(%arg0: i32) -> (i32, i32, i32) {
    %c0_i32 = arith.constant 0 : i32
    %c0_i32_0 = arith.constant 0 : i32
    %c0_i32_1 = arith.constant 0 : i32
    return %arg0, %c0_i32, %c0_i32_0 : i32, i32, i32
  }
  func.func @transform_13(%arg0: i32) -> (i32, i32, i32) {
    %c0_i32 = arith.constant 0 : i32
    %c0_i32_0 = arith.constant 0 : i32
    %c0_i32_1 = arith.constant 0 : i32
    return %arg0, %c0_i32, %c0_i32_0 : i32, i32, i32
  }
  func.func @transform_14(%arg0: i32) -> (i32, i32, i32) {
    %c0_i32 = arith.constant 0 : i32
    %c0_i32_0 = arith.constant 0 : i32
    %c0_i32_1 = arith.constant 0 : i32
    return %arg0, %c0_i32, %c0_i32_0 : i32, i32, i32
  }
  func.func @transform_15(%arg0: i32) -> (i32, i32, i32) {
    %c0_i32 = arith.constant 0 : i32
    %c0_i32_0 = arith.constant 0 : i32
    %c0_i32_1 = arith.constant 0 : i32
    return %arg0, %c0_i32, %c0_i32_0 : i32, i32, i32
  }
  func.func @transform_16(%arg0: i32) -> (i32, i32, i32) {
    %c0_i32 = arith.constant 0 : i32
    %c0_i32_0 = arith.constant 0 : i32
    %c0_i32_1 = arith.constant 0 : i32
    return %arg0, %c0_i32, %c0_i32_0 : i32, i32, i32
  }
  func.func @transform_17(%arg0: i32) -> (i32, i32, i32) {
    %c0_i32 = arith.constant 0 : i32
    %c0_i32_0 = arith.constant 0 : i32
    %c0_i32_1 = arith.constant 0 : i32
    return %arg0, %c0_i32, %c0_i32_0 : i32, i32, i32
  }
  func.func @transform_18(%arg0: i32) -> (i32, i32) {
    %c0_i32 = arith.constant 0 : i32
    %c0_i32_0 = arith.constant 0 : i32
    %c0_i32_1 = arith.constant 0 : i32
    return %c0_i32, %c0_i32_0 : i32, i32
  }
  func.func @transform_19(%arg0: i32) -> (i32, i32) {
    %c0_i32 = arith.constant 0 : i32
    %c0_i32_0 = arith.constant 0 : i32
    %c0_i32_1 = arith.constant 0 : i32
    return %c0_i32, %c0_i32_0 : i32, i32
  }
}

</mosaic_0001>

<bundles_post_ra>
// kernel: translation_model_forward.2
= control target key start
LH: loop header
LB: loop body
LE: loop exit
PB: predicated region body
PF: predicated region fallthrough
CT: control target
= control target key end

     0   :  { %s6330_s25 = smov 0   ;;  %s7294_s0 = inlined_call_operand.vmem [shape: f32[16,32], index: 0, kind: input, shape index: {}]   ;;  %s7295_s1 = inlined_call_operand.vmem [shape: f32[2,8,8], index: 1, kind: input, shape index: {}]   ;;  %s7296_s2 = inlined_call_operand.vmem [shape: f32[6,32,96], index: 2, kind: input, shape index: {}]   ;;  %s7297_s3 = inlined_call_operand.vmem [shape: f32[6,1,96], index: 3, kind: input, shape index: {}]   ;;  %s7298_s4 = inlined_call_operand.vmem [shape: f32[6,32,32], index: 4, kind: input, shape index: {}]   ;;  %s7299_s5 = inlined_call_operand.vmem [shape: f32[6,1,32], index: 5, kind: input, shape index: {}]   ;;  %s7300_s6 = inlined_call_operand.vmem [shape: f32[6,2,32], index: 6, kind: input, shape index: {}]   ;;  %s7301_s7 = inlined_call_operand.vmem [shape: f32[6,32,2048], index: 7, kind: input, shape index: {}]   ;;  %s7302_s8 = inlined_call_operand.vmem [shape: f32[6,1,2048], index: 8, kind: input, shape index: {}]   ;;  %s7303_s9 = inlined_call_operand.vmem [shape: f32[6,2048,32], index: 9, kind: input, shape index: {}]   ;;  %s7304_s10 = inlined_call_operand.vmem [shape: f32[6,1,32], index: 10, kind: input, shape index: {}]   ;;  %s7305_s11 = inlined_call_operand.vmem [shape: f32[6,2,32], index: 11, kind: input, shape index: {}]   ;;  %s7306_s12 = inlined_call_operand.vmem [shape: f32[2,32], index: 12, kind: input, shape index: {}]   ;;  %s7307_s13 = inlined_call_operand.vmem [shape: f32[16,32], index: 13, kind: output, shape index: {}]  }
   0x1   :  { %7309 = sst [smem:[#allocation4_spill]] %s7296_s2 }
   0x2   :  { %7310 = sst [smem:[#allocation5_spill]] %s7298_s4 }
   0x3   :  { %7311 = sst [smem:[#allocation6_spill]] %s7300_s6 }
   0x4   :  { %7312 = sst [smem:[#allocation7_spill]] %s7306_s12 }
   0x5 LB: > { %7313 = sst [smem:[#allocation2_spill]] %s6226_s25  ;;  %s6336_s26 = sadd.s32 4294967295, %s6226_s25   ;;  %s6226_s25 = sphi %s6330_s25, %s23_s25  }
   0x6   : > { %p5449_p0 = scmp.ge.s32.totalorder %s6226_s25, 1  ;;  %p463_p1 = scmp.lt.s32.totalorder %s6226_s25, 7 }
   0x8   : > { %p464_p2 = pnand %p5449_p0, %p463_p1 }
   0xa   : > { %467 = sbr.rel (%p464_p2) target bundleno = 6602 (0x19ca), region = 72 }
   0xf   : > { %p538_p3 = scmp.lt.s32.totalorder %s6336_s26, 5  ;;  %s7314_s2 = sld [smem:[#allocation4_spill]] }
  0x10   : > { %s7315_s4 = sld [smem:[#allocation5_spill]]  ;;  %p5461_p4 = scmp.ne.s32.totalorder %s6336_s26, 0 }
  0x11   : > { %s6342_s27 = scalar_select %p538_p3, %s6336_s26, 5 }
  0x12   : > { %s7316_s6 = sld [smem:[#allocation6_spill]] }
  0x13   : > { %s5536_s28 = sshll.u32 %s6342_s27, 5  ;;  %s5454_s24 = sshll.u32 %s6342_s27, 1 }
  0x14   : > { %s5538_s30 = sshll.u32 %s6342_s27, 9  ;;  %s5539_s21 = sshll.u32 %s6342_s27, 11 }
  0x15   : > { %s6352_s17 = scalar_lea.vmem %s7314_s2, %s5536_s28  ;;  %s6373_s16 = scalar_lea.vmem %s7301_s7, %s5538_s30 }
  0x16   : > { %s6357_s20 = scalar_lea.vmem %s7315_s4, %s5536_s28  ;;  %s5457_s2 = sshll.u32 %s6342_s27, 4 }
  0x17   : > { %s6379_s19 = scalar_lea.vmem %s7302_s8, %s5457_s2  ;;  %s6385_s4 = scalar_lea.vmem %s7303_s9, %s5539_s21 }
  0x18   : > { %s6367_s29 = scalar_lea.vmem %s7316_s6, %s5454_s24  ;;  %s574_s6 = scalar_lea.vmem %s7304_s10, %s6342_s27 }
  0x19   : > { %7317 = sst [smem:[#allocation3_spill]] %s6367_s29  ;;  %s6394_s30 = scalar_lea.vmem %s7305_s11, %s5454_s24 }
  0x1a   : > { %582 = sbr.rel (%p5461_p4) target bundleno = 33 (0x21), region = 76 }
  0x1f   : > { %v583_v0 = vld [vmem:[%s7294_s0] sm:$0xff]  ;;  %vm585_vm0 = vcmask 261120   ;;  %v584_v1 = vld [vmem:[%s7294_s0 + $0x8] sm:$0xff] }
  0x20   : > { %586 = vst.msk [vmem:[%s7307_s13] sm:$0xff] %vm585_vm0, %v583_v0  ;;  %587 = vst.msk [vmem:[%s7307_s13 + $0x8] sm:$0xff] %vm585_vm0, %v584_v1 }
  0x21 PF: > { %v595_v2 = vld [vmem:[%s6352_s17 + $0x18] sm:$0xff]  ;;  %v594_v3 = vld [vmem:[%s6352_s17 + $0x10] sm:$0xff]  ;;  %vm608_vm1 = vcmask 261120   ;;  %v593_v5 = vld [vmem:[%s6352_s17 + $0x8] sm:$0xff]  ;;  %v6228_v8 = vmov 0.0   ;;  %vm6229_vm2 = vmmov 0   ;;  %s7318_s15 = scalar_lea.vmem %s7297_s3, %s6342_s27 }
  0x22   : > { %5920 = vmatprep.subr.mxu0 %v595_v2  ;;  %v592_v6 = vld [vmem:[%s6352_s17] sm:$0xff]  ;;  %5931 = vmatprep.subr.mxu1 %v6228_v8  ;;  %s6230_s23 = smov 96   ;;  %vm693_vm3 = vcmask 31744   ;;  %vm849_vm4 = vcmask 64512   ;;  %v6459_v22 = vld [vmem:[%s7295_s1 + $0x8] sm:$0xff]  ;;  %s6231_s29 = smov 64  }
  0x23   : > { %5921 = vmatpush3.msra.mxu0 %v595_v2  ;;  %5933 = vmatprep.mubr.msk.f32.mxu1 %vm6229_vm2, %v6228_v8  ;;  %v5462_v10 = vld [vmem:[%s7318_s15] ss:$0 sm:$0xff]  ;;  %s6232_s24 = smov 92   ;;  %s6233_s12 = smov 124   ;;  %vm3422_vm5 = vcmask 97280   ;;  %vm3425_vm6 = vcmask 130048  }
  0x24   : > { %5922 = vmatprep.subr.mxu0 %v594_v3  ;;  %v6453_v17 = vld [vmem:[%s7295_s1] sm:$0xff]  ;;  %s6234_s25 = smov 60   ;;  %s6235_s14 = smov 120   ;;  %vm3428_vm7 = vcmask 162816   ;;  %vm3434_vm8 = vcmask 228352   ;;  %vm3431_vm9 = vcmask 195584  }
  0x25   : > { %5923 = vmatpush3.msra.mxu0 %v594_v3  ;;  %s6236_s17 = smov 88   ;;  %s6237_s2 = smov 56  }
  0x26   : > { %5924 = vmatprep.subr.mxu0 %v593_v5  ;;  %s6238_s15 = smov 84   ;;  %s6240_s18 = smov 52  }
  0x27   : > { %v588_v4 = vld [vmem:[%s7307_s13] sm:$0xff]  ;;  %5925 = vmatpush3.msra.mxu0 %v593_v5  ;;  %v589_v7 = vld [vmem:[%s7307_s13 + $0x8] sm:$0xff]  ;;  %s6241_s28 = smov 80   ;;  %s6242_s21 = smov 112  }
  0x28   : > { %5928 = vmatprep.mubr.msk.f32.mxu0 %vm608_vm1, %v588_v4  ;;  %5926 = vmatprep.subr.mxu0 %v592_v6  ;;  %s6243_s22 = smov 48   ;;  %p5533_p5 = scmp.ne.s32.totalorder %s6336_s26, 5 }
  0x29   : > { %5927 = vmatpush3.msra.mxu0 %v592_v6 }
  0x2a   : > { %5929 = vmatmul.mubr.msk.f32.vlgmr.msra.gmra.mxu0 %vm608_vm1, %v589_v7  ;;  %5951 = vmatprep.subr.mxu0 %v6228_v8 }
  0x2b   : > { %5953 = vmatprep.mubr.msk.f32.mxu0 %vm6229_vm2, %v6228_v8 }
  0xea   : > { %v5930_v9 = vpop.f32.mrf.mxu0 }
  0xeb   : > { %v6435_v13 = vadd.f32 %v5930_v9, %v5462_v10 }
  0xec   : > { %v681_v11 = vpop.f32.mrf.mxu0 }
  0xed   : > { %v6432_v12 = vadd.f32 %v5462_v10, %v681_v11 }
  0xef   : > { %691 = vrot.lane.b32.xlu0 %v6432_v12, %s6230_s23 }
  0xf3   : > { %769 = vrot.lane.b32.xlu0 %v6435_v13, %s6230_s23  ;;  %s6239_s23 = smov 116  }
 0x161   : > { %v692_v14 = vpop.permute.xlu0 %691 }
 0x162   : > { %5932 = vmatpush3.xpose.msk.msra.mxu1 %vm693_vm3, %v692_v14 }
 0x163   : > { %5936 = vmatprep.subr.mxu1 %v6228_v8 }
 0x165   : > { %5934 = vmatmul.mubr.msk.f32.vlgmr.msra.gmra.mxu1 %vm693_vm3, %v6432_v12  ;;  %v770_v15 = vpop.permute.xlu0 %769 }
 0x166   : > { %5937 = vmatpush3.xpose.msk.msra.mxu1 %vm693_vm3, %v770_v15  ;;  %5938 = vmatprep.mubr.msk.f32.mxu1 %vm6229_vm2, %v6228_v8 }
 0x167   : > { %5941 = vmatprep.subr.mxu1 %v6228_v8 }
 0x169   : > { %5939 = vmatmul.mubr.msk.f32.vlgmr.msra.gmra.mxu1 %vm693_vm3, %v6435_v13 }
 0x16a   : > { %5943 = vmatprep.mubr.msk.f32.mxu1 %vm6229_vm2, %v6228_v8 }
 0x225   : > { %v764_v16 = vpop.f32.mrf.mxu1 }
 0x226   : > { %v845_v18 = vmul.f32 0.5, %v764_v16 }
 0x227   : > { %v5935_v19 = vpop.f32.mrf.mxu1 }
 0x228   : > { %v847_v20 = vadd.f32 %v845_v18, %v6453_v17 }
 0x229   : > { %v841_v21 = vpop.f32.mrf.mxu1 }
 0x22a   : > { %v846_v23 = vmul.f32 0.5, %v841_v21  ;;  %v850_v24 = vsel %vm849_vm4, %v847_v20, -inf }
 0x22b   : > { %851 = vmax.xlane.f32.xlu1 %v850_v24  ;;  %v5940_v25 = vpop.f32.mrf.mxu1 }
 0x22c   : > { %v848_v26 = vadd.f32 %v846_v23, %v6459_v22 }
 0x22e   : > { %v853_v27 = vsel %vm849_vm4, %v848_v26, -inf }
 0x22f   : > { %854 = vmax.xlane.f32.xlu1 %v853_v27 }
 0x240   : > { %872 = vrot.lane.b32.xlu1 %v6432_v12, %s6231_s29 }
 0x244   : > { %948 = vrot.lane.b32.xlu1 %v6435_v13, %s6231_s29  ;;  %s6244_s29 = smov 76  }
 0x248   : > { %1026 = vrot.lane.b32.xlu1 %v6432_v12, %s6232_s24 }
 0x24c   : > { %1104 = vrot.lane.b32.xlu1 %v6435_v13, %s6232_s24  ;;  %s6245_s24 = smov 108  }
 0x2b4   : > { %v852_v28 = vpop.xlane.xlu1 %851 }
 0x2b5   : > { %v856_v29 = vsub.f32 %v847_v20, %v852_v28 }
 0x2b7   : > { %v858_v30 = vmul.f32 1.442695, %v856_v29 }
 0x2b8   : > { %v855_v31 = vpop.xlane.xlu1 %854 }
 0x2b9   : > { %6142 = vpow2.f32 %v858_v30  ;;  %v857_v32 = vsub.f32 %v848_v26, %v855_v31 }
 0x2bb   : > { %v860_v33 = vmul.f32 1.442695, %v857_v32 }
 0x2bc   : > { %v873_v34 = vpop.permute.xlu1 %872 }
 0x2bd   : > { %6144 = vpow2.f32 %v860_v33  ;;  %5942 = vmatpush3.msra.mxu1 %v873_v34 }
 0x2be   : > { %5946 = vmatprep.subr.mxu1 %v6228_v8 }
 0x2c0   : > { %v949_v35 = vpop.permute.xlu1 %948 }
 0x2c4   : > { %v1027_v36 = vpop.permute.xlu1 %1026 }
 0x2c5   : > { %5952 = vmatpush3.xpose.msk.msra.mxu0 %vm693_vm3, %v1027_v36 }
 0x2c6   : > { %v6143_v37 = vpop.eup %6142  ;;  %5961 = vmatprep.subr.mxu0 %v6228_v8 }
 0x2c7   : > { %v862_v38 = vsel %vm849_vm4, %v6143_v37, 0.0 }
 0x2c8   : > { %863 = vadd.xlane.f32.xlu0 %v862_v38  ;;  %v1105_v41 = vpop.permute.xlu1 %1104 }
 0x2ca   : > { %v6145_v39 = vpop.eup %6144 }
 0x2cb   : > { %v865_v40 = vsel %vm849_vm4, %v6145_v39, 0.0 }
 0x2cc   : > { %866 = vadd.xlane.f32.xlu1 %v865_v40 }
 0x2dd   : > { %1102 = vrot.lane.b32.xlu1 %v6435_v13, %s6233_s12 }
 0x2de   : > { %1024 = vrot.lane.b32.xlu0 %v6432_v12, %s6233_s12  ;;  %s6246_s12 = smov 44  }
 0x351   : > { %v864_v42 = vpop.xlane.xlu0 %863 }
 0x352   : > { %6146 = vrcp.f32 %v864_v42 }
 0x355   : > { %v867_v43 = vpop.xlane.xlu1 %866  ;;  %v1025_v44 = vpop.permute.xlu0 %1024 }
 0x356   : > { %6148 = vrcp.f32 %v867_v43  ;;  %5954 = vmatmul.mubr.msk.f32.vlgmr.msra.gmra.mxu0 %vm693_vm3, %v1025_v44 }
 0x357   : > { %5963 = vmatprep.mubr.msk.f32.mxu0 %vm6229_vm2, %v6228_v8 }
 0x359   : > { %v1103_v49 = vpop.permute.xlu1 %1102 }
 0x35f   : > { %v6147_v45 = vpop.eup %6146 }
 0x360   : > { %v869_v46 = vmul.f32 %v6147_v45, %v6143_v37 }
 0x362   : > { %5944 = vmatmul.mubr.msk.f32.vlgmr.msra.gmra.mxu1 %vm849_vm4, %v869_v46 }
 0x363   : > { %v6149_v47 = vpop.eup %6148  ;;  %5947 = vmatpush3.msra.mxu1 %v949_v35  ;;  %5948 = vmatprep.mubr.msk.f32.mxu1 %vm6229_vm2, %v6228_v8 }
 0x364   : > { %5956 = vmatprep.subr.mxu1 %v6228_v8  ;;  %v871_v48 = vmul.f32 %v6149_v47, %v6145_v39 }
 0x366   : > { %5949 = vmatmul.mubr.msk.f32.vlgmr.msra.gmra.mxu1 %vm849_vm4, %v871_v48 }
 0x367   : > { %5957 = vmatpush3.xpose.msk.msra.mxu1 %vm693_vm3, %v1105_v41  ;;  %5958 = vmatprep.mubr.msk.f32.mxu1 %vm6229_vm2, %v6228_v8 }
 0x368   : > { %5966 = vmatprep.subr.mxu1 %v6228_v8 }
 0x36a   : > { %5959 = vmatmul.mubr.msk.f32.vlgmr.msra.gmra.mxu1 %vm693_vm3, %v1103_v49 }
 0x36b   : > { %5968 = vmatprep.mubr.msk.f32.mxu1 %vm6229_vm2, %v6228_v8 }
 0x416   : > { %v1098_v50 = vpop.f32.mrf.mxu0 }
 0x417   : > { %v1180_v51 = vmul.f32 0.5, %v1098_v50 }
 0x418   : > { %v5955_v52 = vpop.f32.mrf.mxu0 }
 0x419   : > { %v1182_v53 = vadd.f32 %v1180_v51, %v6453_v17 }
 0x41b   : > { %v1184_v54 = vsel %vm849_vm4, %v1182_v53, -inf }
 0x41c   : > { %1185 = vmax.xlane.f32.xlu1 %v1184_v54 }
 0x422   : > { %v6492_v55 = vpop.f32.mrf.mxu1 }
 0x424   : > { %v5945_v56 = vpop.f32.mrf.mxu1 }
 0x426   : > { %v6494_v57 = vpop.f32.mrf.mxu1 }
 0x428   : > { %v5950_v58 = vpop.f32.mrf.mxu1 }
 0x42a   : > { %v1176_v59 = vpop.f32.mrf.mxu1 }
 0x42b   : > { %v1181_v60 = vmul.f32 0.5, %v1176_v59 }
 0x42c   : > { %v5960_v61 = vpop.f32.mrf.mxu1 }
 0x42d   : > { %v1183_v62 = vadd.f32 %v1181_v60, %v6459_v22 }
 0x42f   : > { %v1187_v63 = vsel %vm849_vm4, %v1183_v62, -inf }
 0x430   : > { %1188 = vmax.xlane.f32.xlu0 %v1187_v63 }
 0x446   : > { %1282 = vrot.lane.b32.xlu0 %v6435_v13, %s6234_s25 }
 0x44a   : > { %1358 = vrot.lane.b32.xlu0 %v6432_v12, %s6235_s14 }
 0x4a5   : > { %v1186_v0 = vpop.xlane.xlu1 %1185 }
 0x4a6   : > { %v1190_v1 = vsub.f32 %v1182_v53, %v1186_v0 }
 0x4a8   : > { %v1192_v2 = vmul.f32 1.442695, %v1190_v1 }
 0x4aa   : > { %6150 = vpow2.f32 %v1192_v2 }
 0x4b7   : > { %v6151_v3 = vpop.eup %6150 }
 0x4b8   : > { %v1196_v4 = vsel %vm849_vm4, %v6151_v3, 0.0 }
 0x4b9   : > { %1197 = vadd.xlane.f32.xlu1 %v1196_v4  ;;  %v1189_v5 = vpop.xlane.xlu0 %1188 }
 0x4ba   : > { %v1191_v7 = vsub.f32 %v1183_v62, %v1189_v5 }
 0x4bc   : > { %v1194_v9 = vmul.f32 1.442695, %v1191_v7 }
 0x4bd   : > { %v1283_v6 = vpop.permute.xlu0 %1282 }
 0x4be   : > { %5967 = vmatpush3.msra.mxu1 %v1283_v6  ;;  %6152 = vpow2.f32 %v1194_v9 }
 0x4bf   : > { %5976 = vmatprep.subr.mxu1 %v6228_v8 }
 0x4c1   : > { %v1359_v20 = vpop.permute.xlu0 %1358 }
 0x4ca   : > { %1206 = vrot.lane.b32.xlu1 %v6432_v12, %s6234_s25  ;;  %s6247_s25 = smov 72  }
 0x4cb   : > { %v6153_v10 = vpop.eup %6152 }
 0x4cc   : > { %v1199_v11 = vsel %vm849_vm4, %v6153_v10, 0.0 }
 0x4ce   : > { %1360 = vrot.lane.b32.xlu1 %v6432_v12, %s6236_s17 }
 0x4d2   : > { %1438 = vrot.lane.b32.xlu1 %v6435_v13, %s6236_s17  ;;  %s6249_s17 = smov 40  }
 0x4f6   : > { %1200 = vadd.xlane.f32.xlu1 %v1199_v11 }
 0x507   : > { %1436 = vrot.lane.b32.xlu1 %v6435_v13, %s6235_s14  ;;  %s6248_s14 = smov 104  }
 0x542   : > { %v1198_v14 = vpop.xlane.xlu1 %1197 }
 0x543   : > { %6154 = vrcp.f32 %v1198_v14 }
 0x546   : > { %v1207_v15 = vpop.permute.xlu1 %1206 }
 0x547   : > { %5962 = vmatpush3.msra.mxu0 %v1207_v15 }
 0x548   : > { %5971 = vmatprep.subr.mxu0 %v6228_v8 }
 0x54a   : > { %v1361_v19 = vpop.permute.xlu1 %1360 }
 0x54e   : > { %v1439_v21 = vpop.permute.xlu1 %1438 }
 0x550   : > { %v6155_v16 = vpop.eup %6154 }
 0x551   : > { %v1203_v18 = vmul.f32 %v6155_v16, %v6151_v3 }
 0x553   : > { %5964 = vmatmul.mubr.msk.f32.vlgmr.msra.gmra.mxu0 %vm849_vm4, %v1203_v18 }
 0x554   : > { %5972 = vmatpush3.xpose.msk.msra.mxu0 %vm693_vm3, %v1361_v19  ;;  %5973 = vmatprep.mubr.msk.f32.mxu0 %vm6229_vm2, %v6228_v8 }
 0x555   : > { %5981 = vmatprep.subr.mxu0 %v6228_v8 }
 0x557   : > { %5974 = vmatmul.mubr.msk.f32.vlgmr.msra.gmra.mxu0 %vm693_vm3, %v1359_v20 }
 0x558   : > { %5983 = vmatprep.mubr.msk.f32.mxu0 %vm6229_vm2, %v6228_v8 }
 0x57f   : > { %v1201_v23 = vpop.xlane.xlu1 %1200 }
 0x580   : > { %6156 = vrcp.f32 %v1201_v23 }
 0x583   : > { %v1437_v26 = vpop.permute.xlu1 %1436 }
 0x58d   : > { %v6157_v24 = vpop.eup %6156 }
 0x58e   : > { %v1205_v25 = vmul.f32 %v6157_v24, %v6153_v10 }
 0x590   : > { %5969 = vmatmul.mubr.msk.f32.vlgmr.msra.gmra.mxu1 %vm849_vm4, %v1205_v25 }
 0x591   : > { %5977 = vmatpush3.xpose.msk.msra.mxu1 %vm693_vm3, %v1439_v21  ;;  %5978 = vmatprep.mubr.msk.f32.mxu1 %vm6229_vm2, %v6228_v8 }
 0x592   : > { %5986 = vmatprep.subr.mxu1 %v6228_v8 }
 0x594   : > { %5979 = vmatmul.mubr.msk.f32.vlgmr.msra.gmra.mxu1 %vm693_vm3, %v1437_v26 }
 0x595   : > { %5988 = vmatprep.mubr.msk.f32.mxu1 %vm6229_vm2, %v6228_v8 }
 0x613   : > { %v6524_v27 = vpop.f32.mrf.mxu0 }
 0x615   : > { %v5965_v28 = vpop.f32.mrf.mxu0 }
 0x617   : > { %v1432_v29 = vpop.f32.mrf.mxu0 }
 0x618   : > { %v1514_v30 = vmul.f32 0.5, %v1432_v29 }
 0x619   : > { %v5975_v31 = vpop.f32.mrf.mxu0 }
 0x61a   : > { %v1516_v32 = vadd.f32 %v1514_v30, %v6453_v17 }
 0x61c   : > { %v1518_v33 = vsel %vm849_vm4, %v1516_v32, -inf }
 0x61d   : > { %1519 = vmax.xlane.f32.xlu0 %v1518_v33 }
 0x650   : > { %v6528_v34 = vpop.f32.mrf.mxu1 }
 0x652   : > { %v5970_v35 = vpop.f32.mrf.mxu1 }
 0x654   : > { %v1510_v36 = vpop.f32.mrf.mxu1 }
 0x655   : > { %v1515_v37 = vmul.f32 0.5, %v1510_v36 }
 0x656   : > { %v5980_v38 = vpop.f32.mrf.mxu1 }
 0x657   : > { %v1517_v39 = vadd.f32 %v1515_v37, %v6459_v22 }
 0x659   : > { %v1521_v40 = vsel %vm849_vm4, %v1517_v39, -inf }
 0x65a   : > { %1522 = vmax.xlane.f32.xlu1 %v1521_v40 }
 0x66b   : > { %1540 = vrot.lane.b32.xlu1 %v6432_v12, %s6237_s2 }
 0x66f   : > { %1694 = vrot.lane.b32.xlu1 %v6432_v12, %s6238_s15 }
 0x673   : > { %1772 = vrot.lane.b32.xlu1 %v6435_v13, %s6238_s15  ;;  %s6251_s15 = smov 100  }
 0x677   : > { %1770 = vrot.lane.b32.xlu1 %v6435_v13, %s6239_s23 }
 0x6a6   : > { %v1520_v41 = vpop.xlane.xlu0 %1519 }
 0x6a7   : > { %v1524_v42 = vsub.f32 %v1516_v32, %v1520_v41 }
 0x6a9   : > { %v1526_v43 = vmul.f32 1.442695, %v1524_v42 }
 0x6ab   : > { %6158 = vpow2.f32 %v1526_v43 }
 0x6b8   : > { %v6159_v44 = vpop.eup %6158 }
 0x6b9   : > { %v1530_v45 = vsel %vm849_vm4, %v6159_v44, 0.0 }
 0x6ba   : > { %1531 = vadd.xlane.f32.xlu0 %v1530_v45 }
 0x6d0   : > { %1616 = vrot.lane.b32.xlu0 %v6435_v13, %s6237_s2  ;;  %s6250_s2 = smov 68  }
 0x6e3   : > { %v1523_v46 = vpop.xlane.xlu1 %1522 }
 0x6e4   : > { %v1525_v47 = vsub.f32 %v1517_v39, %v1523_v46 }
 0x6e6   : > { %v1528_v48 = vmul.f32 1.442695, %v1525_v47 }
 0x6e7   : > { %v1541_v49 = vpop.permute.xlu1 %1540 }
 0x6e8   : > { %6160 = vpow2.f32 %v1528_v48  ;;  %5982 = vmatpush3.msra.mxu0 %v1541_v49 }
 0x6e9   : > { %5991 = vmatprep.subr.mxu0 %v6228_v8 }
 0x6eb   : > { %v1695_v58 = vpop.permute.xlu1 %1694 }
 0x6ef   : > { %v1773_v62 = vpop.permute.xlu1 %1772 }
 0x6f3   : > { %v1771_v0 = vpop.permute.xlu1 %1770 }
 0x6f5   : > { %v6161_v50 = vpop.eup %6160 }
 0x6f6   : > { %v1533_v51 = vsel %vm849_vm4, %v6161_v50, 0.0 }
 0x6f7   : > { %1534 = vadd.xlane.f32.xlu0 %v1533_v51 }
 0x70d   : > { %1692 = vrot.lane.b32.xlu0 %v6432_v12, %s6239_s23  ;;  %s6252_s23 = smov 36  }
 0x743   : > { %v1532_v52 = vpop.xlane.xlu0 %1531 }
 0x744   : > { %6162 = vrcp.f32 %v1532_v52 }
 0x747   : > { %v1617_v53 = vpop.permute.xlu0 %1616 }
 0x748   : > { %5987 = vmatpush3.msra.mxu1 %v1617_v53 }
 0x749   : > { %5996 = vmatprep.subr.mxu1 %v6228_v8 }
 0x751   : > { %v6163_v54 = vpop.eup %6162 }
 0x752   : > { %v1537_v56 = vmul.f32 %v6163_v54, %v6159_v44 }
 0x754   : > { %5984 = vmatmul.mubr.msk.f32.vlgmr.msra.gmra.mxu0 %vm849_vm4, %v1537_v56 }
 0x755   : > { %5992 = vmatpush3.xpose.msk.msra.mxu0 %vm693_vm3, %v1695_v58  ;;  %5993 = vmatprep.mubr.msk.f32.mxu0 %vm6229_vm2, %v6228_v8 }
 0x756   : > { %6001 = vmatprep.subr.mxu0 %v6228_v8 }
 0x780   : > { %v1535_v59 = vpop.xlane.xlu0 %1534 }
 0x781   : > { %6164 = vrcp.f32 %v1535_v59 }
 0x784   : > { %v1693_v60 = vpop.permute.xlu0 %1692 }
 0x785   : > { %5994 = vmatmul.mubr.msk.f32.vlgmr.msra.gmra.mxu0 %vm693_vm3, %v1693_v60 }
 0x786   : > { %6003 = vmatprep.mubr.msk.f32.mxu0 %vm6229_vm2, %v6228_v8 }
 0x78e   : > { %v6165_v61 = vpop.eup %6164 }
 0x78f   : > { %v1539_v63 = vmul.f32 %v6165_v61, %v6161_v50 }
 0x791   : > { %5989 = vmatmul.mubr.msk.f32.vlgmr.msra.gmra.mxu1 %vm849_vm4, %v1539_v63 }
 0x792   : > { %5997 = vmatpush3.xpose.msk.msra.mxu1 %vm693_vm3, %v1773_v62  ;;  %5998 = vmatprep.mubr.msk.f32.mxu1 %vm6229_vm2, %v6228_v8 }
 0x793   : > { %6006 = vmatprep.subr.mxu1 %v6228_v8 }
 0x795   : > { %5999 = vmatmul.mubr.msk.f32.vlgmr.msra.gmra.mxu1 %vm693_vm3, %v1771_v0 }
 0x796   : > { %6008 = vmatprep.mubr.msk.f32.mxu1 %vm6229_vm2, %v6228_v8 }
 0x814   : > { %v6558_v1 = vpop.f32.mrf.mxu0 }
 0x816   : > { %v5985_v2 = vpop.f32.mrf.mxu0 }
 0x845   : > { %v1766_v3 = vpop.f32.mrf.mxu0 }
 0x846   : > { %v1848_v4 = vmul.f32 0.5, %v1766_v3 }
 0x847   : > { %v5995_v5 = vpop.f32.mrf.mxu0 }
 0x848   : > { %v1850_v6 = vadd.f32 %v1848_v4, %v6453_v17 }
 0x84a   : > { %v1852_v7 = vsel %vm849_vm4, %v1850_v6, -inf }
 0x84b   : > { %1853 = vmax.xlane.f32.xlu0 %v1852_v7 }
 0x851   : > { %v6562_v9 = vpop.f32.mrf.mxu1 }
 0x853   : > { %v5990_v10 = vpop.f32.mrf.mxu1 }
 0x855   : > { %v1844_v11 = vpop.f32.mrf.mxu1 }
 0x856   : > { %v1849_v14 = vmul.f32 0.5, %v1844_v11 }
 0x857   : > { %v6000_v15 = vpop.f32.mrf.mxu1 }
 0x858   : > { %v1851_v16 = vadd.f32 %v1849_v14, %v6459_v22 }
 0x85a   : > { %v1855_v18 = vsel %vm849_vm4, %v1851_v16, -inf }
 0x85b   : > { %1856 = vmax.xlane.f32.xlu1 %v1855_v18 }
 0x86c   : > { %1874 = vrot.lane.b32.xlu1 %v6432_v12, %s6240_s18 }
 0x870   : > { %2028 = vrot.lane.b32.xlu1 %v6432_v12, %s6241_s28 }
 0x874   : > { %2106 = vrot.lane.b32.xlu1 %v6435_v13, %s6241_s28  ;;  %s6254_s28 = smov 8  }
 0x878   : > { %2104 = vrot.lane.b32.xlu1 %v6435_v13, %s6242_s21 }
 0x8d4   : > { %v1854_v19 = vpop.xlane.xlu0 %1853 }
 0x8d5   : > { %v1858_v20 = vsub.f32 %v1850_v6, %v1854_v19 }
 0x8d7   : > { %v1860_v21 = vmul.f32 1.442695, %v1858_v20 }
 0x8d9   : > { %6166 = vpow2.f32 %v1860_v21 }
 0x8e4   : > { %v1857_v23 = vpop.xlane.xlu1 %1856 }
 0x8e5   : > { %v1859_v28 = vsub.f32 %v1851_v16, %v1857_v23 }
 0x8e6   : > { %v6167_v24 = vpop.eup %6166 }
 0x8e7   : > { %v1864_v25 = vsel %vm849_vm4, %v6167_v24, 0.0  ;;  %v1862_v29 = vmul.f32 1.442695, %v1859_v28 }
 0x8e8   : > { %v1875_v26 = vpop.permute.xlu1 %1874  ;;  %1865 = vadd.xlane.f32.xlu0 %v1864_v25 }
 0x8e9   : > { %6002 = vmatpush3.msra.mxu0 %v1875_v26  ;;  %6168 = vpow2.f32 %v1862_v29 }
 0x8ea   : > { %6011 = vmatprep.subr.mxu0 %v6228_v8 }
 0x8ec   : > { %v2029_v37 = vpop.permute.xlu1 %2028 }
 0x8f0   : > { %v2107_v41 = vpop.permute.xlu1 %2106 }
 0x8f4   : > { %v2105_v43 = vpop.permute.xlu1 %2104 }
 0x8f6   : > { %v6169_v30 = vpop.eup %6168 }
 0x8f7   : > { %v1867_v31 = vsel %vm849_vm4, %v6169_v30, 0.0 }
 0x8fe   : > { %1950 = vrot.lane.b32.xlu0 %v6435_v13, %s6240_s18  ;;  %s6253_s18 = smov 4  }
 0x91d   : > { %1868 = vadd.xlane.f32.xlu0 %v1867_v31 }
 0x933   : > { %2026 = vrot.lane.b32.xlu0 %v6432_v12, %s6242_s21  ;;  %s6255_s21 = smov 12  }
 0x971   : > { %v1866_v32 = vpop.xlane.xlu0 %1865 }
 0x972   : > { %6170 = vrcp.f32 %v1866_v32 }
 0x975   : > { %v1951_v33 = vpop.permute.xlu0 %1950 }
 0x976   : > { %6007 = vmatpush3.msra.mxu1 %v1951_v33 }
 0x977   : > { %6016 = vmatprep.subr.mxu1 %v6228_v8 }
 0x97f   : > { %v6171_v35 = vpop.eup %6170 }
 0x980   : > { %v1871_v36 = vmul.f32 %v6171_v35, %v6167_v24 }
 0x982   : > { %6004 = vmatmul.mubr.msk.f32.vlgmr.msra.gmra.mxu0 %vm849_vm4, %v1871_v36 }
 0x983   : > { %6012 = vmatpush3.xpose.msk.msra.mxu0 %vm693_vm3, %v2029_v37  ;;  %6013 = vmatprep.mubr.msk.f32.mxu0 %vm6229_vm2, %v6228_v8 }
 0x984   : > { %6021 = vmatprep.subr.mxu0 %v6228_v8 }
 0x9a6   : > { %v1869_v38 = vpop.xlane.xlu0 %1868 }
 0x9a7   : > { %6172 = vrcp.f32 %v1869_v38 }
 0x9aa   : > { %v2027_v39 = vpop.permute.xlu0 %2026 }
 0x9ab   : > { %6014 = vmatmul.mubr.msk.f32.vlgmr.msra.gmra.mxu0 %vm693_vm3, %v2027_v39 }
 0x9ac   : > { %6023 = vmatprep.mubr.msk.f32.mxu0 %vm6229_vm2, %v6228_v8 }
 0x9b4   : > { %v6173_v40 = vpop.eup %6172 }
 0x9b5   : > { %v1873_v42 = vmul.f32 %v6173_v40, %v6169_v30 }
 0x9b7   : > { %6009 = vmatmul.mubr.msk.f32.vlgmr.msra.gmra.mxu1 %vm849_vm4, %v1873_v42 }
 0x9b8   : > { %6017 = vmatpush3.xpose.msk.msra.mxu1 %vm693_vm3, %v2107_v41  ;;  %6018 = vmatprep.mubr.msk.f32.mxu1 %vm6229_vm2, %v6228_v8 }
 0x9b9   : > { %6026 = vmatprep.subr.mxu1 %v6228_v8 }
 0x9bb   : > { %6019 = vmatmul.mubr.msk.f32.vlgmr.msra.gmra.mxu1 %vm693_vm3, %v2105_v43 }
 0x9bc   : > { %6028 = vmatprep.mubr.msk.f32.mxu1 %vm6229_vm2, %v6228_v8 }
 0xa42   : > { %v6592_v44 = vpop.f32.mrf.mxu0 }
 0xa44   : > { %v6005_v45 = vpop.f32.mrf.mxu0 }
 0xa6b   : > { %v2100_v46 = vpop.f32.mrf.mxu0 }
 0xa6c   : > { %v2182_v47 = vmul.f32 0.5, %v2100_v46 }
 0xa6d   : > { %v6015_v48 = vpop.f32.mrf.mxu0 }
 0xa6e   : > { %v2184_v49 = vadd.f32 %v2182_v47, %v6453_v17 }
 0xa70   : > { %v2186_v50 = vsel %vm849_vm4, %v2184_v49, -inf }
 0xa71   : > { %2187 = vmax.xlane.f32.xlu0 %v2186_v50 }
 0xa77   : > { %v6596_v51 = vpop.f32.mrf.mxu1 }
 0xa79   : > { %v6010_v52 = vpop.f32.mrf.mxu1 }
 0xa7b   : > { %v2178_v53 = vpop.f32.mrf.mxu1 }
 0xa7c   : > { %v2183_v54 = vmul.f32 0.5, %v2178_v53 }
 0xa7d   : > { %v6020_v56 = vpop.f32.mrf.mxu1 }
 0xa7e   : > { %v2185_v58 = vadd.f32 %v2183_v54, %v6459_v22 }
 0xa80   : > { %v2189_v59 = vsel %vm849_vm4, %v2185_v58, -inf }
 0xa81   : > { %2190 = vmax.xlane.f32.xlu1 %v2189_v59 }
 0xa92   : > { %2208 = vrot.lane.b32.xlu1 %v6432_v12, %s6243_s22 }
 0xa96   : > { %2362 = vrot.lane.b32.xlu1 %v6432_v12, %s6244_s29 }
 0xa9a   : > { %2440 = vrot.lane.b32.xlu1 %v6435_v13, %s6244_s29  ;;  %s6257_s29 = smov 20  }
 0xa9e   : > { %2438 = vrot.lane.b32.xlu1 %v6435_v13, %s6245_s24 }
 0xafa   : > { %v2188_v60 = vpop.xlane.xlu0 %2187 }
 0xafb   : > { %v2192_v61 = vsub.f32 %v2184_v49, %v2188_v60 }
 0xafd   : > { %v2194_v62 = vmul.f32 1.442695, %v2192_v61 }
 0xaff   : > { %6174 = vpow2.f32 %v2194_v62 }
 0xb0a   : > { %v2191_v63 = vpop.xlane.xlu1 %2190 }
 0xb0b   : > { %v2193_v4 = vsub.f32 %v2185_v58, %v2191_v63 }
 0xb0c   : > { %v6175_v0 = vpop.eup %6174 }
 0xb0d   : > { %v2198_v2 = vsel %vm849_vm4, %v6175_v0, 0.0  ;;  %v2196_v5 = vmul.f32 1.442695, %v2193_v4 }
 0xb0e   : > { %v2209_v3 = vpop.permute.xlu1 %2208  ;;  %2199 = vadd.xlane.f32.xlu0 %v2198_v2 }
 0xb0f   : > { %6022 = vmatpush3.msra.mxu0 %v2209_v3  ;;  %6176 = vpow2.f32 %v2196_v5 }
 0xb10   : > { %6031 = vmatprep.subr.mxu0 %v6228_v8 }
 0xb12   : > { %v2363_v16 = vpop.permute.xlu1 %2362 }
 0xb16   : > { %v2441_v21 = vpop.permute.xlu1 %2440 }
 0xb1a   : > { %v2439_v24 = vpop.permute.xlu1 %2438 }
 0xb1c   : > { %v6177_v6 = vpop.eup %6176 }
 0xb1d   : > { %v2201_v7 = vsel %vm849_vm4, %v6177_v6, 0.0 }
 0xb24   : > { %2284 = vrot.lane.b32.xlu0 %v6435_v13, %s6243_s22  ;;  %s6256_s22 = smov 16  }
 0xb43   : > { %2202 = vadd.xlane.f32.xlu0 %v2201_v7 }
 0xb59   : > { %2360 = vrot.lane.b32.xlu0 %v6432_v12, %s6245_s24  ;;  %s6258_s24 = smov 24  }
 0xb97   : > { %v2200_v10 = vpop.xlane.xlu0 %2199 }
 0xb98   : > { %6178 = vrcp.f32 %v2200_v10 }
 0xb9b   : > { %v2285_v11 = vpop.permute.xlu0 %2284 }
 0xb9c   : > { %6027 = vmatpush3.msra.mxu1 %v2285_v11 }
 0xb9d   : > { %6036 = vmatprep.subr.mxu1 %v6228_v8 }
 0xba5   : > { %v6179_v14 = vpop.eup %6178 }
 0xba6   : > { %v2205_v15 = vmul.f32 %v6179_v14, %v6175_v0 }
 0xba8   : > { %6024 = vmatmul.mubr.msk.f32.vlgmr.msra.gmra.mxu0 %vm849_vm4, %v2205_v15 }
 0xba9   : > { %6032 = vmatpush3.xpose.msk.msra.mxu0 %vm693_vm3, %v2363_v16  ;;  %6033 = vmatprep.mubr.msk.f32.mxu0 %vm6229_vm2, %v6228_v8 }
 0xbaa   : > { %6041 = vmatprep.subr.mxu0 %v6228_v8 }
 0xbcc   : > { %v2203_v18 = vpop.xlane.xlu0 %2202 }
 0xbcd   : > { %6180 = vrcp.f32 %v2203_v18 }
 0xbd0   : > { %v2361_v19 = vpop.permute.xlu0 %2360 }
 0xbd1   : > { %6034 = vmatmul.mubr.msk.f32.vlgmr.msra.gmra.mxu0 %vm693_vm3, %v2361_v19 }
 0xbd2   : > { %6043 = vmatprep.mubr.msk.f32.mxu0 %vm6229_vm2, %v6228_v8 }
 0xbda   : > { %v6181_v20 = vpop.eup %6180 }
 0xbdb   : > { %v2207_v23 = vmul.f32 %v6181_v20, %v6177_v6 }
 0xbdd   : > { %6029 = vmatmul.mubr.msk.f32.vlgmr.msra.gmra.mxu1 %vm849_vm4, %v2207_v23 }
 0xbde   : > { %6037 = vmatpush3.xpose.msk.msra.mxu1 %vm693_vm3, %v2441_v21  ;;  %6038 = vmatprep.mubr.msk.f32.mxu1 %vm6229_vm2, %v6228_v8 }
 0xbdf   : > { %6046 = vmatprep.subr.mxu1 %v6228_v8 }
 0xbe1   : > { %6039 = vmatmul.mubr.msk.f32.vlgmr.msra.gmra.mxu1 %vm693_vm3, %v2439_v24 }
 0xbe2   : > { %6048 = vmatprep.mubr.msk.f32.mxu1 %vm6229_vm2, %v6228_v8 }
 0xc68   : > { %v6626_v25 = vpop.f32.mrf.mxu0 }
 0xc6a   : > { %v6025_v26 = vpop.f32.mrf.mxu0 }
 0xc91   : > { %v2434_v28 = vpop.f32.mrf.mxu0 }
 0xc92   : > { %v2516_v29 = vmul.f32 0.5, %v2434_v28 }
 0xc93   : > { %v6035_v30 = vpop.f32.mrf.mxu0 }
 0xc94   : > { %v2518_v31 = vadd.f32 %v2516_v29, %v6453_v17 }
 0xc96   : > { %v2520_v32 = vsel %vm849_vm4, %v2518_v31, -inf }
 0xc97   : > { %2521 = vmax.xlane.f32.xlu0 %v2520_v32 }
 0xc9d   : > { %v6630_v33 = vpop.f32.mrf.mxu1 }
 0xc9f   : > { %v6030_v35 = vpop.f32.mrf.mxu1 }
 0xca1   : > { %v2512_v36 = vpop.f32.mrf.mxu1 }
 0xca2   : > { %v2517_v37 = vmul.f32 0.5, %v2512_v36 }
 0xca3   : > { %v6040_v38 = vpop.f32.mrf.mxu1 }
 0xca4   : > { %v2519_v39 = vadd.f32 %v2517_v37, %v6459_v22 }
 0xca6   : > { %v2523_v40 = vsel %vm849_vm4, %v2519_v39, -inf }
 0xca7   : > { %2524 = vmax.xlane.f32.xlu1 %v2523_v40 }
 0xcb8   : > { %2542 = vrot.lane.b32.xlu1 %v6432_v12, %s6246_s12 }
 0xcbc   : > { %2696 = vrot.lane.b32.xlu1 %v6432_v12, %s6247_s25 }
 0xcc0   : > { %2774 = vrot.lane.b32.xlu1 %v6435_v13, %s6247_s25 }
 0xcc4   : > { %2772 = vrot.lane.b32.xlu1 %v6435_v13, %s6248_s14 }
 0xd20   : > { %v2522_v41 = vpop.xlane.xlu0 %2521 }
 0xd21   : > { %v2526_v42 = vsub.f32 %v2518_v31, %v2522_v41 }
 0xd23   : > { %v2528_v43 = vmul.f32 1.442695, %v2526_v42 }
 0xd25   : > { %6182 = vpow2.f32 %v2528_v43 }
 0xd30   : > { %v2525_v45 = vpop.xlane.xlu1 %2524 }
 0xd31   : > { %v2527_v49 = vsub.f32 %v2519_v39, %v2525_v45 }
 0xd32   : > { %v6183_v46 = vpop.eup %6182 }
 0xd33   : > { %v2532_v47 = vsel %vm849_vm4, %v6183_v46, 0.0  ;;  %v2530_v50 = vmul.f32 1.442695, %v2527_v49 }
 0xd34   : > { %v2543_v48 = vpop.permute.xlu1 %2542  ;;  %2533 = vadd.xlane.f32.xlu0 %v2532_v47 }
 0xd35   : > { %6042 = vmatpush3.msra.mxu0 %v2543_v48  ;;  %6184 = vpow2.f32 %v2530_v50 }
 0xd36   : > { %6051 = vmatprep.subr.mxu0 %v6228_v8 }
 0xd38   : > { %v2697_v60 = vpop.permute.xlu1 %2696 }
 0xd3c   : > { %v2775_v0 = vpop.permute.xlu1 %2774 }
 0xd40   : > { %v2773_v3 = vpop.permute.xlu1 %2772 }
 0xd42   : > { %v6185_v52 = vpop.eup %6184 }
 0xd43   : > { %v2535_v53 = vsel %vm849_vm4, %v6185_v52, 0.0 }
 0xd4a   : > { %2618 = vrot.lane.b32.xlu0 %v6435_v13, %s6246_s12  ;;  %s6259_s12 = smov 28  }
 0xd69   : > { %2536 = vadd.xlane.f32.xlu0 %v2535_v53 }
 0xd7f   : > { %2694 = vrot.lane.b32.xlu0 %v6432_v12, %s6248_s14  ;;  %s7319_s14 = scalar_lea.vmem %s7299_s5, %s6342_s27 }
 0xdbd   : > { %v2534_v54 = vpop.xlane.xlu0 %2533 }
 0xdbe   : > { %6186 = vrcp.f32 %v2534_v54 }
 0xdc1   : > { %v2619_v56 = vpop.permute.xlu0 %2618 }
 0xdc2   : > { %6047 = vmatpush3.msra.mxu1 %v2619_v56 }
 0xdc3   : > { %6056 = vmatprep.subr.mxu1 %v6228_v8 }
 0xdcb   : > { %v6187_v58 = vpop.eup %6186 }
 0xdcc   : > { %v2539_v59 = vmul.f32 %v6187_v58, %v6183_v46 }
 0xdce   : > { %6044 = vmatmul.mubr.msk.f32.vlgmr.msra.gmra.mxu0 %vm849_vm4, %v2539_v59 }
 0xdcf   : > { %6052 = vmatpush3.xpose.msk.msra.mxu0 %vm693_vm3, %v2697_v60  ;;  %6053 = vmatprep.mubr.msk.f32.mxu0 %vm6229_vm2, %v6228_v8 }
 0xdd0   : > { %6061 = vmatprep.subr.mxu0 %v6228_v8 }
 0xdf2   : > { %v2537_v61 = vpop.xlane.xlu0 %2536 }
 0xdf3   : > { %6188 = vrcp.f32 %v2537_v61 }
 0xdf6   : > { %v2695_v62 = vpop.permute.xlu0 %2694 }
 0xdf7   : > { %6054 = vmatmul.mubr.msk.f32.vlgmr.msra.gmra.mxu0 %vm693_vm3, %v2695_v62 }
 0xdf8   : > { %6063 = vmatprep.mubr.msk.f32.mxu0 %vm6229_vm2, %v6228_v8 }
 0xe00   : > { %v6189_v63 = vpop.eup %6188 }
 0xe01   : > { %v2541_v2 = vmul.f32 %v6189_v63, %v6185_v52 }
 0xe03   : > { %6049 = vmatmul.mubr.msk.f32.vlgmr.msra.gmra.mxu1 %vm849_vm4, %v2541_v2 }
 0xe04   : > { %6057 = vmatpush3.xpose.msk.msra.mxu1 %vm693_vm3, %v2775_v0  ;;  %6058 = vmatprep.mubr.msk.f32.mxu1 %vm6229_vm2, %v6228_v8 }
 0xe05   : > { %6066 = vmatprep.subr.mxu1 %v6228_v8 }
 0xe07   : > { %6059 = vmatmul.mubr.msk.f32.vlgmr.msra.gmra.mxu1 %vm693_vm3, %v2773_v3 }
 0xe08   : > { %6068 = vmatprep.mubr.msk.f32.mxu1 %vm6229_vm2, %v6228_v8 }
 0xe8e   : > { %v6660_v4 = vpop.f32.mrf.mxu0 }
 0xe90   : > { %v6045_v5 = vpop.f32.mrf.mxu0 }
 0xeb7   : > { %v2768_v6 = vpop.f32.mrf.mxu0 }
 0xeb8   : > { %v2850_v7 = vmul.f32 0.5, %v2768_v6 }
 0xeb9   : > { %v6055_v10 = vpop.f32.mrf.mxu0 }
 0xeba   : > { %v2852_v11 = vadd.f32 %v2850_v7, %v6453_v17 }
 0xebc   : > { %v2854_v14 = vsel %vm849_vm4, %v2852_v11, -inf }
 0xebd   : > { %2855 = vmax.xlane.f32.xlu0 %v2854_v14 }
 0xec3   : > { %v6664_v15 = vpop.f32.mrf.mxu1 }
 0xec5   : > { %v6050_v16 = vpop.f32.mrf.mxu1 }
 0xec7   : > { %v2846_v18 = vpop.f32.mrf.mxu1 }
 0xec8   : > { %v2851_v19 = vmul.f32 0.5, %v2846_v18  ;;  %v598_v18 = vld [vmem:[%s6357_s20 + $0x8] sm:$0xff] }
 0xec9   : > { %v6060_v20 = vpop.f32.mrf.mxu1 }
 0xeca   : > { %v2853_v21 = vadd.f32 %v2851_v19, %v6459_v22  ;;  %v597_v19 = vld [vmem:[%s6357_s20] sm:$0xff] }
 0xecc   : > { %v2857_v23 = vsel %vm849_vm4, %v2853_v21, -inf }
 0xecd   : > { %2858 = vmax.xlane.f32.xlu1 %v2857_v23 }
 0xede   : > { %2876 = vrot.lane.b32.xlu1 %v6432_v12, %s6249_s17 }
 0xee2   : > { %3030 = vrot.lane.b32.xlu1 %v6432_v12, %s6250_s2 }
 0xee6   : > { %3108 = vrot.lane.b32.xlu1 %v6435_v13, %s6250_s2 }
 0xeea   : > { %3106 = vrot.lane.b32.xlu1 %v6435_v13, %s6251_s15 }
 0xf46   : > { %v2856_v24 = vpop.xlane.xlu0 %2855 }
 0xf47   : > { %v2860_v26 = vsub.f32 %v2852_v11, %v2856_v24 }
 0xf49   : > { %v2862_v28 = vmul.f32 1.442695, %v2860_v26 }
 0xf4b   : > { %6190 = vpow2.f32 %v2862_v28 }
 0xf56   : > { %v2859_v29 = vpop.xlane.xlu1 %2858 }
 0xf57   : > { %v2861_v35 = vsub.f32 %v2853_v21, %v2859_v29 }
 0xf58   : > { %v6191_v30 = vpop.eup %6190 }
 0xf59   : > { %v2866_v31 = vsel %vm849_vm4, %v6191_v30, 0.0  ;;  %v2864_v36 = vmul.f32 1.442695, %v2861_v35 }
 0xf5a   : > { %v2877_v32 = vpop.permute.xlu1 %2876  ;;  %2867 = vadd.xlane.f32.xlu0 %v2866_v31 }
 0xf5b   : > { %6062 = vmatpush3.msra.mxu0 %v2877_v32  ;;  %6192 = vpow2.f32 %v2864_v36 }
 0xf5c   : > { %6071 = vmatprep.subr.mxu0 %v6228_v8 }
 0xf5e   : > { %v3031_v43 = vpop.permute.xlu1 %3030 }
 0xf62   : > { %v3109_v48 = vpop.permute.xlu1 %3108 }
 0xf66   : > { %v3107_v50 = vpop.permute.xlu1 %3106 }
 0xf68   : > { %v6193_v37 = vpop.eup %6192 }
 0xf69   : > { %v2869_v38 = vsel %vm849_vm4, %v6193_v37, 0.0 }
 0xf70   : > { %2952 = vrot.lane.b32.xlu0 %v6435_v13, %s6249_s17 }
 0xf8f   : > { %2870 = vadd.xlane.f32.xlu0 %v2869_v38 }
 0xfa5   : > { %3028 = vrot.lane.b32.xlu0 %v6432_v12, %s6251_s15 }
 0xfe3   : > { %v2868_v39 = vpop.xlane.xlu0 %2867 }
 0xfe4   : > { %6194 = vrcp.f32 %v2868_v39 }
 0xfe7   : > { %v2953_v40 = vpop.permute.xlu0 %2952 }
 0xfe8   : > { %6067 = vmatpush3.msra.mxu1 %v2953_v40 }
 0xfe9   : > { %6076 = vmatprep.subr.mxu1 %v6228_v8 }
 0xff1   : > { %v6195_v41 = vpop.eup %6194 }
 0xff2   : > { %v2873_v42 = vmul.f32 %v6195_v41, %v6191_v30 }
 0xff4   : > { %6064 = vmatmul.mubr.msk.f32.vlgmr.msra.gmra.mxu0 %vm849_vm4, %v2873_v42 }
 0xff5   : > { %6072 = vmatpush3.xpose.msk.msra.mxu0 %vm693_vm3, %v3031_v43  ;;  %6073 = vmatprep.mubr.msk.f32.mxu0 %vm6229_vm2, %v6228_v8 }
 0xff6   : > { %6081 = vmatprep.subr.mxu0 %v6228_v8 }
0x1018   : > { %v2871_v45 = vpop.xlane.xlu0 %2870 }
0x1019   : > { %6196 = vrcp.f32 %v2871_v45 }
0x101c   : > { %v3029_v46 = vpop.permute.xlu0 %3028 }
0x101d   : > { %6074 = vmatmul.mubr.msk.f32.vlgmr.msra.gmra.mxu0 %vm693_vm3, %v3029_v46 }
0x101e   : > { %6083 = vmatprep.mubr.msk.f32.mxu0 %vm6229_vm2, %v6228_v8 }
0x1026   : > { %v6197_v47 = vpop.eup %6196 }
0x1027   : > { %v2875_v49 = vmul.f32 %v6197_v47, %v6193_v37 }
0x1029   : > { %6069 = vmatmul.mubr.msk.f32.vlgmr.msra.gmra.mxu1 %vm849_vm4, %v2875_v49 }
0x102a   : > { %6077 = vmatpush3.xpose.msk.msra.mxu1 %vm693_vm3, %v3109_v48  ;;  %6078 = vmatprep.mubr.msk.f32.mxu1 %vm6229_vm2, %v6228_v8 }
0x102b   : > { %6086 = vmatprep.subr.mxu1 %v6228_v8 }
0x102d   : > { %6079 = vmatmul.mubr.msk.f32.vlgmr.msra.gmra.mxu1 %vm693_vm3, %v3107_v50 }
0x102e   : > { %6088 = vmatprep.mubr.msk.f32.mxu1 %vm6229_vm2, %v6228_v8 }
0x10b4   : > { %v2948_v52 = vpop.f32.mrf.mxu0 }
0x10b6   : > { %v6065_v53 = vpop.f32.mrf.mxu0 }
0x10dd   : > { %v3102_v54 = vpop.f32.mrf.mxu0 }
0x10de   : > { %v3184_v56 = vmul.f32 0.5, %v3102_v54 }
0x10df   : > { %v6075_v58 = vpop.f32.mrf.mxu0 }
0x10e0   : > { %v3186_v59 = vadd.f32 %v3184_v56, %v6453_v17 }
0x10e2   : > { %v3188_v60 = vsel %vm849_vm4, %v3186_v59, -inf }
0x10e3   : > { %3189 = vmax.xlane.f32.xlu0 %v3188_v60 }
0x10e9   : > { %v3024_v61 = vpop.f32.mrf.mxu1 }
0x10eb   : > { %v6070_v62 = vpop.f32.mrf.mxu1 }
0x10ed   : > { %v3180_v63 = vpop.f32.mrf.mxu1 }
0x10ee   : > { %v3185_v0 = vmul.f32 0.5, %v3180_v63  ;;  %v6214_v63 = vld [vmem:[%s7307_s13 + $0x8] sm:$0xff] }
0x10ef   : > { %v6080_v2 = vpop.f32.mrf.mxu1 }
0x10f0   : > { %v3187_v3 = vadd.f32 %v3185_v0, %v6459_v22 }
0x10f2   : > { %v3191_v5 = vsel %vm849_vm4, %v3187_v3, -inf }
0x10f3   : > { %3192 = vmax.xlane.f32.xlu1 %v3191_v5  ;;  %v6215_v5 = vld [vmem:[%s7307_s13] sm:$0xff] }
0x1104   : > { %3210 = vrot.lane.b32.xlu1 %v6432_v12, %s6252_s23 }
0x1108   : > { %3364 = vrot.lane.b32.xlu1 %v6524_v27, %s6253_s18 }
0x110c   : > { %3366 = vrot.lane.b32.xlu1 %v6528_v34, %s6253_s18  ;;  %s7320_s18 = sld [smem:[#allocation3_spill]] }
0x1110   : > { %3374 = vrot.lane.b32.xlu1 %v6562_v9, %s6254_s28 }
0x1114   : > { %3382 = vrot.lane.b32.xlu1 %v6596_v51, %s6255_s21 }
0x1118   : > { %3390 = vrot.lane.b32.xlu1 %v6630_v33, %s6256_s22 }
0x111c   : > { %3398 = vrot.lane.b32.xlu1 %v6664_v15, %s6257_s29 }
0x1120   : > { %3406 = vrot.lane.b32.xlu1 %v3024_v61, %s6258_s24 }
0x116c   : > { %v3190_v12 = vpop.xlane.xlu0 %3189 }
0x116d   : > { %v3194_v17 = vsub.f32 %v3186_v59, %v3190_v12 }
0x116f   : > { %v3196_v22 = vmul.f32 1.442695, %v3194_v17 }
0x1171   : > { %6198 = vpow2.f32 %v3196_v22 }
0x117c   : > { %v3193_v27 = vpop.xlane.xlu1 %3192 }
0x117d   : > { %v3195_v34 = vsub.f32 %v3187_v3, %v3193_v27 }
0x117e   : > { %v6199_v6 = vpop.eup %6198 }
0x117f   : > { %v3198_v7 = vmul.f32 1.442695, %v3195_v34  ;;  %v3200_v9 = vsel %vm849_vm4, %v6199_v6, 0.0 }
0x1180   : > { %v3211_v10 = vpop.permute.xlu1 %3210  ;;  %3201 = vadd.xlane.f32.xlu0 %v3200_v9 }
0x1181   : > { %6200 = vpow2.f32 %v3198_v7  ;;  %6082 = vmatpush3.msra.mxu0 %v3211_v10 }
0x1184   : > { %v3365_v28 = vpop.permute.xlu1 %3364 }
0x1185   : > { %v3418_v37 = vsel %vm693_vm3, %v6492_v55, %v3365_v28  ;;  %v3568_v28 = vld [vmem:[%s6373_s16 + $0x10] sm:$0xff] }
0x1188   : > { %v3367_v30 = vpop.permute.xlu1 %3366 }
0x1189   : > { %v3419_v48 = vsel %vm693_vm3, %v6494_v57, %v3367_v30  ;;  %v5513_v57 = vld [vmem:[%s7319_s14] ss:$0 sm:$0xff]  ;;  %v3621_v30 = vld [vmem:[%s6373_s16 + $0x1b8] sm:$0xff] }
0x118c   : > { %v3375_v32 = vpop.permute.xlu1 %3374 }
0x118d   : > { %v3421_v49 = vsel %vm849_vm4, %v3419_v48, %v3375_v32 }
0x118e   : > { %v6201_v51 = vpop.eup %6200 }
0x118f   : > { %v3203_v33 = vsel %vm849_vm4, %v6201_v51, 0.0 }
0x1190   : > { %3204 = vadd.xlane.f32.xlu0 %v3203_v33  ;;  %v3383_v36 = vpop.permute.xlu1 %3382 }
0x1194   : > { %v3391_v43 = vpop.permute.xlu1 %3390 }
0x1198   : > { %v3399_v47 = vpop.permute.xlu1 %3398 }
0x119c   : > { %v3407_v50 = vpop.permute.xlu1 %3406 }
0x11a6   : > { %3286 = vrot.lane.b32.xlu0 %v6435_v13, %s6252_s23 }
0x11aa   : > { %3372 = vrot.lane.b32.xlu0 %v6558_v1, %s6254_s28 }
0x11ae   : > { %3380 = vrot.lane.b32.xlu0 %v6592_v44, %s6255_s21  ;;  %s7321_s21 = sld [smem:[#allocation7_spill]] (!%p5533_p5) }
0x11b2   : > { %3388 = vrot.lane.b32.xlu0 %v6626_v25, %s6256_s22  ;;  %v600_v25 = vld [vmem:[%s6357_s20 + $0x18] sm:$0xff] }
0x11b3   : > { %6091 = vmatprep.subr.mxu0 %v600_v25 }
0x11b6   : > { %3396 = vrot.lane.b32.xlu0 %v6660_v4, %s6257_s29  ;;  %v599_v4 = vld [vmem:[%s6357_s20 + $0x10] sm:$0xff] }
0x11ba   : > { %3404 = vrot.lane.b32.xlu0 %v2948_v52, %s6258_s24  ;;  %v3424_v52 = vsel %vm3422_vm5, %v3421_v49, %v3383_v36 }
0x11bb   : > { %v3427_v53 = vsel %vm3425_vm6, %v3424_v52, %v3391_v43 }
0x11bc   : > { %v3430_v54 = vsel %vm3428_vm7, %v3427_v53, %v3399_v47  ;;  %v3618_v53 = vld [vmem:[%s6373_s16 + $0x1a0] sm:$0xff] }
0x11bd   : > { %v3433_v56 = vsel %vm3431_vm9, %v3430_v54, %v3407_v50  ;;  %v3620_v54 = vld [vmem:[%s6373_s16 + $0x1b0] sm:$0xff] }
0x1209   : > { %v3202_v11 = vpop.xlane.xlu0 %3201 }
0x120a   : > { %6202 = vrcp.f32 %v3202_v11 }
0x1217   : > { %v6203_v14 = vpop.eup %6202 }
0x1218   : > { %v3207_v15 = vmul.f32 %v6203_v14, %v6199_v6  ;;  %v3615_v14 = vld [vmem:[%s6373_s16 + $0x188] sm:$0xff] }
0x1219   : > { %v3205_v16 = vpop.xlane.xlu0 %3204 }
0x121a   : > { %6204 = vrcp.f32 %v3205_v16  ;;  %6084 = vmatmul.mubr.msk.f32.vlgmr.msra.gmra.mxu0 %vm849_vm4, %v3207_v15  ;;  %v3617_v15 = vld [vmem:[%s6373_s16 + $0x198] sm:$0xff]  ;;  %v3614_v16 = vld [vmem:[%s6373_s16 + $0x180] sm:$0xff] }
0x121b   : > { %6092 = vmatpush3.msra.mxu0 %v600_v25  ;;  %v3598_v25 = vld [vmem:[%s6373_s16 + $0x100] sm:$0xff] }
0x121c   : > { %6093 = vmatprep.subr.mxu0 %v599_v4 }
0x121d   : > { %v3287_v13 = vpop.permute.xlu0 %3286  ;;  %6094 = vmatpush3.msra.mxu0 %v599_v4  ;;  %v3600_v4 = vld [vmem:[%s6373_s16 + $0x110] sm:$0xff] }
0x121e   : > { %6087 = vmatpush3.msra.mxu1 %v3287_v13  ;;  %6095 = vmatprep.subr.mxu0 %v598_v18  ;;  %v3616_v13 = vld [vmem:[%s6373_s16 + $0x190] sm:$0xff] }
0x121f   : > { %6096 = vmatpush3.msra.mxu0 %v598_v18  ;;  %4001 = vmatprep.subr.mxu1 %v3615_v14  ;;  %v3583_v18 = vld [vmem:[%s6373_s16 + $0x88] sm:$0xff]  ;;  %v3590_v14 = vld [vmem:[%s6373_s16 + $0xc0] sm:$0xff] }
0x1220   : > { %6097 = vmatprep.subr.mxu0 %v597_v19 }
0x1221   : > { %6098 = vmatpush3.msra.mxu0 %v597_v19  ;;  %v3373_v26 = vpop.permute.xlu0 %3372  ;;  %v3585_v19 = vld [vmem:[%s6373_s16 + $0x98] sm:$0xff] }
0x1222   : > { %v3420_v38 = vsel %vm849_vm4, %v3418_v37, %v3373_v26  ;;  %4078 = vmatprep.subr.mxu0 %v3617_v15  ;;  %v3566_v26 = vld [vmem:[%s6373_s16] sm:$0xff]  ;;  %v3554_v37 = vlaneseq  ;;  %v3592_v15 = vld [vmem:[%s6373_s16 + $0xd0] sm:$0xff] }
0x1225   : > { %v3381_v29 = vpop.permute.xlu0 %3380 }
0x1226   : > { %v3423_v40 = vsel %vm3422_vm5, %v3420_v38, %v3381_v29  ;;  %v3619_v29 = vld [vmem:[%s6373_s16 + $0x1a8] sm:$0xff] }
0x1227   : > { %v6205_v1 = vpop.eup %6204 }
0x1228   : > { %v3209_v44 = vmul.f32 %v6205_v1, %v6201_v51  ;;  %v3599_v1 = vld [vmem:[%s6373_s16 + $0x108] sm:$0xff] }
0x1229   : > { %v3389_v31 = vpop.permute.xlu0 %3388 }
0x122a   : > { %6089 = vmatmul.mubr.msk.f32.vlgmr.msra.gmra.mxu1 %vm849_vm4, %v3209_v44  ;;  %v3426_v41 = vsel %vm3425_vm6, %v3423_v40, %v3389_v31  ;;  %v3601_v44 = vld [vmem:[%s6373_s16 + $0x118] sm:$0xff]  ;;  %v6775_v40 = vshrl.u32 %v3554_v37, 7 }
0x122b   : > { %4041 = vmatprep.mubr.f32.mxu1 %v6228_v8  ;;  %4002 = vmatpush1.msra.mxu1 %v3614_v16  ;;  %v3575_v16 = vld [vmem:[%s6373_s16 + $0x48] sm:$0xff]  ;;  %v3663_v37 = vld [vmem:[%s6385_s4 + $0xf8] sm:$0xff] }
0x122c   : > { %4003 = vmatprep.subr.mxu1 %v3599_v1  ;;  %v6782_v43 = vsub.s32 1, %v6775_v40  ;;  %v3574_v1 = vld [vmem:[%s6373_s16 + $0x40] sm:$0xff] }
0x122d   : > { %v3397_v35 = vpop.permute.xlu0 %3396  ;;  %4004 = vmatpush1.msra.mxu1 %v3598_v25  ;;  %v3627_v25 = vld [vmem:[%s6373_s16 + $0x1e8] sm:$0xff] }
0x122e   : > { %v3429_v42 = vsel %vm3428_vm7, %v3426_v41, %v3397_v35  ;;  %4005 = vmatprep.subr.mxu1 %v3583_v18  ;;  %v6778_v41 = vsub.s32 0, %v6775_v40  ;;  %v3626_v18 = vld [vmem:[%s6373_s16 + $0x1e0] sm:$0xff] }
0x1231   : > { %v3405_v39 = vpop.permute.xlu0 %3404 }
0x1232   : > { %v3432_v45 = vsel %vm3431_vm9, %v3429_v42, %v3405_v39  ;;  %v3526_v42 = vld [vmem:[%s7320_s18] sm:$0x3] }
0x12da   : > { %v3282_v20 = vpop.f32.mrf.mxu0 }
0x12db   : > { %3412 = vrot.lane.b32.xlu0 %v3282_v20, %s6259_s12  ;;  %v3582_v20 = vld [vmem:[%s6373_s16 + $0x80] sm:$0xff] }
0x12dc   : > { %v6085_v21 = vpop.f32.mrf.mxu0  ;;  %4006 = vmatpush1.msra.mxu1 %v3582_v20  ;;  %v3611_v20 = vld [vmem:[%s6373_s16 + $0x168] sm:$0xff] }
0x12dd   : > { %v3584_v21 = vld [vmem:[%s6373_s16 + $0x90] sm:$0xff] }
0x12ea   : > { %v3358_v23 = vpop.f32.mrf.mxu1 }
0x12eb   : > { %3414 = vrot.lane.b32.xlu1 %v3358_v23, %s6259_s12  ;;  %v3567_v23 = vld [vmem:[%s6373_s16 + $0x8] sm:$0xff] }
0x12ec   : > { %v6090_v24 = vpop.f32.mrf.mxu1  ;;  %4007 = vmatprep.subr.mxu1 %v3567_v23  ;;  %v3610_v23 = vld [vmem:[%s6373_s16 + $0x160] sm:$0xff] }
0x12ed   : > { %v3569_v24 = vld [vmem:[%s6373_s16 + $0x18] sm:$0xff]  ;;  %4008 = vmatpush1.msra.mxu1 %v3566_v26  ;;  %v3595_v26 = vld [vmem:[%s6373_s16 + $0xe8] sm:$0xff] }
0x12ee   : > { %4155 = vmatprep.subr.mxu1 %v3619_v29  ;;  %v3594_v29 = vld [vmem:[%s6373_s16 + $0xe0] sm:$0xff] }
0x134d   : > { %v3413_v46 = vpop.permute.xlu0 %3412 }
0x134e   : > { %v3435_v55 = vsel %vm3434_vm8, %v3432_v45, %v3413_v46  ;;  %v3557_v45 = vrot.slane %v3526_v42, %v6778_v41 }
0x134f   : > { %6099 = vmatprep.mubr.msk.f32.mxu0 %vm608_vm1, %v3435_v55  ;;  %v3563_v55 = vrot.slane %v3526_v42, %v6782_v43  ;;  %v3679_v42 = vld [vmem:[%s6385_s4 + $0x178] sm:$0xff] }
0x135d   : > { %v3415_v58 = vpop.permute.xlu1 %3414 }
0x135e   : > { %v3436_v59 = vsel %vm3434_vm8, %v3433_v56, %v3415_v58  ;;  %v3603_v56 = vld [vmem:[%s6373_s16 + $0x128] sm:$0xff]  ;;  %v3605_v58 = vld [vmem:[%s6373_s16 + $0x138] sm:$0xff] }
0x135f   : > { %6100 = vmatmul.mubr.msk.f32.vlgmr.msra.gmra.mxu0 %vm608_vm1, %v3436_v59 }
0x1360   : > { %4118 = vmatprep.mubr.f32.mxu0 %v6228_v8  ;;  %4079 = vmatpush1.msra.mxu0 %v3616_v13  ;;  %v3577_v13 = vld [vmem:[%s6373_s16 + $0x58] sm:$0xff] }
0x1361   : > { %4080 = vmatprep.subr.mxu0 %v3601_v44  ;;  %v3576_v44 = vld [vmem:[%s6373_s16 + $0x50] sm:$0xff] }
0x1362   : > { %4081 = vmatpush1.msra.mxu0 %v3600_v4  ;;  %v3629_v4 = vld [vmem:[%s6373_s16 + $0x1f8] sm:$0xff] }
0x1363   : > { %4082 = vmatprep.subr.mxu0 %v3585_v19  ;;  %v3628_v19 = vld [vmem:[%s6373_s16 + $0x1f0] sm:$0xff] }
0x1364   : > { %4083 = vmatpush1.msra.mxu0 %v3584_v21  ;;  %v3613_v21 = vld [vmem:[%s6373_s16 + $0x178] sm:$0xff] }
0x1365   : > { %4084 = vmatprep.subr.mxu0 %v3569_v24  ;;  %v3612_v24 = vld [vmem:[%s6373_s16 + $0x170] sm:$0xff] }
0x1366   : > { %4085 = vmatpush1.msra.mxu0 %v3568_v28  ;;  %v3597_v28 = vld [vmem:[%s6373_s16 + $0xf8] sm:$0xff] }
0x1367   : > { %4232 = vmatprep.subr.mxu0 %v3621_v30  ;;  %v3596_v30 = vld [vmem:[%s6373_s16 + $0xf0] sm:$0xff] }
0x141f   : > { %v6101_v60 = vpop.f32.mrf.mxu0 }
0x1420   : > { %v3521_v61 = vadd.f32 %v6101_v60, %v5513_v57  ;;  %v3604_v60 = vld [vmem:[%s6373_s16 + $0x130] sm:$0xff] }
0x1421   : > { %v3515_v62 = vpop.f32.mrf.mxu0 }
0x1422   : > { %v3525_v0 = vadd.f32 %v6214_v63, %v3521_v61  ;;  %v3516_v2 = vadd.f32 %v5513_v57, %v3515_v62  ;;  %v3602_v57 = vld [vmem:[%s6373_s16 + $0x120] sm:$0xff]  ;;  %v3587_v62 = vld [vmem:[%s6373_s16 + $0xa8] sm:$0xff]  ;;  %v3589_v63 = vld [vmem:[%s6373_s16 + $0xb8] sm:$0xff] }
0x1424   : > { %v3530_v3 = vsel %vm608_vm1, %v3525_v0, 0.0  ;;  %v3524_v12 = vadd.f32 %v6215_v5, %v3516_v2  ;;  %v3588_v2 = vld [vmem:[%s6373_s16 + $0xb0] sm:$0xff]  ;;  %v3573_v5 = vld [vmem:[%s6373_s16 + $0x38] sm:$0xff] }
0x1425   : > { %3531 = vadd.xlane.f32.xlu1 %v3530_v3  ;;  %v3571_v3 = vld [vmem:[%s6373_s16 + $0x28] sm:$0xff] }
0x1426   : > { %v3527_v17 = vsel %vm608_vm1, %v3524_v12, 0.0 }
0x1427   : > { %3528 = vadd.xlane.f32.xlu0 %v3527_v17  ;;  %v3572_v17 = vld [vmem:[%s6373_s16 + $0x30] sm:$0xff] }
0x14ae   : > { %v3532_v22 = vpop.xlane.xlu1 %3531 }
0x14af   : > { %v3535_v27 = vmul.f32 0.03125, %v3532_v22  ;;  %v3623_v22 = vld [vmem:[%s6373_s16 + $0x1c8] sm:$0xff] }
0x14b0   : > { %v3529_v34 = vpop.xlane.xlu0 %3528 }
0x14b1   : > { %v3534_v6 = vmul.f32 0.03125, %v3529_v34  ;;  %v6751_v7 = vsub.f32 %v3525_v0, %v3535_v27  ;;  %v3586_v0 = vld [vmem:[%s6373_s16 + $0xa0] sm:$0xff]  ;;  %v3625_v27 = vld [vmem:[%s6373_s16 + $0x1d8] sm:$0xff] }
0x14b2   : > { %v3622_v34 = vld [vmem:[%s6373_s16 + $0x1c0] sm:$0xff] }
0x14b3   : > { %v3536_v9 = vsub.f32 %v3524_v12, %v3534_v6  ;;  %v3539_v33 = vmul.f32 %v6751_v7, %v6751_v7  ;;  %v3570_v12 = vld [vmem:[%s6373_s16 + $0x20] sm:$0xff]  ;;  %v3624_v6 = vld [vmem:[%s6373_s16 + $0x1d0] sm:$0xff] }
0x14b5   : > { %v3538_v10 = vmul.f32 %v3536_v9, %v3536_v9  ;;  %v3543_v11 = vsel %vm608_vm1, %v3539_v33, 0.0  ;;  %v3591_v33 = vld [vmem:[%s6373_s16 + $0xc8] sm:$0xff] }
0x14b7   : > { %v3540_v51 = vsel %vm608_vm1, %v3538_v10, 0.0  ;;  %v3606_v10 = vld [vmem:[%s6373_s16 + $0x140] sm:$0xff] }
0x14b8   : > { %3541 = vadd.xlane.f32.xlu0 %v3540_v51  ;;  %v3608_v51 = vld [vmem:[%s6373_s16 + $0x150] sm:$0xff] }
0x14bc   : > { %3544 = vadd.xlane.f32.xlu0 %v3543_v11  ;;  %v3593_v11 = vld [vmem:[%s6373_s16 + $0xd8] sm:$0xff] }
0x1541   : > { %v3542_v31 = vpop.xlane.xlu0 %3541 }
0x1542   : > { %v3546_v32 = vmul.f32 0.03125, %v3542_v31  ;;  %v3579_v31 = vld [vmem:[%s6373_s16 + $0x68] sm:$0xff] }
0x1544   : > { %v3548_v35 = vadd.f32 1e-05, %v3546_v32  ;;  %v3581_v32 = vld [vmem:[%s6373_s16 + $0x78] sm:$0xff] }
0x1545   : > { %v3545_v36 = vpop.xlane.xlu0 %3544 }
0x1546   : > { %6206 = vrsqrt.f32 %v3548_v35  ;;  %v3547_v38 = vmul.f32 0.03125, %v3545_v36  ;;  %v3578_v35 = vld [vmem:[%s6373_s16 + $0x60] sm:$0xff]  ;;  %v3580_v36 = vld [vmem:[%s6373_s16 + $0x70] sm:$0xff] }
0x1548   : > { %v3549_v39 = vadd.f32 1e-05, %v3547_v38  ;;  %v3695_v38 = vld [vmem:[%s6385_s4 + $0x1f8] sm:$0xff] }
0x154a   : > { %6208 = vrsqrt.f32 %v3549_v39  ;;  %v3647_v39 = vld [vmem:[%s6385_s4 + $0x78] sm:$0xff] }
0x1553   : > { %v6207_v46 = vpop.eup %6206 }
0x1554   : > { %v3552_v47 = vmul.f32 %v6207_v46, %v3536_v9  ;;  %v3609_v9 = vld [vmem:[%s6373_s16 + $0x158] sm:$0xff]  ;;  %v3694_v46 = vld [vmem:[%s6385_s4 + $0x1f0] sm:$0xff] }
0x1556   : > { %v3558_v48 = vmul.f32 %v3557_v45, %v3552_v47  ;;  %v3678_v47 = vld [vmem:[%s6385_s4 + $0x170] sm:$0xff] }
0x1557   : > { %v6209_v49 = vpop.eup %6208 }
0x1558   : > { %v6786_v50 = vadd.f32 %v3563_v55, %v3558_v48  ;;  %v3553_v52 = vmul.f32 %v6209_v49, %v6751_v7  ;;  %v3607_v7 = vld [vmem:[%s6373_s16 + $0x148] sm:$0xff] }
0x1559   : > { %v3693_v48 = vld [vmem:[%s6385_s4 + $0x1e8] sm:$0xff] }
0x155a   : > { %v3559_v59 = vmul.f32 %v3557_v45, %v3553_v52  ;;  %5516 = vmatmul.mubr.msk.f32.vlgmr.msra.gmra.mxu1 %vm608_vm1, %v6786_v50  ;;  %5518 = vmatmul.mubr.msk.f32.vlgmr.msra.gmra.mxu0 %vm608_vm1, %v6786_v50  ;;  %v3662_v45 = vld [vmem:[%s6385_s4 + $0xf0] sm:$0xff]  ;;  %v3645_v49 = vld [vmem:[%s6385_s4 + $0x68] sm:$0xff] }
0x155b   : > { %4156 = vmatpush1.msra.mxu1 %v3618_v53  ;;  %4233 = vmatpush1.msra.mxu0 %v3620_v54  ;;  %v3677_v52 = vld [vmem:[%s6385_s4 + $0x168] sm:$0xff]  ;;  %v3660_v53 = vld [vmem:[%s6385_s4 + $0xe0] sm:$0xff] }
0x155c   : > { %v6799_v61 = vadd.f32 %v3563_v55, %v3559_v59  ;;  %4157 = vmatprep.subr.mxu1 %v3603_v56  ;;  %4234 = vmatprep.subr.mxu0 %v3605_v58  ;;  %v3646_v55 = vld [vmem:[%s6385_s4 + $0x70] sm:$0xff]  ;;  %v3692_v54 = vld [vmem:[%s6385_s4 + $0x1e0] sm:$0xff]  ;;  %v3659_v59 = vld [vmem:[%s6385_s4 + $0xd8] sm:$0xff] }
0x155d   : > { %4047 = vmatprep.mubr.f32.mxu1 %v6228_v8  ;;  %4124 = vmatprep.mubr.f32.mxu0 %v6228_v8  ;;  %v3644_v56 = vld [vmem:[%s6385_s4 + $0x60] sm:$0xff] }
0x155e   : > { %4158 = vmatpush1.msra.mxu1 %v3602_v57  ;;  %4235 = vmatpush1.msra.mxu0 %v3604_v60  ;;  %v3676_v58 = vld [vmem:[%s6385_s4 + $0x160] sm:$0xff]  ;;  %v3691_v57 = vld [vmem:[%s6385_s4 + $0x1d8] sm:$0xff] }
0x155f   : > { %5517 = vmatmul.mubr.msk.f32.gmra.mxu1 %vm608_vm1, %v6799_v61  ;;  %5519 = vmatmul.mubr.msk.f32.gmra.mxu0 %vm608_vm1, %v6799_v61  ;;  %v3643_v60 = vld [vmem:[%s6385_s4 + $0x58] sm:$0xff] }
0x1560   : > { %4159 = vmatprep.subr.mxu1 %v3587_v62  ;;  %4236 = vmatprep.subr.mxu0 %v3589_v63  ;;  %v3675_v62 = vld [vmem:[%s6385_s4 + $0x158] sm:$0xff]  ;;  %v3658_v63 = vld [vmem:[%s6385_s4 + $0xd0] sm:$0xff] }
0x1561   : > { %4160 = vmatpush1.msra.mxu1 %v3586_v0  ;;  %4237 = vmatpush1.msra.mxu0 %v3588_v2  ;;  %v3690_v0 = vld [vmem:[%s6385_s4 + $0x1d0] sm:$0xff] }
0x1562   : > { %4161 = vmatprep.subr.mxu1 %v3571_v3  ;;  %4238 = vmatprep.subr.mxu0 %v3573_v5  ;;  %v3642_v2 = vld [vmem:[%s6385_s4 + $0x50] sm:$0xff]  ;;  %v3657_v5 = vld [vmem:[%s6385_s4 + $0xc8] sm:$0xff] }
0x1563   : > { %4162 = vmatpush1.msra.mxu1 %v3570_v12  ;;  %4195 = vmatprep.mubr.f32.mxu1 %v6228_v8  ;;  %v3674_v3 = vld [vmem:[%s6385_s4 + $0x150] sm:$0xff]  ;;  %v3689_v12 = vld [vmem:[%s6385_s4 + $0x1c8] sm:$0xff] }
0x1564   : > { %4239 = vmatpush1.msra.mxu0 %v3572_v17  ;;  %4272 = vmatprep.mubr.f32.mxu0 %v6228_v8  ;;  %v3641_v17 = vld [vmem:[%s6385_s4 + $0x48] sm:$0xff] }
0x1565   : > { %5520 = vmatmul.mubr.msk.f32.vlgmr.msra.gmra.mxu1 %vm608_vm1, %v6786_v50  ;;  %5522 = vmatmul.mubr.msk.f32.vlgmr.msra.gmra.mxu0 %vm608_vm1, %v6786_v50 }
0x1566   : > { %4309 = vmatprep.subr.mxu1 %v3623_v22  ;;  %4386 = vmatprep.subr.mxu0 %v3625_v27  ;;  %v3673_v22 = vld [vmem:[%s6385_s4 + $0x148] sm:$0xff]  ;;  %v3656_v27 = vld [vmem:[%s6385_s4 + $0xc0] sm:$0xff] }
0x1567   : > { %4310 = vmatpush1.msra.mxu1 %v3622_v34  ;;  %4387 = vmatpush1.msra.mxu0 %v3624_v6  ;;  %v3688_v34 = vld [vmem:[%s6385_s4 + $0x1c0] sm:$0xff] }
0x1568   : > { %4311 = vmatprep.subr.mxu1 %v3607_v7  ;;  %4388 = vmatprep.subr.mxu0 %v3609_v9  ;;  %v3640_v6 = vld [vmem:[%s6385_s4 + $0x40] sm:$0xff]  ;;  %v3655_v9 = vld [vmem:[%s6385_s4 + $0xb8] sm:$0xff] }
0x1569   : > { %4201 = vmatprep.mubr.f32.mxu1 %v6228_v8  ;;  %4278 = vmatprep.mubr.f32.mxu0 %v6228_v8  ;;  %v3672_v7 = vld [vmem:[%s6385_s4 + $0x140] sm:$0xff] }
0x156a   : > { %4312 = vmatpush1.msra.mxu1 %v3606_v10  ;;  %4389 = vmatpush1.msra.mxu0 %v3608_v51  ;;  %v3687_v10 = vld [vmem:[%s6385_s4 + $0x1b8] sm:$0xff] }
0x156b   : > { %5521 = vmatmul.mubr.msk.f32.gmra.mxu1 %vm608_vm1, %v6799_v61  ;;  %5523 = vmatmul.mubr.msk.f32.gmra.mxu0 %vm608_vm1, %v6799_v61  ;;  %v3639_v51 = vld [vmem:[%s6385_s4 + $0x38] sm:$0xff] }
0x156c   : > { %4313 = vmatprep.subr.mxu1 %v3591_v33  ;;  %4390 = vmatprep.subr.mxu0 %v3593_v11  ;;  %v3671_v33 = vld [vmem:[%s6385_s4 + $0x138] sm:$0xff]  ;;  %v3654_v11 = vld [vmem:[%s6385_s4 + $0xb0] sm:$0xff] }
0x156d   : > { %4314 = vmatpush1.msra.mxu1 %v3590_v14  ;;  %4391 = vmatpush1.msra.mxu0 %v3592_v15  ;;  %v3686_v14 = vld [vmem:[%s6385_s4 + $0x1b0] sm:$0xff] }
0x156e   : > { %4315 = vmatprep.subr.mxu1 %v3575_v16  ;;  %4392 = vmatprep.subr.mxu0 %v3577_v13  ;;  %v3638_v15 = vld [vmem:[%s6385_s4 + $0x30] sm:$0xff]  ;;  %v3653_v13 = vld [vmem:[%s6385_s4 + $0xa8] sm:$0xff] }
0x156f   : > { %4316 = vmatpush1.msra.mxu1 %v3574_v1  ;;  %4349 = vmatprep.mubr.f32.mxu1 %v6228_v8  ;;  %v3670_v16 = vld [vmem:[%s6385_s4 + $0x130] sm:$0xff]  ;;  %v3685_v1 = vld [vmem:[%s6385_s4 + $0x1a8] sm:$0xff] }
0x1570   : > { %4393 = vmatpush1.msra.mxu0 %v3576_v44  ;;  %4426 = vmatprep.mubr.f32.mxu0 %v6228_v8  ;;  %v3637_v44 = vld [vmem:[%s6385_s4 + $0x28] sm:$0xff] }
0x1571   : > { %5524 = vmatmul.mubr.msk.f32.vlgmr.msra.gmra.mxu1 %vm608_vm1, %v6786_v50  ;;  %5526 = vmatmul.mubr.msk.f32.vlgmr.msra.gmra.mxu0 %vm608_vm1, %v6786_v50 }
0x1572   : > { %4463 = vmatprep.subr.mxu1 %v3627_v25  ;;  %4540 = vmatprep.subr.mxu0 %v3629_v4  ;;  %v3669_v25 = vld [vmem:[%s6385_s4 + $0x128] sm:$0xff]  ;;  %v3652_v4 = vld [vmem:[%s6385_s4 + $0xa0] sm:$0xff] }
0x1573   : > { %4464 = vmatpush1.msra.mxu1 %v3626_v18  ;;  %4541 = vmatpush1.msra.mxu0 %v3628_v19  ;;  %v3684_v18 = vld [vmem:[%s6385_s4 + $0x1a0] sm:$0xff] }
0x1574   : > { %4465 = vmatprep.subr.mxu1 %v3611_v20  ;;  %4542 = vmatprep.subr.mxu0 %v3613_v21  ;;  %v3636_v19 = vld [vmem:[%s6385_s4 + $0x20] sm:$0xff]  ;;  %v3651_v21 = vld [vmem:[%s6385_s4 + $0x98] sm:$0xff] }
0x1575   : > { %4355 = vmatprep.mubr.f32.mxu1 %v6228_v8  ;;  %4432 = vmatprep.mubr.f32.mxu0 %v6228_v8  ;;  %v3668_v20 = vld [vmem:[%s6385_s4 + $0x120] sm:$0xff] }
0x1576   : > { %4466 = vmatpush1.msra.mxu1 %v3610_v23  ;;  %4543 = vmatpush1.msra.mxu0 %v3612_v24  ;;  %v3683_v23 = vld [vmem:[%s6385_s4 + $0x198] sm:$0xff] }
0x1577   : > { %5525 = vmatmul.mubr.msk.f32.gmra.mxu1 %vm608_vm1, %v6799_v61  ;;  %5527 = vmatmul.mubr.msk.f32.gmra.mxu0 %vm608_vm1, %v6799_v61  ;;  %v3635_v24 = vld [vmem:[%s6385_s4 + $0x18] sm:$0xff] }
0x1578   : > { %4467 = vmatprep.subr.mxu1 %v3595_v26  ;;  %4544 = vmatprep.subr.mxu0 %v3597_v28  ;;  %v3667_v26 = vld [vmem:[%s6385_s4 + $0x118] sm:$0xff]  ;;  %v3650_v28 = vld [vmem:[%s6385_s4 + $0x90] sm:$0xff] }
0x1579   : > { %4468 = vmatpush1.msra.mxu1 %v3594_v29  ;;  %4545 = vmatpush1.msra.mxu0 %v3596_v30  ;;  %v3682_v29 = vld [vmem:[%s6385_s4 + $0x190] sm:$0xff] }
0x157a   : > { %4469 = vmatprep.subr.mxu1 %v3579_v31  ;;  %4546 = vmatprep.subr.mxu0 %v3581_v32  ;;  %v3634_v30 = vld [vmem:[%s6385_s4 + $0x10] sm:$0xff]  ;;  %v3649_v32 = vld [vmem:[%s6385_s4 + $0x88] sm:$0xff] }
0x157b   : > { %4470 = vmatpush1.msra.mxu1 %v3578_v35  ;;  %4503 = vmatprep.mubr.f32.mxu1 %v6228_v8  ;;  %v3666_v31 = vld [vmem:[%s6385_s4 + $0x110] sm:$0xff]  ;;  %v3681_v35 = vld [vmem:[%s6385_s4 + $0x188] sm:$0xff] }
0x157c   : > { %4547 = vmatpush1.msra.mxu0 %v3580_v36  ;;  %4580 = vmatprep.mubr.f32.mxu0 %v6228_v8  ;;  %v3633_v36 = vld [vmem:[%s6385_s4 + $0x8] sm:$0xff] }
0x157d   : > { %5528 = vmatmul.mubr.msk.f32.vlgmr.msra.gmra.mxu1 %vm608_vm1, %v6786_v50  ;;  %5530 = vmatmul.mubr.msk.f32.vlgmr.msra.gmra.mxu0 %vm608_vm1, %v6786_v50 }
0x157e   : > { %4509 = vmatprep.mubr.f32.mxu1 %v6228_v8  ;;  %4586 = vmatprep.mubr.f32.mxu0 %v6228_v8  ;;  %v3661_v8 = vld [vmem:[%s6385_s4 + $0xe8] sm:$0xff] }
0x157f   : > { %5616 = vmatprep.subr.mxu1 %v3663_v37  ;;  %5654 = vmatprep.subr.mxu0 %v3695_v38  ;;  %v3665_v37 = vld [vmem:[%s6385_s4 + $0x108] sm:$0xff]  ;;  %v3648_v38 = vld [vmem:[%s6385_s4 + $0x80] sm:$0xff] }
0x1580   : > { %5617 = vmatpush3.msra.mxu1 %v3647_v39  ;;  %5655 = vmatpush3.msra.mxu0 %v3679_v42  ;;  %v3680_v39 = vld [vmem:[%s6385_s4 + $0x180] sm:$0xff] }
0x1581   : > { %5529 = vmatmul.mubr.msk.f32.gmra.mxu1 %vm608_vm1, %v6799_v61  ;;  %5531 = vmatmul.mubr.msk.f32.gmra.mxu0 %vm608_vm1, %v6799_v61  ;;  %v3632_v42 = vld [vmem:[%s6385_s4] sm:$0xff] }
0x1582   : > { %5618 = vmatprep.subr.mxu1 %v3662_v45  ;;  %5656 = vmatprep.subr.mxu0 %v3694_v46  ;;  %v3664_v45 = vld [vmem:[%s6385_s4 + $0x100] sm:$0xff]  ;;  %v3727_v46 = vld [vmem:[%s6385_s4 + $0x2f8] sm:$0xff] }
0x1583   : > { %5619 = vmatpush3.msra.mxu1 %v3646_v55  ;;  %5657 = vmatpush3.msra.mxu0 %v3678_v47  ;;  %v3759_v55 = vld [vmem:[%s6385_s4 + $0x3f8] sm:$0xff]  ;;  %v3909_v47 = vsub.s32 4, %v6775_v40 }
0x1584   : > { %5620 = vmatprep.subr.mxu1 %v3661_v8  ;;  %5658 = vmatprep.subr.mxu0 %v3693_v48  ;;  %v3917_v8 = vsub.s32 6, %v6775_v40  ;;  %v6952_v48 = vld [vmem:[%s6379_s19 + $0x8] sm:$0xff] }
0x1585   : > { %5621 = vmatpush3.msra.mxu1 %v3645_v49  ;;  %5659 = vmatpush3.msra.mxu0 %v3677_v52  ;;  %v6957_v49 = vrot.slane %v6952_v48, %v3909_v47 }
0x1586   : > { %5622 = vmatprep.subr.mxu1 %v3660_v53  ;;  %5660 = vmatprep.subr.mxu0 %v3692_v54  ;;  %v6962_v52 = vrot.slane %v6952_v48, %v3917_v8  ;;  %v3901_v53 = vsub.s32 2, %v6775_v40  ;;  %v6966_v54 = vld [vmem:[%s6379_s19] sm:$0xff] }
0x1587   : > { %5623 = vmatpush3.msra.mxu1 %v3644_v56  ;;  %5661 = vmatpush3.msra.mxu0 %v3676_v58  ;;  %v3905_v56 = vsub.s32 3, %v6775_v40  ;;  %v3894_v58 = vrot.slane %v6966_v54, %v6778_v41 }
0x1588   : > { %5624 = vmatprep.subr.mxu1 %v3659_v59  ;;  %5662 = vmatprep.subr.mxu0 %v3691_v57  ;;  %v3902_v59 = vrot.slane %v6966_v54, %v3901_v53  ;;  %v3898_v57 = vrot.slane %v6966_v54, %v6782_v43 }
0x1589   : > { %5625 = vmatpush3.msra.mxu1 %v3643_v60  ;;  %5663 = vmatpush3.msra.mxu0 %v3675_v62  ;;  %v3906_v60 = vrot.slane %v6966_v54, %v3905_v56 }
0x158a   : > { %5626 = vmatprep.subr.mxu1 %v3658_v63  ;;  %5664 = vmatprep.subr.mxu0 %v3690_v0 }
0x158b   : > { %5627 = vmatpush3.msra.mxu1 %v3642_v2  ;;  %5665 = vmatpush3.msra.mxu0 %v3674_v3 }
0x158c   : > { %5628 = vmatprep.subr.mxu1 %v3657_v5  ;;  %5666 = vmatprep.subr.mxu0 %v3689_v12 }
0x158d   : > { %5629 = vmatpush3.msra.mxu1 %v3641_v17  ;;  %5667 = vmatpush3.msra.mxu0 %v3673_v22 }
0x158e   : > { %5630 = vmatprep.subr.mxu1 %v3656_v27  ;;  %5668 = vmatprep.subr.mxu0 %v3688_v34 }
0x158f   : > { %5631 = vmatpush3.msra.mxu1 %v3640_v6  ;;  %5669 = vmatpush3.msra.mxu0 %v3672_v7 }
0x1590   : > { %5632 = vmatprep.subr.mxu1 %v3655_v9  ;;  %5670 = vmatprep.subr.mxu0 %v3687_v10  ;;  %v3711_v10 = vld [vmem:[%s6385_s4 + $0x278] sm:$0xff] }
0x1591   : > { %5633 = vmatpush3.msra.mxu1 %v3639_v51  ;;  %5671 = vmatpush3.msra.mxu0 %v3671_v33  ;;  %v3743_v51 = vld [vmem:[%s6385_s4 + $0x378] sm:$0xff]  ;;  %v3913_v33 = vsub.s32 5, %v6775_v40 }
0x1592   : > { %5634 = vmatprep.subr.mxu1 %v3654_v11  ;;  %5672 = vmatprep.subr.mxu0 %v3686_v14  ;;  %v3921_v11 = vsub.s32 7, %v6775_v40  ;;  %v3854_v40 = vld [vmem:[%s6385_s4 + $0x6f0] sm:$0xff] }
0x1593   : > { %5635 = vmatpush3.msra.mxu1 %v3638_v15  ;;  %5673 = vmatpush3.msra.mxu0 %v3670_v16 }
0x1594   : > { %5636 = vmatprep.subr.mxu1 %v3653_v13  ;;  %5674 = vmatprep.subr.mxu0 %v3685_v1  ;;  %v3726_v13 = vld [vmem:[%s6385_s4 + $0x2f0] sm:$0xff] }
0x1595   : > { %5637 = vmatpush3.msra.mxu1 %v3637_v44  ;;  %5675 = vmatpush3.msra.mxu0 %v3669_v25  ;;  %v3758_v1 = vld [vmem:[%s6385_s4 + $0x3f0] sm:$0xff] }
0x1596   : > { %5638 = vmatprep.subr.mxu1 %v3652_v4  ;;  %5676 = vmatprep.subr.mxu0 %v3684_v18  ;;  %v3710_v18 = vld [vmem:[%s6385_s4 + $0x270] sm:$0xff] }
0x1597   : > { %5639 = vmatpush3.msra.mxu1 %v3636_v19  ;;  %5677 = vmatpush3.msra.mxu0 %v3668_v20  ;;  %v3742_v19 = vld [vmem:[%s6385_s4 + $0x370] sm:$0xff] }
0x1598   : > { %5640 = vmatprep.subr.mxu1 %v3651_v21  ;;  %5678 = vmatprep.subr.mxu0 %v3683_v23  ;;  %v6990_v23 = vrot.slane %v6966_v54, %v3913_v33 }
0x1599   : > { %5641 = vmatpush3.msra.mxu1 %v3635_v24  ;;  %5679 = vmatpush3.msra.mxu0 %v3667_v26  ;;  %v6995_v24 = vrot.slane %v6966_v54, %v3921_v11  ;;  %v3725_v26 = vld [vmem:[%s6385_s4 + $0x2e8] sm:$0xff] }
0x159a   : > { %5642 = vmatprep.subr.mxu1 %v3650_v28  ;;  %5680 = vmatprep.subr.mxu0 %v3682_v29  ;;  %v3757_v28 = vld [vmem:[%s6385_s4 + $0x3e8] sm:$0xff] }
0x159b   : > { %5643 = vmatpush3.msra.mxu1 %v3634_v30  ;;  %5681 = vmatpush3.msra.mxu0 %v3666_v31 }
0x159c   : > { %5644 = vmatprep.subr.mxu1 %v3649_v32  ;;  %5682 = vmatprep.subr.mxu0 %v3681_v35  ;;  %v3709_v35 = vld [vmem:[%s6385_s4 + $0x268] sm:$0xff] }
0x159d   : > { %5645 = vmatpush3.msra.mxu1 %v3633_v36  ;;  %5683 = vmatpush3.msra.mxu0 %v3665_v37  ;;  %v3741_v36 = vld [vmem:[%s6385_s4 + $0x368] sm:$0xff] }
0x159e   : > { %5646 = vmatprep.subr.mxu1 %v3648_v38  ;;  %5684 = vmatprep.subr.mxu0 %v3680_v39  ;;  %v3724_v39 = vld [vmem:[%s6385_s4 + $0x2e0] sm:$0xff] }
0x159f   : > { %5647 = vmatpush3.msra.mxu1 %v3632_v42  ;;  %5685 = vmatpush3.msra.mxu0 %v3664_v45  ;;  %v3756_v42 = vld [vmem:[%s6385_s4 + $0x3e0] sm:$0xff] }
0x15a0   : > { %5692 = vmatprep.subr.mxu1 %v3727_v46  ;;  %5730 = vmatprep.subr.mxu0 %v3759_v55  ;;  %v3708_v55 = vld [vmem:[%s6385_s4 + $0x260] sm:$0xff] }
0x161a   : > { %v4043_v62 = vpop.f32.mrf.mxu1  ;;  %v4120_v63 = vpop.f32.mrf.mxu0 }
0x161b   : > { %v4044_v0 = vadd.f32 %v4043_v62, %v3894_v58  ;;  %v4121_v2 = vadd.f32 %v4120_v63, %v3902_v59  ;;  %v3755_v62 = vld [vmem:[%s6385_s4 + $0x3d8] sm:$0xff] }
0x161c   : > { %v4045_v3 = vpop.f32.mrf.mxu1  ;;  %v4122_v5 = vpop.f32.mrf.mxu0  ;;  %v3707_v63 = vld [vmem:[%s6385_s4 + $0x258] sm:$0xff] }
0x161d   : > { %v4046_v12 = vadd.f32 %v4045_v3, %v3898_v57  ;;  %v4123_v17 = vadd.f32 %v4122_v5, %v3906_v60  ;;  %v4593_v7 = vmax.f32 %v4044_v0, 0.0  ;;  %v4595_v9 = vmax.f32 %v4121_v2, 0.0  ;;  %v3739_v0 = vld [vmem:[%s6385_s4 + $0x358] sm:$0xff]  ;;  %v3722_v2 = vld [vmem:[%s6385_s4 + $0x2d0] sm:$0xff] }
0x161e   : > { %v3754_v3 = vld [vmem:[%s6385_s4 + $0x3d0] sm:$0xff] }
0x161f   : > { %v4594_v22 = vmax.f32 %v4046_v12, 0.0  ;;  %v4596_v27 = vmax.f32 %v4123_v17, 0.0  ;;  %v4049_v34 = vpop.f32.mrf.mxu1  ;;  %v4126_v6 = vpop.f32.mrf.mxu0  ;;  %v3706_v5 = vld [vmem:[%s6385_s4 + $0x250] sm:$0xff]  ;;  %v3721_v17 = vld [vmem:[%s6385_s4 + $0x2c8] sm:$0xff] }
0x1620   : > { %v4050_v14 = vadd.f32 %v4049_v34, %v3894_v58  ;;  %v4127_v44 = vadd.f32 %v4126_v6, %v3902_v59  ;;  %v3740_v58 = vld [vmem:[%s6385_s4 + $0x360] sm:$0xff]  ;;  %v3723_v59 = vld [vmem:[%s6385_s4 + $0x2d8] sm:$0xff]  ;;  %v3738_v12 = vld [vmem:[%s6385_s4 + $0x350] sm:$0xff] }
0x1621   : > { %v4051_v15 = vpop.f32.mrf.mxu1  ;;  %v4128_v16 = vpop.f32.mrf.mxu0  ;;  %4695 = vmatprep.mubr.f32.mxu1 %v4594_v22  ;;  %4770 = vmatprep.mubr.f32.mxu0 %v4596_v27  ;;  %v3753_v22 = vld [vmem:[%s6385_s4 + $0x3c8] sm:$0xff]  ;;  %v3720_v6 = vld [vmem:[%s6385_s4 + $0x2c0] sm:$0xff] }
0x1622   : > { %v4052_v25 = vadd.f32 %v4051_v15, %v3898_v57  ;;  %v4129_v4 = vadd.f32 %v4128_v16, %v3906_v60  ;;  %4696 = vmatmul.mubr.f32.vlgmr.msra.gmra.mxu1 %v4593_v7  ;;  %4771 = vmatmul.mubr.f32.vlgmr.msra.gmra.mxu0 %v4595_v9  ;;  %v4609_v31 = vmax.f32 %v4050_v14, 0.0  ;;  %v4611_v32 = vmax.f32 %v4127_v44, 0.0  ;;  %v3705_v27 = vld [vmem:[%s6385_s4 + $0x248] sm:$0xff]  ;;  %v3752_v7 = vld [vmem:[%s6385_s4 + $0x3c0] sm:$0xff]  ;;  %v3751_v14 = vld [vmem:[%s6385_s4 + $0x3b8] sm:$0xff] }
0x1623   : > { %5693 = vmatpush3.msra.mxu1 %v3711_v10  ;;  %5731 = vmatpush3.msra.mxu0 %v3743_v51  ;;  %v3737_v34 = vld [vmem:[%s6385_s4 + $0x348] sm:$0xff]  ;;  %v3704_v9 = vld [vmem:[%s6385_s4 + $0x240] sm:$0xff]  ;;  %v3719_v51 = vld [vmem:[%s6385_s4 + $0x2b8] sm:$0xff] }
0x1624   : > { %v4610_v20 = vmax.f32 %v4052_v25, 0.0  ;;  %v4612_v21 = vmax.f32 %v4129_v4, 0.0  ;;  %5694 = vmatprep.subr.mxu1 %v3726_v13  ;;  %5732 = vmatprep.subr.mxu0 %v3758_v1  ;;  %v3736_v10 = vld [vmem:[%s6385_s4 + $0x340] sm:$0xff]  ;;  %v3703_v15 = vld [vmem:[%s6385_s4 + $0x238] sm:$0xff]  ;;  %v3718_v13 = vld [vmem:[%s6385_s4 + $0x2b0] sm:$0xff] }
0x1625   : > { %v6999_v29 = vpop.f32.mrf.mxu1  ;;  %v7001_v30 = vpop.f32.mrf.mxu0  ;;  %5695 = vmatpush3.msra.mxu1 %v3710_v18  ;;  %5733 = vmatpush3.msra.mxu0 %v3742_v19  ;;  %v3735_v16 = vld [vmem:[%s6385_s4 + $0x338] sm:$0xff]  ;;  %v3750_v1 = vld [vmem:[%s6385_s4 + $0x3b0] sm:$0xff]  ;;  %v3717_v4 = vld [vmem:[%s6385_s4 + $0x2a8] sm:$0xff] }
0x1626   : > { %4700 = vmatprep.mubr.f32.mxu1 %v4610_v20  ;;  %4775 = vmatprep.mubr.f32.mxu0 %v4612_v21  ;;  %v3702_v44 = vld [vmem:[%s6385_s4 + $0x230] sm:$0xff]  ;;  %v3749_v18 = vld [vmem:[%s6385_s4 + $0x3a8] sm:$0xff] }
0x1627   : > { %v4199_v37 = vpop.f32.mrf.mxu1  ;;  %v4276_v38 = vpop.f32.mrf.mxu0  ;;  %5696 = vmatprep.subr.mxu1 %v3725_v26  ;;  %5734 = vmatprep.subr.mxu0 %v3757_v28  ;;  %v3734_v25 = vld [vmem:[%s6385_s4 + $0x330] sm:$0xff]  ;;  %v3701_v19 = vld [vmem:[%s6385_s4 + $0x228] sm:$0xff]  ;;  %v3716_v26 = vld [vmem:[%s6385_s4 + $0x2a0] sm:$0xff] }
0x1628   : > { %v4200_v45 = vadd.f32 %v4199_v37, %v6990_v23  ;;  %v4277_v46 = vadd.f32 %v4276_v38, %v6995_v24  ;;  %4701 = vmatmul.mubr.f32.gmra.mxu1 %v4609_v31  ;;  %4776 = vmatmul.mubr.f32.gmra.mxu0 %v4611_v32  ;;  %v3733_v20 = vld [vmem:[%s6385_s4 + $0x328] sm:$0xff]  ;;  %v3748_v28 = vld [vmem:[%s6385_s4 + $0x3a0] sm:$0xff]  ;;  %v3747_v37 = vld [vmem:[%s6385_s4 + $0x398] sm:$0xff]  ;;  %v3910_v38 = vrot.slane %v6966_v54, %v3909_v47 }
0x1629   : > { %5697 = vmatpush3.msra.mxu1 %v3709_v35  ;;  %5735 = vmatpush3.msra.mxu0 %v3741_v36  ;;  %v3700_v32 = vld [vmem:[%s6385_s4 + $0x220] sm:$0xff]  ;;  %v3715_v36 = vld [vmem:[%s6385_s4 + $0x298] sm:$0xff]  ;;  %v3698_v47 = vld [vmem:[%s6385_s4 + $0x210] sm:$0xff] }
0x162a   : > { %v4598_v57 = vmax.f32 %v4200_v45, 0.0  ;;  %v4600_v60 = vmax.f32 %v4277_v46, 0.0  ;;  %5698 = vmatprep.subr.mxu1 %v3724_v39  ;;  %5736 = vmatprep.subr.mxu0 %v3756_v42  ;;  %v3732_v35 = vld [vmem:[%s6385_s4 + $0x320] sm:$0xff]  ;;  %v3918_v39 = vrot.slane %v6966_v54, %v3917_v8  ;;  %v3699_v42 = vld [vmem:[%s6385_s4 + $0x218] sm:$0xff]  ;;  %v3730_v8 = vld [vmem:[%s6385_s4 + $0x310] sm:$0xff] }
0x162b   : > { %5699 = vmatpush3.msra.mxu1 %v3708_v55  ;;  %5737 = vmatpush3.msra.mxu0 %v3740_v58  ;;  %v7039_v21 = vpop.f32.mrf.mxu1  ;;  %v4280_v31 = vpop.f32.mrf.mxu0  ;;  %v3731_v45 = vld [vmem:[%s6385_s4 + $0x318] sm:$0xff]  ;;  %v3714_v55 = vld [vmem:[%s6385_s4 + $0x290] sm:$0xff]  ;;  %v3713_v54 = vld [vmem:[%s6385_s4 + $0x288] sm:$0xff] }
0x162c   : > { %5700 = vmatprep.subr.mxu1 %v3723_v59  ;;  %4845 = vmatprep.mubr.f32.mxu1 %v4598_v57  ;;  %v3746_v58 = vld [vmem:[%s6385_s4 + $0x390] sm:$0xff]  ;;  %v3745_v57 = vld [vmem:[%s6385_s4 + $0x388] sm:$0xff] }
0x162d   : > { %5738 = vmatprep.subr.mxu0 %v3755_v62  ;;  %4920 = vmatprep.mubr.f32.mxu0 %v4600_v60  ;;  %v4205_v46 = vpop.f32.mrf.mxu1  ;;  %v4282_v59 = vpop.f32.mrf.mxu0  ;;  %v4198_v60 = vadd.f32 %v6999_v29, %v3910_v38  ;;  %v4275_v62 = vadd.f32 %v7001_v30, %v3918_v39  ;;  %v3696_v30 = vld [vmem:[%s6385_s4 + $0x200] sm:$0xff] }
0x162e   : > { %5701 = vmatpush3.msra.mxu1 %v3707_v63  ;;  %5739 = vmatpush3.msra.mxu0 %v3739_v0  ;;  %v3697_v63 = vld [vmem:[%s6385_s4 + $0x208] sm:$0xff]  ;;  %v4283_v29 = vadd.f32 %v4282_v59, %v6995_v24  ;;  %v3823_v24 = vld [vmem:[%s6385_s4 + $0x5f8] sm:$0xff]  ;;  %v3786_v59 = vld [vmem:[%s6385_s4 + $0x4d0] sm:$0xff] }
0x162f   : > { %5702 = vmatprep.subr.mxu1 %v3722_v2  ;;  %5740 = vmatprep.subr.mxu0 %v3754_v3  ;;  %v3729_v0 = vld [vmem:[%s6385_s4 + $0x308] sm:$0xff]  ;;  %v3712_v3 = vld [vmem:[%s6385_s4 + $0x280] sm:$0xff] }
0x1630   : > { %5703 = vmatpush3.msra.mxu1 %v3706_v5  ;;  %5741 = vmatpush3.msra.mxu0 %v3738_v12  ;;  %v3744_v5 = vld [vmem:[%s6385_s4 + $0x380] sm:$0xff]  ;;  %v4206_v12 = vadd.f32 %v4205_v46, %v6990_v23  ;;  %v3791_v23 = vld [vmem:[%s6385_s4 + $0x4f8] sm:$0xff] }
0x1631   : > { %5704 = vmatprep.subr.mxu1 %v3721_v17  ;;  %5742 = vmatprep.subr.mxu0 %v3753_v22  ;;  %v7065_v2 = vpop.f32.mrf.mxu1  ;;  %v7071_v17 = vpop.f32.mrf.mxu0  ;;  %v3728_v22 = vld [vmem:[%s6385_s4 + $0x300] sm:$0xff]  ;;  %v3819_v46 = vld [vmem:[%s6385_s4 + $0x5d8] sm:$0xff] }
0x1632   : > { %5705 = vmatpush3.msra.mxu1 %v3705_v27  ;;  %5743 = vmatpush3.msra.mxu0 %v3737_v34  ;;  %v4597_v27 = vmax.f32 %v4198_v60, 0.0  ;;  %v4599_v34 = vmax.f32 %v4275_v62, 0.0  ;;  %v3817_v60 = vld [vmem:[%s6385_s4 + $0x5c8] sm:$0xff] }
0x1633   : > { %5706 = vmatprep.subr.mxu1 %v3720_v6  ;;  %5744 = vmatprep.subr.mxu0 %v3752_v7  ;;  %v7077_v6 = vrot.slane %v6952_v48, %v6782_v43  ;;  %v4353_v7 = vpop.f32.mrf.mxu1  ;;  %v3769_v62 = vld [vmem:[%s6385_s4 + $0x448] sm:$0xff] }
0x1634   : > { %5707 = vmatpush3.msra.mxu1 %v3704_v9  ;;  %5745 = vmatpush3.msra.mxu0 %v3736_v10  ;;  %v7084_v9 = vrot.slane %v6952_v48, %v3905_v56  ;;  %v4204_v10 = vadd.f32 %v7039_v21, %v3910_v38  ;;  %v3790_v56 = vld [vmem:[%s6385_s4 + $0x4f0] sm:$0xff]  ;;  %v3820_v38 = vld [vmem:[%s6385_s4 + $0x5e0] sm:$0xff] }
0x1635   : > { %5708 = vmatprep.subr.mxu1 %v3719_v51  ;;  %5746 = vmatprep.subr.mxu0 %v3751_v14  ;;  %v4281_v51 = vadd.f32 %v4280_v31, %v3918_v39  ;;  %v4614_v14 = vmax.f32 %v4206_v12, 0.0  ;;  %v3773_v31 = vld [vmem:[%s6385_s4 + $0x468] sm:$0xff]  ;;  %v3772_v39 = vld [vmem:[%s6385_s4 + $0x460] sm:$0xff] }
0x1636   : > { %5709 = vmatpush3.msra.mxu1 %v3703_v15  ;;  %5747 = vmatpush3.msra.mxu0 %v3735_v16  ;;  %v4616_v15 = vmax.f32 %v4283_v29, 0.0  ;;  %v4430_v16 = vpop.f32.mrf.mxu0  ;;  %v3800_v12 = vld [vmem:[%s6385_s4 + $0x540] sm:$0xff]  ;;  %v3783_v29 = vld [vmem:[%s6385_s4 + $0x4b8] sm:$0xff] }
0x1637   : > { %5710 = vmatprep.subr.mxu1 %v3718_v13  ;;  %5748 = vmatprep.subr.mxu0 %v3750_v1  ;;  %v3775_v13 = vld [vmem:[%s6385_s4 + $0x478] sm:$0xff]  ;;  %v4615_v21 = vmax.f32 %v4281_v51, 0.0  ;;  %v3813_v51 = vld [vmem:[%s6385_s4 + $0x5a8] sm:$0xff] }
0x1638   : > { %5711 = vmatpush3.msra.mxu1 %v3702_v44  ;;  %5749 = vmatpush3.msra.mxu0 %v3734_v25  ;;  %v3807_v1 = vld [vmem:[%s6385_s4 + $0x578] sm:$0xff]  ;;  %v3822_v44 = vld [vmem:[%s6385_s4 + $0x5f0] sm:$0xff]  ;;  %v4354_v25 = vadd.f32 %v4353_v7, %v7077_v6 }
0x1639   : > { %5712 = vmatprep.subr.mxu1 %v3717_v4  ;;  %5750 = vmatprep.subr.mxu0 %v3749_v18  ;;  %v3774_v4 = vld [vmem:[%s6385_s4 + $0x470] sm:$0xff] }
0x163a   : > { %5713 = vmatpush3.msra.mxu1 %v3701_v19  ;;  %5751 = vmatpush3.msra.mxu0 %v3733_v20  ;;  %v3806_v18 = vld [vmem:[%s6385_s4 + $0x570] sm:$0xff]  ;;  %v4431_v19 = vadd.f32 %v4430_v16, %v7084_v9  ;;  %v4613_v20 = vmax.f32 %v4204_v10, 0.0  ;;  %v3781_v10 = vld [vmem:[%s6385_s4 + $0x4a8] sm:$0xff]  ;;  %v7131_v16 = vpop.f32.mrf.mxu1 }
0x163b   : > { %5714 = vmatprep.subr.mxu1 %v3716_v26  ;;  %5752 = vmatprep.subr.mxu0 %v3748_v28  ;;  %v3789_v26 = vld [vmem:[%s6385_s4 + $0x4e8] sm:$0xff]  ;;  %v3798_v7 = vld [vmem:[%s6385_s4 + $0x530] sm:$0xff] }
0x163c   : > { %5715 = vmatpush3.msra.mxu1 %v3700_v32  ;;  %5753 = vmatpush3.msra.mxu0 %v3732_v35  ;;  %v3821_v28 = vld [vmem:[%s6385_s4 + $0x5e8] sm:$0xff]  ;;  %v4602_v32 = vmax.f32 %v4354_v25, 0.0  ;;  %v3796_v25 = vld [vmem:[%s6385_s4 + $0x520] sm:$0xff] }
0x163d   : > { %5716 = vmatprep.subr.mxu1 %v3715_v36  ;;  %5754 = vmatprep.subr.mxu0 %v3747_v37  ;;  %v3805_v35 = vld [vmem:[%s6385_s4 + $0x568] sm:$0xff]  ;;  %v4604_v36 = vmax.f32 %v4431_v19, 0.0  ;;  %v3788_v37 = vld [vmem:[%s6385_s4 + $0x4e0] sm:$0xff]  ;;  %v3926_v19 = vrot.slane %v6952_v48, %v6778_v41 }
0x163e   : > { %5717 = vmatpush3.msra.mxu1 %v3699_v42  ;;  %5755 = vmatpush3.msra.mxu0 %v3731_v45  ;;  %v3804_v42 = vld [vmem:[%s6385_s4 + $0x560] sm:$0xff]  ;;  %v3787_v45 = vld [vmem:[%s6385_s4 + $0x4d8] sm:$0xff] }
0x163f   : > { %5718 = vmatprep.subr.mxu1 %v3714_v55  ;;  %5756 = vmatprep.subr.mxu0 %v3746_v58  ;;  %v3771_v55 = vld [vmem:[%s6385_s4 + $0x458] sm:$0xff] }
0x1640   : > { %5719 = vmatpush3.msra.mxu1 %v3698_v47  ;;  %5757 = vmatpush3.msra.mxu0 %v3730_v8  ;;  %v3803_v58 = vld [vmem:[%s6385_s4 + $0x558] sm:$0xff]  ;;  %v3818_v47 = vld [vmem:[%s6385_s4 + $0x5d0] sm:$0xff] }
0x1641   : > { %5720 = vmatprep.subr.mxu1 %v3713_v54  ;;  %5758 = vmatprep.subr.mxu0 %v3745_v57  ;;  %v3770_v8 = vld [vmem:[%s6385_s4 + $0x450] sm:$0xff]  ;;  %v3785_v57 = vld [vmem:[%s6385_s4 + $0x4c8] sm:$0xff] }
0x1642   : > { %5721 = vmatpush3.msra.mxu1 %v3697_v63  ;;  %5759 = vmatpush3.msra.mxu0 %v3729_v0  ;;  %v3802_v54 = vld [vmem:[%s6385_s4 + $0x550] sm:$0xff]  ;;  %v3801_v63 = vld [vmem:[%s6385_s4 + $0x548] sm:$0xff]  ;;  %v3784_v0 = vld [vmem:[%s6385_s4 + $0x4c0] sm:$0xff] }
0x1643   : > { %5722 = vmatprep.subr.mxu1 %v3712_v3  ;;  %5760 = vmatprep.subr.mxu0 %v3744_v5  ;;  %v3816_v3 = vld [vmem:[%s6385_s4 + $0x5c0] sm:$0xff] }
0x1644   : > { %5723 = vmatpush3.msra.mxu1 %v3696_v30  ;;  %5761 = vmatpush3.msra.mxu0 %v3728_v22  ;;  %v3768_v5 = vld [vmem:[%s6385_s4 + $0x440] sm:$0xff]  ;;  %v3815_v30 = vld [vmem:[%s6385_s4 + $0x5b8] sm:$0xff] }
0x1645   : > { %4846 = vmatmul.mubr.f32.vlgmr.msra.gmra.mxu1 %v4597_v27  ;;  %4921 = vmatmul.mubr.f32.vlgmr.msra.gmra.mxu0 %v4599_v34  ;;  %v3767_v22 = vld [vmem:[%s6385_s4 + $0x438] sm:$0xff]  ;;  %v3782_v34 = vld [vmem:[%s6385_s4 + $0x4b0] sm:$0xff] }
0x1646   : > { %5768 = vmatprep.subr.mxu1 %v3791_v23  ;;  %5806 = vmatprep.subr.mxu0 %v3823_v24  ;;  %v3799_v27 = vld [vmem:[%s6385_s4 + $0x538] sm:$0xff]  ;;  %v3814_v23 = vld [vmem:[%s6385_s4 + $0x5b0] sm:$0xff] }
0x1647   : > { %4850 = vmatprep.mubr.f32.mxu1 %v4614_v14  ;;  %4925 = vmatprep.mubr.f32.mxu0 %v4616_v15  ;;  %v3766_v24 = vld [vmem:[%s6385_s4 + $0x430] sm:$0xff]  ;;  %v3765_v14 = vld [vmem:[%s6385_s4 + $0x428] sm:$0xff] }
0x1648   : > { %5769 = vmatpush3.msra.mxu1 %v3775_v13  ;;  %5807 = vmatpush3.msra.mxu0 %v3807_v1  ;;  %v3797_v15 = vld [vmem:[%s6385_s4 + $0x528] sm:$0xff]  ;;  %v3780_v13 = vld [vmem:[%s6385_s4 + $0x4a0] sm:$0xff] }
0x1649   : > { %5770 = vmatprep.subr.mxu1 %v3790_v56  ;;  %5808 = vmatprep.subr.mxu0 %v3822_v44  ;;  %v3812_v1 = vld [vmem:[%s6385_s4 + $0x5a0] sm:$0xff]  ;;  %v4434_v56 = vpop.f32.mrf.mxu0 }
0x164a   : > { %5771 = vmatpush3.msra.mxu1 %v3774_v4  ;;  %5809 = vmatpush3.msra.mxu0 %v3806_v18  ;;  %v3764_v44 = vld [vmem:[%s6385_s4 + $0x420] sm:$0xff]  ;;  %v3779_v4 = vld [vmem:[%s6385_s4 + $0x498] sm:$0xff] }
0x164b   : > { %4851 = vmatmul.mubr.f32.gmra.mxu1 %v4613_v20  ;;  %4926 = vmatmul.mubr.f32.gmra.mxu0 %v4615_v21  ;;  %v3811_v18 = vld [vmem:[%s6385_s4 + $0x598] sm:$0xff]  ;;  %v3934_v20 = vrot.slane %v6952_v48, %v3901_v53  ;;  %v3794_v53 = vld [vmem:[%s6385_s4 + $0x510] sm:$0xff] }
0x164c   : > { %5772 = vmatprep.subr.mxu1 %v3789_v26  ;;  %5810 = vmatprep.subr.mxu0 %v3821_v28  ;;  %v3763_v21 = vld [vmem:[%s6385_s4 + $0x418] sm:$0xff]  ;;  %v4359_v28 = vpop.f32.mrf.mxu1 }
0x164d   : > { %5773 = vmatpush3.msra.mxu1 %v3773_v31  ;;  %4995 = vmatprep.mubr.f32.mxu1 %v4602_v32  ;;  %v3795_v26 = vld [vmem:[%s6385_s4 + $0x518] sm:$0xff]  ;;  %v3778_v31 = vld [vmem:[%s6385_s4 + $0x490] sm:$0xff] }
0x164e   : > { %5811 = vmatpush3.msra.mxu0 %v3805_v35  ;;  %5070 = vmatprep.mubr.f32.mxu0 %v4604_v36  ;;  %v3810_v32 = vld [vmem:[%s6385_s4 + $0x590] sm:$0xff]  ;;  %v4436_v35 = vpop.f32.mrf.mxu0 }
0x164f   : > { %5774 = vmatprep.subr.mxu1 %v3788_v37  ;;  %5812 = vmatprep.subr.mxu0 %v3820_v38  ;;  %v3762_v36 = vld [vmem:[%s6385_s4 + $0x410] sm:$0xff]  ;;  %v3777_v37 = vld [vmem:[%s6385_s4 + $0x488] sm:$0xff] }
0x1650   : > { %5775 = vmatpush3.msra.mxu1 %v3772_v39  ;;  %5813 = vmatpush3.msra.mxu0 %v3804_v42  ;;  %v3809_v38 = vld [vmem:[%s6385_s4 + $0x588] sm:$0xff]  ;;  %v4352_v39 = vadd.f32 %v7065_v2, %v3926_v19  ;;  %v4429_v42 = vadd.f32 %v7071_v17, %v3934_v20  ;;  %v4437_v2 = vadd.f32 %v4436_v35, %v7084_v9  ;;  %v3760_v17 = vld [vmem:[%s6385_s4 + $0x400] sm:$0xff]  ;;  %v3887_v9 = vld [vmem:[%s6385_s4 + $0x7f8] sm:$0xff] }
0x1651   : > { %5776 = vmatprep.subr.mxu1 %v3787_v45  ;;  %5814 = vmatprep.subr.mxu0 %v3819_v46  ;;  %v3761_v45 = vld [vmem:[%s6385_s4 + $0x408] sm:$0xff] }
0x1652   : > { %5777 = vmatpush3.msra.mxu1 %v3771_v55  ;;  %5815 = vmatpush3.msra.mxu0 %v3803_v58  ;;  %v3793_v46 = vld [vmem:[%s6385_s4 + $0x508] sm:$0xff]  ;;  %v7156_v55 = vpop.f32.mrf.mxu1  ;;  %v3776_v58 = vld [vmem:[%s6385_s4 + $0x480] sm:$0xff] }
0x1653   : > { %5778 = vmatprep.subr.mxu1 %v3786_v59  ;;  %5816 = vmatprep.subr.mxu0 %v3818_v47  ;;  %v3808_v59 = vld [vmem:[%s6385_s4 + $0x580] sm:$0xff]  ;;  %v4360_v47 = vadd.f32 %v4359_v28, %v7077_v6  ;;  %v3855_v6 = vld [vmem:[%s6385_s4 + $0x6f8] sm:$0xff]  ;;  %v3834_v28 = vld [vmem:[%s6385_s4 + $0x650] sm:$0xff] }
0x1654   : > { %5779 = vmatpush3.msra.mxu1 %v3770_v8  ;;  %5817 = vmatpush3.msra.mxu0 %v3802_v54  ;;  %v7162_v8 = vpop.f32.mrf.mxu0  ;;  %v3792_v54 = vld [vmem:[%s6385_s4 + $0x500] sm:$0xff]  ;;  %v3881_v35 = vld [vmem:[%s6385_s4 + $0x7c8] sm:$0xff] }
0x1655   : > { %5780 = vmatprep.subr.mxu1 %v3785_v57  ;;  %5818 = vmatprep.subr.mxu0 %v3817_v60  ;;  %v4601_v57 = vmax.f32 %v4352_v39, 0.0  ;;  %v4603_v60 = vmax.f32 %v4429_v42, 0.0  ;;  %v3832_v39 = vld [vmem:[%s6385_s4 + $0x640] sm:$0xff] }
0x1656   : > { %5781 = vmatpush3.msra.mxu1 %v3769_v62  ;;  %5819 = vmatpush3.msra.mxu0 %v3801_v63  ;;  %v7169_v62 = vrot.slane %v6952_v48, %v3913_v33  ;;  %v4507_v63 = vpop.f32.mrf.mxu1  ;;  %v4435_v33 = vadd.f32 %v4434_v56, %v3934_v20  ;;  %v3884_v56 = vld [vmem:[%s6385_s4 + $0x7e0] sm:$0xff]  ;;  %v3867_v20 = vld [vmem:[%s6385_s4 + $0x758] sm:$0xff] }
0x1657   : > { %5782 = vmatprep.subr.mxu1 %v3784_v0  ;;  %5820 = vmatprep.subr.mxu0 %v3816_v3  ;;  %v7176_v0 = vrot.slane %v6952_v48, %v3921_v11  ;;  %v4358_v3 = vadd.f32 %v7131_v16, %v3926_v19  ;;  %v3886_v48 = vld [vmem:[%s6385_s4 + $0x7f0] sm:$0xff]  ;;  %v3869_v16 = vld [vmem:[%s6385_s4 + $0x768] sm:$0xff]  ;;  %v3835_v19 = vld [vmem:[%s6385_s4 + $0x658] sm:$0xff] }
0x1658   : > { %5783 = vmatpush3.msra.mxu1 %v3768_v5  ;;  %5821 = vmatpush3.msra.mxu0 %v3800_v12  ;;  %v4618_v5 = vmax.f32 %v4360_v47, 0.0  ;;  %v4620_v12 = vmax.f32 %v4437_v2, 0.0  ;;  %v4508_v11 = vadd.f32 %v4507_v63, %v7169_v62  ;;  %v3864_v42 = vld [vmem:[%s6385_s4 + $0x740] sm:$0xff]  ;;  %v3846_v47 = vld [vmem:[%s6385_s4 + $0x6b0] sm:$0xff] }
0x1659   : > { %5784 = vmatprep.subr.mxu1 %v3783_v29  ;;  %5822 = vmatprep.subr.mxu0 %v3815_v30  ;;  %v4584_v29 = vpop.f32.mrf.mxu0  ;;  %v3839_v30 = vld [vmem:[%s6385_s4 + $0x678] sm:$0xff]  ;;  %v3878_v2 = vld [vmem:[%s6385_s4 + $0x7b0] sm:$0xff]  ;;  %v3844_v63 = vld [vmem:[%s6385_s4 + $0x6a0] sm:$0xff] }
0x165a   : > { %5785 = vmatpush3.msra.mxu1 %v3767_v22  ;;  %5823 = vmatpush3.msra.mxu0 %v3799_v27  ;;  %v3871_v22 = vld [vmem:[%s6385_s4 + $0x778] sm:$0xff]  ;;  %v3838_v27 = vld [vmem:[%s6385_s4 + $0x670] sm:$0xff] }
0x165b   : > { %5786 = vmatprep.subr.mxu1 %v3782_v34  ;;  %5824 = vmatprep.subr.mxu0 %v3814_v23  ;;  %v3870_v34 = vld [vmem:[%s6385_s4 + $0x770] sm:$0xff]  ;;  %v4585_v23 = vadd.f32 %v4584_v29, %v7176_v0  ;;  %v3860_v29 = vld [vmem:[%s6385_s4 + $0x720] sm:$0xff] }
0x165c   : > { %5787 = vmatpush3.msra.mxu1 %v3766_v24  ;;  %5825 = vmatpush3.msra.mxu0 %v3798_v7  ;;  %v4617_v24 = vmax.f32 %v4358_v3, 0.0  ;;  %v4619_v7 = vmax.f32 %v4435_v33, 0.0  ;;  %v3876_v3 = vld [vmem:[%s6385_s4 + $0x7a0] sm:$0xff]  ;;  %v4511_v33 = vpop.f32.mrf.mxu1 }
0x165d   : > { %5788 = vmatprep.subr.mxu1 %v3781_v10  ;;  %5826 = vmatprep.subr.mxu0 %v3813_v51  ;;  %v3853_v10 = vld [vmem:[%s6385_s4 + $0x6e8] sm:$0xff] }
0x165e   : > { %5789 = vmatpush3.msra.mxu1 %v3765_v14  ;;  %5827 = vmatpush3.msra.mxu0 %v3797_v15  ;;  %v3885_v51 = vld [vmem:[%s6385_s4 + $0x7e8] sm:$0xff]  ;;  %v4606_v15 = vmax.f32 %v4508_v11, 0.0  ;;  %v3842_v11 = vld [vmem:[%s6385_s4 + $0x690] sm:$0xff] }
0x165f   : > { %5790 = vmatprep.subr.mxu1 %v3780_v13  ;;  %5828 = vmatprep.subr.mxu0 %v3812_v1  ;;  %v3837_v14 = vld [vmem:[%s6385_s4 + $0x668] sm:$0xff]  ;;  %v4608_v13 = vmax.f32 %v4585_v23, 0.0  ;;  %v3852_v1 = vld [vmem:[%s6385_s4 + $0x6e0] sm:$0xff] }
0x1660   : > { %5791 = vmatpush3.msra.mxu1 %v3764_v44  ;;  %5829 = vmatpush3.msra.mxu0 %v3796_v25  ;;  %v3836_v44 = vld [vmem:[%s6385_s4 + $0x660] sm:$0xff] }
0x1661   : > { %5792 = vmatprep.subr.mxu1 %v3779_v4  ;;  %5830 = vmatprep.subr.mxu0 %v3811_v18  ;;  %v3868_v25 = vld [vmem:[%s6385_s4 + $0x760] sm:$0xff]  ;;  %v3851_v4 = vld [vmem:[%s6385_s4 + $0x6d8] sm:$0xff] }
0x1662   : > { %5793 = vmatpush3.msra.mxu1 %v3763_v21  ;;  %5831 = vmatpush3.msra.mxu0 %v3795_v26  ;;  %v3883_v18 = vld [vmem:[%s6385_s4 + $0x7d8] sm:$0xff]  ;;  %v3850_v21 = vld [vmem:[%s6385_s4 + $0x6d0] sm:$0xff] }
0x1663   : > { %5794 = vmatprep.subr.mxu1 %v3778_v31  ;;  %5832 = vmatprep.subr.mxu0 %v3810_v32  ;;  %v3882_v26 = vld [vmem:[%s6385_s4 + $0x7d0] sm:$0xff]  ;;  %v3849_v32 = vld [vmem:[%s6385_s4 + $0x6c8] sm:$0xff] }
0x1664   : > { %5795 = vmatpush3.msra.mxu1 %v3762_v36  ;;  %5833 = vmatpush3.msra.mxu0 %v3794_v53  ;;  %v3866_v31 = vld [vmem:[%s6385_s4 + $0x750] sm:$0xff]  ;;  %v3833_v36 = vld [vmem:[%s6385_s4 + $0x648] sm:$0xff] }
0x1665   : > { %5796 = vmatprep.subr.mxu1 %v3777_v37  ;;  %5834 = vmatprep.subr.mxu0 %v3809_v38  ;;  %v3865_v53 = vld [vmem:[%s6385_s4 + $0x748] sm:$0xff]  ;;  %v3848_v37 = vld [vmem:[%s6385_s4 + $0x6c0] sm:$0xff] }
0x1666   : > { %5797 = vmatpush3.msra.mxu1 %v3761_v45  ;;  %5835 = vmatpush3.msra.mxu0 %v3793_v46  ;;  %v3880_v38 = vld [vmem:[%s6385_s4 + $0x7c0] sm:$0xff]  ;;  %v3847_v45 = vld [vmem:[%s6385_s4 + $0x6b8] sm:$0xff] }
0x1667   : > { %5798 = vmatprep.subr.mxu1 %v3776_v58  ;;  %5836 = vmatprep.subr.mxu0 %v3808_v59  ;;  %v3879_v46 = vld [vmem:[%s6385_s4 + $0x7b8] sm:$0xff] }
0x1668   : > { %5799 = vmatpush3.msra.mxu1 %v3760_v17  ;;  %5837 = vmatpush3.msra.mxu0 %v3792_v54  ;;  %v3831_v58 = vld [vmem:[%s6385_s4 + $0x638] sm:$0xff]  ;;  %v3830_v17 = vld [vmem:[%s6385_s4 + $0x630] sm:$0xff] }
0x1669   : > { %4996 = vmatmul.mubr.f32.vlgmr.msra.gmra.mxu1 %v4601_v57  ;;  %5071 = vmatmul.mubr.f32.vlgmr.msra.gmra.mxu0 %v4603_v60  ;;  %v3863_v59 = vld [vmem:[%s6385_s4 + $0x738] sm:$0xff]  ;;  %v3862_v54 = vld [vmem:[%s6385_s4 + $0x730] sm:$0xff]  ;;  %v3845_v57 = vld [vmem:[%s6385_s4 + $0x6a8] sm:$0xff] }
0x166a   : > { %5844 = vmatprep.subr.mxu1 %v3855_v6  ;;  %5882 = vmatprep.subr.mxu0 %v3887_v9  ;;  %v3877_v60 = vld [vmem:[%s6385_s4 + $0x7a8] sm:$0xff] }
0x166b   : > { %5000 = vmatprep.mubr.f32.mxu1 %v4618_v5  ;;  %5075 = vmatprep.mubr.f32.mxu0 %v4620_v12  ;;  %v3829_v6 = vld [vmem:[%s6385_s4 + $0x628] sm:$0xff]  ;;  %v4588_v5 = vpop.f32.mrf.mxu0  ;;  %v3828_v12 = vld [vmem:[%s6385_s4 + $0x620] sm:$0xff] }
0x166c   : > { %5845 = vmatpush3.msra.mxu1 %v3839_v30  ;;  %5883 = vmatpush3.msra.mxu0 %v3871_v22  ;;  %v3861_v9 = vld [vmem:[%s6385_s4 + $0x728] sm:$0xff]  ;;  %v3843_v30 = vld [vmem:[%s6385_s4 + $0x698] sm:$0xff] }
0x166d   : > { %5846 = vmatprep.subr.mxu1 %v3854_v40  ;;  %5884 = vmatprep.subr.mxu0 %v3886_v48  ;;  %v3875_v22 = vld [vmem:[%s6385_s4 + $0x798] sm:$0xff]  ;;  %v4590_v23 = vpop.f32.mrf.mxu0 }
0x166e   : > { %5847 = vmatpush3.msra.mxu1 %v3838_v27  ;;  %5885 = vmatpush3.msra.mxu0 %v3870_v34  ;;  %v3827_v40 = vld [vmem:[%s6385_s4 + $0x618] sm:$0xff]  ;;  %v3874_v27 = vld [vmem:[%s6385_s4 + $0x790] sm:$0xff]  ;;  %v4513_v34 = vpop.f32.mrf.mxu1 }
0x166f   : > { %5001 = vmatmul.mubr.f32.gmra.mxu1 %v4617_v24  ;;  %5076 = vmatmul.mubr.f32.gmra.mxu0 %v4619_v7  ;;  %v3859_v48 = vld [vmem:[%s6385_s4 + $0x718] sm:$0xff]  ;;  %v3826_v24 = vld [vmem:[%s6385_s4 + $0x610] sm:$0xff] }
0x1670   : > { %5848 = vmatprep.subr.mxu1 %v3853_v10  ;;  %5886 = vmatprep.subr.mxu0 %v3885_v51  ;;  %v3858_v7 = vld [vmem:[%s6385_s4 + $0x710] sm:$0xff]  ;;  %v3841_v10 = vld [vmem:[%s6385_s4 + $0x688] sm:$0xff] }
0x1671   : > { %5849 = vmatpush3.msra.mxu1 %v3837_v14  ;;  %5145 = vmatprep.mubr.f32.mxu1 %v4606_v15  ;;  %v3873_v51 = vld [vmem:[%s6385_s4 + $0x788] sm:$0xff]  ;;  %v4506_v14 = vadd.f32 %v7156_v55, %v6957_v49  ;;  %v4583_v15 = vadd.f32 %v7162_v8, %v6962_v52 }
0x1672   : > { %5887 = vmatpush3.msra.mxu0 %v3869_v16  ;;  %5220 = vmatprep.mubr.f32.mxu0 %v4608_v13  ;;  %v3825_v16 = vld [vmem:[%s6385_s4 + $0x608] sm:$0xff] }
0x1673   : > { %5850 = vmatprep.subr.mxu1 %v3852_v1  ;;  %5888 = vmatprep.subr.mxu0 %v3884_v56  ;;  %v3857_v13 = vld [vmem:[%s6385_s4 + $0x708] sm:$0xff]  ;;  %v4514_v1 = vadd.f32 %v4513_v34, %v7169_v62  ;;  %v4591_v56 = vadd.f32 %v4590_v23, %v7176_v0  ;;  %v4605_v55 = vmax.f32 %v4506_v14, 0.0  ;;  %v4607_v8 = vmax.f32 %v4583_v15, 0.0 }
0x1674   : > { %5851 = vmatpush3.msra.mxu1 %v3836_v44  ;;  %5889 = vmatpush3.msra.mxu0 %v3868_v25  ;;  %v3840_v44 = vld [vmem:[%s6385_s4 + $0x680] sm:$0xff] }
0x1675   : > { %5852 = vmatprep.subr.mxu1 %v3851_v4  ;;  %5890 = vmatprep.subr.mxu0 %v3883_v18  ;;  %v3872_v25 = vld [vmem:[%s6385_s4 + $0x780] sm:$0xff]  ;;  %v4622_v62 = vmax.f32 %v4514_v1, 0.0  ;;  %v4624_v0 = vmax.f32 %v4591_v56, 0.0 }
0x1676   : > { %5853 = vmatpush3.msra.mxu1 %v3835_v19  ;;  %5891 = vmatpush3.msra.mxu0 %v3867_v20  ;;  %v3824_v4 = vld [vmem:[%s6385_s4 + $0x600] sm:$0xff]  ;;  %v4512_v19 = vadd.f32 %v4511_v33, %v6957_v49  ;;  %v4589_v20 = vadd.f32 %v4588_v5, %v6962_v52 }
0x1677   : > { %5854 = vmatprep.subr.mxu1 %v3850_v21  ;;  %5892 = vmatprep.subr.mxu0 %v3882_v26  ;;  %v3856_v18 = vld [vmem:[%s6385_s4 + $0x700] sm:$0xff] }
0x1678   : > { %5855 = vmatpush3.msra.mxu1 %v3834_v28  ;;  %5893 = vmatpush3.msra.mxu0 %v3866_v31  ;;  %v4621_v21 = vmax.f32 %v4512_v19, 0.0  ;;  %v4623_v26 = vmax.f32 %v4589_v20, 0.0 }
0x1679   : > { %5856 = vmatprep.subr.mxu1 %v3849_v32  ;;  %5894 = vmatprep.subr.mxu0 %v3881_v35 }
0x167a   : > { %5857 = vmatpush3.msra.mxu1 %v3833_v36  ;;  %5895 = vmatpush3.msra.mxu0 %v3865_v53 }
0x167b   : > { %5858 = vmatprep.subr.mxu1 %v3848_v37  ;;  %5896 = vmatprep.subr.mxu0 %v3880_v38 }
0x167c   : > { %5859 = vmatpush3.msra.mxu1 %v3832_v39  ;;  %5897 = vmatpush3.msra.mxu0 %v3864_v42 }
0x167d   : > { %5860 = vmatprep.subr.mxu1 %v3847_v45  ;;  %5898 = vmatprep.subr.mxu0 %v3879_v46 }
0x167e   : > { %5861 = vmatpush3.msra.mxu1 %v3831_v58  ;;  %5899 = vmatpush3.msra.mxu0 %v3863_v59 }
0x167f   : > { %5862 = vmatprep.subr.mxu1 %v3846_v47  ;;  %5900 = vmatprep.subr.mxu0 %v3878_v2  ;;  %v5532_v47 = vld [vmem:[%s574_s6] ss:$0 sm:$0xff] }
0x1680   : > { %5863 = vmatpush3.msra.mxu1 %v3830_v17  ;;  %5901 = vmatpush3.msra.mxu0 %v3862_v54 }
0x1681   : > { %5864 = vmatprep.subr.mxu1 %v3845_v57  ;;  %5902 = vmatprep.subr.mxu0 %v3877_v60 }
0x1682   : > { %5865 = vmatpush3.msra.mxu1 %v3829_v6  ;;  %5903 = vmatpush3.msra.mxu0 %v3861_v9 }
0x1683   : > { %5866 = vmatprep.subr.mxu1 %v3844_v63  ;;  %5904 = vmatprep.subr.mxu0 %v3876_v3 }
0x1684   : > { %5867 = vmatpush3.msra.mxu1 %v3828_v12  ;;  %5905 = vmatpush3.msra.mxu0 %v3860_v29 }
0x1685   : > { %5868 = vmatprep.subr.mxu1 %v3843_v30  ;;  %5906 = vmatprep.subr.mxu0 %v3875_v22 }
0x1686   : > { %5869 = vmatpush3.msra.mxu1 %v3827_v40  ;;  %5907 = vmatpush3.msra.mxu0 %v3859_v48 }
0x1687   : > { %5870 = vmatprep.subr.mxu1 %v3842_v11  ;;  %5908 = vmatprep.subr.mxu0 %v3874_v27 }
0x1688   : > { %5871 = vmatpush3.msra.mxu1 %v3826_v24  ;;  %5909 = vmatpush3.msra.mxu0 %v3858_v7 }
0x1689   : > { %5872 = vmatprep.subr.mxu1 %v3841_v10  ;;  %5910 = vmatprep.subr.mxu0 %v3873_v51 }
0x168a   : > { %5873 = vmatpush3.msra.mxu1 %v3825_v16  ;;  %5911 = vmatpush3.msra.mxu0 %v3857_v13 }
0x168b   : > { %5874 = vmatprep.subr.mxu1 %v3840_v44  ;;  %5912 = vmatprep.subr.mxu0 %v3872_v25 }
0x168c   : > { %5875 = vmatpush3.msra.mxu1 %v3824_v4  ;;  %5913 = vmatpush3.msra.mxu0 %v3856_v18 }
0x168d   : > { %5146 = vmatmul.mubr.f32.vlgmr.msra.gmra.mxu1 %v4605_v55  ;;  %5221 = vmatmul.mubr.f32.vlgmr.msra.gmra.mxu0 %v4607_v8 }
0x168e   : > { %5150 = vmatprep.mubr.f32.mxu1 %v4622_v62  ;;  %5225 = vmatprep.mubr.f32.mxu0 %v4624_v0 }
0x1691   : > { %5151 = vmatmul.mubr.f32.gmra.mxu1 %v4621_v21  ;;  %5226 = vmatmul.mubr.f32.gmra.mxu0 %v4623_v26 }
0x16e2   : > { %v5648_v28 = vpop.f32.mrf.mxu1  ;;  %v5686_v31 = vpop.f32.mrf.mxu0 }
0x16e4   : > { %v5649_v49 = vpop.f32.mrf.mxu1  ;;  %v5687_v32 = vpop.f32.mrf.mxu0 }
0x16e5   : > { %v5650_v59 = vadd.f32 %v5649_v49, %v5648_v28  ;;  %v5688_v9 = vadd.f32 %v5687_v32, %v5686_v31 }
0x16e7   : > { %v4698_v57 = vadd.f32 %v5650_v59, %v5532_v47 }
0x16e8   : > { %v5651_v52 = vpop.f32.mrf.mxu1  ;;  %v5689_v35 = vpop.f32.mrf.mxu0 }
0x16e9   : > { %v4773_v33 = vadd.f32 %v5688_v9, %v4698_v57  ;;  %v5233_v9 = vld [vmem:[%s6394_s30] sm:$0x3] }
0x16ea   : > { %v5652_v36 = vpop.f32.mrf.mxu1  ;;  %v5690_v53 = vpop.f32.mrf.mxu0 }
0x16eb   : > { %v5653_v60 = vadd.f32 %v5652_v36, %v5651_v52  ;;  %v5691_v29 = vadd.f32 %v5690_v53, %v5689_v35 }
0x16ed   : > { %v4703_v5 = vadd.f32 %v5653_v60, %v5532_v47 }
0x16ef   : > { %v4778_v48 = vadd.f32 %v5691_v29, %v4703_v5 }
0x1705   : > { %v5724_v37 = vpop.f32.mrf.mxu1  ;;  %v5762_v38 = vpop.f32.mrf.mxu0 }
0x1707   : > { %v5725_v39 = vpop.f32.mrf.mxu1  ;;  %v5763_v42 = vpop.f32.mrf.mxu0 }
0x1708   : > { %v5726_v63 = vadd.f32 %v5725_v39, %v5724_v37  ;;  %v5764_v11 = vadd.f32 %v5763_v42, %v5762_v38 }
0x170a   : > { %v4848_v30 = vadd.f32 %v5726_v63, %v4773_v33  ;;  %v5263_v63 = vrot.slane %v5233_v9, %v6778_v41  ;;  %v5269_v33 = vrot.slane %v5233_v9, %v6782_v43 }
0x170b   : > { %v5727_v45 = vpop.f32.mrf.mxu1  ;;  %v5765_v46 = vpop.f32.mrf.mxu0 }
0x170c   : > { %v4923_v23 = vadd.f32 %v5764_v11, %v4848_v30 }
0x170d   : > { %v5728_v58 = vpop.f32.mrf.mxu1  ;;  %v5766_v2 = vpop.f32.mrf.mxu0 }
0x170e   : > { %v5729_v22 = vadd.f32 %v5728_v58, %v5727_v45  ;;  %v5767_v10 = vadd.f32 %v5766_v2, %v5765_v46 }
0x1710   : > { %v4853_v24 = vadd.f32 %v5729_v22, %v4778_v48 }
0x1712   : > { %v4928_v13 = vadd.f32 %v5767_v10, %v4853_v24 }
0x1729   : > { %v5800_v17 = vpop.f32.mrf.mxu1  ;;  %v5838_v54 = vpop.f32.mrf.mxu0 }
0x172b   : > { %v5801_v6 = vpop.f32.mrf.mxu1  ;;  %v5839_v3 = vpop.f32.mrf.mxu0 }
0x172c   : > { %v5802_v27 = vadd.f32 %v5801_v6, %v5800_v17  ;;  %v5840_v1 = vadd.f32 %v5839_v3, %v5838_v54 }
0x172e   : > { %v4998_v51 = vadd.f32 %v5802_v27, %v4923_v23 }
0x172f   : > { %v5803_v12 = vpop.f32.mrf.mxu1  ;;  %v5841_v40 = vpop.f32.mrf.mxu0 }
0x1730   : > { %v5073_v25 = vadd.f32 %v5840_v1, %v4998_v51 }
0x1731   : > { %v5804_v34 = vpop.f32.mrf.mxu1  ;;  %v5842_v7 = vpop.f32.mrf.mxu0 }
0x1732   : > { %v5805_v14 = vadd.f32 %v5804_v34, %v5803_v12  ;;  %v5843_v19 = vadd.f32 %v5842_v7, %v5841_v40 }
0x1734   : > { %v5003_v4 = vadd.f32 %v5805_v14, %v4928_v13 }
0x1736   : > { %v5078_v26 = vadd.f32 %v5843_v19, %v5003_v4 }
0x174d   : > { %v5876_v15 = vpop.f32.mrf.mxu1  ;;  %v5914_v16 = vpop.f32.mrf.mxu0 }
0x174f   : > { %v5877_v56 = vpop.f32.mrf.mxu1  ;;  %v5915_v44 = vpop.f32.mrf.mxu0 }
0x1750   : > { %v5878_v18 = vadd.f32 %v5877_v56, %v5876_v15  ;;  %v5916_v62 = vadd.f32 %v5915_v44, %v5914_v16 }
0x1751   : > { %v5879_v55 = vpop.f32.mrf.mxu1  ;;  %v5917_v8 = vpop.f32.mrf.mxu0 }
0x1752   : > { %v5148_v20 = vadd.f32 %v5878_v18, %v5073_v25 }
0x1753   : > { %v5880_v0 = vpop.f32.mrf.mxu1  ;;  %v5918_v21 = vpop.f32.mrf.mxu0 }
0x1754   : > { %v5223_v28 = vadd.f32 %v5916_v62, %v5148_v20  ;;  %v5881_v31 = vadd.f32 %v5880_v0, %v5879_v55  ;;  %v5919_v32 = vadd.f32 %v5918_v21, %v5917_v8 }
0x1756   : > { %v5153_v49 = vadd.f32 %v5881_v31, %v5078_v26  ;;  %v5231_v52 = vadd.f32 %v5223_v28, %v6786_v50 }
0x1758   : > { %v5228_v35 = vadd.f32 %v5919_v32, %v5153_v49  ;;  %v5234_v36 = vsel %vm608_vm1, %v5231_v52, 0.0 }
0x1759   : > { %5235 = vadd.xlane.f32.xlu1 %v5234_v36 }
0x175a   : > { %v5232_v53 = vadd.f32 %v5228_v35, %v6799_v61 }
0x175c   : > { %v5237_v37 = vsel %vm608_vm1, %v5232_v53, 0.0 }
0x175d   : > { %5238 = vadd.xlane.f32.xlu0 %v5237_v37 }
0x17e2   : > { %v5236_v38 = vpop.xlane.xlu1 %5235 }
0x17e3   : > { %v5240_v39 = vmul.f32 0.03125, %v5236_v38 }
0x17e5   : > { %v5242_v42 = vsub.f32 %v5231_v52, %v5240_v39 }
0x17e6   : > { %v5239_v45 = vpop.xlane.xlu0 %5238 }
0x17e7   : > { %v5241_v46 = vmul.f32 0.03125, %v5239_v45  ;;  %v5244_v58 = vmul.f32 %v5242_v42, %v5242_v42 }
0x17e9   : > { %v5243_v59 = vsub.f32 %v5232_v53, %v5241_v46  ;;  %v5246_v47 = vsel %vm608_vm1, %v5244_v58, 0.0 }
0x17ea   : > { %5247 = vadd.xlane.f32.xlu1 %v5246_v47 }
0x17eb   : > { %v5245_v50 = vmul.f32 %v5243_v59, %v5243_v59 }
0x17ed   : > { %v5249_v2 = vsel %vm608_vm1, %v5245_v50, 0.0 }
0x17ee   : > { %5250 = vadd.xlane.f32.xlu0 %v5249_v2 }
0x1873   : > { %v5248_v17 = vpop.xlane.xlu1 %5247 }
0x1874   : > { %v5252_v61 = vmul.f32 0.03125, %v5248_v17 }
0x1876   : > { %v5254_v54 = vadd.f32 1e-05, %v5252_v61 }
0x1877   : > { %v5251_v57 = vpop.xlane.xlu0 %5250 }
0x1878   : > { %6210 = vrsqrt.f32 %v5254_v54  ;;  %v5253_v60 = vmul.f32 0.03125, %v5251_v57 }
0x187a   : > { %v5255_v6 = vadd.f32 1e-05, %v5253_v60 }
0x187c   : > { %6212 = vrsqrt.f32 %v5255_v6 }
0x1885   : > { %v6211_v3 = vpop.eup %6210 }
0x1886   : > { %v5258_v5 = vmul.f32 %v6211_v3, %v5242_v42 }
0x1888   : > { %v5264_v12 = vmul.f32 %v5263_v63, %v5258_v5 }
0x1889   : > { %v6213_v29 = vpop.eup %6212 }
0x188a   : > { %v5270_v30 = vadd.f32 %v5269_v33, %v5264_v12  ;;  %v5259_v22 = vmul.f32 %v6213_v29, %v5243_v59 }
0x188c   : > { %5272 = vst.msk [vmem:[%s7307_s13] sm:$0xff] %vm608_vm1, %v5270_v30  ;;  %v5265_v40 = vmul.f32 %v5263_v63, %v5259_v22  ;;  %5277 = sbr.rel (%p5533_p5) target bundleno = 6602 (0x19ca), region = 80 }
0x188e   : > { %v5271_v48 = vadd.f32 %v5269_v33, %v5265_v40 }
0x1890   : > { %5273 = vst.msk [vmem:[%s7307_s13 + $0x8] sm:$0xff] %vm608_vm1, %v5271_v48 }
0x1891   : > { %v5279_v11 = vsel %vm608_vm1, %v5270_v30, 0.0  ;;  %v5282_v27 = vsel %vm608_vm1, %v5271_v48, 0.0  ;;  %v5278_v55 = vld [vmem:[%s7321_s21] sm:$0x3] }
0x1892   : > { %5280 = vadd.xlane.f32.xlu0 %v5279_v11  ;;  %v5308_v8 = vrot.slane %v5278_v55, %v6778_v41  ;;  %v5314_v62 = vrot.slane %v5278_v55, %v6782_v43 }
0x1896   : > { %5283 = vadd.xlane.f32.xlu0 %v5282_v27 }
0x191b   : > { %v5281_v34 = vpop.xlane.xlu0 %5280 }
0x191c   : > { %v5285_v23 = vmul.f32 0.03125, %v5281_v34 }
0x191e   : > { %v5287_v24 = vsub.f32 %v5270_v30, %v5285_v23 }
0x191f   : > { %v5284_v7 = vpop.xlane.xlu0 %5283 }
0x1920   : > { %v5286_v10 = vmul.f32 0.03125, %v5284_v7  ;;  %v5289_v51 = vmul.f32 %v5287_v24, %v5287_v24 }
0x1922   : > { %v5288_v14 = vsub.f32 %v5271_v48, %v5286_v10  ;;  %v5291_v15 = vsel %vm608_vm1, %v5289_v51, 0.0 }
0x1923   : > { %5292 = vadd.xlane.f32.xlu1 %v5291_v15 }
0x1924   : > { %v5290_v16 = vmul.f32 %v5288_v14, %v5288_v14 }
0x1926   : > { %v5294_v13 = vsel %vm608_vm1, %v5290_v16, 0.0 }
0x1927   : > { %5295 = vadd.xlane.f32.xlu1 %v5294_v13 }
0x19ac   : > { %v5293_v1 = vpop.xlane.xlu1 %5292 }
0x19ad   : > { %v5297_v56 = vmul.f32 0.03125, %v5293_v1 }
0x19af   : > { %v5299_v44 = vadd.f32 1e-05, %v5297_v56 }
0x19b0   : > { %v5296_v25 = vpop.xlane.xlu1 %5295 }
0x19b1   : > { %6216 = vrsqrt.f32 %v5299_v44  ;;  %v5298_v4 = vmul.f32 0.03125, %v5296_v25 }
0x19b3   : > { %v5300_v18 = vadd.f32 1e-05, %v5298_v4 }
0x19b5   : > { %6218 = vrsqrt.f32 %v5300_v18 }
0x19be   : > { %v6217_v19 = vpop.eup %6216 }
0x19bf   : > { %v5303_v20 = vmul.f32 %v6217_v19, %v5287_v24 }
0x19c1   : > { %v5309_v0 = vmul.f32 %v5308_v8, %v5303_v20 }
0x19c2   : > { %v6219_v21 = vpop.eup %6218 }
0x19c3   : > { %v5315_v26 = vadd.f32 %v5314_v62, %v5309_v0  ;;  %v5304_v28 = vmul.f32 %v6219_v21, %v5288_v14 }
0x19c5   : > { %5317 = vst.msk [vmem:[%s7307_s13] sm:$0xff] %vm608_vm1, %v5315_v26  ;;  %v5310_v31 = vmul.f32 %v5308_v8, %v5304_v28 }
0x19c7   : > { %v5316_v49 = vadd.f32 %v5314_v62, %v5310_v31 }
0x19c9   : > { %5318 = vst.msk [vmem:[%s7307_s13 + $0x8] sm:$0xff] %vm608_vm1, %v5316_v49 }
0x19ca PF: > { %s7322_s20 = sld [smem:[#allocation2_spill]] }
0x19d0   : > { %s23_s25 = sadd.s32 1, %s7322_s20  }
0x19d1   : > { %p20_p6 = scmp.ge.s32.totalorder %s23_s25, 8  }
0x19d3   :  { %22 = sbr.rel (!%p20_p6) target bundleno = 5 (0x5), region = 133 }

// kernel: translation_model_forward.3
= control target key start
LH: loop header
LB: loop body
LE: loop exit
PB: predicated region body
PF: predicated region fallthrough
CT: control target
= control target key end

     0   :  { %s11589_s0 = inlined_call_operand.vmem [shape: f32[16,32], index: 0, kind: input, shape index: {}]   ;;  %s11590_s1 = inlined_call_operand.vmem [shape: f32[16,32], index: 1, kind: input, shape index: {}]   ;;  %s11591_s2 = inlined_call_operand.vmem [shape: f32[2,8,8], index: 2, kind: input, shape index: {}]   ;;  %s11592_s3 = inlined_call_operand.vmem [shape: f32[6,32,96], index: 3, kind: input, shape index: {}]   ;;  %s11593_s4 = inlined_call_operand.vmem [shape: f32[6,1,96], index: 4, kind: input, shape index: {}]   ;;  %s11594_s5 = inlined_call_operand.vmem [shape: f32[6,32,32], index: 5, kind: input, shape index: {}]   ;;  %s11595_s6 = inlined_call_operand.vmem [shape: f32[6,1,32], index: 6, kind: input, shape index: {}]   ;;  %s11596_s7 = inlined_call_operand.vmem [shape: f32[6,2,32], index: 7, kind: input, shape index: {}]   ;;  %s11597_s8 = inlined_call_operand.vmem [shape: f32[6,32,96], index: 8, kind: input, shape index: {}]   ;;  %s11598_s9 = inlined_call_operand.vmem [shape: f32[6,1,96], index: 9, kind: input, shape index: {}]   ;;  %s11599_s10 = inlined_call_operand.vmem [shape: f32[6,32,32], index: 10, kind: input, shape index: {}]   ;;  %s11600_s11 = inlined_call_operand.vmem [shape: f32[6,1,32], index: 11, kind: input, shape index: {}]   ;;  %s11601_s12 = inlined_call_operand.vmem [shape: f32[6,2,32], index: 12, kind: input, shape index: {}]   ;;  %s11602_s13 = inlined_call_operand.vmem [shape: f32[6,32,2048], index: 13, kind: input, shape index: {}]   ;;  %s11603_s14 = inlined_call_operand.vmem [shape: f32[6,1,2048], index: 14, kind: input, shape index: {}]   ;;  %s11604_s15 = inlined_call_operand.vmem [shape: f32[6,2048,32], index: 15, kind: input, shape index: {}]   ;;  %s11605_s16 = inlined_call_operand.vmem [shape: f32[6,1,32], index: 16, kind: input, shape index: {}]   ;;  %s11606_s17 = inlined_call_operand.vmem [shape: f32[6,2,32], index: 17, kind: input, shape index: {}]   ;;  %s11607_s18 = inlined_call_operand.vmem [shape: f32[2,32], index: 18, kind: input, shape index: {}]   ;;  %s11608_s19 = inlined_call_operand.hbm [shape: f32[16,32], index: 19, kind: output, shape index: {}]  }
   0x1   :  { %11647 = sst [smem:[#allocation8_spill]] %s11589_s0 }
   0x2   :  { %11648 = sst [smem:[#allocation9_spill]] %s11590_s1 }
   0x3   :  { %11649 = sst [smem:[#allocation10_spill]] %s11591_s2 }
   0x4   :  { %11650 = sst [smem:[#allocation11_spill]] %s11592_s3 }
   0x5   :  { %11651 = sst [smem:[#allocation12_spill]] %s11594_s5 }
   0x6   :  { %11652 = sst [smem:[#allocation13_spill]] %s11595_s6 }
   0x7   :  { %11653 = sst [smem:[#allocation14_spill]] %s11596_s7 }
   0x8   :  { %11654 = sst [smem:[#allocation15_spill]] %s11597_s8 }
   0x9   :  { %11655 = sst [smem:[#allocation16_spill]] %s11599_s10 }
   0xa   :  { %11656 = sst [smem:[#allocation17_spill]] %s11607_s18 }
   0xb   :  { %11657 = sst [smem:[#allocation18_spill]] %s11608_s19 }
   0xc   :  { %24 = vsyncpa [#allocation3], 0  ;;  %s10177_s0 = smov 0  }
   0xd LB: > { %11658 = sst [smem:[#allocation5_spill]] %s10041_s0  ;;  %s10183_s30 = sadd.s32 4294967295, %s10041_s0   ;;  %s10041_s0 = sphi %s10177_s0, %s30_s0  }
   0xe   : > { %p8820_p0 = scmp.ge.s32.totalorder %s10041_s0, 1  ;;  %p659_p1 = scmp.lt.s32.totalorder %s10041_s0, 7 }
  0x10   : > { %p660_p2 = pnand %p8820_p0, %p659_p1 }
  0x12   : > { %663 = sbr.rel (%p660_p2) target bundleno = 11738 (0x2dda), region = 96 }
  0x17   : > { %p766_p3 = scmp.lt.s32.totalorder %s10183_s30, 5  ;;  %s11659_s25 = sld [smem:[#allocation11_spill]] }
  0x18   : > { %s11660_s5 = sld [smem:[#allocation12_spill]]  ;;  %p8837_p4 = scmp.ne.s32.totalorder %s10183_s30, 0 }
  0x19   : > { %s10189_s20 = scalar_select %p766_p3, %s10183_s30, 5 }
  0x1a   : > { %s11664_s8 = sld [smem:[#allocation15_spill]] }
  0x1b   : > { %s8970_s21 = sshll.u32 %s10189_s20, 5  ;;  %s10211_s18 = sshll.u32 %s10189_s20, 1 }
  0x1c   : > { %s11666_s10 = sld [smem:[#allocation16_spill]]  ;;  %s8974_s24 = sshll.u32 %s10189_s20, 9 }
  0x1d   : > { %s10199_s3 = scalar_lea.vmem %s11659_s25, %s8970_s21  ;;  %s8833_s25 = sshll.u32 %s10189_s20, 4 }
  0x1e   : > { %s10204_s28 = scalar_lea.vmem %s11660_s5, %s8970_s21  ;;  %s10244_s26 = scalar_lea.vmem %s11602_s13, %s8974_s24 }
  0x1f   : > { %11661 = sst [smem:[#allocation6_spill]] %s10204_s28  ;;  %s8975_s0 = sshll.u32 %s10189_s20, 11 }
  0x20   : > { %s10220_s2 = scalar_lea.vmem %s11664_s8, %s8970_s21  ;;  %s10259_s22 = scalar_lea.vmem %s11604_s15, %s8975_s0 }
  0x21   : > { %11665 = sst [smem:[#allocation7_spill]] %s10220_s2  ;;  %830 = sbr.rel (%p8837_p4) target bundleno = 43 (0x2b), region = 100 }
  0x22   : > { %s10229_s19 = scalar_lea.vmem %s11666_s10, %s8970_s21  ;;  %s10249_s21 = scalar_lea.vmem %s11603_s14, %s8833_s25 }
  0x23   : > { %s11667_s24 = sld [smem:[#allocation8_spill]] (!%p8837_p4) }
  0x26   : > { %vm833_vm0 = vcmask 261120  }
  0x29   : > { %v831_v0 = vld [vmem:[%s11667_s24] sm:$0xff]  ;;  %v832_v1 = vld [vmem:[%s11667_s24 + $0x8] sm:$0xff] }
  0x2a   : > { %834 = vst.msk [vmem:[#allocation2] sm:$0xff] %vm833_vm0, %v831_v0  ;;  %835 = vst.msk [vmem:[#allocation2 + $0x8] sm:$0xff] %vm833_vm0, %v832_v1 }
  0x2b PF: > { %v845_v2 = vld [vmem:[%s10199_s3 + $0x18] sm:$0xff]  ;;  %v844_v3 = vld [vmem:[%s10199_s3 + $0x10] sm:$0xff]  ;;  %vm858_vm1 = vcmask 261120   ;;  %v843_v5 = vld [vmem:[%s10199_s3 + $0x8] sm:$0xff]  ;;  %v10043_v8 = vmov 0.0   ;;  %vm10044_vm2 = vmmov 0  }
  0x2c   : > { %9438 = vmatprep.subr.mxu0 %v845_v2  ;;  %v842_v6 = vld [vmem:[%s10199_s3] sm:$0xff]  ;;  %9449 = vmatprep.subr.mxu1 %v10043_v8  ;;  %s11668_s3 = scalar_lea.vmem %s11593_s4, %s10189_s20  ;;  %s10045_s1 = smov 96   ;;  %vm943_vm3 = vcmask 31744   ;;  %vm1099_vm4 = vcmask 64512   ;;  %vm3672_vm5 = vcmask 97280   ;;  %vm3675_vm6 = vcmask 130048  }
  0x2d   : > { %9439 = vmatpush3.msra.mxu0 %v845_v2  ;;  %9451 = vmatprep.mubr.msk.f32.mxu1 %vm10044_vm2, %v10043_v8  ;;  %v8838_v10 = vld [vmem:[%s11668_s3] ss:$0 sm:$0xff]  ;;  %s11669_s6 = sld [smem:[#allocation10_spill]]  ;;  %s10046_s2 = smov 64   ;;  %vm3678_vm7 = vcmask 162816   ;;  %vm3684_vm8 = vcmask 228352  }
  0x2e   : > { %9440 = vmatprep.subr.mxu0 %v844_v3  ;;  %s10047_s25 = smov 92   ;;  %s10048_s27 = smov 124   ;;  %vm3681_vm9 = vcmask 195584  }
  0x2f   : > { %9441 = vmatpush3.msra.mxu0 %v844_v3  ;;  %s10049_s7 = smov 60   ;;  %s10050_s10 = smov 120  }
  0x30   : > { %9442 = vmatprep.subr.mxu0 %v843_v5  ;;  %s10051_s3 = smov 88   ;;  %s10052_s0 = smov 56  }
  0x31   : > { %v836_v4 = vld [vmem:[#allocation2] sm:$0xff]  ;;  %9443 = vmatpush3.msra.mxu0 %v843_v5  ;;  %v837_v7 = vld [vmem:[#allocation2 + $0x8] sm:$0xff]  ;;  %s11631_s29 = smov 84   ;;  %s10054_s23 = smov 116  }
  0x32   : > { %9446 = vmatprep.mubr.msk.f32.mxu0 %vm858_vm1, %v836_v4  ;;  %9444 = vmatprep.subr.mxu0 %v842_v6  ;;  %s10055_s5 = smov 52   ;;  %s11625_s8 = smov 108  }
  0x33   : > { %9445 = vmatpush3.msra.mxu0 %v842_v6  ;;  %v10312_v17 = vld [vmem:[%s11669_s6] sm:$0xff]  ;;  %v10318_v22 = vld [vmem:[%s11669_s6 + $0x8] sm:$0xff]  ;;  %s11617_s28 = smov 72   ;;  %p8965_p5 = scmp.ne.s32.totalorder %s10183_s30, 5 }
  0x34   : > { %9447 = vmatmul.mubr.msk.f32.vlgmr.msra.gmra.mxu0 %vm858_vm1, %v837_v7  ;;  %9469 = vmatprep.subr.mxu0 %v10043_v8 }
  0x35   : > { %9471 = vmatprep.mubr.msk.f32.mxu0 %vm10044_vm2, %v10043_v8 }
  0xf4   : > { %v9448_v9 = vpop.f32.mrf.mxu0 }
  0xf5   : > { %v10293_v13 = vadd.f32 %v9448_v9, %v8838_v10 }
  0xf6   : > { %v931_v11 = vpop.f32.mrf.mxu0 }
  0xf7   : > { %v10289_v12 = vadd.f32 %v8838_v10, %v931_v11 }
  0xf9   : > { %941 = vrot.lane.b32.xlu0 %v10289_v12, %s10045_s1 }
  0xfd   : > { %1019 = vrot.lane.b32.xlu0 %v10293_v13, %s10045_s1 }
 0x16b   : > { %v942_v14 = vpop.permute.xlu0 %941 }
 0x16c   : > { %9450 = vmatpush3.xpose.msk.msra.mxu1 %vm943_vm3, %v942_v14 }
 0x16d   : > { %9454 = vmatprep.subr.mxu1 %v10043_v8 }
 0x16f   : > { %9452 = vmatmul.mubr.msk.f32.vlgmr.msra.gmra.mxu1 %vm943_vm3, %v10289_v12  ;;  %v1020_v15 = vpop.permute.xlu0 %1019 }
 0x170   : > { %9455 = vmatpush3.xpose.msk.msra.mxu1 %vm943_vm3, %v1020_v15  ;;  %9456 = vmatprep.mubr.msk.f32.mxu1 %vm10044_vm2, %v10043_v8 }
 0x171   : > { %9459 = vmatprep.subr.mxu1 %v10043_v8 }
 0x173   : > { %9457 = vmatmul.mubr.msk.f32.vlgmr.msra.gmra.mxu1 %vm943_vm3, %v10293_v13 }
 0x174   : > { %9461 = vmatprep.mubr.msk.f32.mxu1 %vm10044_vm2, %v10043_v8 }
 0x22f   : > { %v1014_v16 = vpop.f32.mrf.mxu1 }
 0x230   : > { %v1095_v18 = vmul.f32 0.5, %v1014_v16 }
 0x231   : > { %v9453_v19 = vpop.f32.mrf.mxu1 }
 0x232   : > { %v1097_v20 = vadd.f32 %v1095_v18, %v10312_v17 }
 0x233   : > { %v1091_v21 = vpop.f32.mrf.mxu1 }
 0x234   : > { %v1096_v23 = vmul.f32 0.5, %v1091_v21  ;;  %v1100_v24 = vsel %vm1099_vm4, %v1097_v20, -inf }
 0x235   : > { %1101 = vmax.xlane.f32.xlu1 %v1100_v24  ;;  %v9458_v25 = vpop.f32.mrf.mxu1 }
 0x236   : > { %v1098_v26 = vadd.f32 %v1096_v23, %v10318_v22 }
 0x238   : > { %v1103_v27 = vsel %vm1099_vm4, %v1098_v26, -inf }
 0x239   : > { %1104 = vmax.xlane.f32.xlu1 %v1103_v27 }
 0x24a   : > { %1122 = vrot.lane.b32.xlu1 %v10289_v12, %s10046_s2 }
 0x24e   : > { %1198 = vrot.lane.b32.xlu1 %v10293_v13, %s10046_s2  ;;  %s11627_s2 = smov 80  }
 0x252   : > { %1276 = vrot.lane.b32.xlu1 %v10289_v12, %s10047_s25 }
 0x256   : > { %1354 = vrot.lane.b32.xlu1 %v10293_v13, %s10047_s25 }
 0x2be   : > { %v1102_v28 = vpop.xlane.xlu1 %1101 }
 0x2bf   : > { %v1106_v29 = vsub.f32 %v1097_v20, %v1102_v28 }
 0x2c1   : > { %v1108_v30 = vmul.f32 1.442695, %v1106_v29 }
 0x2c2   : > { %v1105_v31 = vpop.xlane.xlu1 %1104 }
 0x2c3   : > { %9861 = vpow2.f32 %v1108_v30  ;;  %v1107_v32 = vsub.f32 %v1098_v26, %v1105_v31 }
 0x2c5   : > { %v1110_v33 = vmul.f32 1.442695, %v1107_v32 }
 0x2c6   : > { %v1123_v34 = vpop.permute.xlu1 %1122 }
 0x2c7   : > { %9863 = vpow2.f32 %v1110_v33  ;;  %9460 = vmatpush3.msra.mxu1 %v1123_v34 }
 0x2c8   : > { %9464 = vmatprep.subr.mxu1 %v10043_v8 }
 0x2ca   : > { %v1199_v35 = vpop.permute.xlu1 %1198 }
 0x2ce   : > { %v1277_v36 = vpop.permute.xlu1 %1276 }
 0x2cf   : > { %9470 = vmatpush3.xpose.msk.msra.mxu0 %vm943_vm3, %v1277_v36 }
 0x2d0   : > { %v9862_v37 = vpop.eup %9861  ;;  %9479 = vmatprep.subr.mxu0 %v10043_v8 }
 0x2d1   : > { %v1112_v38 = vsel %vm1099_vm4, %v9862_v37, 0.0 }
 0x2d2   : > { %1113 = vadd.xlane.f32.xlu0 %v1112_v38  ;;  %v1355_v41 = vpop.permute.xlu1 %1354 }
 0x2d4   : > { %v9864_v39 = vpop.eup %9863 }
 0x2d5   : > { %v1115_v40 = vsel %vm1099_vm4, %v9864_v39, 0.0 }
 0x2d6   : > { %1116 = vadd.xlane.f32.xlu1 %v1115_v40 }
 0x2e7   : > { %1352 = vrot.lane.b32.xlu1 %v10293_v13, %s10048_s27 }
 0x2e8   : > { %1274 = vrot.lane.b32.xlu0 %v10289_v12, %s10048_s27 }
 0x35b   : > { %v1114_v42 = vpop.xlane.xlu0 %1113 }
 0x35c   : > { %9865 = vrcp.f32 %v1114_v42 }
 0x35f   : > { %v1117_v43 = vpop.xlane.xlu1 %1116  ;;  %v1275_v44 = vpop.permute.xlu0 %1274 }
 0x360   : > { %9867 = vrcp.f32 %v1117_v43  ;;  %9472 = vmatmul.mubr.msk.f32.vlgmr.msra.gmra.mxu0 %vm943_vm3, %v1275_v44 }
 0x361   : > { %9481 = vmatprep.mubr.msk.f32.mxu0 %vm10044_vm2, %v10043_v8 }
 0x363   : > { %v1353_v49 = vpop.permute.xlu1 %1352 }
 0x369   : > { %v9866_v45 = vpop.eup %9865 }
 0x36a   : > { %v1119_v46 = vmul.f32 %v9866_v45, %v9862_v37 }
 0x36c   : > { %9462 = vmatmul.mubr.msk.f32.vlgmr.msra.gmra.mxu1 %vm1099_vm4, %v1119_v46 }
 0x36d   : > { %v9868_v47 = vpop.eup %9867  ;;  %9465 = vmatpush3.msra.mxu1 %v1199_v35  ;;  %9466 = vmatprep.mubr.msk.f32.mxu1 %vm10044_vm2, %v10043_v8 }
 0x36e   : > { %9474 = vmatprep.subr.mxu1 %v10043_v8  ;;  %v1121_v48 = vmul.f32 %v9868_v47, %v9864_v39 }
 0x370   : > { %9467 = vmatmul.mubr.msk.f32.vlgmr.msra.gmra.mxu1 %vm1099_vm4, %v1121_v48 }
 0x371   : > { %9475 = vmatpush3.xpose.msk.msra.mxu1 %vm943_vm3, %v1355_v41  ;;  %9476 = vmatprep.mubr.msk.f32.mxu1 %vm10044_vm2, %v10043_v8 }
 0x372   : > { %9484 = vmatprep.subr.mxu1 %v10043_v8 }
 0x374   : > { %9477 = vmatmul.mubr.msk.f32.vlgmr.msra.gmra.mxu1 %vm943_vm3, %v1353_v49 }
 0x375   : > { %9486 = vmatprep.mubr.msk.f32.mxu1 %vm10044_vm2, %v10043_v8 }
 0x420   : > { %v1348_v50 = vpop.f32.mrf.mxu0 }
 0x421   : > { %v1430_v51 = vmul.f32 0.5, %v1348_v50 }
 0x422   : > { %v9473_v52 = vpop.f32.mrf.mxu0 }
 0x423   : > { %v1432_v53 = vadd.f32 %v1430_v51, %v10312_v17 }
 0x425   : > { %v1434_v54 = vsel %vm1099_vm4, %v1432_v53, -inf }
 0x426   : > { %1435 = vmax.xlane.f32.xlu1 %v1434_v54 }
 0x42c   : > { %v10355_v55 = vpop.f32.mrf.mxu1 }
 0x42e   : > { %v9463_v56 = vpop.f32.mrf.mxu1 }
 0x430   : > { %v10357_v57 = vpop.f32.mrf.mxu1 }
 0x432   : > { %v9468_v58 = vpop.f32.mrf.mxu1 }
 0x434   : > { %v1426_v59 = vpop.f32.mrf.mxu1 }
 0x435   : > { %v1431_v60 = vmul.f32 0.5, %v1426_v59 }
 0x436   : > { %v9478_v61 = vpop.f32.mrf.mxu1 }
 0x437   : > { %v1433_v62 = vadd.f32 %v1431_v60, %v10318_v22 }
 0x439   : > { %v1437_v63 = vsel %vm1099_vm4, %v1433_v62, -inf }
 0x43a   : > { %1438 = vmax.xlane.f32.xlu0 %v1437_v63 }
 0x450   : > { %1532 = vrot.lane.b32.xlu0 %v10293_v13, %s10049_s7 }
 0x454   : > { %1608 = vrot.lane.b32.xlu0 %v10289_v12, %s10050_s10 }
 0x4af   : > { %v1436_v0 = vpop.xlane.xlu1 %1435 }
 0x4b0   : > { %v1440_v1 = vsub.f32 %v1432_v53, %v1436_v0 }
 0x4b2   : > { %v1442_v2 = vmul.f32 1.442695, %v1440_v1 }
 0x4b4   : > { %9869 = vpow2.f32 %v1442_v2 }
 0x4c1   : > { %v9870_v3 = vpop.eup %9869 }
 0x4c2   : > { %v1446_v4 = vsel %vm1099_vm4, %v9870_v3, 0.0 }
 0x4c3   : > { %1447 = vadd.xlane.f32.xlu1 %v1446_v4  ;;  %v1439_v5 = vpop.xlane.xlu0 %1438 }
 0x4c4   : > { %v1441_v7 = vsub.f32 %v1433_v62, %v1439_v5 }
 0x4c6   : > { %v1444_v9 = vmul.f32 1.442695, %v1441_v7 }
 0x4c7   : > { %v1533_v6 = vpop.permute.xlu0 %1532 }
 0x4c8   : > { %9485 = vmatpush3.msra.mxu1 %v1533_v6  ;;  %9871 = vpow2.f32 %v1444_v9 }
 0x4c9   : > { %9494 = vmatprep.subr.mxu1 %v10043_v8 }
 0x4cb   : > { %v1609_v20 = vpop.permute.xlu0 %1608 }
 0x4d4   : > { %1456 = vrot.lane.b32.xlu1 %v10289_v12, %s10049_s7  ;;  %s11629_s7 = smov 112  }
 0x4d5   : > { %v9872_v10 = vpop.eup %9871 }
 0x4d6   : > { %v1449_v11 = vsel %vm1099_vm4, %v9872_v10, 0.0 }
 0x4d8   : > { %1610 = vrot.lane.b32.xlu1 %v10289_v12, %s10051_s3 }
 0x4dc   : > { %1688 = vrot.lane.b32.xlu1 %v10293_v13, %s10051_s3 }
 0x500   : > { %1450 = vadd.xlane.f32.xlu1 %v1449_v11 }
 0x511   : > { %1686 = vrot.lane.b32.xlu1 %v10293_v13, %s10050_s10 }
 0x54c   : > { %v1448_v14 = vpop.xlane.xlu1 %1447 }
 0x54d   : > { %9873 = vrcp.f32 %v1448_v14 }
 0x550   : > { %v1457_v15 = vpop.permute.xlu1 %1456 }
 0x551   : > { %9480 = vmatpush3.msra.mxu0 %v1457_v15 }
 0x552   : > { %9489 = vmatprep.subr.mxu0 %v10043_v8 }
 0x554   : > { %v1611_v19 = vpop.permute.xlu1 %1610 }
 0x558   : > { %v1689_v21 = vpop.permute.xlu1 %1688 }
 0x55a   : > { %v9874_v16 = vpop.eup %9873 }
 0x55b   : > { %v1453_v18 = vmul.f32 %v9874_v16, %v9870_v3 }
 0x55d   : > { %9482 = vmatmul.mubr.msk.f32.vlgmr.msra.gmra.mxu0 %vm1099_vm4, %v1453_v18 }
 0x55e   : > { %9490 = vmatpush3.xpose.msk.msra.mxu0 %vm943_vm3, %v1611_v19  ;;  %9491 = vmatprep.mubr.msk.f32.mxu0 %vm10044_vm2, %v10043_v8 }
 0x55f   : > { %9499 = vmatprep.subr.mxu0 %v10043_v8 }
 0x561   : > { %9492 = vmatmul.mubr.msk.f32.vlgmr.msra.gmra.mxu0 %vm943_vm3, %v1609_v20 }
 0x562   : > { %9501 = vmatprep.mubr.msk.f32.mxu0 %vm10044_vm2, %v10043_v8 }
 0x589   : > { %v1451_v23 = vpop.xlane.xlu1 %1450 }
 0x58a   : > { %9875 = vrcp.f32 %v1451_v23 }
 0x58d   : > { %v1687_v26 = vpop.permute.xlu1 %1686 }
 0x597   : > { %v9876_v24 = vpop.eup %9875 }
 0x598   : > { %v1455_v25 = vmul.f32 %v9876_v24, %v9872_v10 }
 0x59a   : > { %9487 = vmatmul.mubr.msk.f32.vlgmr.msra.gmra.mxu1 %vm1099_vm4, %v1455_v25 }
 0x59b   : > { %9495 = vmatpush3.xpose.msk.msra.mxu1 %vm943_vm3, %v1689_v21  ;;  %9496 = vmatprep.mubr.msk.f32.mxu1 %vm10044_vm2, %v10043_v8 }
 0x59c   : > { %9504 = vmatprep.subr.mxu1 %v10043_v8 }
 0x59e   : > { %9497 = vmatmul.mubr.msk.f32.vlgmr.msra.gmra.mxu1 %vm943_vm3, %v1687_v26 }
 0x59f   : > { %9506 = vmatprep.mubr.msk.f32.mxu1 %vm10044_vm2, %v10043_v8 }
 0x61d   : > { %v10391_v27 = vpop.f32.mrf.mxu0 }
 0x61f   : > { %v9483_v28 = vpop.f32.mrf.mxu0 }
 0x621   : > { %v1682_v29 = vpop.f32.mrf.mxu0 }
 0x622   : > { %v1764_v30 = vmul.f32 0.5, %v1682_v29 }
 0x623   : > { %v9493_v31 = vpop.f32.mrf.mxu0 }
 0x624   : > { %v1766_v32 = vadd.f32 %v1764_v30, %v10312_v17 }
 0x626   : > { %v1768_v33 = vsel %vm1099_vm4, %v1766_v32, -inf }
 0x627   : > { %1769 = vmax.xlane.f32.xlu0 %v1768_v33 }
 0x65a   : > { %v10395_v34 = vpop.f32.mrf.mxu1 }
 0x65c   : > { %v9488_v35 = vpop.f32.mrf.mxu1 }
 0x65e   : > { %v1760_v36 = vpop.f32.mrf.mxu1 }
 0x65f   : > { %v1765_v37 = vmul.f32 0.5, %v1760_v36 }
 0x660   : > { %v9498_v38 = vpop.f32.mrf.mxu1 }
 0x661   : > { %v1767_v39 = vadd.f32 %v1765_v37, %v10318_v22 }
 0x663   : > { %v1771_v40 = vsel %vm1099_vm4, %v1767_v39, -inf }
 0x664   : > { %1772 = vmax.xlane.f32.xlu1 %v1771_v40 }
 0x675   : > { %1790 = vrot.lane.b32.xlu1 %v10289_v12, %s10052_s0 }
 0x679   : > { %1944 = vrot.lane.b32.xlu1 %v10289_v12, %s11631_s29 }
 0x67d   : > { %2022 = vrot.lane.b32.xlu1 %v10293_v13, %s11631_s29  ;;  %s11637_s29 = smov 24  }
 0x681   : > { %2020 = vrot.lane.b32.xlu1 %v10293_v13, %s10054_s23 }
 0x6b0   : > { %v1770_v41 = vpop.xlane.xlu0 %1769 }
 0x6b1   : > { %v1774_v42 = vsub.f32 %v1766_v32, %v1770_v41 }
 0x6b3   : > { %v1776_v43 = vmul.f32 1.442695, %v1774_v42 }
 0x6b5   : > { %9877 = vpow2.f32 %v1776_v43 }
 0x6c2   : > { %v9878_v44 = vpop.eup %9877 }
 0x6c3   : > { %v1780_v45 = vsel %vm1099_vm4, %v9878_v44, 0.0 }
 0x6c4   : > { %1781 = vadd.xlane.f32.xlu0 %v1780_v45 }
 0x6da   : > { %1866 = vrot.lane.b32.xlu0 %v10293_v13, %s10052_s0  ;;  %s10058_s0 = smov 48  }
 0x6ed   : > { %v1773_v46 = vpop.xlane.xlu1 %1772 }
 0x6ee   : > { %v1775_v47 = vsub.f32 %v1767_v39, %v1773_v46 }
 0x6f0   : > { %v1778_v48 = vmul.f32 1.442695, %v1775_v47 }
 0x6f1   : > { %v1791_v49 = vpop.permute.xlu1 %1790 }
 0x6f2   : > { %9879 = vpow2.f32 %v1778_v48  ;;  %9500 = vmatpush3.msra.mxu0 %v1791_v49 }
 0x6f3   : > { %9509 = vmatprep.subr.mxu0 %v10043_v8 }
 0x6f5   : > { %v1945_v58 = vpop.permute.xlu1 %1944 }
 0x6f9   : > { %v2023_v62 = vpop.permute.xlu1 %2022 }
 0x6fd   : > { %v2021_v0 = vpop.permute.xlu1 %2020 }
 0x6ff   : > { %v9880_v50 = vpop.eup %9879 }
 0x700   : > { %v1783_v51 = vsel %vm1099_vm4, %v9880_v50, 0.0 }
 0x701   : > { %1784 = vadd.xlane.f32.xlu0 %v1783_v51 }
 0x717   : > { %1942 = vrot.lane.b32.xlu0 %v10289_v12, %s10054_s23 }
 0x74d   : > { %v1782_v52 = vpop.xlane.xlu0 %1781 }
 0x74e   : > { %9881 = vrcp.f32 %v1782_v52 }
 0x751   : > { %v1867_v53 = vpop.permute.xlu0 %1866 }
 0x752   : > { %9505 = vmatpush3.msra.mxu1 %v1867_v53 }
 0x753   : > { %9514 = vmatprep.subr.mxu1 %v10043_v8 }
 0x75b   : > { %v9882_v54 = vpop.eup %9881 }
 0x75c   : > { %v1787_v56 = vmul.f32 %v9882_v54, %v9878_v44 }
 0x75e   : > { %9502 = vmatmul.mubr.msk.f32.vlgmr.msra.gmra.mxu0 %vm1099_vm4, %v1787_v56 }
 0x75f   : > { %9510 = vmatpush3.xpose.msk.msra.mxu0 %vm943_vm3, %v1945_v58  ;;  %9511 = vmatprep.mubr.msk.f32.mxu0 %vm10044_vm2, %v10043_v8 }
 0x760   : > { %9519 = vmatprep.subr.mxu0 %v10043_v8 }
 0x78a   : > { %v1785_v59 = vpop.xlane.xlu0 %1784 }
 0x78b   : > { %9883 = vrcp.f32 %v1785_v59 }
 0x78e   : > { %v1943_v60 = vpop.permute.xlu0 %1942 }
 0x78f   : > { %9512 = vmatmul.mubr.msk.f32.vlgmr.msra.gmra.mxu0 %vm943_vm3, %v1943_v60 }
 0x790   : > { %9521 = vmatprep.mubr.msk.f32.mxu0 %vm10044_vm2, %v10043_v8 }
 0x798   : > { %v9884_v61 = vpop.eup %9883 }
 0x799   : > { %v1789_v63 = vmul.f32 %v9884_v61, %v9880_v50 }
 0x79b   : > { %9507 = vmatmul.mubr.msk.f32.vlgmr.msra.gmra.mxu1 %vm1099_vm4, %v1789_v63 }
 0x79c   : > { %9515 = vmatpush3.xpose.msk.msra.mxu1 %vm943_vm3, %v2023_v62  ;;  %9516 = vmatprep.mubr.msk.f32.mxu1 %vm10044_vm2, %v10043_v8 }
 0x79d   : > { %9524 = vmatprep.subr.mxu1 %v10043_v8 }
 0x79f   : > { %9517 = vmatmul.mubr.msk.f32.vlgmr.msra.gmra.mxu1 %vm943_vm3, %v2021_v0 }
 0x7a0   : > { %9526 = vmatprep.mubr.msk.f32.mxu1 %vm10044_vm2, %v10043_v8 }
 0x81e   : > { %v10429_v1 = vpop.f32.mrf.mxu0 }
 0x820   : > { %v9503_v2 = vpop.f32.mrf.mxu0 }
 0x84f   : > { %v2016_v3 = vpop.f32.mrf.mxu0 }
 0x850   : > { %v2098_v4 = vmul.f32 0.5, %v2016_v3 }
 0x851   : > { %v9513_v5 = vpop.f32.mrf.mxu0 }
 0x852   : > { %v2100_v6 = vadd.f32 %v2098_v4, %v10312_v17 }
 0x854   : > { %v2102_v7 = vsel %vm1099_vm4, %v2100_v6, -inf }
 0x855   : > { %2103 = vmax.xlane.f32.xlu0 %v2102_v7 }
 0x85b   : > { %v10433_v9 = vpop.f32.mrf.mxu1 }
 0x85d   : > { %v9508_v10 = vpop.f32.mrf.mxu1 }
 0x85f   : > { %v2094_v11 = vpop.f32.mrf.mxu1 }
 0x860   : > { %v2099_v14 = vmul.f32 0.5, %v2094_v11 }
 0x861   : > { %v9518_v15 = vpop.f32.mrf.mxu1 }
 0x862   : > { %v2101_v16 = vadd.f32 %v2099_v14, %v10318_v22 }
 0x864   : > { %v2105_v18 = vsel %vm1099_vm4, %v2101_v16, -inf }
 0x865   : > { %2106 = vmax.xlane.f32.xlu1 %v2105_v18 }
 0x876   : > { %2124 = vrot.lane.b32.xlu1 %v10289_v12, %s10055_s5 }
 0x87a   : > { %2278 = vrot.lane.b32.xlu1 %v10289_v12, %s11627_s2 }
 0x87e   : > { %2356 = vrot.lane.b32.xlu1 %v10293_v13, %s11627_s2  ;;  %s11641_s2 = smov 16  }
 0x882   : > { %2354 = vrot.lane.b32.xlu1 %v10293_v13, %s11629_s7 }
 0x8de   : > { %v2104_v19 = vpop.xlane.xlu0 %2103 }
 0x8df   : > { %v2108_v20 = vsub.f32 %v2100_v6, %v2104_v19 }
 0x8e1   : > { %v2110_v21 = vmul.f32 1.442695, %v2108_v20 }
 0x8e3   : > { %9885 = vpow2.f32 %v2110_v21 }
 0x8ee   : > { %v2107_v23 = vpop.xlane.xlu1 %2106 }
 0x8ef   : > { %v2109_v28 = vsub.f32 %v2101_v16, %v2107_v23 }
 0x8f0   : > { %v9886_v24 = vpop.eup %9885 }
 0x8f1   : > { %v2114_v25 = vsel %vm1099_vm4, %v9886_v24, 0.0  ;;  %v2112_v29 = vmul.f32 1.442695, %v2109_v28 }
 0x8f2   : > { %v2125_v26 = vpop.permute.xlu1 %2124  ;;  %2115 = vadd.xlane.f32.xlu0 %v2114_v25 }
 0x8f3   : > { %9520 = vmatpush3.msra.mxu0 %v2125_v26  ;;  %9887 = vpow2.f32 %v2112_v29 }
 0x8f4   : > { %9529 = vmatprep.subr.mxu0 %v10043_v8 }
 0x8f6   : > { %v2279_v37 = vpop.permute.xlu1 %2278 }
 0x8fa   : > { %v2357_v41 = vpop.permute.xlu1 %2356 }
 0x8fe   : > { %v2355_v43 = vpop.permute.xlu1 %2354 }
 0x900   : > { %v9888_v30 = vpop.eup %9887 }
 0x901   : > { %v2117_v31 = vsel %vm1099_vm4, %v9888_v30, 0.0 }
 0x908   : > { %2200 = vrot.lane.b32.xlu0 %v10293_v13, %s10055_s5  ;;  %s11615_s5 = smov 76  }
 0x927   : > { %2118 = vadd.xlane.f32.xlu0 %v2117_v31 }
 0x93d   : > { %2276 = vrot.lane.b32.xlu0 %v10289_v12, %s11629_s7  ;;  %s11639_s7 = smov 20  }
 0x97b   : > { %v2116_v32 = vpop.xlane.xlu0 %2115 }
 0x97c   : > { %9889 = vrcp.f32 %v2116_v32 }
 0x97f   : > { %v2201_v33 = vpop.permute.xlu0 %2200 }
 0x980   : > { %9525 = vmatpush3.msra.mxu1 %v2201_v33 }
 0x981   : > { %9534 = vmatprep.subr.mxu1 %v10043_v8 }
 0x989   : > { %v9890_v35 = vpop.eup %9889 }
 0x98a   : > { %v2121_v36 = vmul.f32 %v9890_v35, %v9886_v24 }
 0x98c   : > { %9522 = vmatmul.mubr.msk.f32.vlgmr.msra.gmra.mxu0 %vm1099_vm4, %v2121_v36 }
 0x98d   : > { %9530 = vmatpush3.xpose.msk.msra.mxu0 %vm943_vm3, %v2279_v37  ;;  %9531 = vmatprep.mubr.msk.f32.mxu0 %vm10044_vm2, %v10043_v8 }
 0x98e   : > { %9539 = vmatprep.subr.mxu0 %v10043_v8 }
 0x9b0   : > { %v2119_v38 = vpop.xlane.xlu0 %2118 }
 0x9b1   : > { %9891 = vrcp.f32 %v2119_v38 }
 0x9b4   : > { %v2277_v39 = vpop.permute.xlu0 %2276 }
 0x9b5   : > { %9532 = vmatmul.mubr.msk.f32.vlgmr.msra.gmra.mxu0 %vm943_vm3, %v2277_v39 }
 0x9b6   : > { %9541 = vmatprep.mubr.msk.f32.mxu0 %vm10044_vm2, %v10043_v8 }
 0x9be   : > { %v9892_v40 = vpop.eup %9891 }
 0x9bf   : > { %v2123_v42 = vmul.f32 %v9892_v40, %v9888_v30 }
 0x9c1   : > { %9527 = vmatmul.mubr.msk.f32.vlgmr.msra.gmra.mxu1 %vm1099_vm4, %v2123_v42 }
 0x9c2   : > { %9535 = vmatpush3.xpose.msk.msra.mxu1 %vm943_vm3, %v2357_v41  ;;  %9536 = vmatprep.mubr.msk.f32.mxu1 %vm10044_vm2, %v10043_v8 }
 0x9c3   : > { %9544 = vmatprep.subr.mxu1 %v10043_v8 }
 0x9c5   : > { %9537 = vmatmul.mubr.msk.f32.vlgmr.msra.gmra.mxu1 %vm943_vm3, %v2355_v43 }
 0x9c6   : > { %9546 = vmatprep.mubr.msk.f32.mxu1 %vm10044_vm2, %v10043_v8 }
 0xa4c   : > { %v10467_v44 = vpop.f32.mrf.mxu0 }
 0xa4e   : > { %v9523_v45 = vpop.f32.mrf.mxu0 }
 0xa75   : > { %v2350_v46 = vpop.f32.mrf.mxu0 }
 0xa76   : > { %v2432_v47 = vmul.f32 0.5, %v2350_v46 }
 0xa77   : > { %v9533_v48 = vpop.f32.mrf.mxu0 }
 0xa78   : > { %v2434_v49 = vadd.f32 %v2432_v47, %v10312_v17 }
 0xa7a   : > { %v2436_v50 = vsel %vm1099_vm4, %v2434_v49, -inf }
 0xa7b   : > { %2437 = vmax.xlane.f32.xlu0 %v2436_v50 }
 0xa81   : > { %v10471_v51 = vpop.f32.mrf.mxu1 }
 0xa83   : > { %v9528_v52 = vpop.f32.mrf.mxu1 }
 0xa85   : > { %v2428_v53 = vpop.f32.mrf.mxu1 }
 0xa86   : > { %v2433_v54 = vmul.f32 0.5, %v2428_v53 }
 0xa87   : > { %v9538_v56 = vpop.f32.mrf.mxu1 }
 0xa88   : > { %v2435_v58 = vadd.f32 %v2433_v54, %v10318_v22 }
 0xa8a   : > { %v2439_v59 = vsel %vm1099_vm4, %v2435_v58, -inf }
 0xa8b   : > { %2440 = vmax.xlane.f32.xlu1 %v2439_v59 }
 0xa9c   : > { %2458 = vrot.lane.b32.xlu1 %v10289_v12, %s10058_s0 }
 0xaa0   : > { %2612 = vrot.lane.b32.xlu1 %v10289_v12, %s11615_s5 }
 0xaa4   : > { %2690 = vrot.lane.b32.xlu1 %v10293_v13, %s11615_s5  ;;  %s11619_s5 = smov 104  }
 0xaa8   : > { %2688 = vrot.lane.b32.xlu1 %v10293_v13, %s11625_s8 }
 0xb04   : > { %v2438_v60 = vpop.xlane.xlu0 %2437 }
 0xb05   : > { %v2442_v61 = vsub.f32 %v2434_v49, %v2438_v60 }
 0xb07   : > { %v2444_v62 = vmul.f32 1.442695, %v2442_v61 }
 0xb09   : > { %9893 = vpow2.f32 %v2444_v62 }
 0xb14   : > { %v2441_v63 = vpop.xlane.xlu1 %2440 }
 0xb15   : > { %v2443_v4 = vsub.f32 %v2435_v58, %v2441_v63 }
 0xb16   : > { %v9894_v0 = vpop.eup %9893 }
 0xb17   : > { %v2448_v2 = vsel %vm1099_vm4, %v9894_v0, 0.0  ;;  %v2446_v5 = vmul.f32 1.442695, %v2443_v4 }
 0xb18   : > { %v2459_v3 = vpop.permute.xlu1 %2458  ;;  %2449 = vadd.xlane.f32.xlu0 %v2448_v2 }
 0xb19   : > { %9540 = vmatpush3.msra.mxu0 %v2459_v3  ;;  %9895 = vpow2.f32 %v2446_v5 }
 0xb1a   : > { %9549 = vmatprep.subr.mxu0 %v10043_v8 }
 0xb1c   : > { %v2613_v16 = vpop.permute.xlu1 %2612 }
 0xb20   : > { %v2691_v21 = vpop.permute.xlu1 %2690 }
 0xb24   : > { %v2689_v24 = vpop.permute.xlu1 %2688 }
 0xb26   : > { %v9896_v6 = vpop.eup %9895 }
 0xb27   : > { %v2451_v7 = vsel %vm1099_vm4, %v9896_v6, 0.0 }
 0xb2e   : > { %2534 = vrot.lane.b32.xlu0 %v10293_v13, %s10058_s0  ;;  %s10061_s0 = smov 44  }
 0xb4d   : > { %2452 = vadd.xlane.f32.xlu0 %v2451_v7 }
 0xb63   : > { %2610 = vrot.lane.b32.xlu0 %v10289_v12, %s11625_s8  ;;  %s11643_s8 = smov 12  }
 0xba1   : > { %v2450_v10 = vpop.xlane.xlu0 %2449 }
 0xba2   : > { %9897 = vrcp.f32 %v2450_v10 }
 0xba5   : > { %v2535_v11 = vpop.permute.xlu0 %2534 }
 0xba6   : > { %9545 = vmatpush3.msra.mxu1 %v2535_v11 }
 0xba7   : > { %9554 = vmatprep.subr.mxu1 %v10043_v8 }
 0xbaf   : > { %v9898_v14 = vpop.eup %9897 }
 0xbb0   : > { %v2455_v15 = vmul.f32 %v9898_v14, %v9894_v0 }
 0xbb2   : > { %9542 = vmatmul.mubr.msk.f32.vlgmr.msra.gmra.mxu0 %vm1099_vm4, %v2455_v15 }
 0xbb3   : > { %9550 = vmatpush3.xpose.msk.msra.mxu0 %vm943_vm3, %v2613_v16  ;;  %9551 = vmatprep.mubr.msk.f32.mxu0 %vm10044_vm2, %v10043_v8 }
 0xbb4   : > { %9559 = vmatprep.subr.mxu0 %v10043_v8 }
 0xbd6   : > { %v2453_v18 = vpop.xlane.xlu0 %2452 }
 0xbd7   : > { %9899 = vrcp.f32 %v2453_v18 }
 0xbda   : > { %v2611_v19 = vpop.permute.xlu0 %2610 }
 0xbdb   : > { %9552 = vmatmul.mubr.msk.f32.vlgmr.msra.gmra.mxu0 %vm943_vm3, %v2611_v19 }
 0xbdc   : > { %9561 = vmatprep.mubr.msk.f32.mxu0 %vm10044_vm2, %v10043_v8 }
 0xbe4   : > { %v9900_v20 = vpop.eup %9899 }
 0xbe5   : > { %v2457_v23 = vmul.f32 %v9900_v20, %v9896_v6 }
 0xbe7   : > { %9547 = vmatmul.mubr.msk.f32.vlgmr.msra.gmra.mxu1 %vm1099_vm4, %v2457_v23 }
 0xbe8   : > { %9555 = vmatpush3.xpose.msk.msra.mxu1 %vm943_vm3, %v2691_v21  ;;  %9556 = vmatprep.mubr.msk.f32.mxu1 %vm10044_vm2, %v10043_v8 }
 0xbe9   : > { %9564 = vmatprep.subr.mxu1 %v10043_v8 }
 0xbeb   : > { %9557 = vmatmul.mubr.msk.f32.vlgmr.msra.gmra.mxu1 %vm943_vm3, %v2689_v24 }
 0xbec   : > { %9566 = vmatprep.mubr.msk.f32.mxu1 %vm10044_vm2, %v10043_v8 }
 0xc72   : > { %v10505_v25 = vpop.f32.mrf.mxu0 }
 0xc74   : > { %v9543_v26 = vpop.f32.mrf.mxu0 }
 0xc9b   : > { %v2684_v28 = vpop.f32.mrf.mxu0 }
 0xc9c   : > { %v2766_v29 = vmul.f32 0.5, %v2684_v28 }
 0xc9d   : > { %v9553_v30 = vpop.f32.mrf.mxu0 }
 0xc9e   : > { %v2768_v31 = vadd.f32 %v2766_v29, %v10312_v17 }
 0xca0   : > { %v2770_v32 = vsel %vm1099_vm4, %v2768_v31, -inf }
 0xca1   : > { %2771 = vmax.xlane.f32.xlu0 %v2770_v32 }
 0xca7   : > { %v10509_v33 = vpop.f32.mrf.mxu1 }
 0xca9   : > { %v9548_v35 = vpop.f32.mrf.mxu1 }
 0xcab   : > { %v2762_v36 = vpop.f32.mrf.mxu1 }
 0xcac   : > { %v2767_v37 = vmul.f32 0.5, %v2762_v36 }
 0xcad   : > { %v9558_v38 = vpop.f32.mrf.mxu1 }
 0xcae   : > { %v2769_v39 = vadd.f32 %v2767_v37, %v10318_v22 }
 0xcb0   : > { %v2773_v40 = vsel %vm1099_vm4, %v2769_v39, -inf }
 0xcb1   : > { %2774 = vmax.xlane.f32.xlu1 %v2773_v40 }
 0xcc2   : > { %2792 = vrot.lane.b32.xlu1 %v10289_v12, %s10061_s0 }
 0xcc6   : > { %2946 = vrot.lane.b32.xlu1 %v10289_v12, %s11617_s28 }
 0xcca   : > { %3024 = vrot.lane.b32.xlu1 %v10293_v13, %s11617_s28  ;;  %s11621_s28 = smov 68  }
 0xcce   : > { %3022 = vrot.lane.b32.xlu1 %v10293_v13, %s11619_s5 }
 0xd2a   : > { %v2772_v41 = vpop.xlane.xlu0 %2771 }
 0xd2b   : > { %v2776_v42 = vsub.f32 %v2768_v31, %v2772_v41 }
 0xd2d   : > { %v2778_v43 = vmul.f32 1.442695, %v2776_v42 }
 0xd2f   : > { %9901 = vpow2.f32 %v2778_v43 }
 0xd3a   : > { %v2775_v45 = vpop.xlane.xlu1 %2774 }
 0xd3b   : > { %v2777_v49 = vsub.f32 %v2769_v39, %v2775_v45 }
 0xd3c   : > { %v9902_v46 = vpop.eup %9901 }
 0xd3d   : > { %v2782_v47 = vsel %vm1099_vm4, %v9902_v46, 0.0  ;;  %v2780_v50 = vmul.f32 1.442695, %v2777_v49 }
 0xd3e   : > { %v2793_v48 = vpop.permute.xlu1 %2792  ;;  %2783 = vadd.xlane.f32.xlu0 %v2782_v47 }
 0xd3f   : > { %9560 = vmatpush3.msra.mxu0 %v2793_v48  ;;  %9903 = vpow2.f32 %v2780_v50 }
 0xd40   : > { %9569 = vmatprep.subr.mxu0 %v10043_v8 }
 0xd42   : > { %v2947_v60 = vpop.permute.xlu1 %2946 }
 0xd46   : > { %v3025_v0 = vpop.permute.xlu1 %3024 }
 0xd4a   : > { %v3023_v3 = vpop.permute.xlu1 %3022 }
 0xd4c   : > { %v9904_v52 = vpop.eup %9903 }
 0xd4d   : > { %v2785_v53 = vsel %vm1099_vm4, %v9904_v52, 0.0 }
 0xd54   : > { %2868 = vrot.lane.b32.xlu0 %v10293_v13, %s10061_s0  ;;  %s10064_s0 = smov 40  }
 0xd73   : > { %2786 = vadd.xlane.f32.xlu0 %v2785_v53 }
 0xd89   : > { %2944 = vrot.lane.b32.xlu0 %v10289_v12, %s11619_s5  ;;  %s11623_s5 = smov 100  }
 0xdc7   : > { %v2784_v54 = vpop.xlane.xlu0 %2783 }
 0xdc8   : > { %9905 = vrcp.f32 %v2784_v54 }
 0xdcb   : > { %v2869_v56 = vpop.permute.xlu0 %2868 }
 0xdcc   : > { %9565 = vmatpush3.msra.mxu1 %v2869_v56 }
 0xdcd   : > { %9574 = vmatprep.subr.mxu1 %v10043_v8 }
 0xdd5   : > { %v9906_v58 = vpop.eup %9905 }
 0xdd6   : > { %v2789_v59 = vmul.f32 %v9906_v58, %v9902_v46 }
 0xdd8   : > { %9562 = vmatmul.mubr.msk.f32.vlgmr.msra.gmra.mxu0 %vm1099_vm4, %v2789_v59 }
 0xdd9   : > { %9570 = vmatpush3.xpose.msk.msra.mxu0 %vm943_vm3, %v2947_v60  ;;  %9571 = vmatprep.mubr.msk.f32.mxu0 %vm10044_vm2, %v10043_v8 }
 0xdda   : > { %9579 = vmatprep.subr.mxu0 %v10043_v8 }
 0xdfc   : > { %v2787_v61 = vpop.xlane.xlu0 %2786 }
 0xdfd   : > { %9907 = vrcp.f32 %v2787_v61 }
 0xe00   : > { %v2945_v62 = vpop.permute.xlu0 %2944 }
 0xe01   : > { %9572 = vmatmul.mubr.msk.f32.vlgmr.msra.gmra.mxu0 %vm943_vm3, %v2945_v62 }
 0xe02   : > { %9581 = vmatprep.mubr.msk.f32.mxu0 %vm10044_vm2, %v10043_v8 }
 0xe0a   : > { %v9908_v63 = vpop.eup %9907 }
 0xe0b   : > { %v2791_v2 = vmul.f32 %v9908_v63, %v9904_v52 }
 0xe0d   : > { %9567 = vmatmul.mubr.msk.f32.vlgmr.msra.gmra.mxu1 %vm1099_vm4, %v2791_v2 }
 0xe0e   : > { %9575 = vmatpush3.xpose.msk.msra.mxu1 %vm943_vm3, %v3025_v0  ;;  %9576 = vmatprep.mubr.msk.f32.mxu1 %vm10044_vm2, %v10043_v8 }
 0xe0f   : > { %9584 = vmatprep.subr.mxu1 %v10043_v8 }
 0xe11   : > { %9577 = vmatmul.mubr.msk.f32.vlgmr.msra.gmra.mxu1 %vm943_vm3, %v3023_v3 }
 0xe12   : > { %9586 = vmatprep.mubr.msk.f32.mxu1 %vm10044_vm2, %v10043_v8 }
 0xe98   : > { %v10543_v4 = vpop.f32.mrf.mxu0 }
 0xe9a   : > { %v9563_v5 = vpop.f32.mrf.mxu0 }
 0xec1   : > { %v3018_v6 = vpop.f32.mrf.mxu0 }
 0xec2   : > { %v3100_v7 = vmul.f32 0.5, %v3018_v6 }
 0xec3   : > { %v9573_v10 = vpop.f32.mrf.mxu0 }
 0xec4   : > { %v3102_v11 = vadd.f32 %v3100_v7, %v10312_v17 }
 0xec6   : > { %v3104_v14 = vsel %vm1099_vm4, %v3102_v11, -inf }
 0xec7   : > { %3105 = vmax.xlane.f32.xlu0 %v3104_v14 }
 0xecd   : > { %v10547_v15 = vpop.f32.mrf.mxu1 }
 0xecf   : > { %v9568_v16 = vpop.f32.mrf.mxu1 }
 0xed1   : > { %v3096_v18 = vpop.f32.mrf.mxu1 }
 0xed2   : > { %v3101_v19 = vmul.f32 0.5, %v3096_v18 }
 0xed3   : > { %v9578_v20 = vpop.f32.mrf.mxu1 }
 0xed4   : > { %v3103_v21 = vadd.f32 %v3101_v19, %v10318_v22 }
 0xed6   : > { %v3107_v23 = vsel %vm1099_vm4, %v3103_v21, -inf }
 0xed7   : > { %3108 = vmax.xlane.f32.xlu1 %v3107_v23 }
 0xee8   : > { %3126 = vrot.lane.b32.xlu1 %v10289_v12, %s10064_s0 }
 0xeec   : > { %3280 = vrot.lane.b32.xlu1 %v10289_v12, %s11621_s28 }
 0xef0   : > { %3358 = vrot.lane.b32.xlu1 %v10293_v13, %s11621_s28  ;;  %s11633_s28 = smov 4  }
 0xef4   : > { %3356 = vrot.lane.b32.xlu1 %v10293_v13, %s11623_s5 }
 0xf50   : > { %v3106_v24 = vpop.xlane.xlu0 %3105 }
 0xf51   : > { %v3110_v26 = vsub.f32 %v3102_v11, %v3106_v24 }
 0xf53   : > { %v3112_v28 = vmul.f32 1.442695, %v3110_v26 }
 0xf55   : > { %9909 = vpow2.f32 %v3112_v28 }
 0xf60   : > { %v3109_v29 = vpop.xlane.xlu1 %3108 }
 0xf61   : > { %v3111_v35 = vsub.f32 %v3103_v21, %v3109_v29 }
 0xf62   : > { %v9910_v30 = vpop.eup %9909 }
 0xf63   : > { %v3116_v31 = vsel %vm1099_vm4, %v9910_v30, 0.0  ;;  %v3114_v36 = vmul.f32 1.442695, %v3111_v35 }
 0xf64   : > { %v3127_v32 = vpop.permute.xlu1 %3126  ;;  %3117 = vadd.xlane.f32.xlu0 %v3116_v31 }
 0xf65   : > { %9580 = vmatpush3.msra.mxu0 %v3127_v32  ;;  %9911 = vpow2.f32 %v3114_v36 }
 0xf66   : > { %9589 = vmatprep.subr.mxu0 %v10043_v8 }
 0xf68   : > { %v3281_v43 = vpop.permute.xlu1 %3280 }
 0xf6c   : > { %v3359_v48 = vpop.permute.xlu1 %3358 }
 0xf70   : > { %v3357_v50 = vpop.permute.xlu1 %3356 }
 0xf72   : > { %v9912_v37 = vpop.eup %9911 }
 0xf73   : > { %v3119_v38 = vsel %vm1099_vm4, %v9912_v37, 0.0 }
 0xf7a   : > { %3202 = vrot.lane.b32.xlu0 %v10293_v13, %s10064_s0  ;;  %s10067_s0 = smov 36  }
 0xf99   : > { %3120 = vadd.xlane.f32.xlu0 %v3119_v38 }
 0xfaf   : > { %3278 = vrot.lane.b32.xlu0 %v10289_v12, %s11623_s5  ;;  %s11645_s5 = smov 8  }
 0xfed   : > { %v3118_v39 = vpop.xlane.xlu0 %3117 }
 0xfee   : > { %9913 = vrcp.f32 %v3118_v39 }
 0xff1   : > { %v3203_v40 = vpop.permute.xlu0 %3202 }
 0xff2   : > { %9585 = vmatpush3.msra.mxu1 %v3203_v40 }
 0xff3   : > { %9594 = vmatprep.subr.mxu1 %v10043_v8 }
 0xffb   : > { %v9914_v41 = vpop.eup %9913 }
 0xffc   : > { %v3123_v42 = vmul.f32 %v9914_v41, %v9910_v30 }
 0xffe   : > { %9582 = vmatmul.mubr.msk.f32.vlgmr.msra.gmra.mxu0 %vm1099_vm4, %v3123_v42 }
 0xfff   : > { %9590 = vmatpush3.xpose.msk.msra.mxu0 %vm943_vm3, %v3281_v43  ;;  %9591 = vmatprep.mubr.msk.f32.mxu0 %vm10044_vm2, %v10043_v8 }
0x1000   : > { %9599 = vmatprep.subr.mxu0 %v10043_v8 }
0x1022   : > { %v3121_v45 = vpop.xlane.xlu0 %3120 }
0x1023   : > { %9915 = vrcp.f32 %v3121_v45 }
0x1026   : > { %v3279_v46 = vpop.permute.xlu0 %3278 }
0x1027   : > { %9592 = vmatmul.mubr.msk.f32.vlgmr.msra.gmra.mxu0 %vm943_vm3, %v3279_v46 }
0x1028   : > { %9601 = vmatprep.mubr.msk.f32.mxu0 %vm10044_vm2, %v10043_v8 }
0x1030   : > { %v9916_v47 = vpop.eup %9915 }
0x1031   : > { %v3125_v49 = vmul.f32 %v9916_v47, %v9912_v37 }
0x1033   : > { %9587 = vmatmul.mubr.msk.f32.vlgmr.msra.gmra.mxu1 %vm1099_vm4, %v3125_v49 }
0x1034   : > { %9595 = vmatpush3.xpose.msk.msra.mxu1 %vm943_vm3, %v3359_v48  ;;  %9596 = vmatprep.mubr.msk.f32.mxu1 %vm10044_vm2, %v10043_v8 }
0x1035   : > { %9604 = vmatprep.subr.mxu1 %v10043_v8 }
0x1037   : > { %9597 = vmatmul.mubr.msk.f32.vlgmr.msra.gmra.mxu1 %vm943_vm3, %v3357_v50 }
0x1038   : > { %9606 = vmatprep.mubr.msk.f32.mxu1 %vm10044_vm2, %v10043_v8 }
0x10be   : > { %v3198_v52 = vpop.f32.mrf.mxu0 }
0x10c0   : > { %v9583_v53 = vpop.f32.mrf.mxu0 }
0x10e7   : > { %v3352_v54 = vpop.f32.mrf.mxu0 }
0x10e8   : > { %v3434_v56 = vmul.f32 0.5, %v3352_v54 }
0x10e9   : > { %v9593_v58 = vpop.f32.mrf.mxu0 }
0x10ea   : > { %v3436_v59 = vadd.f32 %v3434_v56, %v10312_v17 }
0x10ec   : > { %v3438_v60 = vsel %vm1099_vm4, %v3436_v59, -inf }
0x10ed   : > { %3439 = vmax.xlane.f32.xlu0 %v3438_v60 }
0x10f3   : > { %v3274_v61 = vpop.f32.mrf.mxu1 }
0x10f5   : > { %v9588_v62 = vpop.f32.mrf.mxu1 }
0x10f7   : > { %v3430_v63 = vpop.f32.mrf.mxu1 }
0x10f8   : > { %v3435_v0 = vmul.f32 0.5, %v3430_v63  ;;  %v10001_v63 = vld [vmem:[#allocation2 + $0x8] sm:$0xff] }
0x10f9   : > { %v9598_v2 = vpop.f32.mrf.mxu1 }
0x10fa   : > { %v3437_v3 = vadd.f32 %v3435_v0, %v10318_v22 }
0x10fc   : > { %v3441_v5 = vsel %vm1099_vm4, %v3437_v3, -inf }
0x10fd   : > { %3442 = vmax.xlane.f32.xlu1 %v3441_v5  ;;  %v10002_v5 = vld [vmem:[#allocation2] sm:$0xff] }
0x110e   : > { %3460 = vrot.lane.b32.xlu1 %v10289_v12, %s10067_s0 }
0x1112   : > { %3614 = vrot.lane.b32.xlu1 %v10391_v27, %s11633_s28 }
0x1116   : > { %3616 = vrot.lane.b32.xlu1 %v10395_v34, %s11633_s28  ;;  %s11670_s28 = sld [smem:[#allocation6_spill]] }
0x111a   : > { %3624 = vrot.lane.b32.xlu1 %v10433_v9, %s11645_s5 }
0x111c   : > { %v850_v16 = vld [vmem:[%s11670_s28 + $0x18] sm:$0xff]  ;;  %v848_v18 = vld [vmem:[%s11670_s28 + $0x8] sm:$0xff]  ;;  %v847_v19 = vld [vmem:[%s11670_s28] sm:$0xff] }
0x111e   : > { %3632 = vrot.lane.b32.xlu1 %v10471_v51, %s11643_s8 }
0x1122   : > { %3640 = vrot.lane.b32.xlu1 %v10509_v33, %s11641_s2 }
0x1126   : > { %3648 = vrot.lane.b32.xlu1 %v10547_v15, %s11639_s7 }
0x112a   : > { %3656 = vrot.lane.b32.xlu1 %v3274_v61, %s11637_s29 }
0x1176   : > { %v3440_v12 = vpop.xlane.xlu0 %3439 }
0x1177   : > { %v3444_v17 = vsub.f32 %v3436_v59, %v3440_v12 }
0x1179   : > { %v3446_v22 = vmul.f32 1.442695, %v3444_v17 }
0x117b   : > { %9917 = vpow2.f32 %v3446_v22 }
0x1186   : > { %v3443_v27 = vpop.xlane.xlu1 %3442 }
0x1187   : > { %v3445_v34 = vsub.f32 %v3437_v3, %v3443_v27 }
0x1188   : > { %v9918_v9 = vpop.eup %9917 }
0x1189   : > { %v3448_v6 = vmul.f32 1.442695, %v3445_v34  ;;  %v3450_v51 = vsel %vm1099_vm4, %v9918_v9, 0.0 }
0x118a   : > { %v3461_v7 = vpop.permute.xlu1 %3460  ;;  %3451 = vadd.xlane.f32.xlu0 %v3450_v51 }
0x118b   : > { %9919 = vpow2.f32 %v3448_v6  ;;  %9600 = vmatpush3.msra.mxu0 %v3461_v7 }
0x118c   : > { %9609 = vmatprep.subr.mxu0 %v850_v16 }
0x118e   : > { %v3615_v28 = vpop.permute.xlu1 %3614 }
0x118f   : > { %v3668_v37 = vsel %vm943_vm3, %v10355_v55, %v3615_v28  ;;  %v3804_v28 = vlaneseq }
0x1192   : > { %v3617_v30 = vpop.permute.xlu1 %3616 }
0x1193   : > { %v3669_v48 = vsel %vm943_vm3, %v10357_v57, %v3617_v30 }
0x1196   : > { %v3625_v32 = vpop.permute.xlu1 %3624 }
0x1197   : > { %v3671_v49 = vsel %vm1099_vm4, %v3669_v48, %v3625_v32 }
0x1198   : > { %v9920_v33 = vpop.eup %9919 }
0x1199   : > { %v3453_v10 = vsel %vm1099_vm4, %v9920_v33, 0.0 }
0x119a   : > { %3454 = vadd.xlane.f32.xlu0 %v3453_v10  ;;  %v3633_v36 = vpop.permute.xlu1 %3632 }
0x119e   : > { %v3641_v43 = vpop.permute.xlu1 %3640 }
0x11a2   : > { %v3649_v47 = vpop.permute.xlu1 %3648 }
0x11a6   : > { %v3657_v50 = vpop.permute.xlu1 %3656 }
0x11b0   : > { %3536 = vrot.lane.b32.xlu0 %v10293_v13, %s10067_s0  ;;  %s11635_s0 = smov 28  }
0x11b4   : > { %3622 = vrot.lane.b32.xlu0 %v10429_v1, %s11645_s5 }
0x11b8   : > { %3630 = vrot.lane.b32.xlu0 %v10467_v44, %s11643_s8  ;;  %s11675_s8 = scalar_lea.vmem %s11598_s9, %s10189_s20 }
0x11bc   : > { %3638 = vrot.lane.b32.xlu0 %v10505_v25, %s11641_s2 }
0x11c0   : > { %3646 = vrot.lane.b32.xlu0 %v10543_v4, %s11639_s7  ;;  %v849_v4 = vld [vmem:[%s11670_s28 + $0x10] sm:$0xff]  ;;  %s11671_s28 = sld [smem:[#allocation7_spill]] }
0x11c1   : > { %s11672_s7 = sld [smem:[#allocation13_spill]] }
0x11c4   : > { %3654 = vrot.lane.b32.xlu0 %v3198_v52, %s11637_s29  ;;  %v3674_v52 = vsel %vm3672_vm5, %v3671_v49, %v3633_v36  ;;  %s11686_s29 = smov 68  }
0x11c5   : > { %v3677_v53 = vsel %vm3675_vm6, %v3674_v52, %v3641_v43 }
0x11c6   : > { %v3680_v54 = vsel %vm3678_vm7, %v3677_v53, %v3649_v47  ;;  %v3819_v22 = vld [vmem:[%s11671_s28 + $0x18] sm:$0xff]  ;;  %v3818_v27 = vld [vmem:[%s11671_s28 + $0x10] sm:$0xff]  ;;  %v3817_v34 = vld [vmem:[%s11671_s28 + $0x8] sm:$0xff] }
0x11c7   : > { %v3683_v56 = vsel %vm3681_vm9, %v3680_v54, %v3657_v50  ;;  %s11673_s2 = scalar_lea.vmem %s11672_s7, %s10189_s20  ;;  %s11674_s7 = sld [smem:[#allocation9_spill]] }
0x11c8   : > { %v8889_v57 = vld [vmem:[%s11673_s2] ss:$0 sm:$0xff]  ;;  %s11687_s2 = smov 4  }
0x11cd   : > { %v839_v30 = vld [vmem:[%s11674_s7 + $0x8] sm:$0xff] }
0x1213   : > { %v3452_v11 = vpop.xlane.xlu0 %3451 }
0x1214   : > { %9921 = vrcp.f32 %v3452_v11 }
0x1221   : > { %v9922_v13 = vpop.eup %9921 }
0x1222   : > { %v3457_v14 = vmul.f32 %v9922_v13, %v9918_v9  ;;  %v3816_v9 = vld [vmem:[%s11671_s28] sm:$0xff]  ;;  %s11676_s28 = sld [smem:[#allocation14_spill]] }
0x1223   : > { %v3455_v1 = vpop.xlane.xlu0 %3454 }
0x1224   : > { %9923 = vrcp.f32 %v3455_v1  ;;  %9602 = vmatmul.mubr.msk.f32.vlgmr.msra.gmra.mxu0 %vm1099_vm4, %v3457_v14 }
0x1225   : > { %9610 = vmatpush3.msra.mxu0 %v850_v16  ;;  %v8892_v16 = vld [vmem:[%s11675_s8] ss:$0 sm:$0xff]  ;;  %s11685_s8 = smov 100  }
0x1226   : > { %9611 = vmatprep.subr.mxu0 %v849_v4 }
0x1227   : > { %v3537_v44 = vpop.permute.xlu0 %3536  ;;  %9612 = vmatpush3.msra.mxu0 %v849_v4 }
0x1228   : > { %9605 = vmatpush3.msra.mxu1 %v3537_v44  ;;  %9613 = vmatprep.subr.mxu0 %v848_v18  ;;  %s11677_s5 = scalar_lea.vmem %s11676_s28, %s10211_s18  ;;  %s11689_s28 = smov 12  }
0x1229   : > { %9614 = vmatpush3.msra.mxu0 %v848_v18  ;;  %9620 = vmatprep.subr.mxu1 %v3819_v22 }
0x122a   : > { %9615 = vmatprep.subr.mxu0 %v847_v19 }
0x122b   : > { %9616 = vmatpush3.msra.mxu0 %v847_v19  ;;  %v3623_v26 = vpop.permute.xlu0 %3622 }
0x122c   : > { %v3670_v38 = vsel %vm1099_vm4, %v3668_v37, %v3623_v26 }
0x122f   : > { %v3631_v29 = vpop.permute.xlu0 %3630 }
0x1230   : > { %v3673_v40 = vsel %vm3672_vm5, %v3670_v38, %v3631_v29 }
0x1231   : > { %v9924_v15 = vpop.eup %9923 }
0x1232   : > { %v3459_v25 = vmul.f32 %v9924_v15, %v9920_v33 }
0x1233   : > { %v3639_v31 = vpop.permute.xlu0 %3638 }
0x1234   : > { %9607 = vmatmul.mubr.msk.f32.vlgmr.msra.gmra.mxu1 %vm1099_vm4, %v3459_v25  ;;  %v3676_v41 = vsel %vm3675_vm6, %v3673_v40, %v3639_v31  ;;  %v838_v25 = vld [vmem:[%s11674_s7] sm:$0xff]  ;;  %v10670_v31 = vshrl.u32 %v3804_v28, 7 }
0x1235   : > { %9621 = vmatpush3.msra.mxu1 %v3819_v22 }
0x1236   : > { %9622 = vmatprep.subr.mxu1 %v3818_v27  ;;  %v10675_v32 = vsub.s32 0, %v10670_v31 }
0x1237   : > { %v3647_v35 = vpop.permute.xlu0 %3646  ;;  %9623 = vmatpush3.msra.mxu1 %v3818_v27 }
0x1238   : > { %v3679_v42 = vsel %vm3678_vm7, %v3676_v41, %v3647_v35  ;;  %9624 = vmatprep.subr.mxu1 %v3817_v34  ;;  %v3776_v35 = vld [vmem:[%s11677_s5] sm:$0x3]  ;;  %s11684_s5 = smov 72  }
0x1239   : > { %9625 = vmatpush3.msra.mxu1 %v3817_v34  ;;  %v3807_v38 = vrot.slane %v3776_v35, %v10675_v32 }
0x123a   : > { %9626 = vmatprep.subr.mxu1 %v3816_v9 }
0x123b   : > { %v3655_v39 = vpop.permute.xlu0 %3654  ;;  %9627 = vmatpush3.msra.mxu1 %v3816_v9 }
0x123c   : > { %v3682_v45 = vsel %vm3681_vm9, %v3679_v42, %v3655_v39  ;;  %9642 = vmatprep.subr.mxu1 %v10043_v8  ;;  %v10686_v39 = vsub.s32 1, %v10670_v31 }
0x123e   : > { %v3813_v43 = vrot.slane %v3776_v35, %v10686_v39 }
0x12e4   : > { %v3532_v20 = vpop.f32.mrf.mxu0 }
0x12e5   : > { %3662 = vrot.lane.b32.xlu0 %v3532_v20, %s11635_s0 }
0x12e6   : > { %v9603_v21 = vpop.f32.mrf.mxu0 }
0x12f4   : > { %v3608_v23 = vpop.f32.mrf.mxu1 }
0x12f5   : > { %3664 = vrot.lane.b32.xlu1 %v3608_v23, %s11635_s0  ;;  %s11688_s0 = smov 8  }
0x12f6   : > { %v9608_v24 = vpop.f32.mrf.mxu1 }
0x1357   : > { %v3663_v46 = vpop.permute.xlu0 %3662 }
0x1358   : > { %v3685_v55 = vsel %vm3684_vm8, %v3682_v45, %v3663_v46 }
0x1359   : > { %9617 = vmatprep.mubr.msk.f32.mxu0 %vm858_vm1, %v3685_v55 }
0x1367   : > { %v3665_v58 = vpop.permute.xlu1 %3664 }
0x1368   : > { %v3686_v59 = vsel %vm3684_vm8, %v3683_v56, %v3665_v58 }
0x1369   : > { %9618 = vmatmul.mubr.msk.f32.vlgmr.msra.gmra.mxu0 %vm858_vm1, %v3686_v59 }
0x136a   : > { %9639 = vmatprep.mubr.msk.f32.mxu0 %vm858_vm1, %v838_v25 }
0x1429   : > { %v9619_v60 = vpop.f32.mrf.mxu0 }
0x142a   : > { %v3771_v61 = vadd.f32 %v9619_v60, %v8889_v57 }
0x142b   : > { %v3765_v62 = vpop.f32.mrf.mxu0 }
0x142c   : > { %v3775_v0 = vadd.f32 %v10001_v63, %v3771_v61  ;;  %v3766_v2 = vadd.f32 %v8889_v57, %v3765_v62 }
0x142e   : > { %v3780_v3 = vsel %vm858_vm1, %v3775_v0, 0.0  ;;  %v3774_v12 = vadd.f32 %v10002_v5, %v3766_v2 }
0x142f   : > { %3781 = vadd.xlane.f32.xlu1 %v3780_v3 }
0x1430   : > { %v3777_v17 = vsel %vm858_vm1, %v3774_v12, 0.0 }
0x1431   : > { %3778 = vadd.xlane.f32.xlu0 %v3777_v17 }
0x1440   : > { %3923 = vrot.lane.b32.xlu1 %v3819_v22, %s10045_s1 }
0x1444   : > { %3919 = vrot.lane.b32.xlu1 %v3817_v34, %s10045_s1 }
0x1448   : > { %3917 = vrot.lane.b32.xlu1 %v3816_v9, %s10045_s1 }
0x14b8   : > { %v3782_v6 = vpop.xlane.xlu1 %3781 }
0x14b9   : > { %v3785_v51 = vmul.f32 0.03125, %v3782_v6 }
0x14ba   : > { %v3779_v7 = vpop.xlane.xlu0 %3778 }
0x14bb   : > { %v3787_v33 = vsub.f32 %v3775_v0, %v3785_v51  ;;  %v3784_v10 = vmul.f32 0.03125, %v3779_v7 }
0x14bc   : > { %v3924_v15 = vpop.permute.xlu1 %3923 }
0x14bd   : > { %v3786_v11 = vsub.f32 %v3774_v12, %v3784_v10  ;;  %v3789_v13 = vmul.f32 %v3787_v33, %v3787_v33  ;;  %9631 = vmatprep.subr.mxu0 %v3924_v15 }
0x14be   : > { %9632 = vmatpush3.msra.mxu0 %v3924_v15 }
0x14bf   : > { %v3793_v14 = vsel %vm858_vm1, %v3789_v13, 0.0  ;;  %v3788_v1 = vmul.f32 %v3786_v11, %v3786_v11 }
0x14c0   : > { %3794 = vadd.xlane.f32.xlu0 %v3793_v14  ;;  %v3920_v21 = vpop.permute.xlu1 %3919 }
0x14c1   : > { %v3790_v44 = vsel %vm858_vm1, %v3788_v1, 0.0 }
0x14c4   : > { %3791 = vadd.xlane.f32.xlu0 %v3790_v44  ;;  %v3918_v29 = vpop.permute.xlu1 %3917 }
0x14da   : > { %3921 = vrot.lane.b32.xlu0 %v3818_v27, %s10045_s1 }
0x14de   : > { %3929 = vrot.lane.b32.xlu0 %v8892_v16, %s10045_s1 }
0x1549   : > { %v3795_v4 = vpop.xlane.xlu0 %3794 }
0x154a   : > { %v3797_v18 = vmul.f32 0.03125, %v3795_v4 }
0x154c   : > { %v3799_v19 = vadd.f32 1e-05, %v3797_v18 }
0x154d   : > { %v3792_v20 = vpop.xlane.xlu0 %3791 }
0x154e   : > { %9925 = vrsqrt.f32 %v3799_v19  ;;  %v3796_v23 = vmul.f32 0.03125, %v3792_v20 }
0x1550   : > { %v3798_v24 = vadd.f32 1e-05, %v3796_v23 }
0x1551   : > { %v3922_v26 = vpop.permute.xlu0 %3921 }
0x1552   : > { %9927 = vrsqrt.f32 %v3798_v24  ;;  %9633 = vmatprep.subr.mxu0 %v3922_v26 }
0x1553   : > { %9634 = vmatpush3.msra.mxu0 %v3922_v26 }
0x1554   : > { %9635 = vmatprep.subr.mxu0 %v3920_v21 }
0x1555   : > { %9636 = vmatpush3.msra.mxu0 %v3920_v21  ;;  %v3930_v48 = vpop.permute.xlu0 %3929 }
0x1556   : > { %9637 = vmatprep.subr.mxu0 %v3918_v29 }
0x1557   : > { %9638 = vmatpush3.msra.mxu0 %v3918_v29 }
0x1558   : > { %9640 = vmatmul.mubr.msk.f32.vlgmr.msra.gmra.mxu0 %vm858_vm1, %v839_v30  ;;  %9652 = vmatprep.subr.mxu0 %v10043_v8 }
0x1559   : > { %9654 = vmatprep.mubr.msk.f32.mxu0 %vm10044_vm2, %v10043_v8 }
0x155b   : > { %v9926_v36 = vpop.eup %9925 }
0x155c   : > { %v3803_v37 = vmul.f32 %v9926_v36, %v3787_v33 }
0x155e   : > { %v3809_v42 = vmul.f32 %v3807_v38, %v3803_v37 }
0x155f   : > { %v9928_v40 = vpop.eup %9927 }
0x1560   : > { %v3802_v41 = vmul.f32 %v9928_v40, %v3786_v11  ;;  %v10691_v55 = vadd.f32 %v3813_v43, %v3809_v42 }
0x1562   : > { %v3808_v45 = vmul.f32 %v3807_v38, %v3802_v41 }
0x1564   : > { %v10689_v46 = vadd.f32 %v3813_v43, %v3808_v45 }
0x1566   : > { %9628 = vmatprep.mubr.msk.f32.mxu1 %vm858_vm1, %v10689_v46 }
0x1567   : > { %9629 = vmatmul.mubr.msk.f32.vlgmr.msra.gmra.mxu1 %vm858_vm1, %v10691_v55 }
0x1568   : > { %9644 = vmatprep.mubr.msk.f32.mxu1 %vm10044_vm2, %v10043_v8 }
0x1618   : > { %v9641_v47 = vpop.f32.mrf.mxu0 }
0x1619   : > { %v10706_v56 = vadd.f32 %v9641_v47, %v3930_v48 }
0x161a   : > { %v4004_v49 = vpop.f32.mrf.mxu0 }
0x161b   : > { %v10699_v50 = vadd.f32 %v4004_v49, %v3930_v48 }
0x161d   : > { %9643 = vmatpush3.xpose.msk.msra.mxu1 %vm943_vm3, %v10699_v50 }
0x161e   : > { %9647 = vmatprep.subr.mxu1 %v10043_v8 }
0x1627   : > { %v9630_v52 = vpop.f32.mrf.mxu1 }
0x1628   : > { %v10714_v58 = vadd.f32 %v9630_v52, %v8892_v16 }
0x1629   : > { %v3904_v53 = vpop.f32.mrf.mxu1 }
0x162a   : > { %v10704_v54 = vadd.f32 %v8892_v16, %v3904_v53 }
0x162c   : > { %9645 = vmatmul.mubr.msk.f32.vlgmr.msra.gmra.mxu1 %vm943_vm3, %v10704_v54 }
0x162d   : > { %9648 = vmatpush3.xpose.msk.msra.mxu1 %vm943_vm3, %v10706_v56  ;;  %9649 = vmatprep.mubr.msk.f32.mxu1 %vm10044_vm2, %v10043_v8 }
0x162e   : > { %9657 = vmatprep.subr.mxu1 %v10043_v8 }
0x1630   : > { %9650 = vmatmul.mubr.msk.f32.vlgmr.msra.gmra.mxu1 %vm943_vm3, %v10714_v58 }
0x1631   : > { %9659 = vmatprep.mubr.msk.f32.mxu1 %vm10044_vm2, %v10043_v8 }
0x16ec   : > { %v4085_v59 = vpop.f32.mrf.mxu1 }
0x16ed   : > { %v4165_v57 = vmul.f32 0.5, %v4085_v59 }
0x16ee   : > { %v9646_v60 = vpop.f32.mrf.mxu1 }
0x16ef   : > { %v4167_v61 = vsel %vm1099_vm4, %v4165_v57, -inf }
0x16f0   : > { %4168 = vmax.xlane.f32.xlu1 %v4167_v61  ;;  %v4161_v62 = vpop.f32.mrf.mxu1 }
0x16f1   : > { %v4166_v63 = vmul.f32 0.5, %v4161_v62 }
0x16f2   : > { %v9651_v0 = vpop.f32.mrf.mxu1 }
0x16f3   : > { %v4170_v2 = vsel %vm1099_vm4, %v4166_v63, -inf }
0x16f4   : > { %4171 = vmax.xlane.f32.xlu0 %v4170_v2 }
0x1701   : > { %4265 = vrot.lane.b32.xlu1 %v10706_v56, %s10045_s1 }
0x1705   : > { %4343 = vrot.lane.b32.xlu1 %v10699_v50, %s10048_s27 }
0x170a   : > { %4189 = vrot.lane.b32.xlu0 %v10699_v50, %s10045_s1  ;;  %s11678_s1 = smov 84  }
0x1779   : > { %v4169_v3 = vpop.xlane.xlu1 %4168 }
0x177a   : > { %v4173_v5 = vsub.f32 %v4165_v57, %v4169_v3 }
0x177c   : > { %v4175_v12 = vmul.f32 1.442695, %v4173_v5 }
0x177d   : > { %v4266_v17 = vpop.permute.xlu1 %4265  ;;  %v4172_v22 = vpop.xlane.xlu0 %4171 }
0x177e   : > { %9929 = vpow2.f32 %v4175_v12  ;;  %v4174_v27 = vsub.f32 %v4166_v63, %v4172_v22  ;;  %9658 = vmatpush3.msra.mxu1 %v4266_v17 }
0x177f   : > { %9667 = vmatprep.subr.mxu1 %v10043_v8 }
0x1780   : > { %v4177_v34 = vmul.f32 1.442695, %v4174_v27 }
0x1781   : > { %v4190_v9 = vpop.permute.xlu0 %4189  ;;  %v4344_v10 = vpop.permute.xlu1 %4343 }
0x1782   : > { %9931 = vpow2.f32 %v4177_v34  ;;  %9653 = vmatpush3.msra.mxu0 %v4190_v9 }
0x1783   : > { %9662 = vmatprep.subr.mxu0 %v10043_v8 }
0x178b   : > { %v9930_v6 = vpop.eup %9929 }
0x178c   : > { %v4179_v51 = vsel %vm1099_vm4, %v9930_v6, 0.0 }
0x178d   : > { %4180 = vadd.xlane.f32.xlu0 %v4179_v51 }
0x178f   : > { %v9932_v7 = vpop.eup %9931 }
0x1790   : > { %v4182_v33 = vsel %vm1099_vm4, %v9932_v7, 0.0 }
0x1791   : > { %4183 = vadd.xlane.f32.xlu1 %v4182_v33 }
0x17a2   : > { %4341 = vrot.lane.b32.xlu1 %v10704_v54, %s10048_s27 }
0x17a3   : > { %4421 = vrot.lane.b32.xlu0 %v10706_v56, %s10048_s27 }
0x17a7   : > { %4419 = vrot.lane.b32.xlu0 %v10714_v58, %s10048_s27  ;;  %s11680_s27 = smov 80  }
0x1816   : > { %v4181_v11 = vpop.xlane.xlu0 %4180 }
0x1817   : > { %9933 = vrcp.f32 %v4181_v11 }
0x181a   : > { %v4184_v13 = vpop.xlane.xlu1 %4183  ;;  %v4422_v15 = vpop.permute.xlu0 %4421 }
0x181b   : > { %9935 = vrcp.f32 %v4184_v13 }
0x181e   : > { %v4342_v16 = vpop.permute.xlu1 %4341  ;;  %v4420_v4 = vpop.permute.xlu0 %4419 }
0x1824   : > { %v9934_v14 = vpop.eup %9933 }
0x1825   : > { %v4186_v1 = vmul.f32 %v9934_v14, %v9930_v6 }
0x1827   : > { %9655 = vmatmul.mubr.msk.f32.vlgmr.msra.gmra.mxu0 %vm1099_vm4, %v4186_v1 }
0x1828   : > { %v9936_v44 = vpop.eup %9935  ;;  %9663 = vmatpush3.xpose.msk.msra.mxu0 %vm943_vm3, %v4344_v10  ;;  %9664 = vmatprep.mubr.msk.f32.mxu0 %vm10044_vm2, %v10043_v8 }
0x1829   : > { %v4188_v25 = vmul.f32 %v9936_v44, %v9932_v7  ;;  %9672 = vmatprep.subr.mxu0 %v10043_v8 }
0x182b   : > { %9660 = vmatmul.mubr.msk.f32.vlgmr.msra.gmra.mxu1 %vm1099_vm4, %v4188_v25  ;;  %9665 = vmatmul.mubr.msk.f32.vlgmr.msra.gmra.mxu0 %vm943_vm3, %v4342_v16 }
0x182c   : > { %9668 = vmatpush3.xpose.msk.msra.mxu1 %vm943_vm3, %v4422_v15  ;;  %9669 = vmatprep.mubr.msk.f32.mxu1 %vm10044_vm2, %v10043_v8 }
0x182d   : > { %9677 = vmatprep.subr.mxu1 %v10043_v8  ;;  %9674 = vmatprep.mubr.msk.f32.mxu0 %vm10044_vm2, %v10043_v8 }
0x182f   : > { %9670 = vmatmul.mubr.msk.f32.vlgmr.msra.gmra.mxu1 %vm943_vm3, %v4420_v4 }
0x1830   : > { %9679 = vmatprep.mubr.msk.f32.mxu1 %vm10044_vm2, %v10043_v8 }
0x18e7   : > { %v10755_v18 = vpop.f32.mrf.mxu0 }
0x18e9   : > { %v9656_v19 = vpop.f32.mrf.mxu0 }
0x18eb   : > { %v10757_v20 = vpop.f32.mrf.mxu1  ;;  %v4415_v21 = vpop.f32.mrf.mxu0 }
0x18ec   : > { %v4497_v23 = vmul.f32 0.5, %v4415_v21 }
0x18ed   : > { %v9661_v24 = vpop.f32.mrf.mxu1  ;;  %v9666_v26 = vpop.f32.mrf.mxu0 }
0x18ee   : > { %v4499_v28 = vsel %vm1099_vm4, %v4497_v23, -inf }
0x18ef   : > { %4500 = vmax.xlane.f32.xlu1 %v4499_v28  ;;  %v4493_v29 = vpop.f32.mrf.mxu1 }
0x18f0   : > { %v4498_v30 = vmul.f32 0.5, %v4493_v29 }
0x18f1   : > { %v9671_v35 = vpop.f32.mrf.mxu1 }
0x18f2   : > { %v4502_v36 = vsel %vm1099_vm4, %v4498_v30, -inf }
0x18f3   : > { %4503 = vmax.xlane.f32.xlu0 %v4502_v36 }
0x1900   : > { %4597 = vrot.lane.b32.xlu1 %v10706_v56, %s10047_s25 }
0x1904   : > { %4675 = vrot.lane.b32.xlu1 %v10699_v50, %s10050_s10 }
0x1909   : > { %4521 = vrot.lane.b32.xlu0 %v10699_v50, %s10047_s25  ;;  %s11679_s25 = smov 112  }
0x1978   : > { %v4501_v37 = vpop.xlane.xlu1 %4500 }
0x1979   : > { %v4505_v38 = vsub.f32 %v4497_v23, %v4501_v37 }
0x197b   : > { %v4507_v40 = vmul.f32 1.442695, %v4505_v38 }
0x197c   : > { %v4598_v41 = vpop.permute.xlu1 %4597  ;;  %v4504_v42 = vpop.xlane.xlu0 %4503 }
0x197d   : > { %9937 = vpow2.f32 %v4507_v40  ;;  %v4506_v43 = vsub.f32 %v4498_v30, %v4504_v42  ;;  %9678 = vmatpush3.msra.mxu1 %v4598_v41 }
0x197e   : > { %9687 = vmatprep.subr.mxu1 %v10043_v8 }
0x197f   : > { %v4509_v45 = vmul.f32 1.442695, %v4506_v43 }
0x1980   : > { %v4522_v47 = vpop.permute.xlu0 %4521  ;;  %v4676_v59 = vpop.permute.xlu1 %4675 }
0x1981   : > { %9939 = vpow2.f32 %v4509_v45  ;;  %9673 = vmatpush3.msra.mxu0 %v4522_v47 }
0x1982   : > { %9682 = vmatprep.subr.mxu0 %v10043_v8 }
0x198a   : > { %v9938_v48 = vpop.eup %9937 }
0x198b   : > { %v4511_v49 = vsel %vm1099_vm4, %v9938_v48, 0.0 }
0x198c   : > { %4512 = vadd.xlane.f32.xlu0 %v4511_v49 }
0x198e   : > { %v9940_v52 = vpop.eup %9939 }
0x198f   : > { %v4514_v53 = vsel %vm1099_vm4, %v9940_v52, 0.0 }
0x1990   : > { %4515 = vadd.xlane.f32.xlu1 %v4514_v53 }
0x19a1   : > { %4673 = vrot.lane.b32.xlu1 %v10704_v54, %s10050_s10 }
0x19a2   : > { %4753 = vrot.lane.b32.xlu0 %v10706_v56, %s10050_s10 }
0x19a6   : > { %4751 = vrot.lane.b32.xlu0 %v10714_v58, %s10050_s10  ;;  %s11681_s10 = smov 108  }
0x1a15   : > { %v4513_v57 = vpop.xlane.xlu0 %4512 }
0x1a16   : > { %9941 = vrcp.f32 %v4513_v57 }
0x1a19   : > { %v4516_v60 = vpop.xlane.xlu1 %4515  ;;  %v4754_v0 = vpop.permute.xlu0 %4753 }
0x1a1a   : > { %9943 = vrcp.f32 %v4516_v60 }
0x1a1d   : > { %v4674_v3 = vpop.permute.xlu1 %4673  ;;  %v4752_v5 = vpop.permute.xlu0 %4751 }
0x1a23   : > { %v9942_v61 = vpop.eup %9941 }
0x1a24   : > { %v4518_v62 = vmul.f32 %v9942_v61, %v9938_v48 }
0x1a26   : > { %9675 = vmatmul.mubr.msk.f32.vlgmr.msra.gmra.mxu0 %vm1099_vm4, %v4518_v62 }
0x1a27   : > { %v9944_v63 = vpop.eup %9943  ;;  %9683 = vmatpush3.xpose.msk.msra.mxu0 %vm943_vm3, %v4676_v59  ;;  %9684 = vmatprep.mubr.msk.f32.mxu0 %vm10044_vm2, %v10043_v8 }
0x1a28   : > { %v4520_v2 = vmul.f32 %v9944_v63, %v9940_v52  ;;  %9692 = vmatprep.subr.mxu0 %v10043_v8 }
0x1a2a   : > { %9680 = vmatmul.mubr.msk.f32.vlgmr.msra.gmra.mxu1 %vm1099_vm4, %v4520_v2  ;;  %9685 = vmatmul.mubr.msk.f32.vlgmr.msra.gmra.mxu0 %vm943_vm3, %v4674_v3 }
0x1a2b   : > { %9688 = vmatpush3.xpose.msk.msra.mxu1 %vm943_vm3, %v4754_v0  ;;  %9689 = vmatprep.mubr.msk.f32.mxu1 %vm10044_vm2, %v10043_v8 }
0x1a2c   : > { %9697 = vmatprep.subr.mxu1 %v10043_v8  ;;  %9694 = vmatprep.mubr.msk.f32.mxu0 %vm10044_vm2, %v10043_v8 }
0x1a2e   : > { %9690 = vmatmul.mubr.msk.f32.vlgmr.msra.gmra.mxu1 %vm943_vm3, %v4752_v5 }
0x1a2f   : > { %9699 = vmatprep.mubr.msk.f32.mxu1 %vm10044_vm2, %v10043_v8 }
0x1ae6   : > { %v10793_v12 = vpop.f32.mrf.mxu0 }
0x1ae8   : > { %v9676_v17 = vpop.f32.mrf.mxu0 }
0x1aea   : > { %v10795_v22 = vpop.f32.mrf.mxu1  ;;  %v4747_v27 = vpop.f32.mrf.mxu0 }
0x1aeb   : > { %v4829_v34 = vmul.f32 0.5, %v4747_v27 }
0x1aec   : > { %v9681_v9 = vpop.f32.mrf.mxu1  ;;  %v9686_v6 = vpop.f32.mrf.mxu0 }
0x1aed   : > { %v4831_v51 = vsel %vm1099_vm4, %v4829_v34, -inf }
0x1aee   : > { %4832 = vmax.xlane.f32.xlu1 %v4831_v51  ;;  %v4825_v7 = vpop.f32.mrf.mxu1 }
0x1aef   : > { %v4830_v33 = vmul.f32 0.5, %v4825_v7 }
0x1af0   : > { %v9691_v10 = vpop.f32.mrf.mxu1 }
0x1af1   : > { %v4834_v11 = vsel %vm1099_vm4, %v4830_v33, -inf }
0x1af2   : > { %4835 = vmax.xlane.f32.xlu0 %v4834_v11 }
0x1aff   : > { %4929 = vrot.lane.b32.xlu1 %v10706_v56, %s10051_s3 }
0x1b03   : > { %5007 = vrot.lane.b32.xlu1 %v10699_v50, %s10054_s23 }
0x1b08   : > { %4853 = vrot.lane.b32.xlu0 %v10699_v50, %s10051_s3  ;;  %s11682_s3 = smov 76  }
0x1b77   : > { %v4833_v13 = vpop.xlane.xlu1 %4832 }
0x1b78   : > { %v4837_v14 = vsub.f32 %v4829_v34, %v4833_v13 }
0x1b7a   : > { %v4839_v1 = vmul.f32 1.442695, %v4837_v14 }
0x1b7b   : > { %v4930_v44 = vpop.permute.xlu1 %4929  ;;  %v4836_v15 = vpop.xlane.xlu0 %4835 }
0x1b7c   : > { %9945 = vpow2.f32 %v4839_v1  ;;  %v4838_v25 = vsub.f32 %v4830_v33, %v4836_v15  ;;  %9698 = vmatpush3.msra.mxu1 %v4930_v44 }
0x1b7d   : > { %9707 = vmatprep.subr.mxu1 %v10043_v8 }
0x1b7e   : > { %v4841_v16 = vmul.f32 1.442695, %v4838_v25 }
0x1b7f   : > { %v4854_v4 = vpop.permute.xlu0 %4853  ;;  %v5008_v26 = vpop.permute.xlu1 %5007 }
0x1b80   : > { %9947 = vpow2.f32 %v4841_v16  ;;  %9693 = vmatpush3.msra.mxu0 %v4854_v4 }
0x1b81   : > { %9702 = vmatprep.subr.mxu0 %v10043_v8 }
0x1b89   : > { %v9946_v19 = vpop.eup %9945 }
0x1b8a   : > { %v4843_v21 = vsel %vm1099_vm4, %v9946_v19, 0.0 }
0x1b8b   : > { %4844 = vadd.xlane.f32.xlu0 %v4843_v21 }
0x1b8d   : > { %v9948_v23 = vpop.eup %9947 }
0x1b8e   : > { %v4846_v24 = vsel %vm1099_vm4, %v9948_v23, 0.0 }
0x1b8f   : > { %4847 = vadd.xlane.f32.xlu1 %v4846_v24 }
0x1ba0   : > { %5005 = vrot.lane.b32.xlu1 %v10704_v54, %s10054_s23 }
0x1ba1   : > { %5085 = vrot.lane.b32.xlu0 %v10706_v56, %s10054_s23 }
0x1ba5   : > { %5083 = vrot.lane.b32.xlu0 %v10714_v58, %s10054_s23  ;;  %s11683_s23 = smov 104  }
0x1c14   : > { %v4845_v28 = vpop.xlane.xlu0 %4844 }
0x1c15   : > { %9949 = vrcp.f32 %v4845_v28 }
0x1c18   : > { %v4848_v29 = vpop.xlane.xlu1 %4847  ;;  %v5086_v37 = vpop.permute.xlu0 %5085 }
0x1c19   : > { %9951 = vrcp.f32 %v4848_v29 }
0x1c1c   : > { %v5006_v40 = vpop.permute.xlu1 %5005  ;;  %v5084_v41 = vpop.permute.xlu0 %5083 }
0x1c22   : > { %v9950_v30 = vpop.eup %9949 }
0x1c23   : > { %v4850_v35 = vmul.f32 %v9950_v30, %v9946_v19 }
0x1c25   : > { %9695 = vmatmul.mubr.msk.f32.vlgmr.msra.gmra.mxu0 %vm1099_vm4, %v4850_v35 }
0x1c26   : > { %v9952_v36 = vpop.eup %9951  ;;  %9703 = vmatpush3.xpose.msk.msra.mxu0 %vm943_vm3, %v5008_v26  ;;  %9704 = vmatprep.mubr.msk.f32.mxu0 %vm10044_vm2, %v10043_v8 }
0x1c27   : > { %v4852_v38 = vmul.f32 %v9952_v36, %v9948_v23  ;;  %9712 = vmatprep.subr.mxu0 %v10043_v8 }
0x1c29   : > { %9700 = vmatmul.mubr.msk.f32.vlgmr.msra.gmra.mxu1 %vm1099_vm4, %v4852_v38  ;;  %9705 = vmatmul.mubr.msk.f32.vlgmr.msra.gmra.mxu0 %vm943_vm3, %v5006_v40 }
0x1c2a   : > { %9708 = vmatpush3.xpose.msk.msra.mxu1 %vm943_vm3, %v5086_v37  ;;  %9709 = vmatprep.mubr.msk.f32.mxu1 %vm10044_vm2, %v10043_v8 }
0x1c2b   : > { %9717 = vmatprep.subr.mxu1 %v10043_v8  ;;  %9714 = vmatprep.mubr.msk.f32.mxu0 %vm10044_vm2, %v10043_v8 }
0x1c2d   : > { %9710 = vmatmul.mubr.msk.f32.vlgmr.msra.gmra.mxu1 %vm943_vm3, %v5084_v41 }
0x1c2e   : > { %9719 = vmatprep.mubr.msk.f32.mxu1 %vm10044_vm2, %v10043_v8 }
0x1ce5   : > { %v10831_v42 = vpop.f32.mrf.mxu0 }
0x1ce7   : > { %v9696_v43 = vpop.f32.mrf.mxu0 }
0x1ce9   : > { %v10833_v45 = vpop.f32.mrf.mxu1  ;;  %v5079_v47 = vpop.f32.mrf.mxu0 }
0x1cea   : > { %v5161_v48 = vmul.f32 0.5, %v5079_v47 }
0x1ceb   : > { %v9701_v49 = vpop.f32.mrf.mxu1  ;;  %v9706_v52 = vpop.f32.mrf.mxu0 }
0x1cec   : > { %v5163_v53 = vsel %vm1099_vm4, %v5161_v48, -inf }
0x1ced   : > { %5164 = vmax.xlane.f32.xlu1 %v5163_v53  ;;  %v5157_v59 = vpop.f32.mrf.mxu1 }
0x1cee   : > { %v5162_v57 = vmul.f32 0.5, %v5157_v59 }
0x1cef   : > { %v9711_v60 = vpop.f32.mrf.mxu1 }
0x1cf0   : > { %v5166_v61 = vsel %vm1099_vm4, %v5162_v57, -inf }
0x1cf1   : > { %5167 = vmax.xlane.f32.xlu0 %v5166_v61 }
0x1cfe   : > { %5261 = vrot.lane.b32.xlu1 %v10706_v56, %s11678_s1 }
0x1d02   : > { %5339 = vrot.lane.b32.xlu1 %v10699_v50, %s11679_s25 }
0x1d07   : > { %5185 = vrot.lane.b32.xlu0 %v10699_v50, %s11678_s1  ;;  %s11690_s1 = smov 16  }
0x1d76   : > { %v5165_v62 = vpop.xlane.xlu1 %5164 }
0x1d77   : > { %v5169_v63 = vsub.f32 %v5161_v48, %v5165_v62 }
0x1d79   : > { %v5171_v0 = vmul.f32 1.442695, %v5169_v63 }
0x1d7a   : > { %v5262_v2 = vpop.permute.xlu1 %5261  ;;  %v5168_v3 = vpop.xlane.xlu0 %5167 }
0x1d7b   : > { %9953 = vpow2.f32 %v5171_v0  ;;  %v5170_v5 = vsub.f32 %v5162_v57, %v5168_v3  ;;  %9718 = vmatpush3.msra.mxu1 %v5262_v2 }
0x1d7c   : > { %9727 = vmatprep.subr.mxu1 %v10043_v8 }
0x1d7d   : > { %v5173_v17 = vmul.f32 1.442695, %v5170_v5 }
0x1d7e   : > { %v5186_v27 = vpop.permute.xlu0 %5185  ;;  %v5340_v7 = vpop.permute.xlu1 %5339 }
0x1d7f   : > { %9955 = vpow2.f32 %v5173_v17  ;;  %9713 = vmatpush3.msra.mxu0 %v5186_v27 }
0x1d80   : > { %9722 = vmatprep.subr.mxu0 %v10043_v8 }
0x1d88   : > { %v9954_v34 = vpop.eup %9953 }
0x1d89   : > { %v5175_v9 = vsel %vm1099_vm4, %v9954_v34, 0.0 }
0x1d8a   : > { %5176 = vadd.xlane.f32.xlu0 %v5175_v9 }
0x1d8c   : > { %v9956_v6 = vpop.eup %9955 }
0x1d8d   : > { %v5178_v51 = vsel %vm1099_vm4, %v9956_v6, 0.0 }
0x1d8e   : > { %5179 = vadd.xlane.f32.xlu1 %v5178_v51 }
0x1d9f   : > { %5337 = vrot.lane.b32.xlu1 %v10704_v54, %s11679_s25 }
0x1da0   : > { %5417 = vrot.lane.b32.xlu0 %v10706_v56, %s11679_s25 }
0x1da4   : > { %5415 = vrot.lane.b32.xlu0 %v10714_v58, %s11679_s25  ;;  %s11691_s25 = smov 20  }
0x1e13   : > { %v5177_v33 = vpop.xlane.xlu0 %5176 }
0x1e14   : > { %9957 = vrcp.f32 %v5177_v33 }
0x1e17   : > { %v5180_v10 = vpop.xlane.xlu1 %5179  ;;  %v5418_v1 = vpop.permute.xlu0 %5417 }
0x1e18   : > { %9959 = vrcp.f32 %v5180_v10 }
0x1e1b   : > { %v5338_v15 = vpop.permute.xlu1 %5337  ;;  %v5416_v25 = vpop.permute.xlu0 %5415 }
0x1e21   : > { %v9958_v11 = vpop.eup %9957 }
0x1e22   : > { %v5182_v13 = vmul.f32 %v9958_v11, %v9954_v34 }
0x1e24   : > { %9715 = vmatmul.mubr.msk.f32.vlgmr.msra.gmra.mxu0 %vm1099_vm4, %v5182_v13 }
0x1e25   : > { %v9960_v14 = vpop.eup %9959  ;;  %9723 = vmatpush3.xpose.msk.msra.mxu0 %vm943_vm3, %v5340_v7  ;;  %9724 = vmatprep.mubr.msk.f32.mxu0 %vm10044_vm2, %v10043_v8 }
0x1e26   : > { %v5184_v44 = vmul.f32 %v9960_v14, %v9956_v6  ;;  %9732 = vmatprep.subr.mxu0 %v10043_v8 }
0x1e28   : > { %9720 = vmatmul.mubr.msk.f32.vlgmr.msra.gmra.mxu1 %vm1099_vm4, %v5184_v44  ;;  %9725 = vmatmul.mubr.msk.f32.vlgmr.msra.gmra.mxu0 %vm943_vm3, %v5338_v15 }
0x1e29   : > { %9728 = vmatpush3.xpose.msk.msra.mxu1 %vm943_vm3, %v5418_v1  ;;  %9729 = vmatprep.mubr.msk.f32.mxu1 %vm10044_vm2, %v10043_v8 }
0x1e2a   : > { %9737 = vmatprep.subr.mxu1 %v10043_v8  ;;  %9734 = vmatprep.mubr.msk.f32.mxu0 %vm10044_vm2, %v10043_v8 }
0x1e2c   : > { %9730 = vmatmul.mubr.msk.f32.vlgmr.msra.gmra.mxu1 %vm943_vm3, %v5416_v25 }
0x1e2d   : > { %9739 = vmatprep.mubr.msk.f32.mxu1 %vm10044_vm2, %v10043_v8 }
0x1ee4   : > { %v10869_v16 = vpop.f32.mrf.mxu0 }
0x1ee6   : > { %v9716_v4 = vpop.f32.mrf.mxu0 }
0x1ee8   : > { %v10871_v19 = vpop.f32.mrf.mxu1  ;;  %v5411_v21 = vpop.f32.mrf.mxu0 }
0x1ee9   : > { %v5493_v23 = vmul.f32 0.5, %v5411_v21 }
0x1eea   : > { %v9721_v24 = vpop.f32.mrf.mxu1  ;;  %v9726_v26 = vpop.f32.mrf.mxu0 }
0x1eeb   : > { %v5495_v28 = vsel %vm1099_vm4, %v5493_v23, -inf }
0x1eec   : > { %5496 = vmax.xlane.f32.xlu1 %v5495_v28  ;;  %v5489_v29 = vpop.f32.mrf.mxu1 }
0x1eed   : > { %v5494_v30 = vmul.f32 0.5, %v5489_v29 }
0x1eee   : > { %v9731_v35 = vpop.f32.mrf.mxu1 }
0x1eef   : > { %v5498_v36 = vsel %vm1099_vm4, %v5494_v30, -inf }
0x1ef0   : > { %5499 = vmax.xlane.f32.xlu0 %v5498_v36 }
0x1efd   : > { %5593 = vrot.lane.b32.xlu1 %v10706_v56, %s11680_s27 }
0x1f01   : > { %5671 = vrot.lane.b32.xlu1 %v10699_v50, %s11681_s10 }
0x1f06   : > { %5517 = vrot.lane.b32.xlu0 %v10699_v50, %s11680_s27  ;;  %s11692_s27 = smov 24  }
0x1f75   : > { %v5497_v37 = vpop.xlane.xlu1 %5496 }
0x1f76   : > { %v5501_v38 = vsub.f32 %v5493_v23, %v5497_v37 }
0x1f78   : > { %v5503_v40 = vmul.f32 1.442695, %v5501_v38 }
0x1f79   : > { %v5594_v41 = vpop.permute.xlu1 %5593  ;;  %v5500_v43 = vpop.xlane.xlu0 %5499 }
0x1f7a   : > { %9961 = vpow2.f32 %v5503_v40  ;;  %v5502_v47 = vsub.f32 %v5494_v30, %v5500_v43  ;;  %9738 = vmatpush3.msra.mxu1 %v5594_v41 }
0x1f7b   : > { %9747 = vmatprep.subr.mxu1 %v10043_v8 }
0x1f7c   : > { %v5505_v48 = vmul.f32 1.442695, %v5502_v47 }
0x1f7d   : > { %v5518_v49 = vpop.permute.xlu0 %5517  ;;  %v5672_v60 = vpop.permute.xlu1 %5671 }
0x1f7e   : > { %9963 = vpow2.f32 %v5505_v48  ;;  %9733 = vmatpush3.msra.mxu0 %v5518_v49 }
0x1f7f   : > { %9742 = vmatprep.subr.mxu0 %v10043_v8 }
0x1f87   : > { %v9962_v52 = vpop.eup %9961 }
0x1f88   : > { %v5507_v53 = vsel %vm1099_vm4, %v9962_v52, 0.0 }
0x1f89   : > { %5508 = vadd.xlane.f32.xlu0 %v5507_v53 }
0x1f8b   : > { %v9964_v59 = vpop.eup %9963 }
0x1f8c   : > { %v5510_v57 = vsel %vm1099_vm4, %v9964_v59, 0.0 }
0x1f8d   : > { %5511 = vadd.xlane.f32.xlu1 %v5510_v57 }
0x1f9e   : > { %5669 = vrot.lane.b32.xlu1 %v10704_v54, %s11681_s10 }
0x1f9f   : > { %5749 = vrot.lane.b32.xlu0 %v10706_v56, %s11681_s10 }
0x1fa3   : > { %5747 = vrot.lane.b32.xlu0 %v10714_v58, %s11681_s10  ;;  %s11693_s10 = smov 28  }
0x2012   : > { %v5509_v61 = vpop.xlane.xlu0 %5508 }
0x2013   : > { %9965 = vrcp.f32 %v5509_v61 }
0x2016   : > { %v5512_v62 = vpop.xlane.xlu1 %5511  ;;  %v5750_v3 = vpop.permute.xlu0 %5749 }
0x2017   : > { %9967 = vrcp.f32 %v5512_v62 }
0x201a   : > { %v5670_v17 = vpop.permute.xlu1 %5669  ;;  %v5748_v27 = vpop.permute.xlu0 %5747 }
0x2020   : > { %v9966_v63 = vpop.eup %9965 }
0x2021   : > { %v5514_v0 = vmul.f32 %v9966_v63, %v9962_v52 }
0x2023   : > { %9735 = vmatmul.mubr.msk.f32.vlgmr.msra.gmra.mxu0 %vm1099_vm4, %v5514_v0 }
0x2024   : > { %v9968_v2 = vpop.eup %9967  ;;  %9743 = vmatpush3.xpose.msk.msra.mxu0 %vm943_vm3, %v5672_v60  ;;  %9744 = vmatprep.mubr.msk.f32.mxu0 %vm10044_vm2, %v10043_v8 }
0x2025   : > { %v5516_v5 = vmul.f32 %v9968_v2, %v9964_v59  ;;  %9752 = vmatprep.subr.mxu0 %v10043_v8 }
0x2027   : > { %9740 = vmatmul.mubr.msk.f32.vlgmr.msra.gmra.mxu1 %vm1099_vm4, %v5516_v5  ;;  %9745 = vmatmul.mubr.msk.f32.vlgmr.msra.gmra.mxu0 %vm943_vm3, %v5670_v17 }
0x2028   : > { %9748 = vmatpush3.xpose.msk.msra.mxu1 %vm943_vm3, %v5750_v3  ;;  %9749 = vmatprep.mubr.msk.f32.mxu1 %vm10044_vm2, %v10043_v8 }
0x2029   : > { %9757 = vmatprep.subr.mxu1 %v10043_v8  ;;  %9754 = vmatprep.mubr.msk.f32.mxu0 %vm10044_vm2, %v10043_v8 }
0x202b   : > { %9750 = vmatmul.mubr.msk.f32.vlgmr.msra.gmra.mxu1 %vm943_vm3, %v5748_v27 }
0x202c   : > { %9759 = vmatprep.mubr.msk.f32.mxu1 %vm10044_vm2, %v10043_v8 }
0x20e3   : > { %v10907_v34 = vpop.f32.mrf.mxu0 }
0x20e5   : > { %v9736_v9 = vpop.f32.mrf.mxu0 }
0x20e7   : > { %v10909_v6 = vpop.f32.mrf.mxu1  ;;  %v5743_v51 = vpop.f32.mrf.mxu0 }
0x20e8   : > { %v5825_v7 = vmul.f32 0.5, %v5743_v51 }
0x20e9   : > { %v9741_v33 = vpop.f32.mrf.mxu1  ;;  %v9746_v10 = vpop.f32.mrf.mxu0 }
0x20ea   : > { %v5827_v11 = vsel %vm1099_vm4, %v5825_v7, -inf }
0x20eb   : > { %5828 = vmax.xlane.f32.xlu1 %v5827_v11  ;;  %v5821_v13 = vpop.f32.mrf.mxu1 }
0x20ec   : > { %v5826_v14 = vmul.f32 0.5, %v5821_v13 }
0x20ed   : > { %v9751_v1 = vpop.f32.mrf.mxu1 }
0x20ee   : > { %v5830_v44 = vsel %vm1099_vm4, %v5826_v14, -inf }
0x20ef   : > { %5831 = vmax.xlane.f32.xlu0 %v5830_v44 }
0x20fc   : > { %5925 = vrot.lane.b32.xlu1 %v10706_v56, %s11682_s3 }
0x2100   : > { %6003 = vrot.lane.b32.xlu1 %v10699_v50, %s11683_s23 }
0x2105   : > { %5849 = vrot.lane.b32.xlu0 %v10699_v50, %s11682_s3 }
0x2174   : > { %v5829_v15 = vpop.xlane.xlu1 %5828 }
0x2175   : > { %v5833_v25 = vsub.f32 %v5825_v7, %v5829_v15 }
0x2177   : > { %v5835_v4 = vmul.f32 1.442695, %v5833_v25 }
0x2178   : > { %v5926_v21 = vpop.permute.xlu1 %5925  ;;  %v5832_v23 = vpop.xlane.xlu0 %5831 }
0x2179   : > { %9969 = vpow2.f32 %v5835_v4  ;;  %v5834_v24 = vsub.f32 %v5826_v14, %v5832_v23  ;;  %9758 = vmatpush3.msra.mxu1 %v5926_v21 }
0x217a   : > { %9767 = vmatprep.subr.mxu1 %v10043_v8 }
0x217b   : > { %v5837_v26 = vmul.f32 1.442695, %v5834_v24 }
0x217c   : > { %v5850_v28 = vpop.permute.xlu0 %5849  ;;  %v6004_v37 = vpop.permute.xlu1 %6003 }
0x217d   : > { %9971 = vpow2.f32 %v5837_v26  ;;  %9753 = vmatpush3.msra.mxu0 %v5850_v28 }
0x217e   : > { %9762 = vmatprep.subr.mxu0 %v10043_v8 }
0x2186   : > { %v9970_v29 = vpop.eup %9969 }
0x2187   : > { %v5839_v30 = vsel %vm1099_vm4, %v9970_v29, 0.0 }
0x2188   : > { %5840 = vadd.xlane.f32.xlu0 %v5839_v30 }
0x218a   : > { %v9972_v35 = vpop.eup %9971 }
0x218b   : > { %v5842_v36 = vsel %vm1099_vm4, %v9972_v35, 0.0 }
0x218c   : > { %5843 = vadd.xlane.f32.xlu1 %v5842_v36 }
0x219d   : > { %6001 = vrot.lane.b32.xlu1 %v10704_v54, %s11683_s23 }
0x219e   : > { %6081 = vrot.lane.b32.xlu0 %v10706_v56, %s11683_s23 }
0x21a2   : > { %6079 = vrot.lane.b32.xlu0 %v10714_v58, %s11683_s23  ;;  %s11694_s23 = scalar_lea.vmem %s11600_s11, %s10189_s20 }
0x2211   : > { %v5841_v38 = vpop.xlane.xlu0 %5840 }
0x2212   : > { %9973 = vrcp.f32 %v5841_v38 }
0x2215   : > { %v5844_v40 = vpop.xlane.xlu1 %5843  ;;  %v6082_v48 = vpop.permute.xlu0 %6081 }
0x2216   : > { %9975 = vrcp.f32 %v5844_v40 }
0x2219   : > { %v6002_v52 = vpop.permute.xlu1 %6001  ;;  %v6080_v53 = vpop.permute.xlu0 %6079 }
0x221f   : > { %v9974_v41 = vpop.eup %9973 }
0x2220   : > { %v5846_v43 = vmul.f32 %v9974_v41, %v9970_v29 }
0x2222   : > { %9755 = vmatmul.mubr.msk.f32.vlgmr.msra.gmra.mxu0 %vm1099_vm4, %v5846_v43 }
0x2223   : > { %v9976_v47 = vpop.eup %9975  ;;  %9763 = vmatpush3.xpose.msk.msra.mxu0 %vm943_vm3, %v6004_v37  ;;  %9764 = vmatprep.mubr.msk.f32.mxu0 %vm10044_vm2, %v10043_v8 }
0x2224   : > { %v5848_v49 = vmul.f32 %v9976_v47, %v9972_v35  ;;  %9772 = vmatprep.subr.mxu0 %v10043_v8 }
0x2226   : > { %9760 = vmatmul.mubr.msk.f32.vlgmr.msra.gmra.mxu1 %vm1099_vm4, %v5848_v49  ;;  %9765 = vmatmul.mubr.msk.f32.vlgmr.msra.gmra.mxu0 %vm943_vm3, %v6002_v52 }
0x2227   : > { %9768 = vmatpush3.xpose.msk.msra.mxu1 %vm943_vm3, %v6082_v48  ;;  %9769 = vmatprep.mubr.msk.f32.mxu1 %vm10044_vm2, %v10043_v8 }
0x2228   : > { %9777 = vmatprep.subr.mxu1 %v10043_v8  ;;  %9774 = vmatprep.mubr.msk.f32.mxu0 %vm10044_vm2, %v10043_v8 }
0x222a   : > { %9770 = vmatmul.mubr.msk.f32.vlgmr.msra.gmra.mxu1 %vm943_vm3, %v6080_v53 }
0x222b   : > { %9779 = vmatprep.mubr.msk.f32.mxu1 %vm10044_vm2, %v10043_v8 }
0x22e2   : > { %v10945_v59 = vpop.f32.mrf.mxu0 }
0x22e4   : > { %v9756_v57 = vpop.f32.mrf.mxu0 }
0x22e6   : > { %v10947_v60 = vpop.f32.mrf.mxu1  ;;  %v6075_v61 = vpop.f32.mrf.mxu0 }
0x22e7   : > { %v6157_v62 = vmul.f32 0.5, %v6075_v61 }
0x22e8   : > { %v9761_v63 = vpop.f32.mrf.mxu1  ;;  %v9766_v0 = vpop.f32.mrf.mxu0 }
0x22e9   : > { %v6159_v2 = vsel %vm1099_vm4, %v6157_v62, -inf }
0x22ea   : > { %6160 = vmax.xlane.f32.xlu1 %v6159_v2  ;;  %v6153_v3 = vpop.f32.mrf.mxu1 }
0x22eb   : > { %v6158_v5 = vmul.f32 0.5, %v6153_v3 }
0x22ec   : > { %v9771_v17 = vpop.f32.mrf.mxu1 }
0x22ed   : > { %v6162_v27 = vsel %vm1099_vm4, %v6158_v5, -inf }
0x22ee   : > { %6163 = vmax.xlane.f32.xlu0 %v6162_v27 }
0x22fb   : > { %6257 = vrot.lane.b32.xlu1 %v10706_v56, %s11684_s5 }
0x22ff   : > { %6335 = vrot.lane.b32.xlu1 %v10699_v50, %s11685_s8 }
0x2304   : > { %6181 = vrot.lane.b32.xlu0 %v10699_v50, %s11684_s5 }
0x2373   : > { %v6161_v9 = vpop.xlane.xlu1 %6160 }
0x2374   : > { %v6165_v51 = vsub.f32 %v6157_v62, %v6161_v9 }
0x2376   : > { %v6167_v7 = vmul.f32 1.442695, %v6165_v51 }
0x2377   : > { %v6258_v33 = vpop.permute.xlu1 %6257  ;;  %v6164_v10 = vpop.xlane.xlu0 %6163 }
0x2378   : > { %9977 = vpow2.f32 %v6167_v7  ;;  %v6166_v11 = vsub.f32 %v6158_v5, %v6164_v10  ;;  %9778 = vmatpush3.msra.mxu1 %v6258_v33 }
0x2379   : > { %9787 = vmatprep.subr.mxu1 %v10043_v8 }
0x237a   : > { %v6169_v13 = vmul.f32 1.442695, %v6166_v11 }
0x237b   : > { %v6182_v14 = vpop.permute.xlu0 %6181  ;;  %v6336_v4 = vpop.permute.xlu1 %6335 }
0x237c   : > { %9979 = vpow2.f32 %v6169_v13  ;;  %9773 = vmatpush3.msra.mxu0 %v6182_v14 }
0x237d   : > { %9782 = vmatprep.subr.mxu0 %v10043_v8 }
0x2385   : > { %v9978_v1 = vpop.eup %9977 }
0x2386   : > { %v6171_v44 = vsel %vm1099_vm4, %v9978_v1, 0.0 }
0x2387   : > { %6172 = vadd.xlane.f32.xlu0 %v6171_v44 }
0x2389   : > { %v9980_v15 = vpop.eup %9979 }
0x238a   : > { %v6174_v25 = vsel %vm1099_vm4, %v9980_v15, 0.0 }
0x238b   : > { %6175 = vadd.xlane.f32.xlu1 %v6174_v25 }
0x239c   : > { %6333 = vrot.lane.b32.xlu1 %v10704_v54, %s11685_s8 }
0x239d   : > { %6413 = vrot.lane.b32.xlu0 %v10706_v56, %s11685_s8 }
0x23a1   : > { %6411 = vrot.lane.b32.xlu0 %v10714_v58, %s11685_s8 }
0x2410   : > { %v6173_v21 = vpop.xlane.xlu0 %6172 }
0x2411   : > { %9981 = vrcp.f32 %v6173_v21 }
0x2414   : > { %v6176_v23 = vpop.xlane.xlu1 %6175  ;;  %v6414_v29 = vpop.permute.xlu0 %6413 }
0x2415   : > { %9983 = vrcp.f32 %v6176_v23 }
0x2418   : > { %v6334_v58 = vpop.permute.xlu1 %6333  ;;  %v6412_v30 = vpop.permute.xlu0 %6411 }
0x241e   : > { %v9982_v24 = vpop.eup %9981 }
0x241f   : > { %v6178_v26 = vmul.f32 %v9982_v24, %v9978_v1 }
0x2421   : > { %9775 = vmatmul.mubr.msk.f32.vlgmr.msra.gmra.mxu0 %vm1099_vm4, %v6178_v26 }
0x2422   : > { %v9984_v28 = vpop.eup %9983  ;;  %9783 = vmatpush3.xpose.msk.msra.mxu0 %vm943_vm3, %v6336_v4  ;;  %9784 = vmatprep.mubr.msk.f32.mxu0 %vm10044_vm2, %v10043_v8 }
0x2423   : > { %v6180_v54 = vmul.f32 %v9984_v28, %v9980_v15  ;;  %9792 = vmatprep.subr.mxu0 %v10043_v8 }
0x2425   : > { %9780 = vmatmul.mubr.msk.f32.vlgmr.msra.gmra.mxu1 %vm1099_vm4, %v6180_v54  ;;  %9785 = vmatmul.mubr.msk.f32.vlgmr.msra.gmra.mxu0 %vm943_vm3, %v6334_v58 }
0x2426   : > { %9788 = vmatpush3.xpose.msk.msra.mxu1 %vm943_vm3, %v6414_v29  ;;  %9789 = vmatprep.mubr.msk.f32.mxu1 %vm10044_vm2, %v10043_v8 }
0x2427   : > { %9797 = vmatprep.subr.mxu1 %v10043_v8  ;;  %9794 = vmatprep.mubr.msk.f32.mxu0 %vm10044_vm2, %v10043_v8 }
0x2429   : > { %9790 = vmatmul.mubr.msk.f32.vlgmr.msra.gmra.mxu1 %vm943_vm3, %v6412_v30 }
0x242a   : > { %9799 = vmatprep.mubr.msk.f32.mxu1 %vm10044_vm2, %v10043_v8 }
0x24e1   : > { %v6253_v35 = vpop.f32.mrf.mxu0 }
0x24e3   : > { %v9776_v36 = vpop.f32.mrf.mxu0 }
0x24e5   : > { %v6329_v37 = vpop.f32.mrf.mxu1  ;;  %v6407_v38 = vpop.f32.mrf.mxu0 }
0x24e6   : > { %v6489_v40 = vmul.f32 0.5, %v6407_v38 }
0x24e7   : > { %v9781_v41 = vpop.f32.mrf.mxu1  ;;  %v9786_v43 = vpop.f32.mrf.mxu0 }
0x24e8   : > { %v6491_v47 = vsel %vm1099_vm4, %v6489_v40, -inf }
0x24e9   : > { %6492 = vmax.xlane.f32.xlu1 %v6491_v47  ;;  %v6485_v48 = vpop.f32.mrf.mxu1 }
0x24ea   : > { %v6490_v49 = vmul.f32 0.5, %v6485_v48  ;;  %v8945_v48 = vld [vmem:[%s11694_s23] ss:$0 sm:$0xff] }
0x24eb   : > { %v9791_v52 = vpop.f32.mrf.mxu1 }
0x24ec   : > { %v6494_v53 = vsel %vm1099_vm4, %v6490_v49, -inf }
0x24ed   : > { %6495 = vmax.xlane.f32.xlu0 %v6494_v53 }
0x2572   : > { %v6493_v57 = vpop.xlane.xlu1 %6492 }
0x2573   : > { %v6497_v61 = vsub.f32 %v6489_v40, %v6493_v57 }
0x2575   : > { %v6499_v62 = vmul.f32 1.442695, %v6497_v61 }
0x2576   : > { %v6496_v63 = vpop.xlane.xlu0 %6495 }
0x2577   : > { %9985 = vpow2.f32 %v6499_v62  ;;  %v6498_v0 = vsub.f32 %v6490_v49, %v6496_v63 }
0x2579   : > { %v6501_v2 = vmul.f32 1.442695, %v6498_v0 }
0x257b   : > { %9987 = vpow2.f32 %v6501_v2 }
0x2584   : > { %v9986_v3 = vpop.eup %9985 }
0x2585   : > { %v6503_v5 = vsel %vm1099_vm4, %v9986_v3, 0.0 }
0x2586   : > { %6504 = vadd.xlane.f32.xlu0 %v6503_v5 }
0x2588   : > { %v9988_v17 = vpop.eup %9987 }
0x2589   : > { %v6506_v27 = vsel %vm1099_vm4, %v9988_v17, 0.0 }
0x258a   : > { %6507 = vadd.xlane.f32.xlu1 %v6506_v27 }
0x259b   : > { %6589 = vrot.lane.b32.xlu1 %v10706_v56, %s11686_s29 }
0x259c   : > { %6513 = vrot.lane.b32.xlu0 %v10699_v50, %s11686_s29  ;;  %s11695_s29 = scalar_lea.vmem %s11601_s12, %s10211_s18 }
0x259f   : > { %6667 = vrot.lane.b32.xlu1 %v10793_v12, %s11687_s2 }
0x25a0   : > { %6669 = vrot.lane.b32.xlu0 %v10795_v22, %s11687_s2 }
0x25a3   : > { %6675 = vrot.lane.b32.xlu1 %v10831_v42, %s11688_s0 }
0x25a4   : > { %6677 = vrot.lane.b32.xlu0 %v10833_v45, %s11688_s0  ;;  %s11697_s0 = scalar_lea.vmem %s11606_s17, %s10211_s18 }
0x25a7   : > { %6683 = vrot.lane.b32.xlu1 %v10869_v16, %s11689_s28 }
0x25a8   : > { %6685 = vrot.lane.b32.xlu0 %v10871_v19, %s11689_s28 }
0x25ab   : > { %6691 = vrot.lane.b32.xlu1 %v10907_v34, %s11690_s1  ;;  %v3824_v34 = vld [vmem:[%s10229_s19 + $0x18] sm:$0xff] }
0x25ac   : > { %6693 = vrot.lane.b32.xlu0 %v10909_v6, %s11690_s1  ;;  %v3823_v6 = vld [vmem:[%s10229_s19 + $0x10] sm:$0xff]  ;;  %s11698_s1 = sld [smem:[#allocation17_spill]] (!%p8965_p5) }
0x25af   : > { %6699 = vrot.lane.b32.xlu1 %v10945_v59, %s11691_s25  ;;  %v3822_v59 = vld [vmem:[%s10229_s19 + $0x8] sm:$0xff] }
0x25b0   : > { %6701 = vrot.lane.b32.xlu0 %v10947_v60, %s11691_s25  ;;  %v3821_v60 = vld [vmem:[%s10229_s19] sm:$0xff] }
0x25b3   : > { %6707 = vrot.lane.b32.xlu1 %v6253_v35, %s11692_s27 }
0x25b4   : > { %6709 = vrot.lane.b32.xlu0 %v6329_v37, %s11692_s27 }
0x260f   : > { %v6505_v50 = vpop.xlane.xlu0 %6504 }
0x2610   : > { %9989 = vrcp.f32 %v6505_v50 }
0x2613   : > { %v6508_v56 = vpop.xlane.xlu1 %6507  ;;  %v6514_v12 = vpop.permute.xlu0 %6513 }
0x2614   : > { %9991 = vrcp.f32 %v6508_v56  ;;  %9793 = vmatpush3.msra.mxu0 %v6514_v12 }
0x2615   : > { %9802 = vmatprep.subr.mxu0 %v3824_v34 }
0x2617   : > { %v6590_v22 = vpop.permute.xlu1 %6589  ;;  %v6670_v11 = vpop.permute.xlu0 %6669 }
0x2618   : > { %9798 = vmatpush3.msra.mxu1 %v6590_v22  ;;  %v6722_v54 = vsel %vm943_vm3, %v10757_v20, %v6670_v11  ;;  %v6912_v22 = vld [vmem:[%s10244_s26 + $0x188] sm:$0xff]  ;;  %v6863_v11 = vld [vmem:[%s10244_s26] sm:$0xff] }
0x2619   : > { %7298 = vmatprep.subr.mxu1 %v6912_v22  ;;  %v6889_v22 = vld [vmem:[%s10244_s26 + $0xd0] sm:$0xff] }
0x261b   : > { %v6668_v10 = vpop.permute.xlu1 %6667  ;;  %v6678_v14 = vpop.permute.xlu0 %6677 }
0x261c   : > { %v6721_v23 = vsel %vm943_vm3, %v10755_v18, %v6668_v10  ;;  %v6724_v30 = vsel %vm1099_vm4, %v6722_v54, %v6678_v14  ;;  %v6866_v10 = vld [vmem:[%s10244_s26 + $0x18] sm:$0xff]  ;;  %v6916_v14 = vld [vmem:[%s10244_s26 + $0x1a8] sm:$0xff] }
0x261d   : > { %v9990_v42 = vpop.eup %9989 }
0x261e   : > { %v6510_v45 = vmul.f32 %v9990_v42, %v9986_v3  ;;  %v6914_v42 = vld [vmem:[%s10244_s26 + $0x198] sm:$0xff] }
0x261f   : > { %v6676_v13 = vpop.permute.xlu1 %6675  ;;  %v6686_v44 = vpop.permute.xlu0 %6685 }
0x2620   : > { %9795 = vmatmul.mubr.msk.f32.vlgmr.msra.gmra.mxu0 %vm1099_vm4, %v6510_v45  ;;  %v6723_v24 = vsel %vm1099_vm4, %v6721_v23, %v6676_v13  ;;  %v6726_v18 = vsel %vm3672_vm5, %v6724_v30, %v6686_v44  ;;  %v6911_v45 = vld [vmem:[%s10244_s26 + $0x180] sm:$0xff]  ;;  %v6865_v13 = vld [vmem:[%s10244_s26 + $0x10] sm:$0xff] }
0x2621   : > { %v9992_v16 = vpop.eup %9991  ;;  %9803 = vmatpush3.msra.mxu0 %v3824_v34  ;;  %v6898_v34 = vld [vmem:[%s10244_s26 + $0x118] sm:$0xff] }
0x2622   : > { %v6512_v19 = vmul.f32 %v9992_v16, %v9988_v17  ;;  %9804 = vmatprep.subr.mxu0 %v3823_v6  ;;  %v6913_v16 = vld [vmem:[%s10244_s26 + $0x190] sm:$0xff] }
0x2623   : > { %9805 = vmatpush3.msra.mxu0 %v3823_v6  ;;  %v6684_v1 = vpop.permute.xlu1 %6683  ;;  %v6694_v25 = vpop.permute.xlu0 %6693  ;;  %v6895_v6 = vld [vmem:[%s10244_s26 + $0x100] sm:$0xff] }
0x2624   : > { %9800 = vmatmul.mubr.msk.f32.vlgmr.msra.gmra.mxu1 %vm1099_vm4, %v6512_v19  ;;  %9806 = vmatprep.subr.mxu0 %v3822_v59  ;;  %v6725_v28 = vsel %vm3672_vm5, %v6723_v24, %v6684_v1  ;;  %v6728_v40 = vsel %vm3675_vm6, %v6726_v18, %v6694_v25  ;;  %v6896_v19 = vld [vmem:[%s10244_s26 + $0x108] sm:$0xff]  ;;  %v6918_v1 = vld [vmem:[%s10244_s26 + $0x1b8] sm:$0xff]  ;;  %v6824_v24 = vld [vmem:[%s11695_s29] sm:$0x3] }
0x2625   : > { %7338 = vmatprep.mubr.f32.mxu1 %v10043_v8  ;;  %9807 = vmatpush3.msra.mxu0 %v3822_v59  ;;  %v6897_v59 = vld [vmem:[%s10244_s26 + $0x110] sm:$0xff]  ;;  %v6860_v30 = vrot.slane %v6824_v24, %v10686_v39 }
0x2626   : > { %9808 = vmatprep.subr.mxu0 %v3821_v60  ;;  %7299 = vmatpush1.msra.mxu1 %v6911_v45  ;;  %v6917_v18 = vld [vmem:[%s10244_s26 + $0x1b0] sm:$0xff]  ;;  %v6874_v45 = vld [vmem:[%s10244_s26 + $0x58] sm:$0xff] }
0x2627   : > { %9809 = vmatpush3.msra.mxu0 %v3821_v60  ;;  %v6692_v15 = vpop.permute.xlu1 %6691  ;;  %v6702_v21 = vpop.permute.xlu0 %6701  ;;  %7300 = vmatprep.subr.mxu1 %v6896_v19  ;;  %v6880_v60 = vld [vmem:[%s10244_s26 + $0x88] sm:$0xff]  ;;  %v6873_v19 = vld [vmem:[%s10244_s26 + $0x50] sm:$0xff] }
0x2628   : > { %v6727_v29 = vsel %vm3675_vm6, %v6725_v28, %v6692_v15  ;;  %v6730_v41 = vsel %vm3678_vm7, %v6728_v40, %v6702_v21  ;;  %7375 = vmatprep.subr.mxu0 %v6914_v42  ;;  %7301 = vmatpush1.msra.mxu1 %v6895_v6  ;;  %v6900_v40 = vld [vmem:[%s10244_s26 + $0x128] sm:$0xff]  ;;  %v6926_v6 = vld [vmem:[%s10244_s26 + $0x1f8] sm:$0xff] }
0x2629   : > { %7302 = vmatprep.subr.mxu1 %v6880_v60  ;;  %v6872_v42 = vld [vmem:[%s10244_s26 + $0x48] sm:$0xff]  ;;  %v6925_v60 = vld [vmem:[%s10244_s26 + $0x1f0] sm:$0xff] }
0x262b   : > { %v6700_v4 = vpop.permute.xlu1 %6699  ;;  %v6710_v35 = vpop.permute.xlu0 %6709 }
0x262c   : > { %v6729_v58 = vsel %vm3678_vm7, %v6727_v29, %v6700_v4  ;;  %v6732_v20 = vsel %vm3681_vm9, %v6730_v41, %v6710_v35  ;;  %v6854_v29 = vrot.slane %v6824_v24, %v10675_v32  ;;  %v6902_v41 = vld [vmem:[%s10244_s26 + $0x138] sm:$0xff] }
0x262d   : > { %v6976_v24 = vld [vmem:[%s10259_s22 + $0x178] sm:$0xff] }
0x262f   : > { %v6708_v26 = vpop.permute.xlu1 %6707 }
0x2630   : > { %v6731_v36 = vsel %vm3681_vm9, %v6729_v58, %v6708_v26 }
0x26e0   : > { %v6585_v9 = vpop.f32.mrf.mxu0 }
0x26e1   : > { %6715 = vrot.lane.b32.xlu1 %v6585_v9, %s11693_s10  ;;  %v6882_v9 = vld [vmem:[%s10244_s26 + $0x98] sm:$0xff] }
0x26e2   : > { %v9796_v51 = vpop.f32.mrf.mxu0 }
0x26e3   : > { %v6879_v51 = vld [vmem:[%s10244_s26 + $0x80] sm:$0xff] }
0x26e4   : > { %v6661_v7 = vpop.f32.mrf.mxu1  ;;  %7303 = vmatpush1.msra.mxu1 %v6879_v51  ;;  %v6910_v51 = vld [vmem:[%s10244_s26 + $0x178] sm:$0xff] }
0x26e5   : > { %6717 = vrot.lane.b32.xlu0 %v6661_v7, %s11693_s10  ;;  %v6881_v7 = vld [vmem:[%s10244_s26 + $0x90] sm:$0xff] }
0x26e6   : > { %v9801_v33 = vpop.f32.mrf.mxu1 }
0x26e7   : > { %v6864_v33 = vld [vmem:[%s10244_s26 + $0x8] sm:$0xff] }
0x26e8   : > { %7304 = vmatprep.subr.mxu1 %v6864_v33  ;;  %v6909_v33 = vld [vmem:[%s10244_s26 + $0x170] sm:$0xff] }
0x26e9   : > { %7305 = vmatpush1.msra.mxu1 %v6863_v11  ;;  %v6894_v11 = vld [vmem:[%s10244_s26 + $0xf8] sm:$0xff] }
0x26ea   : > { %7452 = vmatprep.subr.mxu1 %v6916_v14  ;;  %v6893_v14 = vld [vmem:[%s10244_s26 + $0xf0] sm:$0xff] }
0x2753   : > { %v6716_v37 = vpop.permute.xlu1 %6715 }
0x2754   : > { %v6733_v38 = vsel %vm3684_vm8, %v6731_v36, %v6716_v37  ;;  %v6915_v37 = vld [vmem:[%s10244_s26 + $0x1a0] sm:$0xff] }
0x2755   : > { %9810 = vmatprep.mubr.msk.f32.mxu0 %vm858_vm1, %v6733_v38 }
0x2757   : > { %v6718_v43 = vpop.permute.xlu0 %6717 }
0x2758   : > { %v6734_v47 = vsel %vm3684_vm8, %v6732_v20, %v6718_v43  ;;  %v6899_v20 = vld [vmem:[%s10244_s26 + $0x120] sm:$0xff]  ;;  %v6901_v43 = vld [vmem:[%s10244_s26 + $0x130] sm:$0xff] }
0x2759   : > { %9811 = vmatmul.mubr.msk.f32.vlgmr.msra.gmra.mxu0 %vm858_vm1, %v6734_v47 }
0x275a   : > { %7415 = vmatprep.mubr.f32.mxu0 %v10043_v8  ;;  %7376 = vmatpush1.msra.mxu0 %v6913_v16  ;;  %v6871_v16 = vld [vmem:[%s10244_s26 + $0x40] sm:$0xff] }
0x275b   : > { %7377 = vmatprep.subr.mxu0 %v6898_v34  ;;  %v6924_v34 = vld [vmem:[%s10244_s26 + $0x1e8] sm:$0xff] }
0x275c   : > { %7378 = vmatpush1.msra.mxu0 %v6897_v59  ;;  %v6923_v59 = vld [vmem:[%s10244_s26 + $0x1e0] sm:$0xff] }
0x275d   : > { %7379 = vmatprep.subr.mxu0 %v6882_v9  ;;  %v6908_v9 = vld [vmem:[%s10244_s26 + $0x168] sm:$0xff] }
0x275e   : > { %7380 = vmatpush1.msra.mxu0 %v6881_v7  ;;  %v6907_v7 = vld [vmem:[%s10244_s26 + $0x160] sm:$0xff] }
0x275f   : > { %7381 = vmatprep.subr.mxu0 %v6866_v10  ;;  %v6892_v10 = vld [vmem:[%s10244_s26 + $0xe8] sm:$0xff] }
0x2760   : > { %7382 = vmatpush1.msra.mxu0 %v6865_v13  ;;  %v6891_v13 = vld [vmem:[%s10244_s26 + $0xe0] sm:$0xff] }
0x2761   : > { %7529 = vmatprep.subr.mxu0 %v6918_v1  ;;  %v6876_v1 = vld [vmem:[%s10244_s26 + $0x68] sm:$0xff] }
0x2819   : > { %v9812_v49 = vpop.f32.mrf.mxu0 }
0x281a   : > { %v6819_v52 = vadd.f32 %v9812_v49, %v8945_v48  ;;  %v6886_v49 = vld [vmem:[%s10244_s26 + $0xb8] sm:$0xff] }
0x281b   : > { %v6813_v53 = vpop.f32.mrf.mxu0 }
0x281c   : > { %v6823_v57 = vadd.f32 %v6819_v52, %v10691_v55  ;;  %v6814_v61 = vadd.f32 %v8945_v48, %v6813_v53  ;;  %v6884_v48 = vld [vmem:[%s10244_s26 + $0xa8] sm:$0xff]  ;;  %v6883_v52 = vld [vmem:[%s10244_s26 + $0xa0] sm:$0xff]  ;;  %v6885_v53 = vld [vmem:[%s10244_s26 + $0xb0] sm:$0xff] }
0x281e   : > { %v6822_v62 = vadd.f32 %v6814_v61, %v10689_v46  ;;  %v6828_v63 = vsel %vm858_vm1, %v6823_v57, 0.0  ;;  %v6870_v61 = vld [vmem:[%s10244_s26 + $0x38] sm:$0xff] }
0x281f   : > { %6829 = vadd.xlane.f32.xlu0 %v6828_v63  ;;  %v6869_v63 = vld [vmem:[%s10244_s26 + $0x30] sm:$0xff] }
0x2820   : > { %v6825_v0 = vsel %vm858_vm1, %v6822_v62, 0.0 }
0x2821   : > { %6826 = vadd.xlane.f32.xlu1 %v6825_v0  ;;  %v6920_v0 = vld [vmem:[%s10244_s26 + $0x1c8] sm:$0xff] }
0x28a8   : > { %v6830_v2 = vpop.xlane.xlu0 %6829 }
0x28a9   : > { %v6832_v3 = vmul.f32 0.03125, %v6830_v2  ;;  %v6922_v2 = vld [vmem:[%s10244_s26 + $0x1d8] sm:$0xff] }
0x28aa   : > { %v6827_v5 = vpop.xlane.xlu1 %6826 }
0x28ab   : > { %v6834_v17 = vsub.f32 %v6823_v57, %v6832_v3  ;;  %v6831_v27 = vmul.f32 0.03125, %v6827_v5  ;;  %v6868_v57 = vld [vmem:[%s10244_s26 + $0x28] sm:$0xff]  ;;  %v6919_v3 = vld [vmem:[%s10244_s26 + $0x1c0] sm:$0xff]  ;;  %v6921_v5 = vld [vmem:[%s10244_s26 + $0x1d0] sm:$0xff] }
0x28ad   : > { %v6833_v55 = vsub.f32 %v6822_v62, %v6831_v27  ;;  %v6836_v50 = vmul.f32 %v6834_v17, %v6834_v17  ;;  %v6867_v62 = vld [vmem:[%s10244_s26 + $0x20] sm:$0xff]  ;;  %v6906_v27 = vld [vmem:[%s10244_s26 + $0x158] sm:$0xff] }
0x28af   : > { %v6840_v46 = vsel %vm858_vm1, %v6836_v50, 0.0  ;;  %v6835_v56 = vmul.f32 %v6833_v55, %v6833_v55  ;;  %v6905_v50 = vld [vmem:[%s10244_s26 + $0x150] sm:$0xff] }
0x28b0   : > { %6841 = vadd.xlane.f32.xlu1 %v6840_v46  ;;  %v6888_v46 = vld [vmem:[%s10244_s26 + $0xc8] sm:$0xff] }
0x28b1   : > { %v6837_v12 = vsel %vm858_vm1, %v6835_v56, 0.0  ;;  %v6890_v56 = vld [vmem:[%s10244_s26 + $0xd8] sm:$0xff] }
0x28b2   : > { %6838 = vadd.xlane.f32.xlu0 %v6837_v12  ;;  %v6887_v12 = vld [vmem:[%s10244_s26 + $0xc0] sm:$0xff] }
0x2939   : > { %v6842_v44 = vpop.xlane.xlu1 %6841 }
0x293a   : > { %v6844_v15 = vmul.f32 0.03125, %v6842_v44  ;;  %v6878_v44 = vld [vmem:[%s10244_s26 + $0x78] sm:$0xff] }
0x293b   : > { %v6839_v25 = vpop.xlane.xlu0 %6838 }
0x293c   : > { %v6846_v4 = vadd.f32 1e-05, %v6844_v15  ;;  %v6843_v21 = vmul.f32 0.03125, %v6839_v25  ;;  %v6875_v15 = vld [vmem:[%s10244_s26 + $0x60] sm:$0xff]  ;;  %v6877_v25 = vld [vmem:[%s10244_s26 + $0x70] sm:$0xff] }
0x293e   : > { %v6845_v23 = vadd.f32 1e-05, %v6843_v21  ;;  %9993 = vrsqrt.f32 %v6846_v4  ;;  %v6960_v4 = vld [vmem:[%s10259_s22 + $0xf8] sm:$0xff] }
0x293f   : > { %v6992_v21 = vld [vmem:[%s10259_s22 + $0x1f8] sm:$0xff] }
0x2940   : > { %9995 = vrsqrt.f32 %v6845_v23  ;;  %v6944_v23 = vld [vmem:[%s10259_s22 + $0x78] sm:$0xff] }
0x294b   : > { %v9994_v26 = vpop.eup %9993 }
0x294c   : > { %v6850_v58 = vmul.f32 %v9994_v26, %v6834_v17  ;;  %v6904_v17 = vld [vmem:[%s10244_s26 + $0x148] sm:$0xff]  ;;  %v6959_v26 = vld [vmem:[%s10259_s22 + $0xf0] sm:$0xff] }
0x294d   : > { %v9996_v28 = vpop.eup %9995 }
0x294e   : > { %v6849_v54 = vmul.f32 %v9996_v28, %v6833_v55  ;;  %v6856_v38 = vmul.f32 %v6854_v29, %v6850_v58  ;;  %v6903_v55 = vld [vmem:[%s10244_s26 + $0x140] sm:$0xff]  ;;  %v6991_v28 = vld [vmem:[%s10259_s22 + $0x1f0] sm:$0xff]  ;;  %v6990_v58 = vld [vmem:[%s10259_s22 + $0x1e8] sm:$0xff] }
0x2950   : > { %v6855_v35 = vmul.f32 %v6854_v29, %v6849_v54  ;;  %v11089_v47 = vadd.f32 %v6860_v30, %v6856_v38  ;;  %v6943_v29 = vld [vmem:[%s10259_s22 + $0x70] sm:$0xff]  ;;  %v6941_v38 = vld [vmem:[%s10259_s22 + $0x60] sm:$0xff] }
0x2951   : > { %v6975_v54 = vld [vmem:[%s10259_s22 + $0x170] sm:$0xff] }
0x2952   : > { %v11077_v36 = vadd.f32 %v6860_v30, %v6855_v35  ;;  %v6942_v30 = vld [vmem:[%s10259_s22 + $0x68] sm:$0xff] }
0x2953   : > { %v6974_v35 = vld [vmem:[%s10259_s22 + $0x168] sm:$0xff] }
0x2954   : > { %8948 = vmatmul.mubr.msk.f32.vlgmr.msra.gmra.mxu1 %vm858_vm1, %v11077_v36  ;;  %8950 = vmatmul.mubr.msk.f32.vlgmr.msra.gmra.mxu0 %vm858_vm1, %v11077_v36 }
0x2955   : > { %7453 = vmatpush1.msra.mxu1 %v6915_v37  ;;  %7530 = vmatpush1.msra.mxu0 %v6917_v18  ;;  %v6957_v37 = vld [vmem:[%s10259_s22 + $0xe0] sm:$0xff] }
0x2956   : > { %7454 = vmatprep.subr.mxu1 %v6900_v40  ;;  %7531 = vmatprep.subr.mxu0 %v6902_v41  ;;  %v6989_v18 = vld [vmem:[%s10259_s22 + $0x1e0] sm:$0xff]  ;;  %v6956_v41 = vld [vmem:[%s10259_s22 + $0xd8] sm:$0xff] }
0x2957   : > { %7344 = vmatprep.mubr.f32.mxu1 %v10043_v8  ;;  %7421 = vmatprep.mubr.f32.mxu0 %v10043_v8  ;;  %v6973_v40 = vld [vmem:[%s10259_s22 + $0x160] sm:$0xff] }
0x2958   : > { %7455 = vmatpush1.msra.mxu1 %v6899_v20  ;;  %7532 = vmatpush1.msra.mxu0 %v6901_v43  ;;  %v6988_v20 = vld [vmem:[%s10259_s22 + $0x1d8] sm:$0xff] }
0x2959   : > { %8949 = vmatmul.mubr.msk.f32.gmra.mxu1 %vm858_vm1, %v11089_v47  ;;  %8951 = vmatmul.mubr.msk.f32.gmra.mxu0 %vm858_vm1, %v11089_v47  ;;  %v6940_v43 = vld [vmem:[%s10259_s22 + $0x58] sm:$0xff] }
0x295a   : > { %7456 = vmatprep.subr.mxu1 %v6884_v48  ;;  %7533 = vmatprep.subr.mxu0 %v6886_v49  ;;  %v6972_v48 = vld [vmem:[%s10259_s22 + $0x158] sm:$0xff]  ;;  %v6955_v49 = vld [vmem:[%s10259_s22 + $0xd0] sm:$0xff] }
0x295b   : > { %7457 = vmatpush1.msra.mxu1 %v6883_v52  ;;  %7534 = vmatpush1.msra.mxu0 %v6885_v53  ;;  %v6987_v52 = vld [vmem:[%s10259_s22 + $0x1d0] sm:$0xff] }
0x295c   : > { %7458 = vmatprep.subr.mxu1 %v6868_v57  ;;  %7535 = vmatprep.subr.mxu0 %v6870_v61  ;;  %v6939_v53 = vld [vmem:[%s10259_s22 + $0x50] sm:$0xff]  ;;  %v6954_v61 = vld [vmem:[%s10259_s22 + $0xc8] sm:$0xff] }
0x295d   : > { %7459 = vmatpush1.msra.mxu1 %v6867_v62  ;;  %7492 = vmatprep.mubr.f32.mxu1 %v10043_v8  ;;  %v6971_v57 = vld [vmem:[%s10259_s22 + $0x150] sm:$0xff]  ;;  %v6986_v62 = vld [vmem:[%s10259_s22 + $0x1c8] sm:$0xff] }
0x295e   : > { %7536 = vmatpush1.msra.mxu0 %v6869_v63  ;;  %7569 = vmatprep.mubr.f32.mxu0 %v10043_v8  ;;  %v6938_v63 = vld [vmem:[%s10259_s22 + $0x48] sm:$0xff] }
0x295f   : > { %8952 = vmatmul.mubr.msk.f32.vlgmr.msra.gmra.mxu1 %vm858_vm1, %v11077_v36  ;;  %8954 = vmatmul.mubr.msk.f32.vlgmr.msra.gmra.mxu0 %vm858_vm1, %v11077_v36 }
0x2960   : > { %7606 = vmatprep.subr.mxu1 %v6920_v0  ;;  %7683 = vmatprep.subr.mxu0 %v6922_v2  ;;  %v6970_v0 = vld [vmem:[%s10259_s22 + $0x148] sm:$0xff]  ;;  %v6953_v2 = vld [vmem:[%s10259_s22 + $0xc0] sm:$0xff] }
0x2961   : > { %7607 = vmatpush1.msra.mxu1 %v6919_v3  ;;  %7684 = vmatpush1.msra.mxu0 %v6921_v5  ;;  %v6985_v3 = vld [vmem:[%s10259_s22 + $0x1c0] sm:$0xff] }
0x2962   : > { %7608 = vmatprep.subr.mxu1 %v6904_v17  ;;  %7685 = vmatprep.subr.mxu0 %v6906_v27  ;;  %v6937_v5 = vld [vmem:[%s10259_s22 + $0x40] sm:$0xff]  ;;  %v6952_v27 = vld [vmem:[%s10259_s22 + $0xb8] sm:$0xff] }
0x2963   : > { %7498 = vmatprep.mubr.f32.mxu1 %v10043_v8  ;;  %7575 = vmatprep.mubr.f32.mxu0 %v10043_v8  ;;  %v6969_v17 = vld [vmem:[%s10259_s22 + $0x140] sm:$0xff] }
0x2964   : > { %7609 = vmatpush1.msra.mxu1 %v6903_v55  ;;  %7686 = vmatpush1.msra.mxu0 %v6905_v50  ;;  %v6984_v55 = vld [vmem:[%s10259_s22 + $0x1b8] sm:$0xff] }
0x2965   : > { %8953 = vmatmul.mubr.msk.f32.gmra.mxu1 %vm858_vm1, %v11089_v47  ;;  %8955 = vmatmul.mubr.msk.f32.gmra.mxu0 %vm858_vm1, %v11089_v47  ;;  %v6936_v50 = vld [vmem:[%s10259_s22 + $0x38] sm:$0xff] }
0x2966   : > { %7610 = vmatprep.subr.mxu1 %v6888_v46  ;;  %7687 = vmatprep.subr.mxu0 %v6890_v56  ;;  %v6968_v46 = vld [vmem:[%s10259_s22 + $0x138] sm:$0xff]  ;;  %v6951_v56 = vld [vmem:[%s10259_s22 + $0xb0] sm:$0xff] }
0x2967   : > { %7611 = vmatpush1.msra.mxu1 %v6887_v12  ;;  %7688 = vmatpush1.msra.mxu0 %v6889_v22  ;;  %v6983_v12 = vld [vmem:[%s10259_s22 + $0x1b0] sm:$0xff] }
0x2968   : > { %7612 = vmatprep.subr.mxu1 %v6872_v42  ;;  %7689 = vmatprep.subr.mxu0 %v6874_v45  ;;  %v6935_v22 = vld [vmem:[%s10259_s22 + $0x30] sm:$0xff]  ;;  %v6950_v45 = vld [vmem:[%s10259_s22 + $0xa8] sm:$0xff] }
0x2969   : > { %7613 = vmatpush1.msra.mxu1 %v6871_v16  ;;  %7646 = vmatprep.mubr.f32.mxu1 %v10043_v8  ;;  %v6967_v42 = vld [vmem:[%s10259_s22 + $0x130] sm:$0xff]  ;;  %v6982_v16 = vld [vmem:[%s10259_s22 + $0x1a8] sm:$0xff] }
0x296a   : > { %7690 = vmatpush1.msra.mxu0 %v6873_v19  ;;  %7723 = vmatprep.mubr.f32.mxu0 %v10043_v8  ;;  %v6934_v19 = vld [vmem:[%s10259_s22 + $0x28] sm:$0xff] }
0x296b   : > { %8956 = vmatmul.mubr.msk.f32.vlgmr.msra.gmra.mxu1 %vm858_vm1, %v11077_v36  ;;  %8958 = vmatmul.mubr.msk.f32.vlgmr.msra.gmra.mxu0 %vm858_vm1, %v11077_v36 }
0x296c   : > { %7760 = vmatprep.subr.mxu1 %v6924_v34  ;;  %7837 = vmatprep.subr.mxu0 %v6926_v6  ;;  %v6966_v34 = vld [vmem:[%s10259_s22 + $0x128] sm:$0xff]  ;;  %v6949_v6 = vld [vmem:[%s10259_s22 + $0xa0] sm:$0xff] }
0x296d   : > { %7761 = vmatpush1.msra.mxu1 %v6923_v59  ;;  %7838 = vmatpush1.msra.mxu0 %v6925_v60  ;;  %v6981_v59 = vld [vmem:[%s10259_s22 + $0x1a0] sm:$0xff] }
0x296e   : > { %7762 = vmatprep.subr.mxu1 %v6908_v9  ;;  %7839 = vmatprep.subr.mxu0 %v6910_v51  ;;  %v6933_v60 = vld [vmem:[%s10259_s22 + $0x20] sm:$0xff]  ;;  %v6948_v51 = vld [vmem:[%s10259_s22 + $0x98] sm:$0xff] }
0x296f   : > { %7652 = vmatprep.mubr.f32.mxu1 %v10043_v8  ;;  %7729 = vmatprep.mubr.f32.mxu0 %v10043_v8  ;;  %v6965_v9 = vld [vmem:[%s10259_s22 + $0x120] sm:$0xff] }
0x2970   : > { %7763 = vmatpush1.msra.mxu1 %v6907_v7  ;;  %7840 = vmatpush1.msra.mxu0 %v6909_v33  ;;  %v6980_v7 = vld [vmem:[%s10259_s22 + $0x198] sm:$0xff] }
0x2971   : > { %8957 = vmatmul.mubr.msk.f32.gmra.mxu1 %vm858_vm1, %v11089_v47  ;;  %8959 = vmatmul.mubr.msk.f32.gmra.mxu0 %vm858_vm1, %v11089_v47  ;;  %v6932_v33 = vld [vmem:[%s10259_s22 + $0x18] sm:$0xff] }
0x2972   : > { %7764 = vmatprep.subr.mxu1 %v6892_v10  ;;  %7841 = vmatprep.subr.mxu0 %v6894_v11  ;;  %v6964_v10 = vld [vmem:[%s10259_s22 + $0x118] sm:$0xff]  ;;  %v6947_v11 = vld [vmem:[%s10259_s22 + $0x90] sm:$0xff] }
0x2973   : > { %7765 = vmatpush1.msra.mxu1 %v6891_v13  ;;  %7842 = vmatpush1.msra.mxu0 %v6893_v14  ;;  %v6979_v13 = vld [vmem:[%s10259_s22 + $0x190] sm:$0xff] }
0x2974   : > { %7766 = vmatprep.subr.mxu1 %v6876_v1  ;;  %7843 = vmatprep.subr.mxu0 %v6878_v44  ;;  %v6931_v14 = vld [vmem:[%s10259_s22 + $0x10] sm:$0xff]  ;;  %v6946_v44 = vld [vmem:[%s10259_s22 + $0x88] sm:$0xff] }
0x2975   : > { %7767 = vmatpush1.msra.mxu1 %v6875_v15  ;;  %7800 = vmatprep.mubr.f32.mxu1 %v10043_v8  ;;  %v6963_v1 = vld [vmem:[%s10259_s22 + $0x110] sm:$0xff]  ;;  %v6978_v15 = vld [vmem:[%s10259_s22 + $0x188] sm:$0xff] }
0x2976   : > { %7844 = vmatpush1.msra.mxu0 %v6877_v25  ;;  %7877 = vmatprep.mubr.f32.mxu0 %v10043_v8  ;;  %v6930_v25 = vld [vmem:[%s10259_s22 + $0x8] sm:$0xff] }
0x2977   : > { %8960 = vmatmul.mubr.msk.f32.vlgmr.msra.gmra.mxu1 %vm858_vm1, %v11077_v36  ;;  %8962 = vmatmul.mubr.msk.f32.vlgmr.msra.gmra.mxu0 %vm858_vm1, %v11077_v36 }
0x2978   : > { %7806 = vmatprep.mubr.f32.mxu1 %v10043_v8  ;;  %7883 = vmatprep.mubr.f32.mxu0 %v10043_v8  ;;  %v6958_v8 = vld [vmem:[%s10259_s22 + $0xe8] sm:$0xff] }
0x2979   : > { %9134 = vmatprep.subr.mxu1 %v6960_v4  ;;  %9172 = vmatprep.subr.mxu0 %v6992_v21  ;;  %v6962_v4 = vld [vmem:[%s10259_s22 + $0x108] sm:$0xff]  ;;  %v6945_v21 = vld [vmem:[%s10259_s22 + $0x80] sm:$0xff] }
0x297a   : > { %9135 = vmatpush3.msra.mxu1 %v6944_v23  ;;  %9173 = vmatpush3.msra.mxu0 %v6976_v24  ;;  %v6977_v23 = vld [vmem:[%s10259_s22 + $0x180] sm:$0xff] }
0x297b   : > { %8961 = vmatmul.mubr.msk.f32.gmra.mxu1 %vm858_vm1, %v11089_v47  ;;  %8963 = vmatmul.mubr.msk.f32.gmra.mxu0 %vm858_vm1, %v11089_v47  ;;  %v6929_v24 = vld [vmem:[%s10259_s22] sm:$0xff] }
0x297c   : > { %9136 = vmatprep.subr.mxu1 %v6959_v26  ;;  %9174 = vmatprep.subr.mxu0 %v6991_v28  ;;  %v6961_v26 = vld [vmem:[%s10259_s22 + $0x100] sm:$0xff]  ;;  %v7024_v28 = vld [vmem:[%s10259_s22 + $0x2f8] sm:$0xff] }
0x297d   : > { %9137 = vmatpush3.msra.mxu1 %v6943_v29  ;;  %9175 = vmatpush3.msra.mxu0 %v6975_v54  ;;  %v7056_v29 = vld [vmem:[%s10259_s22 + $0x3f8] sm:$0xff]  ;;  %v7206_v54 = vsub.s32 4, %v10670_v31 }
0x297e   : > { %9138 = vmatprep.subr.mxu1 %v6958_v8  ;;  %9176 = vmatprep.subr.mxu0 %v6990_v58  ;;  %v7214_v8 = vsub.s32 6, %v10670_v31  ;;  %v11242_v58 = vld [vmem:[%s10249_s21 + $0x8] sm:$0xff] }
0x297f   : > { %9139 = vmatpush3.msra.mxu1 %v6942_v30  ;;  %9177 = vmatpush3.msra.mxu0 %v6974_v35  ;;  %v11247_v30 = vrot.slane %v11242_v58, %v7206_v54 }
0x2980   : > { %9140 = vmatprep.subr.mxu1 %v6957_v37  ;;  %9178 = vmatprep.subr.mxu0 %v6989_v18  ;;  %v11252_v35 = vrot.slane %v11242_v58, %v7214_v8  ;;  %v7198_v37 = vsub.s32 2, %v10670_v31  ;;  %v11256_v18 = vld [vmem:[%s10249_s21] sm:$0xff] }
0x2981   : > { %9141 = vmatpush3.msra.mxu1 %v6941_v38  ;;  %9179 = vmatpush3.msra.mxu0 %v6973_v40  ;;  %v7202_v38 = vsub.s32 3, %v10670_v31  ;;  %v7191_v40 = vrot.slane %v11256_v18, %v10675_v32 }
0x2982   : > { %9142 = vmatprep.subr.mxu1 %v6956_v41  ;;  %9180 = vmatprep.subr.mxu0 %v6988_v20  ;;  %v7199_v41 = vrot.slane %v11256_v18, %v7198_v37  ;;  %v7195_v20 = vrot.slane %v11256_v18, %v10686_v39 }
0x2983   : > { %9143 = vmatpush3.msra.mxu1 %v6940_v43  ;;  %9181 = vmatpush3.msra.mxu0 %v6972_v48  ;;  %v7203_v43 = vrot.slane %v11256_v18, %v7202_v38 }
0x2984   : > { %9144 = vmatprep.subr.mxu1 %v6955_v49  ;;  %9182 = vmatprep.subr.mxu0 %v6987_v52 }
0x2985   : > { %9145 = vmatpush3.msra.mxu1 %v6939_v53  ;;  %9183 = vmatpush3.msra.mxu0 %v6971_v57 }
0x2986   : > { %9146 = vmatprep.subr.mxu1 %v6954_v61  ;;  %9184 = vmatprep.subr.mxu0 %v6986_v62 }
0x2987   : > { %9147 = vmatpush3.msra.mxu1 %v6938_v63  ;;  %9185 = vmatpush3.msra.mxu0 %v6970_v0 }
0x2988   : > { %9148 = vmatprep.subr.mxu1 %v6953_v2  ;;  %9186 = vmatprep.subr.mxu0 %v6985_v3 }
0x2989   : > { %9149 = vmatpush3.msra.mxu1 %v6937_v5  ;;  %9187 = vmatpush3.msra.mxu0 %v6969_v17 }
0x298a   : > { %9150 = vmatprep.subr.mxu1 %v6952_v27  ;;  %9188 = vmatprep.subr.mxu0 %v6984_v55  ;;  %v7008_v55 = vld [vmem:[%s10259_s22 + $0x278] sm:$0xff] }
0x298b   : > { %9151 = vmatpush3.msra.mxu1 %v6936_v50  ;;  %9189 = vmatpush3.msra.mxu0 %v6968_v46  ;;  %v7040_v50 = vld [vmem:[%s10259_s22 + $0x378] sm:$0xff]  ;;  %v7210_v46 = vsub.s32 5, %v10670_v31 }
0x298c   : > { %9152 = vmatprep.subr.mxu1 %v6951_v56  ;;  %9190 = vmatprep.subr.mxu0 %v6983_v12  ;;  %v7218_v56 = vsub.s32 7, %v10670_v31  ;;  %v7151_v31 = vld [vmem:[%s10259_s22 + $0x6f0] sm:$0xff] }
0x298d   : > { %9153 = vmatpush3.msra.mxu1 %v6935_v22  ;;  %9191 = vmatpush3.msra.mxu0 %v6967_v42 }
0x298e   : > { %9154 = vmatprep.subr.mxu1 %v6950_v45  ;;  %9192 = vmatprep.subr.mxu0 %v6982_v16  ;;  %v7023_v45 = vld [vmem:[%s10259_s22 + $0x2f0] sm:$0xff] }
0x298f   : > { %9155 = vmatpush3.msra.mxu1 %v6934_v19  ;;  %9193 = vmatpush3.msra.mxu0 %v6966_v34  ;;  %v7055_v16 = vld [vmem:[%s10259_s22 + $0x3f0] sm:$0xff] }
0x2990   : > { %9156 = vmatprep.subr.mxu1 %v6949_v6  ;;  %9194 = vmatprep.subr.mxu0 %v6981_v59  ;;  %v7007_v59 = vld [vmem:[%s10259_s22 + $0x270] sm:$0xff] }
0x2991   : > { %9157 = vmatpush3.msra.mxu1 %v6933_v60  ;;  %9195 = vmatpush3.msra.mxu0 %v6965_v9  ;;  %v7039_v60 = vld [vmem:[%s10259_s22 + $0x370] sm:$0xff] }
0x2992   : > { %9158 = vmatprep.subr.mxu1 %v6948_v51  ;;  %9196 = vmatprep.subr.mxu0 %v6980_v7  ;;  %v11280_v7 = vrot.slane %v11256_v18, %v7210_v46 }
0x2993   : > { %9159 = vmatpush3.msra.mxu1 %v6932_v33  ;;  %9197 = vmatpush3.msra.mxu0 %v6964_v10  ;;  %v11285_v33 = vrot.slane %v11256_v18, %v7218_v56  ;;  %v7022_v10 = vld [vmem:[%s10259_s22 + $0x2e8] sm:$0xff] }
0x2994   : > { %9160 = vmatprep.subr.mxu1 %v6947_v11  ;;  %9198 = vmatprep.subr.mxu0 %v6979_v13  ;;  %v7054_v11 = vld [vmem:[%s10259_s22 + $0x3e8] sm:$0xff] }
0x2995   : > { %9161 = vmatpush3.msra.mxu1 %v6931_v14  ;;  %9199 = vmatpush3.msra.mxu0 %v6963_v1 }
0x2996   : > { %9162 = vmatprep.subr.mxu1 %v6946_v44  ;;  %9200 = vmatprep.subr.mxu0 %v6978_v15  ;;  %v7006_v15 = vld [vmem:[%s10259_s22 + $0x268] sm:$0xff] }
0x2997   : > { %9163 = vmatpush3.msra.mxu1 %v6930_v25  ;;  %9201 = vmatpush3.msra.mxu0 %v6962_v4  ;;  %v7038_v25 = vld [vmem:[%s10259_s22 + $0x368] sm:$0xff] }
0x2998   : > { %9164 = vmatprep.subr.mxu1 %v6945_v21  ;;  %9202 = vmatprep.subr.mxu0 %v6977_v23  ;;  %v7021_v23 = vld [vmem:[%s10259_s22 + $0x2e0] sm:$0xff] }
0x2999   : > { %9165 = vmatpush3.msra.mxu1 %v6929_v24  ;;  %9203 = vmatpush3.msra.mxu0 %v6961_v26  ;;  %v7053_v24 = vld [vmem:[%s10259_s22 + $0x3e0] sm:$0xff] }
0x299a   : > { %9210 = vmatprep.subr.mxu1 %v7024_v28  ;;  %9248 = vmatprep.subr.mxu0 %v7056_v29  ;;  %v7005_v29 = vld [vmem:[%s10259_s22 + $0x260] sm:$0xff] }
0x2a14   : > { %v7340_v48 = vpop.f32.mrf.mxu1  ;;  %v7417_v49 = vpop.f32.mrf.mxu0 }
0x2a15   : > { %v7341_v52 = vadd.f32 %v7340_v48, %v7191_v40  ;;  %v7418_v53 = vadd.f32 %v7417_v49, %v7199_v41  ;;  %v7052_v48 = vld [vmem:[%s10259_s22 + $0x3d8] sm:$0xff] }
0x2a16   : > { %v7342_v57 = vpop.f32.mrf.mxu1  ;;  %v7419_v61 = vpop.f32.mrf.mxu0  ;;  %v7004_v49 = vld [vmem:[%s10259_s22 + $0x258] sm:$0xff] }
0x2a17   : > { %v7343_v62 = vadd.f32 %v7342_v57, %v7195_v20  ;;  %v7420_v63 = vadd.f32 %v7419_v61, %v7203_v43  ;;  %v7890_v17 = vmax.f32 %v7341_v52, 0.0  ;;  %v7892_v27 = vmax.f32 %v7418_v53, 0.0  ;;  %v7036_v52 = vld [vmem:[%s10259_s22 + $0x358] sm:$0xff]  ;;  %v7019_v53 = vld [vmem:[%s10259_s22 + $0x2d0] sm:$0xff] }
0x2a18   : > { %v7051_v57 = vld [vmem:[%s10259_s22 + $0x3d0] sm:$0xff] }
0x2a19   : > { %v7891_v0 = vmax.f32 %v7343_v62, 0.0  ;;  %v7893_v2 = vmax.f32 %v7420_v63, 0.0  ;;  %v7346_v3 = vpop.f32.mrf.mxu1  ;;  %v7423_v5 = vpop.f32.mrf.mxu0  ;;  %v7003_v61 = vld [vmem:[%s10259_s22 + $0x250] sm:$0xff]  ;;  %v7018_v63 = vld [vmem:[%s10259_s22 + $0x2c8] sm:$0xff] }
0x2a1a   : > { %v7347_v12 = vadd.f32 %v7346_v3, %v7191_v40  ;;  %v7424_v19 = vadd.f32 %v7423_v5, %v7199_v41  ;;  %v7037_v40 = vld [vmem:[%s10259_s22 + $0x360] sm:$0xff]  ;;  %v7020_v41 = vld [vmem:[%s10259_s22 + $0x2d8] sm:$0xff]  ;;  %v7035_v62 = vld [vmem:[%s10259_s22 + $0x350] sm:$0xff] }
0x2a1b   : > { %v7348_v22 = vpop.f32.mrf.mxu1  ;;  %v7425_v42 = vpop.f32.mrf.mxu0  ;;  %7992 = vmatprep.mubr.f32.mxu1 %v7891_v0  ;;  %8067 = vmatprep.mubr.f32.mxu0 %v7893_v2  ;;  %v7050_v0 = vld [vmem:[%s10259_s22 + $0x3c8] sm:$0xff]  ;;  %v7017_v5 = vld [vmem:[%s10259_s22 + $0x2c0] sm:$0xff] }
0x2a1c   : > { %v7349_v34 = vadd.f32 %v7348_v22, %v7195_v20  ;;  %v7426_v6 = vadd.f32 %v7425_v42, %v7203_v43  ;;  %7993 = vmatmul.mubr.f32.vlgmr.msra.gmra.mxu1 %v7890_v17  ;;  %8068 = vmatmul.mubr.f32.vlgmr.msra.gmra.mxu0 %v7892_v27  ;;  %v7906_v1 = vmax.f32 %v7347_v12, 0.0  ;;  %v7908_v44 = vmax.f32 %v7424_v19, 0.0  ;;  %v7002_v2 = vld [vmem:[%s10259_s22 + $0x248] sm:$0xff]  ;;  %v7049_v17 = vld [vmem:[%s10259_s22 + $0x3c0] sm:$0xff]  ;;  %v7048_v12 = vld [vmem:[%s10259_s22 + $0x3b8] sm:$0xff] }
0x2a1d   : > { %9211 = vmatpush3.msra.mxu1 %v7008_v55  ;;  %9249 = vmatpush3.msra.mxu0 %v7040_v50  ;;  %v7034_v3 = vld [vmem:[%s10259_s22 + $0x348] sm:$0xff]  ;;  %v7001_v27 = vld [vmem:[%s10259_s22 + $0x240] sm:$0xff]  ;;  %v7016_v50 = vld [vmem:[%s10259_s22 + $0x2b8] sm:$0xff] }
0x2a1e   : > { %v7907_v9 = vmax.f32 %v7349_v34, 0.0  ;;  %v7909_v51 = vmax.f32 %v7426_v6, 0.0  ;;  %9212 = vmatprep.subr.mxu1 %v7023_v45  ;;  %9250 = vmatprep.subr.mxu0 %v7055_v16  ;;  %v7033_v55 = vld [vmem:[%s10259_s22 + $0x340] sm:$0xff]  ;;  %v7000_v22 = vld [vmem:[%s10259_s22 + $0x238] sm:$0xff]  ;;  %v7015_v45 = vld [vmem:[%s10259_s22 + $0x2b0] sm:$0xff] }
0x2a1f   : > { %v11289_v13 = vpop.f32.mrf.mxu1  ;;  %v11291_v14 = vpop.f32.mrf.mxu0  ;;  %9213 = vmatpush3.msra.mxu1 %v7007_v59  ;;  %9251 = vmatpush3.msra.mxu0 %v7039_v60  ;;  %v7032_v42 = vld [vmem:[%s10259_s22 + $0x338] sm:$0xff]  ;;  %v7047_v16 = vld [vmem:[%s10259_s22 + $0x3b0] sm:$0xff]  ;;  %v7014_v6 = vld [vmem:[%s10259_s22 + $0x2a8] sm:$0xff] }
0x2a20   : > { %7997 = vmatprep.mubr.f32.mxu1 %v7907_v9  ;;  %8072 = vmatprep.mubr.f32.mxu0 %v7909_v51  ;;  %v6999_v19 = vld [vmem:[%s10259_s22 + $0x230] sm:$0xff]  ;;  %v7046_v59 = vld [vmem:[%s10259_s22 + $0x3a8] sm:$0xff] }
0x2a21   : > { %v7496_v4 = vpop.f32.mrf.mxu1  ;;  %v7573_v21 = vpop.f32.mrf.mxu0  ;;  %9214 = vmatprep.subr.mxu1 %v7022_v10  ;;  %9252 = vmatprep.subr.mxu0 %v7054_v11  ;;  %v7031_v34 = vld [vmem:[%s10259_s22 + $0x330] sm:$0xff]  ;;  %v6998_v60 = vld [vmem:[%s10259_s22 + $0x228] sm:$0xff]  ;;  %v7013_v10 = vld [vmem:[%s10259_s22 + $0x2a0] sm:$0xff] }
0x2a22   : > { %v7497_v26 = vadd.f32 %v7496_v4, %v11280_v7  ;;  %v7574_v28 = vadd.f32 %v7573_v21, %v11285_v33  ;;  %7998 = vmatmul.mubr.f32.gmra.mxu1 %v7906_v1  ;;  %8073 = vmatmul.mubr.f32.gmra.mxu0 %v7908_v44  ;;  %v7030_v9 = vld [vmem:[%s10259_s22 + $0x328] sm:$0xff]  ;;  %v7045_v11 = vld [vmem:[%s10259_s22 + $0x3a0] sm:$0xff]  ;;  %v7044_v4 = vld [vmem:[%s10259_s22 + $0x398] sm:$0xff]  ;;  %v7207_v21 = vrot.slane %v11256_v18, %v7206_v54 }
0x2a23   : > { %9215 = vmatpush3.msra.mxu1 %v7006_v15  ;;  %9253 = vmatpush3.msra.mxu0 %v7038_v25  ;;  %v6997_v44 = vld [vmem:[%s10259_s22 + $0x220] sm:$0xff]  ;;  %v7012_v25 = vld [vmem:[%s10259_s22 + $0x298] sm:$0xff]  ;;  %v6995_v54 = vld [vmem:[%s10259_s22 + $0x210] sm:$0xff] }
0x2a24   : > { %v7895_v20 = vmax.f32 %v7497_v26, 0.0  ;;  %v7897_v43 = vmax.f32 %v7574_v28, 0.0  ;;  %9216 = vmatprep.subr.mxu1 %v7021_v23  ;;  %9254 = vmatprep.subr.mxu0 %v7053_v24  ;;  %v7029_v15 = vld [vmem:[%s10259_s22 + $0x320] sm:$0xff]  ;;  %v7215_v23 = vrot.slane %v11256_v18, %v7214_v8  ;;  %v6996_v24 = vld [vmem:[%s10259_s22 + $0x218] sm:$0xff]  ;;  %v7027_v8 = vld [vmem:[%s10259_s22 + $0x310] sm:$0xff] }
0x2a25   : > { %9217 = vmatpush3.msra.mxu1 %v7005_v29  ;;  %9255 = vmatpush3.msra.mxu0 %v7037_v40  ;;  %v11329_v51 = vpop.f32.mrf.mxu1  ;;  %v7577_v1 = vpop.f32.mrf.mxu0  ;;  %v7028_v26 = vld [vmem:[%s10259_s22 + $0x318] sm:$0xff]  ;;  %v7011_v29 = vld [vmem:[%s10259_s22 + $0x290] sm:$0xff]  ;;  %v7010_v18 = vld [vmem:[%s10259_s22 + $0x288] sm:$0xff] }
0x2a26   : > { %9218 = vmatprep.subr.mxu1 %v7020_v41  ;;  %8142 = vmatprep.mubr.f32.mxu1 %v7895_v20  ;;  %v7043_v40 = vld [vmem:[%s10259_s22 + $0x390] sm:$0xff]  ;;  %v7042_v20 = vld [vmem:[%s10259_s22 + $0x388] sm:$0xff] }
0x2a27   : > { %9256 = vmatprep.subr.mxu0 %v7052_v48  ;;  %8217 = vmatprep.mubr.f32.mxu0 %v7897_v43  ;;  %v7502_v28 = vpop.f32.mrf.mxu1  ;;  %v7579_v41 = vpop.f32.mrf.mxu0  ;;  %v7495_v43 = vadd.f32 %v11289_v13, %v7207_v21  ;;  %v7572_v48 = vadd.f32 %v11291_v14, %v7215_v23  ;;  %v6993_v14 = vld [vmem:[%s10259_s22 + $0x200] sm:$0xff] }
0x2a28   : > { %9219 = vmatpush3.msra.mxu1 %v7004_v49  ;;  %9257 = vmatpush3.msra.mxu0 %v7036_v52  ;;  %v6994_v49 = vld [vmem:[%s10259_s22 + $0x208] sm:$0xff]  ;;  %v7580_v13 = vadd.f32 %v7579_v41, %v11285_v33  ;;  %v7120_v33 = vld [vmem:[%s10259_s22 + $0x5f8] sm:$0xff]  ;;  %v7083_v41 = vld [vmem:[%s10259_s22 + $0x4d0] sm:$0xff] }
0x2a29   : > { %9220 = vmatprep.subr.mxu1 %v7019_v53  ;;  %9258 = vmatprep.subr.mxu0 %v7051_v57  ;;  %v7026_v52 = vld [vmem:[%s10259_s22 + $0x308] sm:$0xff]  ;;  %v7009_v57 = vld [vmem:[%s10259_s22 + $0x280] sm:$0xff] }
0x2a2a   : > { %9221 = vmatpush3.msra.mxu1 %v7003_v61  ;;  %9259 = vmatpush3.msra.mxu0 %v7035_v62  ;;  %v7041_v61 = vld [vmem:[%s10259_s22 + $0x380] sm:$0xff]  ;;  %v7503_v62 = vadd.f32 %v7502_v28, %v11280_v7  ;;  %v7088_v7 = vld [vmem:[%s10259_s22 + $0x4f8] sm:$0xff] }
0x2a2b   : > { %9222 = vmatprep.subr.mxu1 %v7018_v63  ;;  %9260 = vmatprep.subr.mxu0 %v7050_v0  ;;  %v11355_v53 = vpop.f32.mrf.mxu1  ;;  %v11361_v63 = vpop.f32.mrf.mxu0  ;;  %v7025_v0 = vld [vmem:[%s10259_s22 + $0x300] sm:$0xff]  ;;  %v7116_v28 = vld [vmem:[%s10259_s22 + $0x5d8] sm:$0xff] }
0x2a2c   : > { %9223 = vmatpush3.msra.mxu1 %v7002_v2  ;;  %9261 = vmatpush3.msra.mxu0 %v7034_v3  ;;  %v7894_v2 = vmax.f32 %v7495_v43, 0.0  ;;  %v7896_v3 = vmax.f32 %v7572_v48, 0.0  ;;  %v7114_v43 = vld [vmem:[%s10259_s22 + $0x5c8] sm:$0xff] }
0x2a2d   : > { %9224 = vmatprep.subr.mxu1 %v7017_v5  ;;  %9262 = vmatprep.subr.mxu0 %v7049_v17  ;;  %v11367_v5 = vrot.slane %v11242_v58, %v10686_v39  ;;  %v7650_v17 = vpop.f32.mrf.mxu1  ;;  %v7066_v48 = vld [vmem:[%s10259_s22 + $0x448] sm:$0xff] }
0x2a2e   : > { %9225 = vmatpush3.msra.mxu1 %v7001_v27  ;;  %9263 = vmatpush3.msra.mxu0 %v7033_v55  ;;  %v11374_v27 = vrot.slane %v11242_v58, %v7202_v38  ;;  %v7501_v55 = vadd.f32 %v11329_v51, %v7207_v21  ;;  %v7087_v38 = vld [vmem:[%s10259_s22 + $0x4f0] sm:$0xff]  ;;  %v7117_v21 = vld [vmem:[%s10259_s22 + $0x5e0] sm:$0xff] }
0x2a2f   : > { %9226 = vmatprep.subr.mxu1 %v7016_v50  ;;  %9264 = vmatprep.subr.mxu0 %v7048_v12  ;;  %v7578_v50 = vadd.f32 %v7577_v1, %v7215_v23  ;;  %v7911_v12 = vmax.f32 %v7503_v62, 0.0  ;;  %v7070_v1 = vld [vmem:[%s10259_s22 + $0x468] sm:$0xff]  ;;  %v7069_v23 = vld [vmem:[%s10259_s22 + $0x460] sm:$0xff] }
0x2a30   : > { %9227 = vmatpush3.msra.mxu1 %v7000_v22  ;;  %9265 = vmatpush3.msra.mxu0 %v7032_v42  ;;  %v7913_v22 = vmax.f32 %v7580_v13, 0.0  ;;  %v7727_v42 = vpop.f32.mrf.mxu0  ;;  %v7097_v62 = vld [vmem:[%s10259_s22 + $0x540] sm:$0xff]  ;;  %v7080_v13 = vld [vmem:[%s10259_s22 + $0x4b8] sm:$0xff] }
0x2a31   : > { %9228 = vmatprep.subr.mxu1 %v7015_v45  ;;  %9266 = vmatprep.subr.mxu0 %v7047_v16  ;;  %v7072_v45 = vld [vmem:[%s10259_s22 + $0x478] sm:$0xff]  ;;  %v7912_v51 = vmax.f32 %v7578_v50, 0.0  ;;  %v7110_v50 = vld [vmem:[%s10259_s22 + $0x5a8] sm:$0xff] }
0x2a32   : > { %9229 = vmatpush3.msra.mxu1 %v6999_v19  ;;  %9267 = vmatpush3.msra.mxu0 %v7031_v34  ;;  %v7104_v16 = vld [vmem:[%s10259_s22 + $0x578] sm:$0xff]  ;;  %v7119_v19 = vld [vmem:[%s10259_s22 + $0x5f0] sm:$0xff]  ;;  %v7651_v34 = vadd.f32 %v7650_v17, %v11367_v5 }
0x2a33   : > { %9230 = vmatprep.subr.mxu1 %v7014_v6  ;;  %9268 = vmatprep.subr.mxu0 %v7046_v59  ;;  %v7071_v6 = vld [vmem:[%s10259_s22 + $0x470] sm:$0xff] }
0x2a34   : > { %9231 = vmatpush3.msra.mxu1 %v6998_v60  ;;  %9269 = vmatpush3.msra.mxu0 %v7030_v9  ;;  %v7103_v59 = vld [vmem:[%s10259_s22 + $0x570] sm:$0xff]  ;;  %v7728_v60 = vadd.f32 %v7727_v42, %v11374_v27  ;;  %v7910_v9 = vmax.f32 %v7501_v55, 0.0  ;;  %v7078_v55 = vld [vmem:[%s10259_s22 + $0x4a8] sm:$0xff]  ;;  %v11421_v42 = vpop.f32.mrf.mxu1 }
0x2a35   : > { %9232 = vmatprep.subr.mxu1 %v7013_v10  ;;  %9270 = vmatprep.subr.mxu0 %v7045_v11  ;;  %v7086_v10 = vld [vmem:[%s10259_s22 + $0x4e8] sm:$0xff]  ;;  %v7095_v17 = vld [vmem:[%s10259_s22 + $0x530] sm:$0xff] }
0x2a36   : > { %9233 = vmatpush3.msra.mxu1 %v6997_v44  ;;  %9271 = vmatpush3.msra.mxu0 %v7029_v15  ;;  %v7118_v11 = vld [vmem:[%s10259_s22 + $0x5e8] sm:$0xff]  ;;  %v7899_v44 = vmax.f32 %v7651_v34, 0.0  ;;  %v7093_v34 = vld [vmem:[%s10259_s22 + $0x520] sm:$0xff] }
0x2a37   : > { %9234 = vmatprep.subr.mxu1 %v7012_v25  ;;  %9272 = vmatprep.subr.mxu0 %v7044_v4  ;;  %v7102_v15 = vld [vmem:[%s10259_s22 + $0x568] sm:$0xff]  ;;  %v7901_v25 = vmax.f32 %v7728_v60, 0.0  ;;  %v7085_v4 = vld [vmem:[%s10259_s22 + $0x4e0] sm:$0xff]  ;;  %v7223_v60 = vrot.slane %v11242_v58, %v10675_v32 }
0x2a38   : > { %9235 = vmatpush3.msra.mxu1 %v6996_v24  ;;  %9273 = vmatpush3.msra.mxu0 %v7028_v26  ;;  %v7101_v24 = vld [vmem:[%s10259_s22 + $0x560] sm:$0xff]  ;;  %v7084_v26 = vld [vmem:[%s10259_s22 + $0x4d8] sm:$0xff] }
0x2a39   : > { %9236 = vmatprep.subr.mxu1 %v7011_v29  ;;  %9274 = vmatprep.subr.mxu0 %v7043_v40  ;;  %v7068_v29 = vld [vmem:[%s10259_s22 + $0x458] sm:$0xff] }
0x2a3a   : > { %9237 = vmatpush3.msra.mxu1 %v6995_v54  ;;  %9275 = vmatpush3.msra.mxu0 %v7027_v8  ;;  %v7100_v40 = vld [vmem:[%s10259_s22 + $0x558] sm:$0xff]  ;;  %v7115_v54 = vld [vmem:[%s10259_s22 + $0x5d0] sm:$0xff] }
0x2a3b   : > { %9238 = vmatprep.subr.mxu1 %v7010_v18  ;;  %9276 = vmatprep.subr.mxu0 %v7042_v20  ;;  %v7067_v8 = vld [vmem:[%s10259_s22 + $0x450] sm:$0xff]  ;;  %v7082_v20 = vld [vmem:[%s10259_s22 + $0x4c8] sm:$0xff] }
0x2a3c   : > { %9239 = vmatpush3.msra.mxu1 %v6994_v49  ;;  %9277 = vmatpush3.msra.mxu0 %v7026_v52  ;;  %v7099_v18 = vld [vmem:[%s10259_s22 + $0x550] sm:$0xff]  ;;  %v7098_v49 = vld [vmem:[%s10259_s22 + $0x548] sm:$0xff]  ;;  %v7081_v52 = vld [vmem:[%s10259_s22 + $0x4c0] sm:$0xff] }
0x2a3d   : > { %9240 = vmatprep.subr.mxu1 %v7009_v57  ;;  %9278 = vmatprep.subr.mxu0 %v7041_v61  ;;  %v7113_v57 = vld [vmem:[%s10259_s22 + $0x5c0] sm:$0xff] }
0x2a3e   : > { %9241 = vmatpush3.msra.mxu1 %v6993_v14  ;;  %9279 = vmatpush3.msra.mxu0 %v7025_v0  ;;  %v7065_v61 = vld [vmem:[%s10259_s22 + $0x440] sm:$0xff]  ;;  %v7112_v14 = vld [vmem:[%s10259_s22 + $0x5b8] sm:$0xff] }
0x2a3f   : > { %8143 = vmatmul.mubr.f32.vlgmr.msra.gmra.mxu1 %v7894_v2  ;;  %8218 = vmatmul.mubr.f32.vlgmr.msra.gmra.mxu0 %v7896_v3  ;;  %v7064_v0 = vld [vmem:[%s10259_s22 + $0x438] sm:$0xff]  ;;  %v7079_v3 = vld [vmem:[%s10259_s22 + $0x4b0] sm:$0xff] }
0x2a40   : > { %9286 = vmatprep.subr.mxu1 %v7088_v7  ;;  %9324 = vmatprep.subr.mxu0 %v7120_v33  ;;  %v7096_v2 = vld [vmem:[%s10259_s22 + $0x538] sm:$0xff]  ;;  %v7111_v7 = vld [vmem:[%s10259_s22 + $0x5b0] sm:$0xff] }
0x2a41   : > { %8147 = vmatprep.mubr.f32.mxu1 %v7911_v12  ;;  %8222 = vmatprep.mubr.f32.mxu0 %v7913_v22  ;;  %v7063_v33 = vld [vmem:[%s10259_s22 + $0x430] sm:$0xff]  ;;  %v7062_v12 = vld [vmem:[%s10259_s22 + $0x428] sm:$0xff] }
0x2a42   : > { %9287 = vmatpush3.msra.mxu1 %v7072_v45  ;;  %9325 = vmatpush3.msra.mxu0 %v7104_v16  ;;  %v7094_v22 = vld [vmem:[%s10259_s22 + $0x528] sm:$0xff]  ;;  %v7077_v45 = vld [vmem:[%s10259_s22 + $0x4a0] sm:$0xff] }
0x2a43   : > { %9288 = vmatprep.subr.mxu1 %v7087_v38  ;;  %9326 = vmatprep.subr.mxu0 %v7119_v19  ;;  %v7109_v16 = vld [vmem:[%s10259_s22 + $0x5a0] sm:$0xff]  ;;  %v7731_v38 = vpop.f32.mrf.mxu0 }
0x2a44   : > { %9289 = vmatpush3.msra.mxu1 %v7071_v6  ;;  %9327 = vmatpush3.msra.mxu0 %v7103_v59  ;;  %v7061_v19 = vld [vmem:[%s10259_s22 + $0x420] sm:$0xff]  ;;  %v7076_v6 = vld [vmem:[%s10259_s22 + $0x498] sm:$0xff] }
0x2a45   : > { %8148 = vmatmul.mubr.f32.gmra.mxu1 %v7910_v9  ;;  %8223 = vmatmul.mubr.f32.gmra.mxu0 %v7912_v51  ;;  %v7108_v59 = vld [vmem:[%s10259_s22 + $0x598] sm:$0xff]  ;;  %v7231_v9 = vrot.slane %v11242_v58, %v7198_v37  ;;  %v7091_v37 = vld [vmem:[%s10259_s22 + $0x510] sm:$0xff] }
0x2a46   : > { %9290 = vmatprep.subr.mxu1 %v7086_v10  ;;  %9328 = vmatprep.subr.mxu0 %v7118_v11  ;;  %v7060_v51 = vld [vmem:[%s10259_s22 + $0x418] sm:$0xff]  ;;  %v7656_v11 = vpop.f32.mrf.mxu1 }
0x2a47   : > { %9291 = vmatpush3.msra.mxu1 %v7070_v1  ;;  %8292 = vmatprep.mubr.f32.mxu1 %v7899_v44  ;;  %v7092_v10 = vld [vmem:[%s10259_s22 + $0x518] sm:$0xff]  ;;  %v7075_v1 = vld [vmem:[%s10259_s22 + $0x490] sm:$0xff] }
0x2a48   : > { %9329 = vmatpush3.msra.mxu0 %v7102_v15  ;;  %8367 = vmatprep.mubr.f32.mxu0 %v7901_v25  ;;  %v7107_v44 = vld [vmem:[%s10259_s22 + $0x590] sm:$0xff]  ;;  %v7733_v15 = vpop.f32.mrf.mxu0 }
0x2a49   : > { %9292 = vmatprep.subr.mxu1 %v7085_v4  ;;  %9330 = vmatprep.subr.mxu0 %v7117_v21  ;;  %v7059_v25 = vld [vmem:[%s10259_s22 + $0x410] sm:$0xff]  ;;  %v7074_v4 = vld [vmem:[%s10259_s22 + $0x488] sm:$0xff] }
0x2a4a   : > { %9293 = vmatpush3.msra.mxu1 %v7069_v23  ;;  %9331 = vmatpush3.msra.mxu0 %v7101_v24  ;;  %v7106_v21 = vld [vmem:[%s10259_s22 + $0x588] sm:$0xff]  ;;  %v7649_v23 = vadd.f32 %v11355_v53, %v7223_v60  ;;  %v7726_v24 = vadd.f32 %v11361_v63, %v7231_v9  ;;  %v7734_v53 = vadd.f32 %v7733_v15, %v11374_v27  ;;  %v7057_v63 = vld [vmem:[%s10259_s22 + $0x400] sm:$0xff]  ;;  %v7184_v27 = vld [vmem:[%s10259_s22 + $0x7f8] sm:$0xff] }
0x2a4b   : > { %9294 = vmatprep.subr.mxu1 %v7084_v26  ;;  %9332 = vmatprep.subr.mxu0 %v7116_v28  ;;  %v7058_v26 = vld [vmem:[%s10259_s22 + $0x408] sm:$0xff] }
0x2a4c   : > { %9295 = vmatpush3.msra.mxu1 %v7068_v29  ;;  %9333 = vmatpush3.msra.mxu0 %v7100_v40  ;;  %v7090_v28 = vld [vmem:[%s10259_s22 + $0x508] sm:$0xff]  ;;  %v11446_v29 = vpop.f32.mrf.mxu1  ;;  %v7073_v40 = vld [vmem:[%s10259_s22 + $0x480] sm:$0xff] }
0x2a4d   : > { %9296 = vmatprep.subr.mxu1 %v7083_v41  ;;  %9334 = vmatprep.subr.mxu0 %v7115_v54  ;;  %v7105_v41 = vld [vmem:[%s10259_s22 + $0x580] sm:$0xff]  ;;  %v7657_v54 = vadd.f32 %v7656_v11, %v11367_v5  ;;  %v7152_v5 = vld [vmem:[%s10259_s22 + $0x6f8] sm:$0xff]  ;;  %v7131_v11 = vld [vmem:[%s10259_s22 + $0x650] sm:$0xff] }
0x2a4e   : > { %9297 = vmatpush3.msra.mxu1 %v7067_v8  ;;  %9335 = vmatpush3.msra.mxu0 %v7099_v18  ;;  %v11452_v8 = vpop.f32.mrf.mxu0  ;;  %v7089_v18 = vld [vmem:[%s10259_s22 + $0x500] sm:$0xff]  ;;  %v7178_v15 = vld [vmem:[%s10259_s22 + $0x7c8] sm:$0xff] }
0x2a4f   : > { %9298 = vmatprep.subr.mxu1 %v7082_v20  ;;  %9336 = vmatprep.subr.mxu0 %v7114_v43  ;;  %v7898_v20 = vmax.f32 %v7649_v23, 0.0  ;;  %v7900_v43 = vmax.f32 %v7726_v24, 0.0  ;;  %v7129_v23 = vld [vmem:[%s10259_s22 + $0x640] sm:$0xff] }
0x2a50   : > { %9299 = vmatpush3.msra.mxu1 %v7066_v48  ;;  %9337 = vmatpush3.msra.mxu0 %v7098_v49  ;;  %v11459_v48 = vrot.slane %v11242_v58, %v7210_v46  ;;  %v7804_v49 = vpop.f32.mrf.mxu1  ;;  %v7732_v46 = vadd.f32 %v7731_v38, %v7231_v9  ;;  %v7181_v38 = vld [vmem:[%s10259_s22 + $0x7e0] sm:$0xff]  ;;  %v7164_v9 = vld [vmem:[%s10259_s22 + $0x758] sm:$0xff] }
0x2a51   : > { %9300 = vmatprep.subr.mxu1 %v7081_v52  ;;  %9338 = vmatprep.subr.mxu0 %v7113_v57  ;;  %v11466_v52 = vrot.slane %v11242_v58, %v7218_v56  ;;  %v7655_v57 = vadd.f32 %v11421_v42, %v7223_v60  ;;  %v7183_v58 = vld [vmem:[%s10259_s22 + $0x7f0] sm:$0xff]  ;;  %v7166_v42 = vld [vmem:[%s10259_s22 + $0x768] sm:$0xff]  ;;  %v7132_v60 = vld [vmem:[%s10259_s22 + $0x658] sm:$0xff] }
0x2a52   : > { %9301 = vmatpush3.msra.mxu1 %v7065_v61  ;;  %9339 = vmatpush3.msra.mxu0 %v7097_v62  ;;  %v7915_v61 = vmax.f32 %v7657_v54, 0.0  ;;  %v7917_v62 = vmax.f32 %v7734_v53, 0.0  ;;  %v7805_v56 = vadd.f32 %v7804_v49, %v11459_v48  ;;  %v7161_v24 = vld [vmem:[%s10259_s22 + $0x740] sm:$0xff]  ;;  %v7143_v54 = vld [vmem:[%s10259_s22 + $0x6b0] sm:$0xff] }
0x2a53   : > { %9302 = vmatprep.subr.mxu1 %v7080_v13  ;;  %9340 = vmatprep.subr.mxu0 %v7112_v14  ;;  %v7881_v13 = vpop.f32.mrf.mxu0  ;;  %v7136_v14 = vld [vmem:[%s10259_s22 + $0x678] sm:$0xff]  ;;  %v7175_v53 = vld [vmem:[%s10259_s22 + $0x7b0] sm:$0xff]  ;;  %v7141_v49 = vld [vmem:[%s10259_s22 + $0x6a0] sm:$0xff] }
0x2a54   : > { %9303 = vmatpush3.msra.mxu1 %v7064_v0  ;;  %9341 = vmatpush3.msra.mxu0 %v7096_v2  ;;  %v7168_v0 = vld [vmem:[%s10259_s22 + $0x778] sm:$0xff]  ;;  %v7135_v2 = vld [vmem:[%s10259_s22 + $0x670] sm:$0xff] }
0x2a55   : > { %9304 = vmatprep.subr.mxu1 %v7079_v3  ;;  %9342 = vmatprep.subr.mxu0 %v7111_v7  ;;  %v7167_v3 = vld [vmem:[%s10259_s22 + $0x770] sm:$0xff]  ;;  %v7882_v7 = vadd.f32 %v7881_v13, %v11466_v52  ;;  %v7157_v13 = vld [vmem:[%s10259_s22 + $0x720] sm:$0xff] }
0x2a56   : > { %9305 = vmatpush3.msra.mxu1 %v7063_v33  ;;  %9343 = vmatpush3.msra.mxu0 %v7095_v17  ;;  %v7914_v33 = vmax.f32 %v7655_v57, 0.0  ;;  %v7916_v17 = vmax.f32 %v7732_v46, 0.0  ;;  %v7173_v57 = vld [vmem:[%s10259_s22 + $0x7a0] sm:$0xff]  ;;  %v7808_v46 = vpop.f32.mrf.mxu1 }
0x2a57   : > { %9306 = vmatprep.subr.mxu1 %v7078_v55  ;;  %9344 = vmatprep.subr.mxu0 %v7110_v50  ;;  %v7150_v55 = vld [vmem:[%s10259_s22 + $0x6e8] sm:$0xff] }
0x2a58   : > { %9307 = vmatpush3.msra.mxu1 %v7062_v12  ;;  %9345 = vmatpush3.msra.mxu0 %v7094_v22  ;;  %v7182_v50 = vld [vmem:[%s10259_s22 + $0x7e8] sm:$0xff]  ;;  %v7903_v22 = vmax.f32 %v7805_v56, 0.0  ;;  %v7139_v56 = vld [vmem:[%s10259_s22 + $0x690] sm:$0xff] }
0x2a59   : > { %9308 = vmatprep.subr.mxu1 %v7077_v45  ;;  %9346 = vmatprep.subr.mxu0 %v7109_v16  ;;  %v7134_v12 = vld [vmem:[%s10259_s22 + $0x668] sm:$0xff]  ;;  %v7905_v45 = vmax.f32 %v7882_v7, 0.0  ;;  %v7149_v16 = vld [vmem:[%s10259_s22 + $0x6e0] sm:$0xff] }
0x2a5a   : > { %9309 = vmatpush3.msra.mxu1 %v7061_v19  ;;  %9347 = vmatpush3.msra.mxu0 %v7093_v34  ;;  %v7133_v19 = vld [vmem:[%s10259_s22 + $0x660] sm:$0xff] }
0x2a5b   : > { %9310 = vmatprep.subr.mxu1 %v7076_v6  ;;  %9348 = vmatprep.subr.mxu0 %v7108_v59  ;;  %v7165_v34 = vld [vmem:[%s10259_s22 + $0x760] sm:$0xff]  ;;  %v7148_v6 = vld [vmem:[%s10259_s22 + $0x6d8] sm:$0xff] }
0x2a5c   : > { %9311 = vmatpush3.msra.mxu1 %v7060_v51  ;;  %9349 = vmatpush3.msra.mxu0 %v7092_v10  ;;  %v7180_v59 = vld [vmem:[%s10259_s22 + $0x7d8] sm:$0xff]  ;;  %v7147_v51 = vld [vmem:[%s10259_s22 + $0x6d0] sm:$0xff] }
0x2a5d   : > { %9312 = vmatprep.subr.mxu1 %v7075_v1  ;;  %9350 = vmatprep.subr.mxu0 %v7107_v44  ;;  %v7179_v10 = vld [vmem:[%s10259_s22 + $0x7d0] sm:$0xff]  ;;  %v7146_v44 = vld [vmem:[%s10259_s22 + $0x6c8] sm:$0xff] }
0x2a5e   : > { %9313 = vmatpush3.msra.mxu1 %v7059_v25  ;;  %9351 = vmatpush3.msra.mxu0 %v7091_v37  ;;  %v7163_v1 = vld [vmem:[%s10259_s22 + $0x750] sm:$0xff]  ;;  %v7130_v25 = vld [vmem:[%s10259_s22 + $0x648] sm:$0xff] }
0x2a5f   : > { %9314 = vmatprep.subr.mxu1 %v7074_v4  ;;  %9352 = vmatprep.subr.mxu0 %v7106_v21  ;;  %v7162_v37 = vld [vmem:[%s10259_s22 + $0x748] sm:$0xff]  ;;  %v7145_v4 = vld [vmem:[%s10259_s22 + $0x6c0] sm:$0xff] }
0x2a60   : > { %9315 = vmatpush3.msra.mxu1 %v7058_v26  ;;  %9353 = vmatpush3.msra.mxu0 %v7090_v28  ;;  %v7177_v21 = vld [vmem:[%s10259_s22 + $0x7c0] sm:$0xff]  ;;  %v7144_v26 = vld [vmem:[%s10259_s22 + $0x6b8] sm:$0xff] }
0x2a61   : > { %9316 = vmatprep.subr.mxu1 %v7073_v40  ;;  %9354 = vmatprep.subr.mxu0 %v7105_v41  ;;  %v7176_v28 = vld [vmem:[%s10259_s22 + $0x7b8] sm:$0xff] }
0x2a62   : > { %9317 = vmatpush3.msra.mxu1 %v7057_v63  ;;  %9355 = vmatpush3.msra.mxu0 %v7089_v18  ;;  %v7128_v40 = vld [vmem:[%s10259_s22 + $0x638] sm:$0xff]  ;;  %v7127_v63 = vld [vmem:[%s10259_s22 + $0x630] sm:$0xff] }
0x2a63   : > { %8293 = vmatmul.mubr.f32.vlgmr.msra.gmra.mxu1 %v7898_v20  ;;  %8368 = vmatmul.mubr.f32.vlgmr.msra.gmra.mxu0 %v7900_v43  ;;  %v7160_v41 = vld [vmem:[%s10259_s22 + $0x738] sm:$0xff]  ;;  %v7159_v18 = vld [vmem:[%s10259_s22 + $0x730] sm:$0xff]  ;;  %v7142_v20 = vld [vmem:[%s10259_s22 + $0x6a8] sm:$0xff] }
0x2a64   : > { %9362 = vmatprep.subr.mxu1 %v7152_v5  ;;  %9400 = vmatprep.subr.mxu0 %v7184_v27  ;;  %v7174_v43 = vld [vmem:[%s10259_s22 + $0x7a8] sm:$0xff] }
0x2a65   : > { %8297 = vmatprep.mubr.f32.mxu1 %v7915_v61  ;;  %8372 = vmatprep.mubr.f32.mxu0 %v7917_v62  ;;  %v7126_v5 = vld [vmem:[%s10259_s22 + $0x628] sm:$0xff]  ;;  %v7885_v61 = vpop.f32.mrf.mxu0  ;;  %v7125_v62 = vld [vmem:[%s10259_s22 + $0x620] sm:$0xff] }
0x2a66   : > { %9363 = vmatpush3.msra.mxu1 %v7136_v14  ;;  %9401 = vmatpush3.msra.mxu0 %v7168_v0  ;;  %v7158_v27 = vld [vmem:[%s10259_s22 + $0x728] sm:$0xff]  ;;  %v7140_v14 = vld [vmem:[%s10259_s22 + $0x698] sm:$0xff] }
0x2a67   : > { %9364 = vmatprep.subr.mxu1 %v7151_v31  ;;  %9402 = vmatprep.subr.mxu0 %v7183_v58  ;;  %v7172_v0 = vld [vmem:[%s10259_s22 + $0x798] sm:$0xff]  ;;  %v7887_v7 = vpop.f32.mrf.mxu0 }
0x2a68   : > { %9365 = vmatpush3.msra.mxu1 %v7135_v2  ;;  %9403 = vmatpush3.msra.mxu0 %v7167_v3  ;;  %v7124_v31 = vld [vmem:[%s10259_s22 + $0x618] sm:$0xff]  ;;  %v7171_v2 = vld [vmem:[%s10259_s22 + $0x790] sm:$0xff]  ;;  %v7810_v3 = vpop.f32.mrf.mxu1 }
0x2a69   : > { %8298 = vmatmul.mubr.f32.gmra.mxu1 %v7914_v33  ;;  %8373 = vmatmul.mubr.f32.gmra.mxu0 %v7916_v17  ;;  %v7156_v58 = vld [vmem:[%s10259_s22 + $0x718] sm:$0xff]  ;;  %v7123_v33 = vld [vmem:[%s10259_s22 + $0x610] sm:$0xff] }
0x2a6a   : > { %9366 = vmatprep.subr.mxu1 %v7150_v55  ;;  %9404 = vmatprep.subr.mxu0 %v7182_v50  ;;  %v7155_v17 = vld [vmem:[%s10259_s22 + $0x710] sm:$0xff]  ;;  %v7138_v55 = vld [vmem:[%s10259_s22 + $0x688] sm:$0xff] }
0x2a6b   : > { %9367 = vmatpush3.msra.mxu1 %v7134_v12  ;;  %8442 = vmatprep.mubr.f32.mxu1 %v7903_v22  ;;  %v7170_v50 = vld [vmem:[%s10259_s22 + $0x788] sm:$0xff]  ;;  %v7803_v12 = vadd.f32 %v11446_v29, %v11247_v30  ;;  %v7880_v22 = vadd.f32 %v11452_v8, %v11252_v35 }
0x2a6c   : > { %9405 = vmatpush3.msra.mxu0 %v7166_v42  ;;  %8517 = vmatprep.mubr.f32.mxu0 %v7905_v45  ;;  %v7122_v42 = vld [vmem:[%s10259_s22 + $0x608] sm:$0xff] }
0x2a6d   : > { %9368 = vmatprep.subr.mxu1 %v7149_v16  ;;  %9406 = vmatprep.subr.mxu0 %v7181_v38  ;;  %v7154_v45 = vld [vmem:[%s10259_s22 + $0x708] sm:$0xff]  ;;  %v7811_v16 = vadd.f32 %v7810_v3, %v11459_v48  ;;  %v7888_v38 = vadd.f32 %v7887_v7, %v11466_v52  ;;  %v7902_v29 = vmax.f32 %v7803_v12, 0.0  ;;  %v7904_v8 = vmax.f32 %v7880_v22, 0.0 }
0x2a6e   : > { %9369 = vmatpush3.msra.mxu1 %v7133_v19  ;;  %9407 = vmatpush3.msra.mxu0 %v7165_v34  ;;  %v7137_v19 = vld [vmem:[%s10259_s22 + $0x680] sm:$0xff] }
0x2a6f   : > { %9370 = vmatprep.subr.mxu1 %v7148_v6  ;;  %9408 = vmatprep.subr.mxu0 %v7180_v59  ;;  %v7169_v34 = vld [vmem:[%s10259_s22 + $0x780] sm:$0xff]  ;;  %v7919_v48 = vmax.f32 %v7811_v16, 0.0  ;;  %v7921_v52 = vmax.f32 %v7888_v38, 0.0 }
0x2a70   : > { %9371 = vmatpush3.msra.mxu1 %v7132_v60  ;;  %9409 = vmatpush3.msra.mxu0 %v7164_v9  ;;  %v7121_v6 = vld [vmem:[%s10259_s22 + $0x600] sm:$0xff]  ;;  %v7809_v60 = vadd.f32 %v7808_v46, %v11247_v30  ;;  %v7886_v9 = vadd.f32 %v7885_v61, %v11252_v35 }
0x2a71   : > { %9372 = vmatprep.subr.mxu1 %v7147_v51  ;;  %9410 = vmatprep.subr.mxu0 %v7179_v10  ;;  %v7153_v59 = vld [vmem:[%s10259_s22 + $0x700] sm:$0xff]  ;;  %s11696_s22 = scalar_lea.vmem %s11605_s16, %s10189_s20 }
0x2a72   : > { %9373 = vmatpush3.msra.mxu1 %v7131_v11  ;;  %9411 = vmatpush3.msra.mxu0 %v7163_v1  ;;  %v7918_v51 = vmax.f32 %v7809_v60, 0.0  ;;  %v7920_v10 = vmax.f32 %v7886_v9, 0.0 }
0x2a73   : > { %9374 = vmatprep.subr.mxu1 %v7146_v44  ;;  %9412 = vmatprep.subr.mxu0 %v7178_v15 }
0x2a74   : > { %9375 = vmatpush3.msra.mxu1 %v7130_v25  ;;  %9413 = vmatpush3.msra.mxu0 %v7162_v37 }
0x2a75   : > { %9376 = vmatprep.subr.mxu1 %v7145_v4  ;;  %9414 = vmatprep.subr.mxu0 %v7177_v21 }
0x2a76   : > { %9377 = vmatpush3.msra.mxu1 %v7129_v23  ;;  %9415 = vmatpush3.msra.mxu0 %v7161_v24 }
0x2a77   : > { %9378 = vmatprep.subr.mxu1 %v7144_v26  ;;  %9416 = vmatprep.subr.mxu0 %v7176_v28 }
0x2a78   : > { %9379 = vmatpush3.msra.mxu1 %v7128_v40  ;;  %9417 = vmatpush3.msra.mxu0 %v7160_v41 }
0x2a79   : > { %9380 = vmatprep.subr.mxu1 %v7143_v54  ;;  %9418 = vmatprep.subr.mxu0 %v7175_v53  ;;  %v8964_v54 = vld [vmem:[%s11696_s22] ss:$0 sm:$0xff] }
0x2a7a   : > { %9381 = vmatpush3.msra.mxu1 %v7127_v63  ;;  %9419 = vmatpush3.msra.mxu0 %v7159_v18 }
0x2a7b   : > { %9382 = vmatprep.subr.mxu1 %v7142_v20  ;;  %9420 = vmatprep.subr.mxu0 %v7174_v43 }
0x2a7c   : > { %9383 = vmatpush3.msra.mxu1 %v7126_v5  ;;  %9421 = vmatpush3.msra.mxu0 %v7158_v27 }
0x2a7d   : > { %9384 = vmatprep.subr.mxu1 %v7141_v49  ;;  %9422 = vmatprep.subr.mxu0 %v7173_v57 }
0x2a7e   : > { %9385 = vmatpush3.msra.mxu1 %v7125_v62  ;;  %9423 = vmatpush3.msra.mxu0 %v7157_v13 }
0x2a7f   : > { %9386 = vmatprep.subr.mxu1 %v7140_v14  ;;  %9424 = vmatprep.subr.mxu0 %v7172_v0 }
0x2a80   : > { %9387 = vmatpush3.msra.mxu1 %v7124_v31  ;;  %9425 = vmatpush3.msra.mxu0 %v7156_v58 }
0x2a81   : > { %9388 = vmatprep.subr.mxu1 %v7139_v56  ;;  %9426 = vmatprep.subr.mxu0 %v7171_v2 }
0x2a82   : > { %9389 = vmatpush3.msra.mxu1 %v7123_v33  ;;  %9427 = vmatpush3.msra.mxu0 %v7155_v17 }
0x2a83   : > { %9390 = vmatprep.subr.mxu1 %v7138_v55  ;;  %9428 = vmatprep.subr.mxu0 %v7170_v50 }
0x2a84   : > { %9391 = vmatpush3.msra.mxu1 %v7122_v42  ;;  %9429 = vmatpush3.msra.mxu0 %v7154_v45 }
0x2a85   : > { %9392 = vmatprep.subr.mxu1 %v7137_v19  ;;  %9430 = vmatprep.subr.mxu0 %v7169_v34 }
0x2a86   : > { %9393 = vmatpush3.msra.mxu1 %v7121_v6  ;;  %9431 = vmatpush3.msra.mxu0 %v7153_v59 }
0x2a87   : > { %8443 = vmatmul.mubr.f32.vlgmr.msra.gmra.mxu1 %v7902_v29  ;;  %8518 = vmatmul.mubr.f32.vlgmr.msra.gmra.mxu0 %v7904_v8 }
0x2a88   : > { %8447 = vmatprep.mubr.f32.mxu1 %v7919_v48  ;;  %8522 = vmatprep.mubr.f32.mxu0 %v7921_v52 }
0x2a8b   : > { %8448 = vmatmul.mubr.f32.gmra.mxu1 %v7918_v51  ;;  %8523 = vmatmul.mubr.f32.gmra.mxu0 %v7920_v10 }
0x2adc   : > { %v9166_v11 = vpop.f32.mrf.mxu1  ;;  %v9204_v1 = vpop.f32.mrf.mxu0 }
0x2ade   : > { %v9167_v30 = vpop.f32.mrf.mxu1  ;;  %v9205_v44 = vpop.f32.mrf.mxu0 }
0x2adf   : > { %v9168_v41 = vadd.f32 %v9167_v30, %v9166_v11  ;;  %v9206_v27 = vadd.f32 %v9205_v44, %v9204_v1 }
0x2ae1   : > { %v7995_v20 = vadd.f32 %v9168_v41, %v8964_v54 }
0x2ae2   : > { %v9169_v35 = vpop.f32.mrf.mxu1  ;;  %v9207_v15 = vpop.f32.mrf.mxu0 }
0x2ae3   : > { %v8070_v46 = vadd.f32 %v9206_v27, %v7995_v20  ;;  %v8530_v27 = vld [vmem:[%s11697_s0] sm:$0x3] }
0x2ae4   : > { %v9170_v25 = vpop.f32.mrf.mxu1  ;;  %v9208_v37 = vpop.f32.mrf.mxu0 }
0x2ae5   : > { %v9171_v43 = vadd.f32 %v9170_v25, %v9169_v35  ;;  %v9209_v13 = vadd.f32 %v9208_v37, %v9207_v15 }
0x2ae7   : > { %v8000_v61 = vadd.f32 %v9171_v43, %v8964_v54 }
0x2ae9   : > { %v8075_v58 = vadd.f32 %v9209_v13, %v8000_v61 }
0x2aff   : > { %v9242_v4 = vpop.f32.mrf.mxu1  ;;  %v9280_v21 = vpop.f32.mrf.mxu0 }
0x2b01   : > { %v9243_v23 = vpop.f32.mrf.mxu1  ;;  %v9281_v24 = vpop.f32.mrf.mxu0 }
0x2b02   : > { %v9244_v49 = vadd.f32 %v9243_v23, %v9242_v4  ;;  %v9282_v56 = vadd.f32 %v9281_v24, %v9280_v21 }
0x2b04   : > { %v8145_v14 = vadd.f32 %v9244_v49, %v8070_v46  ;;  %v8560_v49 = vrot.slane %v8530_v27, %v10675_v32  ;;  %v8566_v46 = vrot.slane %v8530_v27, %v10686_v39 }
0x2b05   : > { %v9245_v26 = vpop.f32.mrf.mxu1  ;;  %v9283_v28 = vpop.f32.mrf.mxu0 }
0x2b06   : > { %v8220_v7 = vadd.f32 %v9282_v56, %v8145_v14 }
0x2b07   : > { %v9246_v40 = vpop.f32.mrf.mxu1  ;;  %v9284_v53 = vpop.f32.mrf.mxu0 }
0x2b08   : > { %v9247_v0 = vadd.f32 %v9246_v40, %v9245_v26  ;;  %v9285_v55 = vadd.f32 %v9284_v53, %v9283_v28 }
0x2b0a   : > { %v8150_v33 = vadd.f32 %v9247_v0, %v8075_v58 }
0x2b0c   : > { %v8225_v45 = vadd.f32 %v9285_v55, %v8150_v33 }
0x2b23   : > { %v9318_v63 = vpop.f32.mrf.mxu1  ;;  %v9356_v18 = vpop.f32.mrf.mxu0 }
0x2b25   : > { %v9319_v5 = vpop.f32.mrf.mxu1  ;;  %v9357_v57 = vpop.f32.mrf.mxu0 }
0x2b26   : > { %v9320_v2 = vadd.f32 %v9319_v5, %v9318_v63  ;;  %v9358_v16 = vadd.f32 %v9357_v57, %v9356_v18 }
0x2b28   : > { %v8295_v50 = vadd.f32 %v9320_v2, %v8220_v7 }
0x2b29   : > { %v9321_v62 = vpop.f32.mrf.mxu1  ;;  %v9359_v31 = vpop.f32.mrf.mxu0 }
0x2b2a   : > { %v8370_v34 = vadd.f32 %v9358_v16, %v8295_v50 }
0x2b2b   : > { %v9322_v3 = vpop.f32.mrf.mxu1  ;;  %v9360_v17 = vpop.f32.mrf.mxu0 }
0x2b2c   : > { %v9323_v12 = vadd.f32 %v9322_v3, %v9321_v62  ;;  %v9361_v60 = vadd.f32 %v9360_v17, %v9359_v31 }
0x2b2e   : > { %v8300_v6 = vadd.f32 %v9323_v12, %v8225_v45 }
0x2b30   : > { %v8375_v10 = vadd.f32 %v9361_v60, %v8300_v6 }
0x2b47   : > { %v9394_v22 = vpop.f32.mrf.mxu1  ;;  %v9432_v42 = vpop.f32.mrf.mxu0 }
0x2b49   : > { %v9395_v38 = vpop.f32.mrf.mxu1  ;;  %v9433_v19 = vpop.f32.mrf.mxu0 }
0x2b4a   : > { %v9396_v59 = vadd.f32 %v9395_v38, %v9394_v22  ;;  %v9434_v48 = vadd.f32 %v9433_v19, %v9432_v42 }
0x2b4b   : > { %v9397_v29 = vpop.f32.mrf.mxu1  ;;  %v9435_v8 = vpop.f32.mrf.mxu0 }
0x2b4c   : > { %v8445_v9 = vadd.f32 %v9396_v59, %v8370_v34 }
0x2b4d   : > { %v9398_v52 = vpop.f32.mrf.mxu1  ;;  %v9436_v51 = vpop.f32.mrf.mxu0 }
0x2b4e   : > { %v8520_v11 = vadd.f32 %v9434_v48, %v8445_v9  ;;  %v9399_v1 = vadd.f32 %v9398_v52, %v9397_v29  ;;  %v9437_v44 = vadd.f32 %v9436_v51, %v9435_v8 }
0x2b50   : > { %v8450_v30 = vadd.f32 %v9399_v1, %v8375_v10  ;;  %v8528_v35 = vadd.f32 %v8520_v11, %v11077_v36 }
0x2b52   : > { %v8525_v15 = vadd.f32 %v9437_v44, %v8450_v30  ;;  %v8531_v25 = vsel %vm858_vm1, %v8528_v35, 0.0 }
0x2b53   : > { %8532 = vadd.xlane.f32.xlu0 %v8531_v25 }
0x2b54   : > { %v8529_v37 = vadd.f32 %v8525_v15, %v11089_v47 }
0x2b56   : > { %v8534_v4 = vsel %vm858_vm1, %v8529_v37, 0.0 }
0x2b57   : > { %8535 = vadd.xlane.f32.xlu1 %v8534_v4 }
0x2bdc   : > { %v8533_v21 = vpop.xlane.xlu0 %8532 }
0x2bdd   : > { %v8537_v23 = vmul.f32 0.03125, %v8533_v21 }
0x2bdf   : > { %v8539_v24 = vsub.f32 %v8528_v35, %v8537_v23 }
0x2be0   : > { %v8536_v26 = vpop.xlane.xlu1 %8535 }
0x2be1   : > { %v8538_v28 = vmul.f32 0.03125, %v8536_v26  ;;  %v8541_v40 = vmul.f32 %v8539_v24, %v8539_v24 }
0x2be3   : > { %v8540_v41 = vsub.f32 %v8529_v37, %v8538_v28  ;;  %v8543_v54 = vsel %vm858_vm1, %v8541_v40, 0.0 }
0x2be4   : > { %8544 = vadd.xlane.f32.xlu0 %v8543_v54 }
0x2be5   : > { %v8542_v36 = vmul.f32 %v8540_v41, %v8540_v41 }
0x2be7   : > { %v8546_v53 = vsel %vm858_vm1, %v8542_v36, 0.0 }
0x2be8   : > { %8547 = vadd.xlane.f32.xlu1 %v8546_v53 }
0x2c6d   : > { %v8545_v63 = vpop.xlane.xlu0 %8544 }
0x2c6e   : > { %v8549_v47 = vmul.f32 0.03125, %v8545_v63 }
0x2c70   : > { %v8551_v18 = vadd.f32 1e-05, %v8549_v47 }
0x2c71   : > { %v8548_v20 = vpop.xlane.xlu1 %8547 }
0x2c72   : > { %9997 = vrsqrt.f32 %v8551_v18  ;;  %v8550_v43 = vmul.f32 0.03125, %v8548_v20 }
0x2c74   : > { %v8552_v5 = vadd.f32 1e-05, %v8550_v43 }
0x2c76   : > { %9999 = vrsqrt.f32 %v8552_v5 }
0x2c7f   : > { %v9998_v57 = vpop.eup %9997 }
0x2c80   : > { %v8555_v61 = vmul.f32 %v9998_v57, %v8539_v24 }
0x2c82   : > { %v8561_v62 = vmul.f32 %v8560_v49, %v8555_v61 }
0x2c83   : > { %v10000_v13 = vpop.eup %9999 }
0x2c84   : > { %v8567_v14 = vadd.f32 %v8566_v46, %v8561_v62  ;;  %v8556_v0 = vmul.f32 %v10000_v13, %v8540_v41 }
0x2c86   : > { %8569 = vst.msk [vmem:[#allocation2] sm:$0xff] %vm858_vm1, %v8567_v14  ;;  %v8562_v31 = vmul.f32 %v8560_v49, %v8556_v0  ;;  %8574 = sbr.rel (%p8965_p5) target bundleno = 11716 (0x2dc4), region = 104 }
0x2c88   : > { %v8568_v58 = vadd.f32 %v8566_v46, %v8562_v31 }
0x2c8a   : > { %8570 = vst.msk [vmem:[#allocation2 + $0x8] sm:$0xff] %vm858_vm1, %v8568_v58 }
0x2c8b   : > { %v8576_v56 = vsel %vm858_vm1, %v8567_v14, 0.0  ;;  %v8579_v2 = vsel %vm858_vm1, %v8568_v58, 0.0  ;;  %v8575_v29 = vld [vmem:[%s11698_s1] sm:$0x3] }
0x2c8c   : > { %8577 = vadd.xlane.f32.xlu0 %v8576_v56  ;;  %v8605_v8 = vrot.slane %v8575_v29, %v10675_v32  ;;  %v8611_v48 = vrot.slane %v8575_v29, %v10686_v39 }
0x2c90   : > { %8580 = vadd.xlane.f32.xlu0 %v8579_v2 }
0x2d15   : > { %v8578_v3 = vpop.xlane.xlu0 %8577 }
0x2d16   : > { %v8582_v7 = vmul.f32 0.03125, %v8578_v3 }
0x2d18   : > { %v8584_v33 = vsub.f32 %v8567_v14, %v8582_v7 }
0x2d19   : > { %v8581_v17 = vpop.xlane.xlu0 %8580 }
0x2d1a   : > { %v8583_v55 = vmul.f32 0.03125, %v8581_v17  ;;  %v8586_v50 = vmul.f32 %v8584_v33, %v8584_v33 }
0x2d1c   : > { %v8585_v12 = vsub.f32 %v8568_v58, %v8583_v55  ;;  %v8588_v22 = vsel %vm858_vm1, %v8586_v50, 0.0 }
0x2d1d   : > { %8589 = vadd.xlane.f32.xlu1 %v8588_v22 }
0x2d1e   : > { %v8587_v42 = vmul.f32 %v8585_v12, %v8585_v12 }
0x2d20   : > { %v8591_v45 = vsel %vm858_vm1, %v8587_v42, 0.0 }
0x2d21   : > { %8592 = vadd.xlane.f32.xlu1 %v8591_v45 }
0x2da6   : > { %v8590_v16 = vpop.xlane.xlu1 %8589 }
0x2da7   : > { %v8594_v38 = vmul.f32 0.03125, %v8590_v16 }
0x2da9   : > { %v8596_v19 = vadd.f32 1e-05, %v8594_v38 }
0x2daa   : > { %v8593_v34 = vpop.xlane.xlu1 %8592 }
0x2dab   : > { %10003 = vrsqrt.f32 %v8596_v19  ;;  %v8595_v6 = vmul.f32 0.03125, %v8593_v34 }
0x2dad   : > { %v8597_v59 = vadd.f32 1e-05, %v8595_v6 }
0x2daf   : > { %10005 = vrsqrt.f32 %v8597_v59 }
0x2db8   : > { %v10004_v60 = vpop.eup %10003 }
0x2db9   : > { %v8600_v9 = vmul.f32 %v10004_v60, %v8584_v33 }
0x2dbb   : > { %v8606_v52 = vmul.f32 %v8605_v8, %v8600_v9 }
0x2dbc   : > { %v10006_v51 = vpop.eup %10005 }
0x2dbd   : > { %v8612_v10 = vadd.f32 %v8611_v48, %v8606_v52  ;;  %v8601_v11 = vmul.f32 %v10006_v51, %v8585_v12 }
0x2dbf   : > { %8614 = vst.msk [vmem:[#allocation2] sm:$0xff] %vm858_vm1, %v8612_v10  ;;  %v8607_v1 = vmul.f32 %v8605_v8, %v8601_v11 }
0x2dc1   : > { %v8613_v30 = vadd.f32 %v8611_v48, %v8607_v1 }
0x2dc3   : > { %8615 = vst.msk [vmem:[#allocation2 + $0x8] sm:$0xff] %vm858_vm1, %v8613_v30 }
0x2dc4 PF: > { %p9817_p6 = scmp.eq.s32.totalorder %s10183_s30, 5  ;;  %s10075_s25 = smov [#allocation2]  }
0x2dc5   : > { %s8622_s27 = sshll.u32 %s10075_s25, 4  ;;  %s8623_s27 = int_to_ptr.vmem [resolvable:$true] %s8622_s27 }
0x2dc6   : > { %s10007_s10 = scalar_lea.vmem %s8623_s27, 256  ;;  %p10014_p10 = scmp.lt.s32.totalorder %s8623_s27, %s8623_s27 }
0x2dc7   : > { %p10008_p7 = scmp.ne.s32.totalorder %s8623_s27, %s10007_s10  ;;  %p10015_p11 = scmp.lt.s32.totalorder %s10007_s10, %s10007_s10 }
0x2dc9   : > { %p10009_p8 = pnand %p10008_p7, %p9817_p6  ;;  %p10016_p12 = por %p10015_p11, %p10014_p10 }
0x2dcb   : > { %p10010_p9 = pneg %p10009_p8 }
0x2dcd   : > { %p10017_p13 = pnand %p10016_p12, %p10010_p9 }
0x2dcf   : > { %10020 = shalt.err (!%p10017_p13)
}
0x2dd0   : > { %s10076_s19 = smov 128   ;;  %s11699_s3 = smov 8  }
0x2dd1   : > { %s11700_s8 = sld [smem:[#allocation18_spill]] }
0x2dd7   : > { %9814 = dma.vmem_to_hbm [thread:$0]  (%p9817_p6), %s8623_s27, 256, %s11700_s8, [#allocation3], %s10076_s19, %s10076_s19, %s11699_s3  }
0x2dd8   : > { %10036 = dma.done.wait (%p9817_p6), [#allocation3], 256  }
0x2dd9   : > { %10038 = vsyncadd (%p9817_p6), [#allocation3], 4294967040 }
0x2dda PF: > { %s11701_s29 = sld [smem:[#allocation5_spill]] }
0x2de0   : > { %s30_s0 = sadd.s32 1, %s11701_s29  }
0x2de1   : > { %p27_p0 = scmp.ge.s32.totalorder %s30_s0, 8  }
0x2de3   :  { %29 = sbr.rel (!%p27_p0) target bundleno = 13 (0xd), region = 173 }
0x2de8   :  { %8638 = vsyncpa [#allocation3], 1 }
0x2de9   :  { %8640 = vsyncpa [#allocation3 + $0x1], 1 }

</bundles_post_ra>
